<compile_context>
chip_gen: v7x
topology: tpu7x:2x2x1
jax: 0.10.0
libtpu: 0.0.40
codegen_flags: <defaults>
</compile_context>

<pallas_src>
import jax
import jax.numpy as jnp
from jax.experimental import pallas as pl
from jax.experimental.pallas import tpu as pltpu


DILATIONS = (1, 2, 3, 4)
PAD = max(DILATIONS)       # zero-ring width of the padded activation scratch
C = 64                     # channel width of every layer's output


def _make_fused_kernel(H, W):
    HW = H * W
    Wp = W + 2 * PAD

    def kernel(x_ref, w1_ref, wmid_ref, w4t_ref, b123_ref, b4_ref, o_ref,
               act_ref, col_ref, xpad_ref):
        # ------------------------------------------------------------------
        # Zero ONLY the PAD-wide ring of the padded activation buffer; the
        # interior is fully overwritten by the layer-1 output below.  This is
        # done every grid step (required for correctness under megacore).
        # ------------------------------------------------------------------
        act_ref[pl.ds(0, PAD), :, :] = jnp.zeros((PAD, Wp, C), jnp.float32)
        act_ref[pl.ds(PAD + H, PAD), :, :] = jnp.zeros((PAD, Wp, C), jnp.float32)
        act_ref[pl.ds(PAD, H), pl.ds(0, PAD), :] = jnp.zeros((H, PAD, C), jnp.float32)
        act_ref[pl.ds(PAD, H), pl.ds(PAD + W, PAD), :] = jnp.zeros((H, PAD, C), jnp.float32)

        # ------------------------------------------------------------------
        # Layer 1, specialized for Cin == 1 (dilation 1): nine broadcast FMAs
        # on the VPU — no im2col copies, no MXU pass, no Cin zero-padding.
        # ------------------------------------------------------------------
        xpad_ref[...] = jnp.zeros_like(xpad_ref)              # tiny (H+2,W+2,1)
        xpad_ref[pl.ds(1, H), pl.ds(1, W), :] = x_ref[0]      # place x (H,W,1)

        acc1 = jnp.zeros((H, W, C), jnp.float32)
        for kh in range(3):
            for kw in range(3):
                tap = xpad_ref[pl.ds(kh, H), pl.ds(kw, W), :]    # (H, W, 1)
                acc1 = acc1 + tap * w1_ref[kh * 3 + kw]          # -> (H, W, C)
        out1 = jnp.maximum(acc1 + b123_ref[0], 0.0)
        act_ref[pl.ds(PAD, H), pl.ds(PAD, W), :] = out1

        # ------------------------------------------------------------------
        # im2col for one dilated 3x3 layer: the 9 shifted (H,W,C) patches are
        # packed into col_ref as 128-lane tap-pair slabs so the dominant
        # stores are unmasked full-width vst (the 9th tap starts 128-aligned).
        # ------------------------------------------------------------------
        def load_patch(tap, d):
            kh, kw = divmod(tap, 3)
            r0 = PAD + (kh - 1) * d      # outer-dim offset (alignment-free)
            c0 = PAD + (kw - 1) * d      # sublane-dim offset
            return act_ref[pl.ds(r0, H), pl.ds(c0, W), :].reshape(HW, C)

        def build_cols(d):
            for p in range(4):
                pair = jnp.concatenate(
                    [load_patch(2 * p, d), load_patch(2 * p + 1, d)], axis=1)
                col_ref[:, p * 2 * C:(p + 1) * 2 * C] = pair      # 128 lanes
            col_ref[:, 8 * C:9 * C] = load_patch(8, d)            # offset 512

        # ------------------------------------------------------------------
        # Layers 2 and 3: one K = 9*C MXU matmul each; activations never
        # leave the padded VMEM buffer.
        # ------------------------------------------------------------------
        for li, d in enumerate(DILATIONS[1:3]):
            build_cols(d)
            acc = jnp.dot(col_ref[...], wmid_ref[li],
                          preferred_element_type=jnp.float32)      # (HW, C)
            out = jnp.maximum(acc + b123_ref[li + 1], 0.0)
            act_ref[pl.ds(PAD, H), pl.ds(PAD, W), :] = out.reshape(H, W, C)

        # ------------------------------------------------------------------
        # Layer 4: channel-major output.  w4 arrives pre-transposed (C, 9*C);
        # contracting both operands on their last dim (A @ B^T form) gives a
        # (C, HW) result, so the only HBM store is lane-dense (HW = 256
        # lanes, unmasked) and the wrapper needs no transpose.
        # ------------------------------------------------------------------
        build_cols(DILATIONS[3])
        acc4 = jax.lax.dot_general(
            w4t_ref[...], col_ref[...],
            dimension_numbers=(((1,), (1,)), ((), ())),
            preferred_element_type=jnp.float32)                    # (C, HW)
        out4 = jnp.maximum(acc4 + b4_ref[...], 0.0)
        o_ref[...] = out4.reshape(1, C, HW)

    return kernel


def shared_net_pallas(x_nhwc1, w1, wmid, w4t, b123, b4):
    """Fused 4-layer dilated conv+ReLU.

    x_nhwc1: (N, H, W, 1) f32.  Returns (N, C, H*W) f32 (channel-major)."""
    N, H, W, _ = x_nhwc1.shape
    Hp, Wp = H + 2 * PAD, W + 2 * PAD
    HW = H * W

    # VMEM-scaling guard: the im2col scratch is HW*9C*4 bytes.  Tile the
    # im2col+matmul over HW row blocks before this trips (matters first on
    # v7x, whose VMEM is half of v5e/v6e).
    assert HW * 9 * C * 4 <= 8 * 1024 * 1024, (
        "H*W too large for single-shot im2col scratch; tile over HW blocks")

    flops = 2 * N * HW * 9 * C + 2 * N * 3 * HW * (9 * C) * C
    bytes_accessed = 4 * (x_nhwc1.size + w1.size + wmid.size + w4t.size
                          + b123.size + b4.size + N * HW * C)

    return pl.pallas_call(
        _make_fused_kernel(H, W),
        out_shape=jax.ShapeDtypeStruct((N, C, HW), jnp.float32),
        grid=(N,),
        in_specs=[
            pl.BlockSpec((1, H, W, 1), lambda n: (n, 0, 0, 0)),   # x
            pl.BlockSpec((9, C), lambda n: (0, 0)),               # w1 (Cin=1)
            pl.BlockSpec((2, 9 * C, C), lambda n: (0, 0, 0)),     # w2, w3
            pl.BlockSpec((C, 9 * C), lambda n: (0, 0)),           # w4^T
            pl.BlockSpec((3, 1, C), lambda n: (0, 0, 0)),         # b1..b3
            pl.BlockSpec((C, 1), lambda n: (0, 0)),               # b4 column
        ],
        out_specs=pl.BlockSpec((1, C, HW), lambda n: (n, 0, 0)),
        scratch_shapes=[
            pltpu.VMEM((Hp, Wp, C), jnp.float32),        # padded activations
            pltpu.VMEM((HW, 9 * C), jnp.float32),        # im2col patches
            pltpu.VMEM((H + 2, W + 2, 1), jnp.float32),  # padded layer-1 input
        ],
        compiler_params=pltpu.CompilerParams(
            dimension_semantics=("parallel",)),
        cost_estimate=pl.CostEstimate(
            flops=flops, transcendentals=0, bytes_accessed=bytes_accessed),
    )(x_nhwc1, w1, wmid, w4t, b123, b4)


@jax.jit
def shared_net_forward(x_nchw, w1, wmid, w4t, b123, b4):
    N, Cin, H, W = x_nchw.shape                 # Cin == 1 for SharedNet
    x = x_nchw.astype(jnp.float32).reshape(N, H, W, 1)     # free reshape (C==1)
    out = shared_net_pallas(x, w1, wmid, w4t, b123, b4)    # (N, C, H*W)
    return out.reshape(N, C, H, W)                          # free reshape, NCHW


def init_params(key):
    """Deterministic init mimicking nn.Conv2d defaults (U(+-1/sqrt(fan_in)))."""
    layer_defs = [(1, C), (C, C), (C, C), (C, C)]
    params = []
    for i, (cin, cout) in enumerate(layer_defs):
        kw_key, kb_key = jax.random.split(jax.random.fold_in(key, i))
        fan_in = cin * 3 * 3
        bound = 1.0 / jnp.sqrt(float(fan_in))
        w = jax.random.uniform(kw_key, (3, 3, cin, cout), jnp.float32,
                               minval=-bound, maxval=bound)
        b = jax.random.uniform(kb_key, (cout,), jnp.float32,
                               minval=-bound, maxval=bound)
        params.append((w, b))
    return params


def pack_params(params):
    """HWIO params -> kernel operands.

    w1   : (9, C)       layer 1 rows ordered kh*3+kw (Cin == 1, no padding)
    wmid : (2, 9*C, C)  layers 2..3, row order (kh*3+kw)*C + cin (im2col order)
    w4t  : (C, 9*C)     layer 4 pre-transposed for the channel-major output
    b123 : (3, 1, C)    biases of layers 1..3 (row-broadcast)
    b4   : (C, 1)       layer-4 bias as a lane-broadcast column
    """
    (w1h, b1), (w2h, b2), (w3h, b3), (w4h, b4v) = params
    w1 = w1h.reshape(9, C)
    wmid = jnp.stack([w2h.reshape(9 * C, C), w3h.reshape(9 * C, C)])
    w4t = w4h.reshape(9 * C, C).T
    b123 = jnp.stack([b1.reshape(1, C), b2.reshape(1, C), b3.reshape(1, C)])
    b4 = b4v.reshape(C, 1)
    return w1, wmid, w4t, b123, b4


def _reference_forward(x_nchw, params):
    """Pure-JAX reference (lax.conv_general_dilated) for verification."""
    x = jnp.transpose(x_nchw, (0, 2, 3, 1)).astype(jnp.float32)
    for (w, b), d in zip(params, DILATIONS):
        y = jax.lax.conv_general_dilated(
            x, w, window_strides=(1, 1), padding="SAME",
            rhs_dilation=(d, d),
            dimension_numbers=("NHWC", "HWIO", "NHWC"))
        x = jnp.maximum(y + b[None, None, None, :], 0.0)
    return jnp.transpose(x, (0, 3, 1, 2))


if __name__ == "__main__":
    key = jax.random.PRNGKey(0)
    pkey, xkey = jax.random.split(key)

    params = init_params(pkey)
    w1, wmid, w4t, b123, b4 = pack_params(params)

    # PyTorch forward implies NCHW with in_channels=1.
    x = jax.random.normal(xkey, (2, 1, 16, 16), jnp.float32)

    out = jax.block_until_ready(shared_net_forward(x, w1, wmid, w4t, b123, b4))

    ref = _reference_forward(x, params)
    assert out.shape == (2, 64, 16, 16)
    assert jnp.allclose(out, ref, atol=1e-4, rtol=1e-4), "mismatch vs reference"

    print("KERNEL_OK")
</pallas_src>

<mosaic_0001>
module attributes {stable_mosaic.version = 11 : i64} {
  func.func @kernel(%arg0: i32, %arg1: memref<1x16x16x1xf32, #tpu.memory_space<vmem>>, %arg2: memref<9x64xf32, #tpu.memory_space<vmem>>, %arg3: memref<2x576x64xf32, #tpu.memory_space<vmem>>, %arg4: memref<64x576xf32, #tpu.memory_space<vmem>>, %arg5: memref<3x1x64xf32, #tpu.memory_space<vmem>>, %arg6: memref<64x1xf32, #tpu.memory_space<vmem>>, %arg7: memref<1x64x256xf32, #tpu.memory_space<vmem>>, %arg8: memref<24x24x64xf32, #tpu.memory_space<vmem>>, %arg9: memref<256x576xf32, #tpu.memory_space<vmem>>, %arg10: memref<18x18x1xf32, #tpu.memory_space<vmem>>) attributes {dimension_semantics = [#tpu.dimension_semantics<parallel>], iteration_bounds = array<i64: 2>, scalar_prefetch = 0 : i64, scratch_operands = 3 : i64, tpu.core_type = #tpu.core_type<tc>, window_params = [{transform_indices = @transform_0, window_bounds = array<i64: 1, 16, 16, 1>}, {pipeline_mode = #tpu.pipeline_mode<synchronous>, transform_indices = @transform_1, window_bounds = array<i64: 9, 64>}, {pipeline_mode = #tpu.pipeline_mode<synchronous>, transform_indices = @transform_2, window_bounds = array<i64: 2, 576, 64>}, {pipeline_mode = #tpu.pipeline_mode<synchronous>, transform_indices = @transform_3, window_bounds = array<i64: 64, 576>}, {pipeline_mode = #tpu.pipeline_mode<synchronous>, transform_indices = @transform_4, window_bounds = array<i64: 3, 1, 64>}, {pipeline_mode = #tpu.pipeline_mode<synchronous>, transform_indices = @transform_5, window_bounds = array<i64: 64, 1>}, {transform_indices = @transform_6, window_bounds = array<i64: 1, 64, 256>}]} {
    %cst = arith.constant 0.000000e+00 : f32
    %0 = vector.broadcast %cst : f32 to vector<4x24x64xf32>
    %c0 = arith.constant 0 : index
    %c0_0 = arith.constant 0 : index
    %c0_1 = arith.constant 0 : index
    %1 = vector.load %arg8[%c0, %c0_0, %c0_1] : memref<24x24x64xf32, #tpu.memory_space<vmem>>, vector<4x24x64xf32>
    tpu.vector_store %arg8[%c0, %c0_0, %c0_1], %0 {strides = array<i32>} : memref<24x24x64xf32, #tpu.memory_space<vmem>>, vector<4x24x64xf32>,
    %cst_2 = arith.constant 0.000000e+00 : f32
    %2 = vector.broadcast %cst_2 : f32 to vector<4x24x64xf32>
    %c20 = arith.constant 20 : index
    %c0_3 = arith.constant 0 : index
    %c0_4 = arith.constant 0 : index
    %3 = vector.load %arg8[%c20, %c0_3, %c0_4] : memref<24x24x64xf32, #tpu.memory_space<vmem>>, vector<4x24x64xf32>
    tpu.vector_store %arg8[%c20, %c0_3, %c0_4], %2 {strides = array<i32>} : memref<24x24x64xf32, #tpu.memory_space<vmem>>, vector<4x24x64xf32>,
    %cst_5 = arith.constant 0.000000e+00 : f32
    %4 = vector.broadcast %cst_5 : f32 to vector<16x4x64xf32>
    %c4 = arith.constant 4 : index
    %c0_6 = arith.constant 0 : index
    %c0_7 = arith.constant 0 : index
    %5 = vector.load %arg8[%c4, %c0_6, %c0_7] : memref<24x24x64xf32, #tpu.memory_space<vmem>>, vector<16x4x64xf32>
    tpu.vector_store %arg8[%c4, %c0_6, %c0_7], %4 {strides = array<i32>} : memref<24x24x64xf32, #tpu.memory_space<vmem>>, vector<16x4x64xf32>,
    %cst_8 = arith.constant 0.000000e+00 : f32
    %6 = vector.broadcast %cst_8 : f32 to vector<16x4x64xf32>
    %c4_9 = arith.constant 4 : index
    %c20_10 = arith.constant 20 : index
    %c0_11 = arith.constant 0 : index
    %7 = vector.load %arg8[%c4_9, %c20_10, %c0_11] : memref<24x24x64xf32, #tpu.memory_space<vmem>>, vector<16x4x64xf32>
    tpu.vector_store %arg8[%c4_9, %c20_10, %c0_11], %6 {strides = array<i32>} : memref<24x24x64xf32, #tpu.memory_space<vmem>>, vector<16x4x64xf32>,
    %cst_12 = arith.constant 0.000000e+00 : f32
    %8 = vector.broadcast %cst_12 : f32 to vector<18x18x1xf32>
    %c0_13 = arith.constant 0 : index
    %c0_14 = arith.constant 0 : index
    %c0_15 = arith.constant 0 : index
    %9 = vector.load %arg10[%c0_13, %c0_14, %c0_15] : memref<18x18x1xf32, #tpu.memory_space<vmem>>, vector<18x18x1xf32>
    tpu.vector_store %arg10[%c0_13, %c0_14, %c0_15], %8 {strides = array<i32>} : memref<18x18x1xf32, #tpu.memory_space<vmem>>, vector<18x18x1xf32>,
    %c0_16 = arith.constant 0 : index
    %c0_17 = arith.constant 0 : index
    %c0_18 = arith.constant 0 : index
    %c0_19 = arith.constant 0 : index
    %10 = vector.load %arg1[%c0_16, %c0_17, %c0_18, %c0_19] : memref<1x16x16x1xf32, #tpu.memory_space<vmem>>, vector<1x16x16x1xf32>
    %11 = vector.shape_cast %10 : vector<1x16x16x1xf32> to vector<16x16x1xf32>
    %c1 = arith.constant 1 : index
    %c1_20 = arith.constant 1 : index
    %c0_21 = arith.constant 0 : index
    %12 = vector.load %arg10[%c1, %c1_20, %c0_21] : memref<18x18x1xf32, #tpu.memory_space<vmem>>, vector<16x16x1xf32>
    tpu.vector_store %arg10[%c1, %c1_20, %c0_21], %11 {strides = array<i32>} : memref<18x18x1xf32, #tpu.memory_space<vmem>>, vector<16x16x1xf32>,
    %cst_22 = arith.constant 0.000000e+00 : f32
    %13 = vector.broadcast %cst_22 : f32 to vector<16x16x64xf32>
    %c0_23 = arith.constant 0 : index
    %c0_24 = arith.constant 0 : index
    %c0_25 = arith.constant 0 : index
    %14 = vector.load %arg10[%c0_23, %c0_24, %c0_25] : memref<18x18x1xf32, #tpu.memory_space<vmem>>, vector<16x16x1xf32>
    %c0_26 = arith.constant 0 : index
    %c0_27 = arith.constant 0 : index
    %15 = vector.load %arg2[%c0_26, %c0_27] : memref<9x64xf32, #tpu.memory_space<vmem>>, vector<1x64xf32>
    %16 = vector.shape_cast %15 : vector<1x64xf32> to vector<64xf32>
    %17 = vector.shape_cast %16 : vector<64xf32> to vector<1x1x64xf32>
    %18 = vector.broadcast %14 : vector<16x16x1xf32> to vector<16x16x64xf32>
    %19 = vector.broadcast %17 : vector<1x1x64xf32> to vector<16x16x64xf32>
    %20 = arith.mulf %18, %19 : vector<16x16x64xf32>
    %21 = arith.addf %13, %20 : vector<16x16x64xf32>
    %c0_28 = arith.constant 0 : index
    %c1_29 = arith.constant 1 : index
    %c0_30 = arith.constant 0 : index
    %22 = vector.load %arg10[%c0_28, %c1_29, %c0_30] : memref<18x18x1xf32, #tpu.memory_space<vmem>>, vector<16x16x1xf32>
    %c1_31 = arith.constant 1 : index
    %c0_32 = arith.constant 0 : index
    %23 = vector.load %arg2[%c1_31, %c0_32] : memref<9x64xf32, #tpu.memory_space<vmem>>, vector<1x64xf32>
    %24 = vector.shape_cast %23 : vector<1x64xf32> to vector<64xf32>
    %25 = vector.shape_cast %24 : vector<64xf32> to vector<1x1x64xf32>
    %26 = vector.broadcast %22 : vector<16x16x1xf32> to vector<16x16x64xf32>
    %27 = vector.broadcast %25 : vector<1x1x64xf32> to vector<16x16x64xf32>
    %28 = arith.mulf %26, %27 : vector<16x16x64xf32>
    %29 = arith.addf %21, %28 : vector<16x16x64xf32>
    %c0_33 = arith.constant 0 : index
    %c2 = arith.constant 2 : index
    %c0_34 = arith.constant 0 : index
    %30 = vector.load %arg10[%c0_33, %c2, %c0_34] : memref<18x18x1xf32, #tpu.memory_space<vmem>>, vector<16x16x1xf32>
    %c2_35 = arith.constant 2 : index
    %c0_36 = arith.constant 0 : index
    %31 = vector.load %arg2[%c2_35, %c0_36] : memref<9x64xf32, #tpu.memory_space<vmem>>, vector<1x64xf32>
    %32 = vector.shape_cast %31 : vector<1x64xf32> to vector<64xf32>
    %33 = vector.shape_cast %32 : vector<64xf32> to vector<1x1x64xf32>
    %34 = vector.broadcast %30 : vector<16x16x1xf32> to vector<16x16x64xf32>
    %35 = vector.broadcast %33 : vector<1x1x64xf32> to vector<16x16x64xf32>
    %36 = arith.mulf %34, %35 : vector<16x16x64xf32>
    %37 = arith.addf %29, %36 : vector<16x16x64xf32>
    %c1_37 = arith.constant 1 : index
    %c0_38 = arith.constant 0 : index
    %c0_39 = arith.constant 0 : index
    %38 = vector.load %arg10[%c1_37, %c0_38, %c0_39] : memref<18x18x1xf32, #tpu.memory_space<vmem>>, vector<16x16x1xf32>
    %c3 = arith.constant 3 : index
    %c0_40 = arith.constant 0 : index
    %39 = vector.load %arg2[%c3, %c0_40] : memref<9x64xf32, #tpu.memory_space<vmem>>, vector<1x64xf32>
    %40 = vector.shape_cast %39 : vector<1x64xf32> to vector<64xf32>
    %41 = vector.shape_cast %40 : vector<64xf32> to vector<1x1x64xf32>
    %42 = vector.broadcast %38 : vector<16x16x1xf32> to vector<16x16x64xf32>
    %43 = vector.broadcast %41 : vector<1x1x64xf32> to vector<16x16x64xf32>
    %44 = arith.mulf %42, %43 : vector<16x16x64xf32>
    %45 = arith.addf %37, %44 : vector<16x16x64xf32>
    %c1_41 = arith.constant 1 : index
    %c1_42 = arith.constant 1 : index
    %c0_43 = arith.constant 0 : index
    %46 = vector.load %arg10[%c1_41, %c1_42, %c0_43] : memref<18x18x1xf32, #tpu.memory_space<vmem>>, vector<16x16x1xf32>
    %c4_44 = arith.constant 4 : index
    %c0_45 = arith.constant 0 : index
    %47 = vector.load %arg2[%c4_44, %c0_45] : memref<9x64xf32, #tpu.memory_space<vmem>>, vector<1x64xf32>
    %48 = vector.shape_cast %47 : vector<1x64xf32> to vector<64xf32>
    %49 = vector.shape_cast %48 : vector<64xf32> to vector<1x1x64xf32>
    %50 = vector.broadcast %46 : vector<16x16x1xf32> to vector<16x16x64xf32>
    %51 = vector.broadcast %49 : vector<1x1x64xf32> to vector<16x16x64xf32>
    %52 = arith.mulf %50, %51 : vector<16x16x64xf32>
    %53 = arith.addf %45, %52 : vector<16x16x64xf32>
    %c1_46 = arith.constant 1 : index
    %c2_47 = arith.constant 2 : index
    %c0_48 = arith.constant 0 : index
    %54 = vector.load %arg10[%c1_46, %c2_47, %c0_48] : memref<18x18x1xf32, #tpu.memory_space<vmem>>, vector<16x16x1xf32>
    %c5 = arith.constant 5 : index
    %c0_49 = arith.constant 0 : index
    %55 = vector.load %arg2[%c5, %c0_49] : memref<9x64xf32, #tpu.memory_space<vmem>>, vector<1x64xf32>
    %56 = vector.shape_cast %55 : vector<1x64xf32> to vector<64xf32>
    %57 = vector.shape_cast %56 : vector<64xf32> to vector<1x1x64xf32>
    %58 = vector.broadcast %54 : vector<16x16x1xf32> to vector<16x16x64xf32>
    %59 = vector.broadcast %57 : vector<1x1x64xf32> to vector<16x16x64xf32>
    %60 = arith.mulf %58, %59 : vector<16x16x64xf32>
    %61 = arith.addf %53, %60 : vector<16x16x64xf32>
    %c2_50 = arith.constant 2 : index
    %c0_51 = arith.constant 0 : index
    %c0_52 = arith.constant 0 : index
    %62 = vector.load %arg10[%c2_50, %c0_51, %c0_52] : memref<18x18x1xf32, #tpu.memory_space<vmem>>, vector<16x16x1xf32>
    %c6 = arith.constant 6 : index
    %c0_53 = arith.constant 0 : index
    %63 = vector.load %arg2[%c6, %c0_53] : memref<9x64xf32, #tpu.memory_space<vmem>>, vector<1x64xf32>
    %64 = vector.shape_cast %63 : vector<1x64xf32> to vector<64xf32>
    %65 = vector.shape_cast %64 : vector<64xf32> to vector<1x1x64xf32>
    %66 = vector.broadcast %62 : vector<16x16x1xf32> to vector<16x16x64xf32>
    %67 = vector.broadcast %65 : vector<1x1x64xf32> to vector<16x16x64xf32>
    %68 = arith.mulf %66, %67 : vector<16x16x64xf32>
    %69 = arith.addf %61, %68 : vector<16x16x64xf32>
    %c2_54 = arith.constant 2 : index
    %c1_55 = arith.constant 1 : index
    %c0_56 = arith.constant 0 : index
    %70 = vector.load %arg10[%c2_54, %c1_55, %c0_56] : memref<18x18x1xf32, #tpu.memory_space<vmem>>, vector<16x16x1xf32>
    %c7 = arith.constant 7 : index
    %c0_57 = arith.constant 0 : index
    %71 = vector.load %arg2[%c7, %c0_57] : memref<9x64xf32, #tpu.memory_space<vmem>>, vector<1x64xf32>
    %72 = vector.shape_cast %71 : vector<1x64xf32> to vector<64xf32>
    %73 = vector.shape_cast %72 : vector<64xf32> to vector<1x1x64xf32>
    %74 = vector.broadcast %70 : vector<16x16x1xf32> to vector<16x16x64xf32>
    %75 = vector.broadcast %73 : vector<1x1x64xf32> to vector<16x16x64xf32>
    %76 = arith.mulf %74, %75 : vector<16x16x64xf32>
    %77 = arith.addf %69, %76 : vector<16x16x64xf32>
    %c2_58 = arith.constant 2 : index
    %c2_59 = arith.constant 2 : index
    %c0_60 = arith.constant 0 : index
    %78 = vector.load %arg10[%c2_58, %c2_59, %c0_60] : memref<18x18x1xf32, #tpu.memory_space<vmem>>, vector<16x16x1xf32>
    %c8 = arith.constant 8 : index
    %c0_61 = arith.constant 0 : index
    %79 = vector.load %arg2[%c8, %c0_61] : memref<9x64xf32, #tpu.memory_space<vmem>>, vector<1x64xf32>
    %80 = vector.shape_cast %79 : vector<1x64xf32> to vector<64xf32>
    %81 = vector.shape_cast %80 : vector<64xf32> to vector<1x1x64xf32>
    %82 = vector.broadcast %78 : vector<16x16x1xf32> to vector<16x16x64xf32>
    %83 = vector.broadcast %81 : vector<1x1x64xf32> to vector<16x16x64xf32>
    %84 = arith.mulf %82, %83 : vector<16x16x64xf32>
    %85 = arith.addf %77, %84 : vector<16x16x64xf32>
    %c0_62 = arith.constant 0 : index
    %c0_63 = arith.constant 0 : index
    %c0_64 = arith.constant 0 : index
    %86 = vector.load %arg5[%c0_62, %c0_63, %c0_64] : memref<3x1x64xf32, #tpu.memory_space<vmem>>, vector<1x1x64xf32>
    %87 = vector.shape_cast %86 : vector<1x1x64xf32> to vector<1x64xf32>
    %88 = vector.shape_cast %87 : vector<1x64xf32> to vector<1x1x64xf32>
    %89 = vector.broadcast %88 : vector<1x1x64xf32> to vector<16x16x64xf32>
    %90 = arith.addf %85, %89 : vector<16x16x64xf32>
    %cst_65 = arith.constant 0.000000e+00 : f32
    %91 = vector.broadcast %cst_65 : f32 to vector<16x16x64xf32>
    %92 = arith.maximumf %90, %91 : vector<16x16x64xf32>
    %c4_66 = arith.constant 4 : index
    %c4_67 = arith.constant 4 : index
    %c0_68 = arith.constant 0 : index
    %93 = vector.load %arg8[%c4_66, %c4_67, %c0_68] : memref<24x24x64xf32, #tpu.memory_space<vmem>>, vector<16x16x64xf32>
    tpu.vector_store %arg8[%c4_66, %c4_67, %c0_68], %92 {strides = array<i32>} : memref<24x24x64xf32, #tpu.memory_space<vmem>>, vector<16x16x64xf32>,
    %c2_69 = arith.constant 2 : index
    %c2_70 = arith.constant 2 : index
    %c0_71 = arith.constant 0 : index
    %94 = vector.load %arg8[%c2_69, %c2_70, %c0_71] : memref<24x24x64xf32, #tpu.memory_space<vmem>>, vector<16x16x64xf32>
    %95 = vector.shape_cast %94 : vector<16x16x64xf32> to vector<256x64xf32>
    %c2_72 = arith.constant 2 : index
    %c4_73 = arith.constant 4 : index
    %c0_74 = arith.constant 0 : index
    %96 = vector.load %arg8[%c2_72, %c4_73, %c0_74] : memref<24x24x64xf32, #tpu.memory_space<vmem>>, vector<16x16x64xf32>
    %97 = vector.shape_cast %96 : vector<16x16x64xf32> to vector<256x64xf32>
    %98 = tpu.concatenate %95, %97 in 1 : vector<256x64xf32>, vector<256x64xf32> -> vector<256x128xf32>
    %c0_75 = arith.constant 0 : index
    %c0_76 = arith.constant 0 : index
    %99 = vector.load %arg9[%c0_75, %c0_76] : memref<256x576xf32, #tpu.memory_space<vmem>>, vector<256x128xf32>
    tpu.vector_store %arg9[%c0_75, %c0_76], %98 {strides = array<i32>} : memref<256x576xf32, #tpu.memory_space<vmem>>, vector<256x128xf32>,
    %c2_77 = arith.constant 2 : index
    %c6_78 = arith.constant 6 : index
    %c0_79 = arith.constant 0 : index
    %100 = vector.load %arg8[%c2_77, %c6_78, %c0_79] : memref<24x24x64xf32, #tpu.memory_space<vmem>>, vector<16x16x64xf32>
    %101 = vector.shape_cast %100 : vector<16x16x64xf32> to vector<256x64xf32>
    %c4_80 = arith.constant 4 : index
    %c2_81 = arith.constant 2 : index
    %c0_82 = arith.constant 0 : index
    %102 = vector.load %arg8[%c4_80, %c2_81, %c0_82] : memref<24x24x64xf32, #tpu.memory_space<vmem>>, vector<16x16x64xf32>
    %103 = vector.shape_cast %102 : vector<16x16x64xf32> to vector<256x64xf32>
    %104 = tpu.concatenate %101, %103 in 1 : vector<256x64xf32>, vector<256x64xf32> -> vector<256x128xf32>
    %c0_83 = arith.constant 0 : index
    %c128 = arith.constant 128 : index
    %105 = vector.load %arg9[%c0_83, %c128] : memref<256x576xf32, #tpu.memory_space<vmem>>, vector<256x128xf32>
    tpu.vector_store %arg9[%c0_83, %c128], %104 {strides = array<i32>} : memref<256x576xf32, #tpu.memory_space<vmem>>, vector<256x128xf32>,
    %c4_84 = arith.constant 4 : index
    %c4_85 = arith.constant 4 : index
    %c0_86 = arith.constant 0 : index
    %106 = vector.load %arg8[%c4_84, %c4_85, %c0_86] : memref<24x24x64xf32, #tpu.memory_space<vmem>>, vector<16x16x64xf32>
    %107 = vector.shape_cast %106 : vector<16x16x64xf32> to vector<256x64xf32>
    %c4_87 = arith.constant 4 : index
    %c6_88 = arith.constant 6 : index
    %c0_89 = arith.constant 0 : index
    %108 = vector.load %arg8[%c4_87, %c6_88, %c0_89] : memref<24x24x64xf32, #tpu.memory_space<vmem>>, vector<16x16x64xf32>
    %109 = vector.shape_cast %108 : vector<16x16x64xf32> to vector<256x64xf32>
    %110 = tpu.concatenate %107, %109 in 1 : vector<256x64xf32>, vector<256x64xf32> -> vector<256x128xf32>
    %c0_90 = arith.constant 0 : index
    %c256 = arith.constant 256 : index
    %111 = vector.load %arg9[%c0_90, %c256] : memref<256x576xf32, #tpu.memory_space<vmem>>, vector<256x128xf32>
    tpu.vector_store %arg9[%c0_90, %c256], %110 {strides = array<i32>} : memref<256x576xf32, #tpu.memory_space<vmem>>, vector<256x128xf32>,
    %c6_91 = arith.constant 6 : index
    %c2_92 = arith.constant 2 : index
    %c0_93 = arith.constant 0 : index
    %112 = vector.load %arg8[%c6_91, %c2_92, %c0_93] : memref<24x24x64xf32, #tpu.memory_space<vmem>>, vector<16x16x64xf32>
    %113 = vector.shape_cast %112 : vector<16x16x64xf32> to vector<256x64xf32>
    %c6_94 = arith.constant 6 : index
    %c4_95 = arith.constant 4 : index
    %c0_96 = arith.constant 0 : index
    %114 = vector.load %arg8[%c6_94, %c4_95, %c0_96] : memref<24x24x64xf32, #tpu.memory_space<vmem>>, vector<16x16x64xf32>
    %115 = vector.shape_cast %114 : vector<16x16x64xf32> to vector<256x64xf32>
    %116 = tpu.concatenate %113, %115 in 1 : vector<256x64xf32>, vector<256x64xf32> -> vector<256x128xf32>
    %c0_97 = arith.constant 0 : index
    %c384 = arith.constant 384 : index
    %117 = vector.load %arg9[%c0_97, %c384] : memref<256x576xf32, #tpu.memory_space<vmem>>, vector<256x128xf32>
    tpu.vector_store %arg9[%c0_97, %c384], %116 {strides = array<i32>} : memref<256x576xf32, #tpu.memory_space<vmem>>, vector<256x128xf32>,
    %c6_98 = arith.constant 6 : index
    %c6_99 = arith.constant 6 : index
    %c0_100 = arith.constant 0 : index
    %118 = vector.load %arg8[%c6_98, %c6_99, %c0_100] : memref<24x24x64xf32, #tpu.memory_space<vmem>>, vector<16x16x64xf32>
    %119 = vector.shape_cast %118 : vector<16x16x64xf32> to vector<256x64xf32>
    %c0_101 = arith.constant 0 : index
    %c512 = arith.constant 512 : index
    %120 = vector.load %arg9[%c0_101, %c512] : memref<256x576xf32, #tpu.memory_space<vmem>>, vector<256x64xf32>
    tpu.vector_store %arg9[%c0_101, %c512], %119 {strides = array<i32>} : memref<256x576xf32, #tpu.memory_space<vmem>>, vector<256x64xf32>,
    %c0_102 = arith.constant 0 : index
    %c0_103 = arith.constant 0 : index
    %121 = vector.load %arg9[%c0_102, %c0_103] : memref<256x576xf32, #tpu.memory_space<vmem>>, vector<256x576xf32>
    %c0_104 = arith.constant 0 : index
    %c0_105 = arith.constant 0 : index
    %c0_106 = arith.constant 0 : index
    %122 = vector.load %arg3[%c0_104, %c0_105, %c0_106] : memref<2x576x64xf32, #tpu.memory_space<vmem>>, vector<1x576x64xf32>
    %123 = vector.shape_cast %122 : vector<1x576x64xf32> to vector<576x64xf32>
    %cst_107 = arith.constant dense<0.000000e+00> : vector<256x64xf32>
    %124 = tpu.matmul %121, %123, %cst_107 {dimension_numbers = #tpu.dot_dimension_numbers<[1], [0], [0], [1], [0, 0, 1, 1], [], []>} : vector<256x576xf32>, vector<576x64xf32>, vector<256x64xf32> -> vector<256x64xf32>
    %c1_108 = arith.constant 1 : index
    %c0_109 = arith.constant 0 : index
    %c0_110 = arith.constant 0 : index
    %125 = vector.load %arg5[%c1_108, %c0_109, %c0_110] : memref<3x1x64xf32, #tpu.memory_space<vmem>>, vector<1x1x64xf32>
    %126 = vector.shape_cast %125 : vector<1x1x64xf32> to vector<1x64xf32>
    %127 = vector.broadcast %126 : vector<1x64xf32> to vector<256x64xf32>
    %128 = arith.addf %124, %127 : vector<256x64xf32>
    %cst_111 = arith.constant 0.000000e+00 : f32
    %129 = vector.broadcast %cst_111 : f32 to vector<256x64xf32>
    %130 = arith.maximumf %128, %129 : vector<256x64xf32>
    %131 = vector.shape_cast %130 : vector<256x64xf32> to vector<16x16x64xf32>
    %c4_112 = arith.constant 4 : index
    %c4_113 = arith.constant 4 : index
    %c0_114 = arith.constant 0 : index
    %132 = vector.load %arg8[%c4_112, %c4_113, %c0_114] : memref<24x24x64xf32, #tpu.memory_space<vmem>>, vector<16x16x64xf32>
    tpu.vector_store %arg8[%c4_112, %c4_113, %c0_114], %131 {strides = array<i32>} : memref<24x24x64xf32, #tpu.memory_space<vmem>>, vector<16x16x64xf32>,
    %c1_115 = arith.constant 1 : index
    %c1_116 = arith.constant 1 : index
    %c0_117 = arith.constant 0 : index
    %133 = vector.load %arg8[%c1_115, %c1_116, %c0_117] : memref<24x24x64xf32, #tpu.memory_space<vmem>>, vector<16x16x64xf32>
    %134 = vector.shape_cast %133 : vector<16x16x64xf32> to vector<256x64xf32>
    %c1_118 = arith.constant 1 : index
    %c4_119 = arith.constant 4 : index
    %c0_120 = arith.constant 0 : index
    %135 = vector.load %arg8[%c1_118, %c4_119, %c0_120] : memref<24x24x64xf32, #tpu.memory_space<vmem>>, vector<16x16x64xf32>
    %136 = vector.shape_cast %135 : vector<16x16x64xf32> to vector<256x64xf32>
    %137 = tpu.concatenate %134, %136 in 1 : vector<256x64xf32>, vector<256x64xf32> -> vector<256x128xf32>
    %c0_121 = arith.constant 0 : index
    %c0_122 = arith.constant 0 : index
    %138 = vector.load %arg9[%c0_121, %c0_122] : memref<256x576xf32, #tpu.memory_space<vmem>>, vector<256x128xf32>
    tpu.vector_store %arg9[%c0_121, %c0_122], %137 {strides = array<i32>} : memref<256x576xf32, #tpu.memory_space<vmem>>, vector<256x128xf32>,
    %c1_123 = arith.constant 1 : index
    %c7_124 = arith.constant 7 : index
    %c0_125 = arith.constant 0 : index
    %139 = vector.load %arg8[%c1_123, %c7_124, %c0_125] : memref<24x24x64xf32, #tpu.memory_space<vmem>>, vector<16x16x64xf32>
    %140 = vector.shape_cast %139 : vector<16x16x64xf32> to vector<256x64xf32>
    %c4_126 = arith.constant 4 : index
    %c1_127 = arith.constant 1 : index
    %c0_128 = arith.constant 0 : index
    %141 = vector.load %arg8[%c4_126, %c1_127, %c0_128] : memref<24x24x64xf32, #tpu.memory_space<vmem>>, vector<16x16x64xf32>
    %142 = vector.shape_cast %141 : vector<16x16x64xf32> to vector<256x64xf32>
    %143 = tpu.concatenate %140, %142 in 1 : vector<256x64xf32>, vector<256x64xf32> -> vector<256x128xf32>
    %c0_129 = arith.constant 0 : index
    %c128_130 = arith.constant 128 : index
    %144 = vector.load %arg9[%c0_129, %c128_130] : memref<256x576xf32, #tpu.memory_space<vmem>>, vector<256x128xf32>
    tpu.vector_store %arg9[%c0_129, %c128_130], %143 {strides = array<i32>} : memref<256x576xf32, #tpu.memory_space<vmem>>, vector<256x128xf32>,
    %c4_131 = arith.constant 4 : index
    %c4_132 = arith.constant 4 : index
    %c0_133 = arith.constant 0 : index
    %145 = vector.load %arg8[%c4_131, %c4_132, %c0_133] : memref<24x24x64xf32, #tpu.memory_space<vmem>>, vector<16x16x64xf32>
    %146 = vector.shape_cast %145 : vector<16x16x64xf32> to vector<256x64xf32>
    %c4_134 = arith.constant 4 : index
    %c7_135 = arith.constant 7 : index
    %c0_136 = arith.constant 0 : index
    %147 = vector.load %arg8[%c4_134, %c7_135, %c0_136] : memref<24x24x64xf32, #tpu.memory_space<vmem>>, vector<16x16x64xf32>
    %148 = vector.shape_cast %147 : vector<16x16x64xf32> to vector<256x64xf32>
    %149 = tpu.concatenate %146, %148 in 1 : vector<256x64xf32>, vector<256x64xf32> -> vector<256x128xf32>
    %c0_137 = arith.constant 0 : index
    %c256_138 = arith.constant 256 : index
    %150 = vector.load %arg9[%c0_137, %c256_138] : memref<256x576xf32, #tpu.memory_space<vmem>>, vector<256x128xf32>
    tpu.vector_store %arg9[%c0_137, %c256_138], %149 {strides = array<i32>} : memref<256x576xf32, #tpu.memory_space<vmem>>, vector<256x128xf32>,
    %c7_139 = arith.constant 7 : index
    %c1_140 = arith.constant 1 : index
    %c0_141 = arith.constant 0 : index
    %151 = vector.load %arg8[%c7_139, %c1_140, %c0_141] : memref<24x24x64xf32, #tpu.memory_space<vmem>>, vector<16x16x64xf32>
    %152 = vector.shape_cast %151 : vector<16x16x64xf32> to vector<256x64xf32>
    %c7_142 = arith.constant 7 : index
    %c4_143 = arith.constant 4 : index
    %c0_144 = arith.constant 0 : index
    %153 = vector.load %arg8[%c7_142, %c4_143, %c0_144] : memref<24x24x64xf32, #tpu.memory_space<vmem>>, vector<16x16x64xf32>
    %154 = vector.shape_cast %153 : vector<16x16x64xf32> to vector<256x64xf32>
    %155 = tpu.concatenate %152, %154 in 1 : vector<256x64xf32>, vector<256x64xf32> -> vector<256x128xf32>
    %c0_145 = arith.constant 0 : index
    %c384_146 = arith.constant 384 : index
    %156 = vector.load %arg9[%c0_145, %c384_146] : memref<256x576xf32, #tpu.memory_space<vmem>>, vector<256x128xf32>
    tpu.vector_store %arg9[%c0_145, %c384_146], %155 {strides = array<i32>} : memref<256x576xf32, #tpu.memory_space<vmem>>, vector<256x128xf32>,
    %c7_147 = arith.constant 7 : index
    %c7_148 = arith.constant 7 : index
    %c0_149 = arith.constant 0 : index
    %157 = vector.load %arg8[%c7_147, %c7_148, %c0_149] : memref<24x24x64xf32, #tpu.memory_space<vmem>>, vector<16x16x64xf32>
    %158 = vector.shape_cast %157 : vector<16x16x64xf32> to vector<256x64xf32>
    %c0_150 = arith.constant 0 : index
    %c512_151 = arith.constant 512 : index
    %159 = vector.load %arg9[%c0_150, %c512_151] : memref<256x576xf32, #tpu.memory_space<vmem>>, vector<256x64xf32>
    tpu.vector_store %arg9[%c0_150, %c512_151], %158 {strides = array<i32>} : memref<256x576xf32, #tpu.memory_space<vmem>>, vector<256x64xf32>,
    %c0_152 = arith.constant 0 : index
    %c0_153 = arith.constant 0 : index
    %160 = vector.load %arg9[%c0_152, %c0_153] : memref<256x576xf32, #tpu.memory_space<vmem>>, vector<256x576xf32>
    %c1_154 = arith.constant 1 : index
    %c0_155 = arith.constant 0 : index
    %c0_156 = arith.constant 0 : index
    %161 = vector.load %arg3[%c1_154, %c0_155, %c0_156] : memref<2x576x64xf32, #tpu.memory_space<vmem>>, vector<1x576x64xf32>
    %162 = vector.shape_cast %161 : vector<1x576x64xf32> to vector<576x64xf32>
    %cst_157 = arith.constant dense<0.000000e+00> : vector<256x64xf32>
    %163 = tpu.matmul %160, %162, %cst_157 {dimension_numbers = #tpu.dot_dimension_numbers<[1], [0], [0], [1], [0, 0, 1, 1], [], []>} : vector<256x576xf32>, vector<576x64xf32>, vector<256x64xf32> -> vector<256x64xf32>
    %c2_158 = arith.constant 2 : index
    %c0_159 = arith.constant 0 : index
    %c0_160 = arith.constant 0 : index
    %164 = vector.load %arg5[%c2_158, %c0_159, %c0_160] : memref<3x1x64xf32, #tpu.memory_space<vmem>>, vector<1x1x64xf32>
    %165 = vector.shape_cast %164 : vector<1x1x64xf32> to vector<1x64xf32>
    %166 = vector.broadcast %165 : vector<1x64xf32> to vector<256x64xf32>
    %167 = arith.addf %163, %166 : vector<256x64xf32>
    %cst_161 = arith.constant 0.000000e+00 : f32
    %168 = vector.broadcast %cst_161 : f32 to vector<256x64xf32>
    %169 = arith.maximumf %167, %168 : vector<256x64xf32>
    %170 = vector.shape_cast %169 : vector<256x64xf32> to vector<16x16x64xf32>
    %c4_162 = arith.constant 4 : index
    %c4_163 = arith.constant 4 : index
    %c0_164 = arith.constant 0 : index
    %171 = vector.load %arg8[%c4_162, %c4_163, %c0_164] : memref<24x24x64xf32, #tpu.memory_space<vmem>>, vector<16x16x64xf32>
    tpu.vector_store %arg8[%c4_162, %c4_163, %c0_164], %170 {strides = array<i32>} : memref<24x24x64xf32, #tpu.memory_space<vmem>>, vector<16x16x64xf32>,
    %c0_165 = arith.constant 0 : index
    %c0_166 = arith.constant 0 : index
    %c0_167 = arith.constant 0 : index
    %172 = vector.load %arg8[%c0_165, %c0_166, %c0_167] : memref<24x24x64xf32, #tpu.memory_space<vmem>>, vector<16x16x64xf32>
    %173 = vector.shape_cast %172 : vector<16x16x64xf32> to vector<256x64xf32>
    %c0_168 = arith.constant 0 : index
    %c4_169 = arith.constant 4 : index
    %c0_170 = arith.constant 0 : index
    %174 = vector.load %arg8[%c0_168, %c4_169, %c0_170] : memref<24x24x64xf32, #tpu.memory_space<vmem>>, vector<16x16x64xf32>
    %175 = vector.shape_cast %174 : vector<16x16x64xf32> to vector<256x64xf32>
    %176 = tpu.concatenate %173, %175 in 1 : vector<256x64xf32>, vector<256x64xf32> -> vector<256x128xf32>
    %c0_171 = arith.constant 0 : index
    %c0_172 = arith.constant 0 : index
    %177 = vector.load %arg9[%c0_171, %c0_172] : memref<256x576xf32, #tpu.memory_space<vmem>>, vector<256x128xf32>
    tpu.vector_store %arg9[%c0_171, %c0_172], %176 {strides = array<i32>} : memref<256x576xf32, #tpu.memory_space<vmem>>, vector<256x128xf32>,
    %c0_173 = arith.constant 0 : index
    %c8_174 = arith.constant 8 : index
    %c0_175 = arith.constant 0 : index
    %178 = vector.load %arg8[%c0_173, %c8_174, %c0_175] : memref<24x24x64xf32, #tpu.memory_space<vmem>>, vector<16x16x64xf32>
    %179 = vector.shape_cast %178 : vector<16x16x64xf32> to vector<256x64xf32>
    %c4_176 = arith.constant 4 : index
    %c0_177 = arith.constant 0 : index
    %c0_178 = arith.constant 0 : index
    %180 = vector.load %arg8[%c4_176, %c0_177, %c0_178] : memref<24x24x64xf32, #tpu.memory_space<vmem>>, vector<16x16x64xf32>
    %181 = vector.shape_cast %180 : vector<16x16x64xf32> to vector<256x64xf32>
    %182 = tpu.concatenate %179, %181 in 1 : vector<256x64xf32>, vector<256x64xf32> -> vector<256x128xf32>
    %c0_179 = arith.constant 0 : index
    %c128_180 = arith.constant 128 : index
    %183 = vector.load %arg9[%c0_179, %c128_180] : memref<256x576xf32, #tpu.memory_space<vmem>>, vector<256x128xf32>
    tpu.vector_store %arg9[%c0_179, %c128_180], %182 {strides = array<i32>} : memref<256x576xf32, #tpu.memory_space<vmem>>, vector<256x128xf32>,
    %c4_181 = arith.constant 4 : index
    %c4_182 = arith.constant 4 : index
    %c0_183 = arith.constant 0 : index
    %184 = vector.load %arg8[%c4_181, %c4_182, %c0_183] : memref<24x24x64xf32, #tpu.memory_space<vmem>>, vector<16x16x64xf32>
    %185 = vector.shape_cast %184 : vector<16x16x64xf32> to vector<256x64xf32>
    %c4_184 = arith.constant 4 : index
    %c8_185 = arith.constant 8 : index
    %c0_186 = arith.constant 0 : index
    %186 = vector.load %arg8[%c4_184, %c8_185, %c0_186] : memref<24x24x64xf32, #tpu.memory_space<vmem>>, vector<16x16x64xf32>
    %187 = vector.shape_cast %186 : vector<16x16x64xf32> to vector<256x64xf32>
    %188 = tpu.concatenate %185, %187 in 1 : vector<256x64xf32>, vector<256x64xf32> -> vector<256x128xf32>
    %c0_187 = arith.constant 0 : index
    %c256_188 = arith.constant 256 : index
    %189 = vector.load %arg9[%c0_187, %c256_188] : memref<256x576xf32, #tpu.memory_space<vmem>>, vector<256x128xf32>
    tpu.vector_store %arg9[%c0_187, %c256_188], %188 {strides = array<i32>} : memref<256x576xf32, #tpu.memory_space<vmem>>, vector<256x128xf32>,
    %c8_189 = arith.constant 8 : index
    %c0_190 = arith.constant 0 : index
    %c0_191 = arith.constant 0 : index
    %190 = vector.load %arg8[%c8_189, %c0_190, %c0_191] : memref<24x24x64xf32, #tpu.memory_space<vmem>>, vector<16x16x64xf32>
    %191 = vector.shape_cast %190 : vector<16x16x64xf32> to vector<256x64xf32>
    %c8_192 = arith.constant 8 : index
    %c4_193 = arith.constant 4 : index
    %c0_194 = arith.constant 0 : index
    %192 = vector.load %arg8[%c8_192, %c4_193, %c0_194] : memref<24x24x64xf32, #tpu.memory_space<vmem>>, vector<16x16x64xf32>
    %193 = vector.shape_cast %192 : vector<16x16x64xf32> to vector<256x64xf32>
    %194 = tpu.concatenate %191, %193 in 1 : vector<256x64xf32>, vector<256x64xf32> -> vector<256x128xf32>
    %c0_195 = arith.constant 0 : index
    %c384_196 = arith.constant 384 : index
    %195 = vector.load %arg9[%c0_195, %c384_196] : memref<256x576xf32, #tpu.memory_space<vmem>>, vector<256x128xf32>
    tpu.vector_store %arg9[%c0_195, %c384_196], %194 {strides = array<i32>} : memref<256x576xf32, #tpu.memory_space<vmem>>, vector<256x128xf32>,
    %c8_197 = arith.constant 8 : index
    %c8_198 = arith.constant 8 : index
    %c0_199 = arith.constant 0 : index
    %196 = vector.load %arg8[%c8_197, %c8_198, %c0_199] : memref<24x24x64xf32, #tpu.memory_space<vmem>>, vector<16x16x64xf32>
    %197 = vector.shape_cast %196 : vector<16x16x64xf32> to vector<256x64xf32>
    %c0_200 = arith.constant 0 : index
    %c512_201 = arith.constant 512 : index
    %198 = vector.load %arg9[%c0_200, %c512_201] : memref<256x576xf32, #tpu.memory_space<vmem>>, vector<256x64xf32>
    tpu.vector_store %arg9[%c0_200, %c512_201], %197 {strides = array<i32>} : memref<256x576xf32, #tpu.memory_space<vmem>>, vector<256x64xf32>,
    %c0_202 = arith.constant 0 : index
    %c0_203 = arith.constant 0 : index
    %199 = vector.load %arg4[%c0_202, %c0_203] : memref<64x576xf32, #tpu.memory_space<vmem>>, vector<64x576xf32>
    %c0_204 = arith.constant 0 : index
    %c0_205 = arith.constant 0 : index
    %200 = vector.load %arg9[%c0_204, %c0_205] : memref<256x576xf32, #tpu.memory_space<vmem>>, vector<256x576xf32>
    %cst_206 = arith.constant dense<0.000000e+00> : vector<64x256xf32>
    %201 = tpu.matmul %199, %200, %cst_206 {dimension_numbers = #tpu.dot_dimension_numbers<[1], [1], [0], [0], [0, 0, 1, 0], [], []>} : vector<64x576xf32>, vector<256x576xf32>, vector<64x256xf32> -> vector<64x256xf32>
    %c0_207 = arith.constant 0 : index
    %c0_208 = arith.constant 0 : index
    %202 = vector.load %arg6[%c0_207, %c0_208] : memref<64x1xf32, #tpu.memory_space<vmem>>, vector<64x1xf32>
    %203 = vector.broadcast %202 : vector<64x1xf32> to vector<64x256xf32>
    %204 = arith.addf %201, %203 : vector<64x256xf32>
    %cst_209 = arith.constant 0.000000e+00 : f32
    %205 = vector.broadcast %cst_209 : f32 to vector<64x256xf32>
    %206 = arith.maximumf %204, %205 : vector<64x256xf32>
    %207 = vector.shape_cast %206 : vector<64x256xf32> to vector<1x64x256xf32>
    %c0_210 = arith.constant 0 : index
    %c0_211 = arith.constant 0 : index
    %c0_212 = arith.constant 0 : index
    %208 = vector.load %arg7[%c0_210, %c0_211, %c0_212] : memref<1x64x256xf32, #tpu.memory_space<vmem>>, vector<1x64x256xf32>
    tpu.vector_store %arg7[%c0_210, %c0_211, %c0_212], %207 {strides = array<i32>} : memref<1x64x256xf32, #tpu.memory_space<vmem>>, vector<1x64x256xf32>,
    return
  }
  func.func @transform_0(%arg0: i32) -> (i32, i32, i32, i32) {
    %c0_i32 = arith.constant 0 : i32
    %c0_i32_0 = arith.constant 0 : i32
    %c0_i32_1 = arith.constant 0 : i32
    %c0_i32_2 = arith.constant 0 : i32
    return %arg0, %c0_i32, %c0_i32_0, %c0_i32_1 : i32, i32, i32, i32
  }
  func.func @transform_1(%arg0: i32) -> (i32, i32) {
    %c0_i32 = arith.constant 0 : i32
    %c0_i32_0 = arith.constant 0 : i32
    %c0_i32_1 = arith.constant 0 : i32
    return %c0_i32, %c0_i32_0 : i32, i32
  }
  func.func @transform_2(%arg0: i32) -> (i32, i32, i32) {
    %c0_i32 = arith.constant 0 : i32
    %c0_i32_0 = arith.constant 0 : i32
    %c0_i32_1 = arith.constant 0 : i32
    %c0_i32_2 = arith.constant 0 : i32
    return %c0_i32, %c0_i32_0, %c0_i32_1 : i32, i32, i32
  }
  func.func @transform_3(%arg0: i32) -> (i32, i32) {
    %c0_i32 = arith.constant 0 : i32
    %c0_i32_0 = arith.constant 0 : i32
    %c0_i32_1 = arith.constant 0 : i32
    return %c0_i32, %c0_i32_0 : i32, i32
  }
  func.func @transform_4(%arg0: i32) -> (i32, i32, i32) {
    %c0_i32 = arith.constant 0 : i32
    %c0_i32_0 = arith.constant 0 : i32
    %c0_i32_1 = arith.constant 0 : i32
    %c0_i32_2 = arith.constant 0 : i32
    return %c0_i32, %c0_i32_0, %c0_i32_1 : i32, i32, i32
  }
  func.func @transform_5(%arg0: i32) -> (i32, i32) {
    %c0_i32 = arith.constant 0 : i32
    %c0_i32_0 = arith.constant 0 : i32
    %c0_i32_1 = arith.constant 0 : i32
    return %c0_i32, %c0_i32_0 : i32, i32
  }
  func.func @transform_6(%arg0: i32) -> (i32, i32, i32) {
    %c0_i32 = arith.constant 0 : i32
    %c0_i32_0 = arith.constant 0 : i32
    %c0_i32_1 = arith.constant 0 : i32
    return %arg0, %c0_i32, %c0_i32_0 : i32, i32, i32
  }
}

</mosaic_0001>

<bundles_post_ra>
// kernel: shared_net_forward.1
= control target key start
LH: loop header
LB: loop body
LE: loop exit
PB: predicated region body
PF: predicated region fallthrough
CT: control target
= control target key end

     0   :  { %s10285_s21 = smov 0   ;;  %s14880_s0 = inlined_call_operand.vmem [shape: f32[2,16,16,1], index: 0, kind: input, shape index: {}]   ;;  %s14881_s1 = inlined_call_operand.vmem [shape: f32[9,64], index: 1, kind: input, shape index: {}]   ;;  %s14882_s2 = inlined_call_operand.vmem [shape: f32[2,576,64], index: 2, kind: input, shape index: {}]   ;;  %s14883_s3 = inlined_call_operand.vmem [shape: f32[64,576], index: 3, kind: input, shape index: {}]   ;;  %s14884_s4 = inlined_call_operand.vmem [shape: f32[3,1,64], index: 4, kind: input, shape index: {}]   ;;  %s14885_s5 = inlined_call_operand.vmem [shape: f32[64,1], index: 5, kind: input, shape index: {}]   ;;  %s14886_s6 = inlined_call_operand.vmem [shape: f32[2,64,256], index: 6, kind: output, shape index: {}]  }
   0x1 LB: > { %s9100_s22 = sadd.s32 4294967295, %s10244_s21   ;;  %p9104_p0 = scmp.ge.s32.totalorder %s10244_s21, 1  ;;  %s10244_s21 = sphi %s10285_s21, %s16_s21  }
   0x2   : > { %p212_p1 = scmp.lt.s32.totalorder %s10244_s21, 3 }
   0x4   : > { %p213_p2 = pnand %p9104_p0, %p212_p1 }
   0x6   : > { %216 = sbr.rel (%p213_p2) target bundleno = 2237 (0x8bd), region = 44 }
   0xd   : > { %vm312_vm0 = vcmask 7168   ;;  %p10295_p3 = scmp.lt.s32.totalorder %s9100_s22, 1  ;;  %vm315_vm1 = vcmask 1024   ;;  %v10246_v0 = vmov 0   ;;  %v14887_v1 = vmov 0.0   ;;  %s10249_s19 = smov 64  }
   0xe   : > { %10211 = vset.pattern.permute.xlu0 %v10246_v0  ;;  %313 = vst.msk [vmem:[#allocation4] sm:$0xff] %vm312_vm0, %v14887_v1  ;;  %314 = vst.msk [vmem:[#allocation4 + $0x8] sm:$0xff] %vm312_vm0, %v14887_v1  ;;  %10212 = vset.pattern.permute.xlu1 %v10246_v0  ;;  %vm252_vm2 = vcmask 523264   ;;  %vm279_vm3 = vcmask 519168  }
   0xf   : > { %317 = vst.msk [vmem:[#allocation4 + $0x18] sm:$0xff] %vm312_vm0, %v14887_v1  ;;  %318 = vst.msk [vmem:[#allocation4 + $0x20] sm:$0xff] %vm312_vm0, %v14887_v1  ;;  %s15166_s22 = smov (!%p10295_p3, %s9100_s22), 1 }
  0x10   : > { %320 = vst.msk [vmem:[#allocation4 + $0x30] sm:$0xff] %vm312_vm0, %v14887_v1  ;;  %321 = vst.msk [vmem:[#allocation4 + $0x38] sm:$0xff] %vm312_vm0, %v14887_v1  ;;  %s9301_s24 = sshll.u32 %s15166_s22, 8  ;;  %s9302_s30 = sshll.u32 %s15166_s22, 7 }
  0x11   : > { %323 = vst.msk [vmem:[#allocation4 + $0x48] sm:$0xff] %vm312_vm0, %v14887_v1  ;;  %324 = vst.msk [vmem:[#allocation4 + $0x50] sm:$0xff] %vm312_vm0, %v14887_v1  ;;  %s10417_s27 = scalar_lea.vmem %s14880_s0, %s9301_s24  ;;  %s14859_s8 = scalar_lea.vmem %s14886_s6, %s9302_s30 }
  0x12   : > { %326 = vst.msk [vmem:[#allocation4 + $0x60] sm:$0xff] %vm312_vm0, %v14887_v1  ;;  %327 = vst.msk [vmem:[#allocation4 + $0x68] sm:$0xff] %vm312_vm0, %v14887_v1  ;;  %v368_v2 = vld [vmem:[%s10417_s27] sm:$0xff]  ;;  %v370_v3 = vld [vmem:[%s10417_s27 + $0x10] sm:$0xff] }
  0x13   : > { %329 = vst.msk [vmem:[#allocation4 + $0x78] sm:$0xff] %vm312_vm0, %v14887_v1  ;;  %330 = vst.msk [vmem:[#allocation4 + $0x80] sm:$0xff] %vm312_vm0, %v14887_v1  ;;  %v369_v4 = vld [vmem:[%s10417_s27 + $0x8] sm:$0xff]  ;;  %v372_v5 = vld [vmem:[%s10417_s27 + $0x20] sm:$0xff] }
  0x14   : > { %332 = vst.msk [vmem:[#allocation4 + $0x90] sm:$0xff] %vm312_vm0, %v14887_v1  ;;  %333 = vst.msk [vmem:[#allocation4 + $0x98] sm:$0xff] %vm312_vm0, %v14887_v1  ;;  %v371_v6 = vld [vmem:[%s10417_s27 + $0x18] sm:$0xff]  ;;  %v374_v7 = vld [vmem:[%s10417_s27 + $0x30] sm:$0xff] }
  0x15   : > { %335 = vst.msk [vmem:[#allocation4 + $0xa8] sm:$0xff] %vm312_vm0, %v14887_v1  ;;  %336 = vst.msk [vmem:[#allocation4 + $0xb0] sm:$0xff] %vm312_vm0, %v14887_v1  ;;  %v433_v8 = vld [vmem:[#allocation4] sm:$0xff]  ;;  %v434_v9 = vld [vmem:[#allocation4 + $0x8] sm:$0xff] }
  0x16   : > { %338 = vst.msk [vmem:[#allocation4 + $0xc0] sm:$0xff] %vm312_vm0, %v14887_v1  ;;  %339 = vst.msk [vmem:[#allocation4 + $0xc8] sm:$0xff] %vm312_vm0, %v14887_v1  ;;  %v373_v10 = vld [vmem:[%s10417_s27 + $0x28] sm:$0xff]  ;;  %468 = vperm.xlu0 %10211, %v433_v8   ;;  %v376_v11 = vld [vmem:[%s10417_s27 + $0x40] sm:$0xff] }
  0x17   : > { %341 = vst.msk [vmem:[#allocation4 + $0xd8] sm:$0xff] %vm312_vm0, %v14887_v1  ;;  %342 = vst.msk [vmem:[#allocation4 + $0xe0] sm:$0xff] %vm312_vm0, %v14887_v1  ;;  %v375_v12 = vld [vmem:[%s10417_s27 + $0x38] sm:$0xff]  ;;  %v378_v13 = vld [vmem:[%s10417_s27 + $0x50] sm:$0xff] }
  0x18   : > { %344 = vst.msk [vmem:[#allocation4 + $0xf0] sm:$0xff] %vm312_vm0, %v14887_v1  ;;  %345 = vst.msk [vmem:[#allocation4 + $0xf8] sm:$0xff] %vm312_vm0, %v14887_v1  ;;  %v377_v14 = vld [vmem:[%s10417_s27 + $0x48] sm:$0xff]  ;;  %v380_v15 = vld [vmem:[%s10417_s27 + $0x60] sm:$0xff] }
  0x19   : > { %347 = vst.msk [vmem:[#allocation4 + $0x108] sm:$0xff] %vm312_vm0, %v14887_v1  ;;  %348 = vst.msk [vmem:[#allocation4 + $0x110] sm:$0xff] %vm312_vm0, %v14887_v1  ;;  %v379_v16 = vld [vmem:[%s10417_s27 + $0x58] sm:$0xff]  ;;  %v382_v17 = vld [vmem:[%s10417_s27 + $0x70] sm:$0xff] }
  0x1a   : > { %350 = vst.msk [vmem:[#allocation4 + $0x120] sm:$0xff] %vm312_vm0, %v14887_v1  ;;  %351 = vst.msk [vmem:[#allocation4 + $0x128] sm:$0xff] %vm312_vm0, %v14887_v1  ;;  %v381_v18 = vld [vmem:[%s10417_s27 + $0x68] sm:$0xff]  ;;  %v384_v19 = vld [vmem:[%s10417_s27 + $0x80] sm:$0xff]  ;;  %473 = vperm.xlu0 %10211, %v434_v9  }
  0x1b   : > { %353 = vst.msk [vmem:[#allocation4 + $0x138] sm:$0xff] %vm312_vm0, %v14887_v1  ;;  %354 = vst.msk [vmem:[#allocation4 + $0x140] sm:$0xff] %vm312_vm0, %v14887_v1  ;;  %v383_v20 = vld [vmem:[%s10417_s27 + $0x78] sm:$0xff]  ;;  %v386_v21 = vld [vmem:[%s10417_s27 + $0x90] sm:$0xff] }
  0x1c   : > { %356 = vst.msk [vmem:[#allocation4 + $0x150] sm:$0xff] %vm312_vm0, %v14887_v1  ;;  %357 = vst.msk [vmem:[#allocation4 + $0x158] sm:$0xff] %vm312_vm0, %v14887_v1  ;;  %v385_v22 = vld [vmem:[%s10417_s27 + $0x88] sm:$0xff]  ;;  %v388_v23 = vld [vmem:[%s10417_s27 + $0xa0] sm:$0xff] }
  0x1d   : > { %359 = vst.msk [vmem:[#allocation4 + $0x168] sm:$0xff] %vm312_vm0, %v14887_v1  ;;  %360 = vst.msk [vmem:[#allocation4 + $0x170] sm:$0xff] %vm312_vm0, %v14887_v1  ;;  %v387_v24 = vld [vmem:[%s10417_s27 + $0x98] sm:$0xff]  ;;  %v390_v25 = vld [vmem:[%s10417_s27 + $0xb0] sm:$0xff] }
  0x1e   : > { %362 = vst.msk [vmem:[#allocation4 + $0x180] sm:$0xff] %vm312_vm0, %v14887_v1  ;;  %363 = vst.msk [vmem:[#allocation4 + $0x188] sm:$0xff] %vm312_vm0, %v14887_v1  ;;  %v389_v29 = vld [vmem:[%s10417_s27 + $0xa8] sm:$0xff]  ;;  %v392_v30 = vld [vmem:[%s10417_s27 + $0xc0] sm:$0xff] }
  0x1f   : > { %365 = vst.msk [vmem:[#allocation4 + $0x198] sm:$0xff] %vm312_vm0, %v14887_v1  ;;  %366 = vst.msk [vmem:[#allocation4 + $0x1a0] sm:$0xff] %vm312_vm0, %v14887_v1  ;;  %v391_v34 = vld [vmem:[%s10417_s27 + $0xb8] sm:$0xff]  ;;  %v394_v35 = vld [vmem:[%s10417_s27 + $0xd0] sm:$0xff] }
  0x20   : > { %319 = vst.msk [vmem:[#allocation4 + $0x28] sm:$0x3] %vm315_vm1, %v14887_v1  ;;  %316 = vst.msk [vmem:[#allocation4 + $0x10] sm:$0x3] %vm315_vm1, %v14887_v1  ;;  %v393_v36 = vld [vmem:[%s10417_s27 + $0xc8] sm:$0xff]  ;;  %v396_v37 = vld [vmem:[%s10417_s27 + $0xe0] sm:$0xff] }
  0x21   : > { %322 = vst.msk [vmem:[#allocation4 + $0x40] sm:$0x3] %vm315_vm1, %v14887_v1  ;;  %325 = vst.msk [vmem:[#allocation4 + $0x58] sm:$0x3] %vm315_vm1, %v14887_v1  ;;  %v395_v38 = vld [vmem:[%s10417_s27 + $0xd8] sm:$0xff]  ;;  %v397_v40 = vld [vmem:[%s10417_s27 + $0xe8] sm:$0xff] }
  0x22   : > { %328 = vst.msk [vmem:[#allocation4 + $0x70] sm:$0x3] %vm315_vm1, %v14887_v1  ;;  %331 = vst.msk [vmem:[#allocation4 + $0x88] sm:$0x3] %vm315_vm1, %v14887_v1  ;;  %v694_v63 = vld [vmem:[#allocation4 + $0x1] sm:$0xff] }
  0x23   : > { %334 = vst.msk [vmem:[#allocation4 + $0xa0] sm:$0x3] %vm315_vm1, %v14887_v1  ;;  %337 = vst.msk [vmem:[#allocation4 + $0xb8] sm:$0x3] %vm315_vm1, %v14887_v1 }
  0x24   : > { %340 = vst.msk [vmem:[#allocation4 + $0xd0] sm:$0x3] %vm315_vm1, %v14887_v1  ;;  %343 = vst.msk [vmem:[#allocation4 + $0xe8] sm:$0x3] %vm315_vm1, %v14887_v1 }
  0x25   : > { %346 = vst.msk [vmem:[#allocation4 + $0x100] sm:$0x3] %vm315_vm1, %v14887_v1  ;;  %349 = vst.msk [vmem:[#allocation4 + $0x118] sm:$0x3] %vm315_vm1, %v14887_v1 }
  0x26   : > { %352 = vst.msk [vmem:[#allocation4 + $0x130] sm:$0x3] %vm315_vm1, %v14887_v1  ;;  %355 = vst.msk [vmem:[#allocation4 + $0x148] sm:$0x3] %vm315_vm1, %v14887_v1 }
  0x27   : > { %358 = vst.msk [vmem:[#allocation4 + $0x160] sm:$0x3] %vm315_vm1, %v14887_v1  ;;  %361 = vst.msk [vmem:[#allocation4 + $0x178] sm:$0x3] %vm315_vm1, %v14887_v1 }
  0x28   : > { %364 = vst.msk [vmem:[#allocation4 + $0x190] sm:$0x3] %vm315_vm1, %v14887_v1  ;;  %367 = vst.msk [vmem:[#allocation4 + $0x1a8] sm:$0x3] %vm315_vm1, %v14887_v1 }
  0x29   : > { %401 = vst.msk [vmem:[#allocation4 + $0x19] sm:$0xff] %vm312_vm0, %v368_v2  ;;  %403 = vst.msk [vmem:[#allocation4 + $0x31] sm:$0xff] %vm312_vm0, %v370_v3  ;;  %v695_v3 = vld [vmem:[#allocation4 + $0x9] sm:$0xff] }
  0x2a   : > { %402 = vst.msk [vmem:[#allocation4 + $0x21] sm:$0xff] %vm312_vm0, %v369_v4  ;;  %405 = vst.msk [vmem:[#allocation4 + $0x49] sm:$0xff] %vm312_vm0, %v372_v5 }
  0x2b   : > { %404 = vst.msk [vmem:[#allocation4 + $0x39] sm:$0xff] %vm312_vm0, %v371_v6  ;;  %407 = vst.msk [vmem:[#allocation4 + $0x61] sm:$0xff] %vm312_vm0, %v374_v7 }
  0x2c   : > { %406 = vst.msk [vmem:[#allocation4 + $0x51] sm:$0xff] %vm312_vm0, %v373_v10  ;;  %409 = vst.msk [vmem:[#allocation4 + $0x79] sm:$0xff] %vm312_vm0, %v376_v11 }
  0x2d   : > { %408 = vst.msk [vmem:[#allocation4 + $0x69] sm:$0xff] %vm312_vm0, %v375_v12  ;;  %411 = vst.msk [vmem:[#allocation4 + $0x91] sm:$0xff] %vm312_vm0, %v378_v13 }
  0x2e   : > { %410 = vst.msk [vmem:[#allocation4 + $0x81] sm:$0xff] %vm312_vm0, %v377_v14  ;;  %413 = vst.msk [vmem:[#allocation4 + $0xa9] sm:$0xff] %vm312_vm0, %v380_v15 }
  0x2f   : > { %412 = vst.msk [vmem:[#allocation4 + $0x99] sm:$0xff] %vm312_vm0, %v379_v16  ;;  %415 = vst.msk [vmem:[#allocation4 + $0xc1] sm:$0xff] %vm312_vm0, %v382_v17 }
  0x30   : > { %414 = vst.msk [vmem:[#allocation4 + $0xb1] sm:$0xff] %vm312_vm0, %v381_v18  ;;  %417 = vst.msk [vmem:[#allocation4 + $0xd9] sm:$0xff] %vm312_vm0, %v384_v19  ;;  %v10460_v26 = vld [vmem:[#allocation4 + $0x18] sm:$0xff]  ;;  %v10462_v27 = vld [vmem:[#allocation4 + $0x30] sm:$0xff] }
  0x31   : > { %416 = vst.msk [vmem:[#allocation4 + $0xc9] sm:$0xff] %vm312_vm0, %v383_v20  ;;  %419 = vst.msk [vmem:[#allocation4 + $0xf1] sm:$0xff] %vm312_vm0, %v386_v21  ;;  %478 = vperm.xlu1 %10212, %v10460_v26   ;;  %v10468_v28 = vld [vmem:[#allocation4 + $0x20] sm:$0xff]  ;;  %488 = vperm.xlu0 %10211, %v10462_v27   ;;  %v10475_v31 = vld [vmem:[#allocation4 + $0x48] sm:$0xff] }
  0x32   : > { %418 = vst.msk [vmem:[#allocation4 + $0xe1] sm:$0xff] %vm312_vm0, %v385_v22  ;;  %421 = vst.msk [vmem:[#allocation4 + $0x109] sm:$0xff] %vm312_vm0, %v388_v23  ;;  %v10478_v32 = vld [vmem:[#allocation4 + $0x38] sm:$0xff]  ;;  %v10481_v33 = vld [vmem:[#allocation4 + $0x60] sm:$0xff] }
  0x33   : > { %420 = vst.msk [vmem:[#allocation4 + $0xf9] sm:$0xff] %vm312_vm0, %v387_v24  ;;  %423 = vst.msk [vmem:[#allocation4 + $0x121] sm:$0xff] %vm312_vm0, %v390_v25  ;;  %v10492_v39 = vld [vmem:[#allocation4 + $0x50] sm:$0xff]  ;;  %v10499_v41 = vld [vmem:[#allocation4 + $0x78] sm:$0xff] }
  0x34   : > { %422 = vst.msk [vmem:[#allocation4 + $0x111] sm:$0xff] %vm312_vm0, %v389_v29  ;;  %425 = vst.msk [vmem:[#allocation4 + $0x139] sm:$0xff] %vm312_vm0, %v392_v30  ;;  %v10502_v42 = vld [vmem:[#allocation4 + $0x68] sm:$0xff]  ;;  %v10505_v43 = vld [vmem:[#allocation4 + $0x90] sm:$0xff] }
  0x35   : > { %483 = vperm.xlu1 %10212, %v10468_v28   ;;  %498 = vperm.xlu0 %10211, %v10475_v31   ;;  %424 = vst.msk [vmem:[#allocation4 + $0x129] sm:$0xff] %vm312_vm0, %v391_v34  ;;  %427 = vst.msk [vmem:[#allocation4 + $0x151] sm:$0xff] %vm312_vm0, %v394_v35  ;;  %v10508_v44 = vld [vmem:[#allocation4 + $0x80] sm:$0xff]  ;;  %v10511_v45 = vld [vmem:[#allocation4 + $0xa8] sm:$0xff] }
  0x36   : > { %426 = vst.msk [vmem:[#allocation4 + $0x141] sm:$0xff] %vm312_vm0, %v393_v36  ;;  %429 = vst.msk [vmem:[#allocation4 + $0x169] sm:$0xff] %vm312_vm0, %v396_v37  ;;  %v10514_v46 = vld [vmem:[#allocation4 + $0x98] sm:$0xff]  ;;  %v10517_v47 = vld [vmem:[#allocation4 + $0xc0] sm:$0xff] }
  0x37   : > { %428 = vst.msk [vmem:[#allocation4 + $0x159] sm:$0xff] %vm312_vm0, %v395_v38  ;;  %430 = vst.msk [vmem:[#allocation4 + $0x171] sm:$0xff] %vm312_vm0, %v397_v40  ;;  %v10520_v48 = vld [vmem:[#allocation4 + $0xb0] sm:$0xff]  ;;  %v10523_v49 = vld [vmem:[#allocation4 + $0xd8] sm:$0xff] }
  0x38   : > { %v10526_v50 = vld [vmem:[#allocation4 + $0xc8] sm:$0xff]  ;;  %v10529_v51 = vld [vmem:[#allocation4 + $0xf0] sm:$0xff]  ;;  %v10551_v2 = vld [vmem:[#allocation4 + $0x19] sm:$0xff] }
  0x39   : > { %493 = vperm.xlu1 %10212, %v10478_v32   ;;  %508 = vperm.xlu0 %10211, %v10481_v33   ;;  %v10532_v52 = vld [vmem:[#allocation4 + $0xe0] sm:$0xff]  ;;  %v10535_v53 = vld [vmem:[#allocation4 + $0x108] sm:$0xff]  ;;  %v10554_v4 = vld [vmem:[#allocation4 + $0x31] sm:$0xff] }
  0x3a   : > { %v10538_v54 = vld [vmem:[#allocation4 + $0xf8] sm:$0xff]  ;;  %v10541_v55 = vld [vmem:[#allocation4 + $0x120] sm:$0xff]  ;;  %v10559_v6 = vld [vmem:[#allocation4 + $0x49] sm:$0xff] }
  0x3b   : > { %v10544_v56 = vld [vmem:[#allocation4 + $0x110] sm:$0xff]  ;;  %v459_v57 = vld [vmem:[#allocation4 + $0x138] sm:$0xff]  ;;  %v10556_v5 = vld [vmem:[#allocation4 + $0x21] sm:$0xff] }
  0x3c   : > { %v10548_v58 = vld [vmem:[#allocation4 + $0x128] sm:$0xff]  ;;  %v461_v59 = vld [vmem:[#allocation4 + $0x150] sm:$0xff]  ;;  %v10562_v7 = vld [vmem:[#allocation4 + $0x39] sm:$0xff] }
  0x3d   : > { %503 = vperm.xlu1 %10212, %v10492_v39   ;;  %518 = vperm.xlu0 %10211, %v10499_v41   ;;  %v460_v60 = vld [vmem:[#allocation4 + $0x140] sm:$0xff]  ;;  %v463_v61 = vld [vmem:[#allocation4 + $0x168] sm:$0xff]  ;;  %v10568_v9 = vld [vmem:[#allocation4 + $0x51] sm:$0xff] }
  0x3e   : > { %v462_v62 = vld [vmem:[#allocation4 + $0x158] sm:$0xff]  ;;  %v464_v0 = vld [vmem:[#allocation4 + $0x170] sm:$0xff]  ;;  %v10565_v8 = vld [vmem:[#allocation4 + $0x61] sm:$0xff] }
  0x3f   : > { %v10571_v10 = vld [vmem:[#allocation4 + $0x79] sm:$0xff]  ;;  %v10574_v11 = vld [vmem:[#allocation4 + $0x69] sm:$0xff]  ;;  %v706_v12 = vld [vmem:[#allocation4 + $0x91] sm:$0xff] }
  0x40   : > { %v10578_v13 = vld [vmem:[#allocation4 + $0x81] sm:$0xff]  ;;  %v708_v14 = vld [vmem:[#allocation4 + $0xa9] sm:$0xff]  ;;  %v707_v15 = vld [vmem:[#allocation4 + $0x99] sm:$0xff] }
  0x41   : > { %513 = vperm.xlu1 %10212, %v10502_v42   ;;  %528 = vperm.xlu0 %10211, %v10505_v43   ;;  %v710_v16 = vld [vmem:[#allocation4 + $0xc1] sm:$0xff]  ;;  %v709_v17 = vld [vmem:[#allocation4 + $0xb1] sm:$0xff]  ;;  %v712_v18 = vld [vmem:[#allocation4 + $0xd9] sm:$0xff] }
  0x42   : > { %v711_v19 = vld [vmem:[#allocation4 + $0xc9] sm:$0xff]  ;;  %v714_v20 = vld [vmem:[#allocation4 + $0xf1] sm:$0xff]  ;;  %v713_v21 = vld [vmem:[#allocation4 + $0xe1] sm:$0xff] }
  0x43   : > { %v716_v22 = vld [vmem:[#allocation4 + $0x109] sm:$0xff]  ;;  %v715_v23 = vld [vmem:[#allocation4 + $0xf9] sm:$0xff]  ;;  %v718_v24 = vld [vmem:[#allocation4 + $0x121] sm:$0xff] }
  0x44   : > { %v717_v25 = vld [vmem:[#allocation4 + $0x111] sm:$0xff]  ;;  %v720_v29 = vld [vmem:[#allocation4 + $0x139] sm:$0xff]  ;;  %v719_v30 = vld [vmem:[#allocation4 + $0x129] sm:$0xff] }
  0x45   : > { %523 = vperm.xlu1 %10212, %v10508_v44   ;;  %538 = vperm.xlu0 %10211, %v10511_v45   ;;  %v722_v34 = vld [vmem:[#allocation4 + $0x151] sm:$0xff]  ;;  %v721_v35 = vld [vmem:[#allocation4 + $0x141] sm:$0xff]  ;;  %v724_v36 = vld [vmem:[#allocation4 + $0x169] sm:$0xff] }
  0x46   : > { %v723_v37 = vld [vmem:[#allocation4 + $0x159] sm:$0xff]  ;;  %v955_v38 = vld [vmem:[#allocation4 + $0x2] sm:$0xff]  ;;  %vm14631_vm4 = vmpackc.low %vm252_vm2, %vm252_vm2 }
  0x49   : > { %533 = vperm.xlu1 %10212, %v10514_v46   ;;  %548 = vperm.xlu0 %10211, %v10517_v47  }
  0x4d   : > { %543 = vperm.xlu1 %10212, %v10520_v48   ;;  %558 = vperm.xlu0 %10211, %v10523_v49  }
  0x51   : > { %553 = vperm.xlu1 %10212, %v10526_v50   ;;  %568 = vperm.xlu0 %10211, %v10529_v51  }
  0x55   : > { %563 = vperm.xlu1 %10212, %v10532_v52   ;;  %578 = vperm.xlu0 %10211, %v10535_v53  }
  0x59   : > { %573 = vperm.xlu1 %10212, %v10538_v54   ;;  %588 = vperm.xlu0 %10211, %v10541_v55  }
  0x5d   : > { %583 = vperm.xlu1 %10212, %v10544_v56   ;;  %598 = vperm.xlu0 %10211, %v459_v57   ;;  %v725_v57 = vld [vmem:[#allocation4 + $0x171] sm:$0xff] }
  0x61   : > { %593 = vperm.xlu1 %10212, %v10548_v58   ;;  %608 = vperm.xlu0 %10211, %v461_v59   ;;  %v10583_v59 = vld [vmem:[#allocation4 + $0x1a] sm:$0xff] }
  0x65   : > { %603 = vperm.xlu1 %10212, %v460_v60   ;;  %618 = vperm.xlu0 %10211, %v463_v61   ;;  %v956_v61 = vld [vmem:[#allocation4 + $0xa] sm:$0xff] }
  0x69   : > { %613 = vperm.xlu1 %10212, %v462_v62   ;;  %729 = vperm.xlu0 %10211, %v694_v63   ;;  %v10590_v63 = vld [vmem:[#allocation4 + $0x32] sm:$0xff] }
  0x6d   : > { %623 = vperm.xlu1 %10212, %v464_v0   ;;  %739 = vperm.xlu0 %10211, %v10551_v2  }
  0x71   : > { %734 = vperm.xlu1 %10212, %v695_v3   ;;  %749 = vperm.xlu0 %10211, %v10554_v4   ;;  %v10594_v3 = vld [vmem:[#allocation4 + $0x22] sm:$0xff] }
  0x75   : > { %744 = vperm.xlu1 %10212, %v10556_v5   ;;  %759 = vperm.xlu0 %10211, %v10559_v6  }
  0x79   : > { %754 = vperm.xlu1 %10212, %v10562_v7   ;;  %769 = vperm.xlu0 %10211, %v10565_v8  }
  0x7d   : > { %764 = vperm.xlu1 %10212, %v10568_v9   ;;  %779 = vperm.xlu0 %10211, %v10571_v10  }
  0x81   : > { %774 = vperm.xlu1 %10212, %v10574_v11   ;;  %789 = vperm.xlu0 %10211, %v706_v12  }
  0x85   : > { %784 = vperm.xlu1 %10212, %v10578_v13   ;;  %799 = vperm.xlu0 %10211, %v708_v14   ;;  %v10599_v14 = vld [vmem:[#allocation4 + $0x4a] sm:$0xff] }
  0x89   : > { %794 = vperm.xlu1 %10212, %v707_v15   ;;  %809 = vperm.xlu0 %10211, %v710_v16   ;;  %v10604_v16 = vld [vmem:[#allocation4 + $0x3a] sm:$0xff] }
  0x8d   : > { %804 = vperm.xlu1 %10212, %v709_v17   ;;  %819 = vperm.xlu0 %10211, %v712_v18   ;;  %v10609_v18 = vld [vmem:[#allocation4 + $0x62] sm:$0xff] }
  0x91   : > { %814 = vperm.xlu1 %10212, %v711_v19   ;;  %829 = vperm.xlu0 %10211, %v714_v20   ;;  %v10614_v20 = vld [vmem:[#allocation4 + $0x52] sm:$0xff] }
  0x95   : > { %824 = vperm.xlu1 %10212, %v713_v21   ;;  %839 = vperm.xlu0 %10211, %v716_v22   ;;  %v10581_v40 = vpop.permute.xlu0 %468  ;;  %v10619_v22 = vld [vmem:[#allocation4 + $0x7a] sm:$0xff] }
  0x99   : > { %834 = vperm.xlu1 %10212, %v715_v23   ;;  %849 = vperm.xlu0 %10211, %v718_v24   ;;  %v10585_v60 = vpop.permute.xlu0 %473  ;;  %v10624_v24 = vld [vmem:[#allocation4 + $0x6a] sm:$0xff] }
  0x9d   : > { %844 = vperm.xlu1 %10212, %v717_v25   ;;  %859 = vperm.xlu0 %10211, %v720_v29   ;;  %v10629_v29 = vld [vmem:[#allocation4 + $0x92] sm:$0xff] }
  0xa1   : > { %854 = vperm.xlu1 %10212, %v719_v30   ;;  %869 = vperm.xlu0 %10211, %v722_v34   ;;  %v10634_v34 = vld [vmem:[#allocation4 + $0x82] sm:$0xff] }
  0xa5   : > { %864 = vperm.xlu1 %10212, %v721_v35   ;;  %879 = vperm.xlu0 %10211, %v724_v36   ;;  %v10639_v36 = vld [vmem:[#allocation4 + $0xaa] sm:$0xff] }
  0xa9   : > { %874 = vperm.xlu1 %10212, %v723_v37   ;;  %990 = vperm.xlu0 %10211, %v955_v38   ;;  %v10644_v38 = vld [vmem:[#allocation4 + $0x9a] sm:$0xff] }
  0xad   : > { %884 = vperm.xlu1 %10212, %v725_v57   ;;  %1000 = vperm.xlu0 %10211, %v10583_v59  }
  0xb0   : > { %v10588_v62 = vpop.permute.xlu1 %478  ;;  %v10592_v0 = vpop.permute.xlu0 %488 }
  0xb1   : > { %995 = vperm.xlu1 %10212, %v956_v61   ;;  %14919 = vst [vmem:[#allocation5_spill] sm:$0xff] %v10592_v0  ;;  %1010 = vperm.xlu0 %10211, %v10590_v63   ;;  %v971_v61 = vld [vmem:[#allocation4 + $0xc2] sm:$0xff] }
  0xb4   : > { %v10597_v12 = vpop.permute.xlu1 %483  ;;  %v10602_v15 = vpop.permute.xlu0 %498 }
  0xb5   : > { %1005 = vperm.xlu1 %10212, %v10594_v3   ;;  %14920 = vst [vmem:[#allocation6_spill] sm:$0xff] %v10602_v15  ;;  %1020 = vperm.xlu0 %10211, %v10599_v14   ;;  %v974_v15 = vld [vmem:[#allocation4 + $0xe2] sm:$0xff] }
  0xb8   : > { %v10607_v17 = vpop.permute.xlu1 %493  ;;  %v10612_v19 = vpop.permute.xlu0 %508 }
  0xb9   : > { %14921 = vst [vmem:[#allocation7_spill] sm:$0xff] %v10607_v17  ;;  %1015 = vperm.xlu1 %10212, %v10604_v16   ;;  %14922 = vst [vmem:[#allocation8_spill] sm:$0xff] %v10612_v19  ;;  %1030 = vperm.xlu0 %10211, %v10609_v18   ;;  %v976_v17 = vld [vmem:[#allocation4 + $0xfa] sm:$0xff] }
  0xbc   : > { %v10617_v21 = vpop.permute.xlu1 %503  ;;  %v10622_v23 = vpop.permute.xlu0 %518 }
  0xbd   : > { %14923 = vst [vmem:[#allocation9_spill] sm:$0xff] %v10617_v21  ;;  %1025 = vperm.xlu1 %10212, %v10614_v20   ;;  %14924 = vst [vmem:[#allocation10_spill] sm:$0xff] %v10622_v23  ;;  %1040 = vperm.xlu0 %10211, %v10619_v22   ;;  %v973_v23 = vld [vmem:[#allocation4 + $0xda] sm:$0xff] }
  0xc0   : > { %v10627_v25 = vpop.permute.xlu1 %513  ;;  %v10632_v30 = vpop.permute.xlu0 %528 }
  0xc1   : > { %14925 = vst [vmem:[#allocation11_spill] sm:$0xff] %v10627_v25  ;;  %1035 = vperm.xlu1 %10212, %v10624_v24   ;;  %14926 = vst [vmem:[#allocation12_spill] sm:$0xff] %v10632_v30  ;;  %1050 = vperm.xlu0 %10211, %v10629_v29   ;;  %v10652_v30 = vld [vmem:[#allocation4 + $0xb2] sm:$0xff]  ;;  %v972_v25 = vld [vmem:[#allocation4 + $0xca] sm:$0xff] }
  0xc4   : > { %v10637_v35 = vpop.permute.xlu1 %523  ;;  %v10642_v37 = vpop.permute.xlu0 %538 }
  0xc5   : > { %14927 = vst [vmem:[#allocation13_spill] sm:$0xff] %v10637_v35  ;;  %1045 = vperm.xlu1 %10212, %v10634_v34   ;;  %14928 = vst [vmem:[#allocation14_spill] sm:$0xff] %v10642_v37  ;;  %1060 = vperm.xlu0 %10211, %v10639_v36  }
  0xc8   : > { %v10647_v57 = vpop.permute.xlu1 %533  ;;  %v10650_v1 = vpop.permute.xlu0 %548 }
  0xc9   : > { %14929 = vst [vmem:[#allocation15_spill] sm:$0xff] %v10647_v57  ;;  %1055 = vperm.xlu1 %10212, %v10644_v38   ;;  %14930 = vst [vmem:[#allocation16_spill] sm:$0xff] %v10650_v1  ;;  %1070 = vperm.xlu0 %10211, %v971_v61   ;;  %v975_v57 = vld [vmem:[#allocation4 + $0xf2] sm:$0xff]  ;;  %v977_v61 = vld [vmem:[#allocation4 + $0x10a] sm:$0xff] }
  0xcc   : > { %v10654_v35 = vpop.permute.xlu1 %543  ;;  %v10657_v37 = vpop.permute.xlu0 %558 }
  0xcd   : > { %14931 = vst [vmem:[#allocation17_spill] sm:$0xff] %v10654_v35  ;;  %1065 = vperm.xlu1 %10212, %v10652_v30   ;;  %14932 = vst [vmem:[#allocation18_spill] sm:$0xff] %v10657_v37  ;;  %1080 = vperm.xlu0 %10211, %v973_v23   ;;  %v979_v37 = vld [vmem:[#allocation4 + $0x122] sm:$0xff] }
  0xd0   : > { %v10659_v19 = vpop.permute.xlu1 %553  ;;  %v10661_v21 = vpop.permute.xlu0 %568 }
  0xd1   : > { %14933 = vst [vmem:[#allocation19_spill] sm:$0xff] %v10659_v19  ;;  %1075 = vperm.xlu1 %10212, %v972_v25   ;;  %14934 = vst [vmem:[#allocation20_spill] sm:$0xff] %v10661_v21  ;;  %1090 = vperm.xlu0 %10211, %v975_v57   ;;  %v978_v19 = vld [vmem:[#allocation4 + $0x112] sm:$0xff]  ;;  %v981_v21 = vld [vmem:[#allocation4 + $0x13a] sm:$0xff] }
  0xd4   : > { %v10663_v1 = vpop.permute.xlu1 %563  ;;  %v10665_v35 = vpop.permute.xlu0 %578 }
  0xd5   : > { %14935 = vst [vmem:[#allocation21_spill] sm:$0xff] %v10663_v1  ;;  %1085 = vperm.xlu1 %10212, %v974_v15   ;;  %14936 = vst [vmem:[#allocation22_spill] sm:$0xff] %v10665_v35  ;;  %1100 = vperm.xlu0 %10211, %v977_v61   ;;  %v980_v1 = vld [vmem:[#allocation4 + $0x12a] sm:$0xff]  ;;  %v983_v35 = vld [vmem:[#allocation4 + $0x152] sm:$0xff] }
  0xd8   : > { %v10667_v0 = vpop.permute.xlu1 %573  ;;  %v10669_v23 = vpop.permute.xlu0 %588 }
  0xd9   : > { %14937 = vst [vmem:[#allocation23_spill] sm:$0xff] %v10667_v0  ;;  %1095 = vperm.xlu1 %10212, %v976_v17   ;;  %14938 = vst [vmem:[#allocation24_spill] sm:$0xff] %v10669_v23  ;;  %1110 = vperm.xlu0 %10211, %v979_v37   ;;  %v982_v0 = vld [vmem:[#allocation4 + $0x142] sm:$0xff]  ;;  %v985_v23 = vld [vmem:[#allocation4 + $0x16a] sm:$0xff] }
  0xdc   : > { %v10671_v25 = vpop.permute.xlu1 %583  ;;  %v10673_v57 = vpop.permute.xlu0 %598 }
  0xdd   : > { %14939 = vst [vmem:[#allocation25_spill] sm:$0xff] %v10671_v25  ;;  %1105 = vperm.xlu1 %10212, %v978_v19   ;;  %14940 = vst [vmem:[#allocation26_spill] sm:$0xff] %v10673_v57  ;;  %1120 = vperm.xlu0 %10211, %v981_v21   ;;  %v984_v25 = vld [vmem:[#allocation4 + $0x15a] sm:$0xff]  ;;  %v986_v57 = vld [vmem:[#allocation4 + $0x172] sm:$0xff] }
  0xe0   : > { %v10675_v15 = vpop.permute.xlu1 %593  ;;  %v10677_v61 = vpop.permute.xlu0 %608 }
  0xe1   : > { %14941 = vst [vmem:[#allocation27_spill] sm:$0xff] %v10675_v15  ;;  %1115 = vperm.xlu1 %10212, %v980_v1   ;;  %14942 = vst [vmem:[#allocation28_spill] sm:$0xff] %v10677_v61  ;;  %1130 = vperm.xlu0 %10211, %v983_v35  }
  0xe4   : > { %v10679_v17 = vpop.permute.xlu1 %603  ;;  %v10681_v37 = vpop.permute.xlu0 %618 }
  0xe5   : > { %14943 = vst [vmem:[#allocation29_spill] sm:$0xff] %v10679_v17  ;;  %1125 = vperm.xlu1 %10212, %v982_v0   ;;  %14944 = vst [vmem:[#allocation30_spill] sm:$0xff] %v10681_v37  ;;  %1140 = vperm.xlu0 %10211, %v985_v23   ;;  %v2004_v17 = vld [vmem:[#allocation4 + $0x60] sm:$0xff] }
  0xe8   : > { %v10683_v19 = vpop.permute.xlu1 %613  ;;  %v10685_v21 = vpop.permute.xlu0 %729 }
  0xe9   : > { %14945 = vst [vmem:[#allocation31_spill] sm:$0xff] %v10683_v19  ;;  %1135 = vperm.xlu1 %10212, %v984_v25   ;;  %1251 = vperm.xlu0 %10211, %v10460_v26  }
  0xec   : > { %v10688_v1 = vpop.permute.xlu1 %623  ;;  %v10690_v35 = vpop.permute.xlu0 %739 }
  0xed   : > { %14946 = vst [vmem:[#allocation32_spill] sm:$0xff] %v10688_v1  ;;  %1145 = vperm.xlu1 %10212, %v986_v57   ;;  %1261 = vperm.xlu0 %10211, %v10462_v27  }
  0xf0   : > { %v10693_v0 = vpop.permute.xlu1 %734  ;;  %v10696_v23 = vpop.permute.xlu0 %749 }
  0xf1   : > { %1256 = vperm.xlu1 %10212, %v10468_v28   ;;  %1271 = vperm.xlu0 %10211, %v10475_v31  }
  0xf4   : > { %v10699_v25 = vpop.permute.xlu1 %744  ;;  %v10702_v26 = vpop.permute.xlu0 %759 }
  0xf5   : > { %1266 = vperm.xlu1 %10212, %v10478_v32   ;;  %1281 = vperm.xlu0 %10211, %v10481_v33  }
  0xf8   : > { %v10705_v57 = vpop.permute.xlu1 %754  ;;  %v10708_v1 = vpop.permute.xlu0 %769 }
  0xf9   : > { %1276 = vperm.xlu1 %10212, %v10492_v39   ;;  %1291 = vperm.xlu0 %10211, %v10499_v41  }
  0xfc   : > { %v10711_v28 = vpop.permute.xlu1 %764  ;;  %v10714_v37 = vpop.permute.xlu0 %779 }
  0xfd   : > { %1286 = vperm.xlu1 %10212, %v10502_v42   ;;  %1301 = vperm.xlu0 %10211, %v10505_v43  }
 0x100   : > { %v10717_v19 = vpop.permute.xlu1 %774  ;;  %v10720_v33 = vpop.permute.xlu0 %789 }
 0x101   : > { %1296 = vperm.xlu1 %10212, %v10508_v44   ;;  %14947 = vst [vmem:[#allocation33_spill] sm:$0xff] %v10720_v33  ;;  %1311 = vperm.xlu0 %10211, %v10511_v45  }
 0x104   : > { %v10723_v61 = vpop.permute.xlu1 %784  ;;  %v10726_v41 = vpop.permute.xlu0 %799 }
 0x105   : > { %1306 = vperm.xlu1 %10212, %v10514_v46   ;;  %14948 = vst [vmem:[#allocation34_spill] sm:$0xff] %v10726_v41  ;;  %1321 = vperm.xlu0 %10211, %v10517_v47  }
 0x108   : > { %v10729_v42 = vpop.permute.xlu1 %794  ;;  %v10732_v43 = vpop.permute.xlu0 %809 }
 0x109   : > { %14949 = vst [vmem:[#allocation35_spill] sm:$0xff] %v10729_v42  ;;  %1316 = vperm.xlu1 %10212, %v10520_v48   ;;  %14950 = vst [vmem:[#allocation36_spill] sm:$0xff] %v10732_v43  ;;  %1331 = vperm.xlu0 %10211, %v10523_v49  }
 0x10c   : > { %v10735_v44 = vpop.permute.xlu1 %804  ;;  %v10738_v45 = vpop.permute.xlu0 %819 }
 0x10d   : > { %14951 = vst [vmem:[#allocation37_spill] sm:$0xff] %v10735_v44  ;;  %1326 = vperm.xlu1 %10212, %v10526_v50   ;;  %14952 = vst [vmem:[#allocation38_spill] sm:$0xff] %v10738_v45  ;;  %1341 = vperm.xlu0 %10211, %v10529_v51  }
 0x110   : > { %v10741_v46 = vpop.permute.xlu1 %814  ;;  %v10744_v47 = vpop.permute.xlu0 %829 }
 0x111   : > { %14953 = vst [vmem:[#allocation39_spill] sm:$0xff] %v10741_v46  ;;  %1336 = vperm.xlu1 %10212, %v10532_v52   ;;  %14954 = vst [vmem:[#allocation40_spill] sm:$0xff] %v10744_v47  ;;  %1351 = vperm.xlu0 %10211, %v10535_v53   ;;  %v2270_v47 = vld [vmem:[#allocation4 + $0x99] sm:$0xff] }
 0x114   : > { %v10747_v48 = vpop.permute.xlu1 %824  ;;  %v10750_v49 = vpop.permute.xlu0 %839 }
 0x115   : > { %14955 = vst [vmem:[#allocation41_spill] sm:$0xff] %v10747_v48  ;;  %1346 = vperm.xlu1 %10212, %v10538_v54   ;;  %14956 = vst [vmem:[#allocation42_spill] sm:$0xff] %v10750_v49  ;;  %1361 = vperm.xlu0 %10211, %v10541_v55  }
 0x118   : > { %v10753_v50 = vpop.permute.xlu1 %834  ;;  %v10756_v51 = vpop.permute.xlu0 %849 }
 0x119   : > { %14957 = vst [vmem:[#allocation43_spill] sm:$0xff] %v10753_v50  ;;  %1356 = vperm.xlu1 %10212, %v10544_v56   ;;  %14958 = vst [vmem:[#allocation44_spill] sm:$0xff] %v10756_v51  ;;  %1512 = vperm.xlu0 %10211, %v10551_v2  }
 0x11c   : > { %v10759_v52 = vpop.permute.xlu1 %844  ;;  %v10762_v53 = vpop.permute.xlu0 %859 }
 0x11d   : > { %14959 = vst [vmem:[#allocation45_spill] sm:$0xff] %v10759_v52  ;;  %1366 = vperm.xlu1 %10212, %v10548_v58   ;;  %14960 = vst [vmem:[#allocation46_spill] sm:$0xff] %v10762_v53  ;;  %1517 = vperm.xlu0 %10211, %v10556_v5   ;;  %v2006_v52 = vld [vmem:[#allocation4 + $0x78] sm:$0xff] }
 0x120   : > { %v10765_v54 = vpop.permute.xlu1 %854  ;;  %v10768_v55 = vpop.permute.xlu0 %869 }
 0x121   : > { %14961 = vst [vmem:[#allocation47_spill] sm:$0xff] %v10765_v54  ;;  %1773 = vperm.xlu1 %10212, %v10583_v59   ;;  %14962 = vst [vmem:[#allocation48_spill] sm:$0xff] %v10768_v55  ;;  %1778 = vperm.xlu0 %10211, %v10594_v3   ;;  %v14967_v3 = vmov 0.0   ;;  %v2005_v54 = vld [vmem:[#allocation4 + $0x68] sm:$0xff] }
 0x122   : > { %253 = vst.msk [vmem:[#allocation2] sm:$0xff] %vm252_vm2, %v14967_v3  ;;  %254 = vst.msk [vmem:[#allocation2 + $0x8] sm:$0xff] %vm252_vm2, %v14967_v3 }
 0x123   : > { %255 = vst.msk [vmem:[#allocation2 + $0x10] sm:$0xff] %vm252_vm2, %v14967_v3  ;;  %256 = vst.msk [vmem:[#allocation2 + $0x18] sm:$0xff] %vm252_vm2, %v14967_v3 }
 0x124   : > { %v10771_v56 = vpop.permute.xlu1 %864  ;;  %v10774_v2 = vpop.permute.xlu0 %879  ;;  %257 = vst.msk [vmem:[#allocation2 + $0x20] sm:$0xff] %vm252_vm2, %v14967_v3  ;;  %258 = vst.msk [vmem:[#allocation2 + $0x28] sm:$0xff] %vm252_vm2, %v14967_v3 }
 0x125   : > { %14963 = vst [vmem:[#allocation49_spill] sm:$0xff] %v10771_v56  ;;  %2035 = vperm.xlu1 %10212, %v10462_v27   ;;  %14964 = vst [vmem:[#allocation50_spill] sm:$0xff] %v10774_v2  ;;  %1522 = vperm.xlu0 %10211, %v10554_v4  }
 0x126   : > { %259 = vst.msk [vmem:[#allocation2 + $0x30] sm:$0xff] %vm252_vm2, %v14967_v3  ;;  %260 = vst.msk [vmem:[#allocation2 + $0x38] sm:$0xff] %vm252_vm2, %v14967_v3 }
 0x127   : > { %261 = vst.msk [vmem:[#allocation2 + $0x40] sm:$0xff] %vm252_vm2, %v14967_v3  ;;  %262 = vst.msk [vmem:[#allocation2 + $0x48] sm:$0xff] %vm252_vm2, %v14967_v3 }
 0x128   : > { %v10777_v58 = vpop.permute.xlu1 %874  ;;  %v10780_v5 = vpop.permute.xlu0 %990  ;;  %263 = vst.msk [vmem:[#allocation2 + $0x50] sm:$0xff] %vm252_vm2, %v14967_v3  ;;  %264 = vst.msk [vmem:[#allocation2 + $0x58] sm:$0xff] %vm252_vm2, %v14967_v3 }
 0x129   : > { %14965 = vst [vmem:[#allocation51_spill] sm:$0xff] %v10777_v58  ;;  %2296 = vperm.xlu1 %10212, %v10554_v4   ;;  %2557 = vperm.xlu0 %10211, %v10590_v63   ;;  %266 = vst.msk [vmem:[#allocation2 + $0x1e0] sm:$0xff] %vm252_vm2, %v14967_v3 }
 0x12a   : > { %267 = vst.msk [vmem:[#allocation2 + $0x1e8] sm:$0xff] %vm252_vm2, %v14967_v3  ;;  %268 = vst.msk [vmem:[#allocation2 + $0x1f0] sm:$0xff] %vm252_vm2, %v14967_v3 }
 0x12b   : > { %269 = vst.msk [vmem:[#allocation2 + $0x1f8] sm:$0xff] %vm252_vm2, %v14967_v3  ;;  %270 = vst.msk [vmem:[#allocation2 + $0x200] sm:$0xff] %vm252_vm2, %v14967_v3 }
 0x12c   : > { %v10783_v59 = vpop.permute.xlu1 %884  ;;  %271 = vst.msk [vmem:[#allocation2 + $0x208] sm:$0xff] %vm252_vm2, %v14967_v3  ;;  %272 = vst.msk [vmem:[#allocation2 + $0x210] sm:$0xff] %vm252_vm2, %v14967_v3  ;;  %v10834_v27 = vpop.permute.xlu0 %1000 }
 0x12d   : > { %14966 = vst [vmem:[#allocation52_spill] sm:$0xff] %v10783_v59  ;;  %273 = vst.msk [vmem:[#allocation2 + $0x218] sm:$0xff] %vm252_vm2, %v14967_v3  ;;  %2040 = vperm.xlu1 %10212, %v10478_v32   ;;  %2301 = vperm.xlu0 %10211, %v10562_v7  }
 0x12e   : > { %274 = vst.msk [vmem:[#allocation2 + $0x220] sm:$0xff] %vm252_vm2, %v14967_v3  ;;  %275 = vst.msk [vmem:[#allocation2 + $0x228] sm:$0xff] %vm252_vm2, %v14967_v3 }
 0x12f   : > { %276 = vst.msk [vmem:[#allocation2 + $0x230] sm:$0xff] %vm252_vm2, %v14967_v3  ;;  %277 = vst.msk [vmem:[#allocation2 + $0x238] sm:$0xff] %vm252_vm2, %v14967_v3 }
 0x130   : > { %v10837_v4 = vpop.permute.xlu1 %995  ;;  %v10840_v59 = vpop.permute.xlu0 %1010  ;;  %280 = vst.msk [vmem:[#allocation2 + $0x60] sm:$0xf] %vm279_vm3, %v14967_v3  ;;  %281 = vst.msk [vmem:[#allocation2 + $0x78] sm:$0xf] %vm279_vm3, %v14967_v3 }
 0x131   : > { %1783 = vperm.xlu1 %10212, %v10590_v63   ;;  %2045 = vperm.xlu0 %10211, %v10475_v31   ;;  %282 = vst.msk [vmem:[#allocation2 + $0x90] sm:$0xf] %vm279_vm3, %v14967_v3  ;;  %283 = vst.msk [vmem:[#allocation2 + $0xa8] sm:$0xf] %vm279_vm3, %v14967_v3 }
 0x132   : > { %284 = vst.msk [vmem:[#allocation2 + $0xc0] sm:$0xf] %vm279_vm3, %v14967_v3  ;;  %285 = vst.msk [vmem:[#allocation2 + $0xd8] sm:$0xf] %vm279_vm3, %v14967_v3 }
 0x133   : > { %286 = vst.msk [vmem:[#allocation2 + $0xf0] sm:$0xf] %vm279_vm3, %v14967_v3  ;;  %287 = vst.msk [vmem:[#allocation2 + $0x108] sm:$0xf] %vm279_vm3, %v14967_v3 }
 0x134   : > { %288 = vst.msk [vmem:[#allocation2 + $0x120] sm:$0xf] %vm279_vm3, %v14967_v3  ;;  %289 = vst.msk [vmem:[#allocation2 + $0x138] sm:$0xf] %vm279_vm3, %v14967_v3  ;;  %v10907_v31 = vpop.permute.xlu1 %1005  ;;  %v10910_v32 = vpop.permute.xlu0 %1020 }
 0x135   : > { %290 = vst.msk [vmem:[#allocation2 + $0x150] sm:$0xf] %vm279_vm3, %v14967_v3  ;;  %291 = vst.msk [vmem:[#allocation2 + $0x168] sm:$0xf] %vm279_vm3, %v14967_v3  ;;  %1527 = vperm.xlu1 %10212, %v10562_v7   ;;  %1788 = vperm.xlu0 %10211, %v10604_v16  }
 0x136   : > { %292 = vst.msk [vmem:[#allocation2 + $0x180] sm:$0xf] %vm279_vm3, %v14967_v3  ;;  %293 = vst.msk [vmem:[#allocation2 + $0x198] sm:$0xf] %vm279_vm3, %v14967_v3 }
 0x137   : > { %294 = vst.msk [vmem:[#allocation2 + $0x1b0] sm:$0xf] %vm279_vm3, %v14967_v3  ;;  %295 = vst.msk [vmem:[#allocation2 + $0x1c8] sm:$0xf] %vm279_vm3, %v14967_v3 }
 0x138   : > { %296 = vst.msk [vmem:[#allocation2 + $0x74] sm:$0xf] %vm279_vm3, %v14967_v3  ;;  %297 = vst.msk [vmem:[#allocation2 + $0x8c] sm:$0xf] %vm279_vm3, %v14967_v3  ;;  %v10913_v63 = vpop.permute.xlu1 %1015  ;;  %v10916_v2 = vpop.permute.xlu0 %1030 }
 0x139   : > { %298 = vst.msk [vmem:[#allocation2 + $0xa4] sm:$0xf] %vm279_vm3, %v14967_v3  ;;  %299 = vst.msk [vmem:[#allocation2 + $0xbc] sm:$0xf] %vm279_vm3, %v14967_v3  ;;  %2562 = vperm.xlu1 %10212, %v10604_v16   ;;  %1532 = vperm.xlu0 %10211, %v10559_v6  }
 0x13a   : > { %300 = vst.msk [vmem:[#allocation2 + $0xd4] sm:$0xf] %vm279_vm3, %v14967_v3  ;;  %301 = vst.msk [vmem:[#allocation2 + $0xec] sm:$0xf] %vm279_vm3, %v14967_v3 }
 0x13b   : > { %302 = vst.msk [vmem:[#allocation2 + $0x104] sm:$0xf] %vm279_vm3, %v14967_v3  ;;  %303 = vst.msk [vmem:[#allocation2 + $0x11c] sm:$0xf] %vm279_vm3, %v14967_v3 }
 0x13c   : > { %304 = vst.msk [vmem:[#allocation2 + $0x134] sm:$0xf] %vm279_vm3, %v14967_v3  ;;  %305 = vst.msk [vmem:[#allocation2 + $0x14c] sm:$0xf] %vm279_vm3, %v14967_v3  ;;  %v10919_v58 = vpop.permute.xlu1 %1025 }
 0x13d   : > { %306 = vst.msk [vmem:[#allocation2 + $0x164] sm:$0xf] %vm279_vm3, %v14967_v3  ;;  %307 = vst.msk [vmem:[#allocation2 + $0x17c] sm:$0xf] %vm279_vm3, %v14967_v3  ;;  %2306 = vperm.xlu1 %10212, %v10559_v6   ;;  %2567 = vperm.xlu0 %10211, %v10599_v14  }
 0x13e   : > { %308 = vst.msk [vmem:[#allocation2 + $0x194] sm:$0xf] %vm279_vm3, %v14967_v3  ;;  %309 = vst.msk [vmem:[#allocation2 + $0x1ac] sm:$0xf] %vm279_vm3, %v14967_v3 }
 0x13f   : > { %310 = vst.msk [vmem:[#allocation2 + $0x1c4] sm:$0xf] %vm279_vm3, %v14967_v3  ;;  %311 = vst.msk [vmem:[#allocation2 + $0x1dc] sm:$0xf] %vm279_vm3, %v14967_v3  ;;  %v10922_v3 = vpop.permute.xlu0 %1040 }
 0x140   : > { %v10925_v7 = vpop.permute.xlu1 %1035 }
 0x141   : > { %2050 = vperm.xlu1 %10212, %v10492_v39   ;;  %2311 = vperm.xlu0 %10211, %v10568_v9  }
 0x143   : > { %v10928_v55 = vpop.permute.xlu0 %1050 }
 0x144   : > { %14968 = vst [vmem:[#allocation53_spill] sm:$0xff] %v10928_v55  ;;  %v10931_v16 = vpop.permute.xlu1 %1045 }
 0x145   : > { %1793 = vperm.xlu1 %10212, %v10599_v14   ;;  %2055 = vperm.xlu0 %10211, %v2004_v17  }
 0x147   : > { %v10934_v56 = vpop.permute.xlu0 %1060 }
 0x148   : > { %14969 = vst [vmem:[#allocation54_spill] sm:$0xff] %v10934_v56  ;;  %v10936_v6 = vpop.permute.xlu1 %1055 }
 0x149   : > { %14970 = vst [vmem:[#allocation55_spill] sm:$0xff] %v10936_v6  ;;  %1537 = vperm.xlu1 %10212, %v10568_v9   ;;  %1798 = vperm.xlu0 %10211, %v10614_v20  }
 0x14b   : > { %v10939_v53 = vpop.permute.xlu0 %1070 }
 0x14c   : > { %14971 = vst [vmem:[#allocation56_spill] sm:$0xff] %v10939_v53  ;;  %v10942_v39 = vpop.permute.xlu1 %1065 }
 0x14d   : > { %14972 = vst [vmem:[#allocation57_spill] sm:$0xff] %v10942_v39  ;;  %2572 = vperm.xlu1 %10212, %v10614_v20   ;;  %1542 = vperm.xlu0 %10211, %v10565_v8  }
 0x14f   : > { %v10945_v15 = vpop.permute.xlu0 %1080 }
 0x150   : > { %14973 = vst [vmem:[#allocation58_spill] sm:$0xff] %v10945_v15  ;;  %v10948_v14 = vpop.permute.xlu1 %1075 }
 0x151   : > { %14974 = vst [vmem:[#allocation59_spill] sm:$0xff] %v10948_v14  ;;  %2316 = vperm.xlu1 %10212, %v10565_v8   ;;  %2577 = vperm.xlu0 %10211, %v10609_v18   ;;  %v2272_v14 = vld [vmem:[#allocation4 + $0xb1] sm:$0xff] }
 0x153   : > { %v10951_v17 = vpop.permute.xlu0 %1090 }
 0x154   : > { %14975 = vst [vmem:[#allocation60_spill] sm:$0xff] %v10951_v17  ;;  %v10954_v9 = vpop.permute.xlu1 %1085 }
 0x155   : > { %14976 = vst [vmem:[#allocation61_spill] sm:$0xff] %v10954_v9  ;;  %2060 = vperm.xlu1 %10212, %v2005_v54   ;;  %2321 = vperm.xlu0 %10211, %v10574_v11  }
 0x157   : > { %v10956_v51 = vpop.permute.xlu0 %1100 }
 0x158   : > { %14977 = vst [vmem:[#allocation62_spill] sm:$0xff] %v10956_v51  ;;  %v10959_v20 = vpop.permute.xlu1 %1095 }
 0x159   : > { %14978 = vst [vmem:[#allocation63_spill] sm:$0xff] %v10959_v20  ;;  %1803 = vperm.xlu1 %10212, %v10609_v18   ;;  %2065 = vperm.xlu0 %10211, %v2006_v52   ;;  %v2009_v20 = vld [vmem:[#allocation4 + $0x98] sm:$0xff] }
 0x15b   : > { %v10962_v49 = vpop.permute.xlu0 %1110 }
 0x15c   : > { %14979 = vst [vmem:[#allocation64_spill] sm:$0xff] %v10962_v49  ;;  %v10964_v8 = vpop.permute.xlu1 %1105  ;;  %v2007_v49 = vld [vmem:[#allocation4 + $0x80] sm:$0xff] }
 0x15d   : > { %14980 = vst [vmem:[#allocation65_spill] sm:$0xff] %v10964_v8  ;;  %1547 = vperm.xlu1 %10212, %v10574_v11   ;;  %1808 = vperm.xlu0 %10211, %v10624_v24   ;;  %v4200_v11 = vld [vmem:[%s14882_s2 + $0x200] sm:$0xff]  ;;  %v2008_v8 = vld [vmem:[#allocation4 + $0x90] sm:$0xff] }
 0x15f   : > { %v10967_v50 = vpop.permute.xlu0 %1120 }
 0x160   : > { %14981 = vst [vmem:[#allocation66_spill] sm:$0xff] %v10967_v50  ;;  %v10970_v54 = vpop.permute.xlu1 %1115 }
 0x161   : > { %14982 = vst [vmem:[#allocation67_spill] sm:$0xff] %v10970_v54  ;;  %2582 = vperm.xlu1 %10212, %v10624_v24   ;;  %1552 = vperm.xlu0 %10211, %v10571_v10   ;;  %v4201_v24 = vld [vmem:[%s14882_s2 + $0x208] sm:$0xff] }
 0x162   : > { %v9655_v50 = vpack.c.bf16 %v4201_v24, %v4200_v11  ;;  %v4205_v11 = vld [vmem:[%s14882_s2 + $0x228] sm:$0xff] }
 0x163   : > { %v10973_v51 = vpop.permute.xlu0 %1130 }
 0x164   : > { %14983 = vst [vmem:[#allocation68_spill] sm:$0xff] %v10973_v51  ;;  %v10976_v18 = vpop.permute.xlu1 %1125  ;;  %9656 = vmatprep.subr.bf16.mxu1 %v9655_v50 }
 0x165   : > { %14984 = vst [vmem:[#allocation69_spill] sm:$0xff] %v10976_v18  ;;  %2326 = vperm.xlu1 %10212, %v10571_v10   ;;  %2587 = vperm.xlu0 %10211, %v10619_v22   ;;  %v4202_v10 = vld [vmem:[%s14882_s2 + $0x210] sm:$0xff] }
 0x166   : > { %9658 = vmatpush3.bf16.msra.mxu1 %v9655_v50  ;;  %v4204_v50 = vld [vmem:[%s14882_s2 + $0x220] sm:$0xff] }
 0x167   : > { %v10979_v52 = vpop.permute.xlu0 %1140 }
 0x168   : > { %14985 = vst [vmem:[#allocation70_spill] sm:$0xff] %v10979_v52  ;;  %v10988_v51 = vpop.permute.xlu1 %1135  ;;  %v4203_v52 = vld [vmem:[%s14882_s2 + $0x218] sm:$0xff] }
 0x169   : > { %14986 = vst [vmem:[#allocation71_spill] sm:$0xff] %v10988_v51  ;;  %2070 = vperm.xlu1 %10212, %v2007_v49   ;;  %2331 = vperm.xlu0 %10211, %v10578_v13   ;;  %v9659_v51 = vpack.c.bf16 %v4203_v52, %v4202_v10  ;;  %v1487_v10 = vld [vmem:[#allocation4 + $0x91] sm:$0xff] }
 0x16b   : > { %v10990_v18 = vpop.permute.xlu0 %1251  ;;  %9660 = vmatprep.subr.bf16.mxu1 %v9659_v51 }
 0x16c   : > { %v10999_v54 = vpop.permute.xlu1 %1145  ;;  %9662 = vmatpush3.bf16.msra.mxu1 %v9659_v51  ;;  %v4207_v51 = vld [vmem:[%s14882_s2 + $0x238] sm:$0xff] }
 0x16d   : > { %14987 = vst [vmem:[#allocation72_spill] sm:$0xff] %v10999_v54  ;;  %1813 = vperm.xlu1 %10212, %v10619_v22   ;;  %2075 = vperm.xlu0 %10211, %v2008_v8   ;;  %v9663_v54 = vpack.c.bf16 %v4205_v11, %v4204_v50  ;;  %v4206_v22 = vld [vmem:[%s14882_s2 + $0x230] sm:$0xff] }
 0x16e   : > { %v9667_v50 = vpack.c.bf16 %v4207_v51, %v4206_v22  ;;  %v2010_v51 = vld [vmem:[#allocation4 + $0xa8] sm:$0xff] }
 0x16f   : > { %v11002_v49 = vpop.permute.xlu0 %1261  ;;  %9664 = vmatprep.subr.bf16.mxu1 %v9663_v54 }
 0x170   : > { %v11010_v24 = vpop.permute.xlu1 %1256  ;;  %9666 = vmatpush3.bf16.msra.mxu1 %v9663_v54 }
 0x171   : > { %1557 = vperm.xlu1 %10212, %v10578_v13   ;;  %1818 = vperm.xlu0 %10211, %v10634_v34  }
 0x172   : > { %9668 = vmatprep.subr.bf16.mxu1 %v9667_v50 }
 0x173   : > { %v11013_v52 = vpop.permute.xlu0 %1271 }
 0x174   : > { %v11022_v8 = vpop.permute.xlu1 %1266  ;;  %9670 = vmatpush3.bf16.msra.mxu1 %v9667_v50 }
 0x175   : > { %2592 = vperm.xlu1 %10212, %v10634_v34   ;;  %1562 = vperm.xlu0 %10211, %v1487_v10  }
 0x177   : > { %v11025_v13 = vpop.permute.xlu0 %1281 }
 0x178   : > { %v11027_v54 = vpop.permute.xlu1 %1276 }
 0x179   : > { %2336 = vperm.xlu1 %10212, %v1487_v10   ;;  %2597 = vperm.xlu0 %10211, %v10629_v29  }
 0x17b   : > { %v11029_v11 = vpop.permute.xlu0 %1291 }
 0x17c   : > { %v11032_v17 = vpop.permute.xlu1 %1286 }
 0x17d   : > { %2080 = vperm.xlu1 %10212, %v2009_v20   ;;  %2341 = vperm.xlu0 %10211, %v2270_v47   ;;  %v1489_v20 = vld [vmem:[#allocation4 + $0xa9] sm:$0xff] }
 0x17f   : > { %v11034_v22 = vpop.permute.xlu0 %1301 }
 0x180   : > { %v11036_v34 = vpop.permute.xlu1 %1296 }
 0x181   : > { %1823 = vperm.xlu1 %10212, %v10629_v29   ;;  %2085 = vperm.xlu0 %10211, %v2010_v51   ;;  %v2011_v51 = vld [vmem:[#allocation4 + $0xb0] sm:$0xff] }
 0x183   : > { %v11039_v50 = vpop.permute.xlu0 %1311 }
 0x184   : > { %14988 = vst [vmem:[#allocation73_spill] sm:$0xff] %v11039_v50  ;;  %v11041_v10 = vpop.permute.xlu1 %1306 }
 0x185   : > { %1567 = vperm.xlu1 %10212, %v2270_v47   ;;  %1828 = vperm.xlu0 %10211, %v10644_v38  }
 0x187   : > { %v11043_v9 = vpop.permute.xlu0 %1321 }
 0x188   : > { %14989 = vst [vmem:[#allocation74_spill] sm:$0xff] %v11043_v9  ;;  %v11046_v48 = vpop.permute.xlu1 %1316 }
 0x189   : > { %14990 = vst [vmem:[#allocation75_spill] sm:$0xff] %v11046_v48  ;;  %2602 = vperm.xlu1 %10212, %v10644_v38   ;;  %1572 = vperm.xlu0 %10211, %v1489_v20   ;;  %v2012_v38 = vld [vmem:[#allocation4 + $0xc0] sm:$0xff]  ;;  %v2274_v48 = vld [vmem:[#allocation4 + $0xc9] sm:$0xff] }
 0x18b   : > { %v11049_v15 = vpop.permute.xlu0 %1331 }
 0x18c   : > { %14991 = vst [vmem:[#allocation76_spill] sm:$0xff] %v11049_v15  ;;  %v11051_v45 = vpop.permute.xlu1 %1326 }
 0x18d   : > { %14992 = vst [vmem:[#allocation77_spill] sm:$0xff] %v11051_v45  ;;  %2346 = vperm.xlu1 %10212, %v1489_v20   ;;  %2607 = vperm.xlu0 %10211, %v10639_v36   ;;  %v11068_v20 = vld [vmem:[%s14881_s1 + $0x1] ss:$0 sm:$0xff] }
 0x18e   : > { %v893_v33 = vmul.f32 %v11068_v20, %v10690_v35 }
 0x18f   : > { %v11053_v29 = vpop.permute.xlu0 %1341 }
 0x190   : > { %14993 = vst [vmem:[#allocation78_spill] sm:$0xff] %v11053_v29  ;;  %v11056_v47 = vpop.permute.xlu1 %1336 }
 0x191   : > { %14994 = vst [vmem:[#allocation79_spill] sm:$0xff] %v11056_v47  ;;  %2090 = vperm.xlu1 %10212, %v2011_v51   ;;  %2351 = vperm.xlu0 %10211, %v2272_v14   ;;  %v11075_v51 = vld [vmem:[%s14881_s1 + $0x2] ss:$0 sm:$0xff]  ;;  %v11100_v47 = vld [vmem:[%s14881_s1 + $0x4] ss:$0 sm:$0xff] }
 0x193   : > { %v11058_v46 = vpop.permute.xlu0 %1351 }
 0x194   : > { %14995 = vst [vmem:[#allocation80_spill] sm:$0xff] %v11058_v46  ;;  %v11060_v53 = vpop.permute.xlu1 %1346 }
 0x195   : > { %14996 = vst [vmem:[#allocation81_spill] sm:$0xff] %v11060_v53  ;;  %1833 = vperm.xlu1 %10212, %v10639_v36   ;;  %2095 = vperm.xlu0 %10211, %v2012_v38   ;;  %v891_v36 = vmul.f32 %v11068_v20, %v10685_v21  ;;  %v11083_v38 = vld [vmem:[%s14881_s1] ss:$0 sm:$0xff]  ;;  %v1152_v21 = vmul.f32 %v11075_v51, %v10780_v5  ;;  %v2534_v5 = vld [vmem:[#allocation4 + $0xc2] sm:$0xff] }
 0x196   : > { %v630_v53 = vmul.f32 %v11083_v38, %v10581_v40  ;;  %v11107_v40 = vld [vmem:[%s14881_s1 + $0x5] ss:$0 sm:$0xff] }
 0x197   : > { %v11063_v15 = vpop.permute.xlu0 %1361 }
 0x198   : > { %14997 = vst [vmem:[#allocation82_spill] sm:$0xff] %v11063_v15  ;;  %v11070_v29 = vpop.permute.xlu1 %1356  ;;  %v923_v45 = vadd.f32 %v891_v36, %v630_v53  ;;  %v11113_v53 = vld [vmem:[%s14881_s1 + $0x6] ss:$0 sm:$0xff]  ;;  %v2013_v36 = vld [vmem:[#allocation4 + $0xc8] sm:$0xff] }
 0x199   : > { %14998 = vst [vmem:[#allocation83_spill] sm:$0xff] %v11070_v29  ;;  %1577 = vperm.xlu1 %10212, %v2272_v14   ;;  %1838 = vperm.xlu0 %10211, %v10652_v30   ;;  %v11088_v14 = vld [vmem:[%s14881_s1 + $0x3] ss:$0 sm:$0xff] }
 0x19a   : > { %v1491_v29 = vld [vmem:[#allocation4 + $0xc1] sm:$0xff]  ;;  %v1413_v39 = vmul.f32 %v11088_v14, %v10990_v18  ;;  %v1184_v44 = vadd.f32 %v1152_v21, %v923_v45 }
 0x19b   : > { %v1513_v46 = vpop.permute.xlu0 %1512 }
 0x19c   : > { %v11090_v15 = vpop.permute.xlu1 %1366  ;;  %v1445_v18 = vadd.f32 %v1413_v39, %v1184_v44  ;;  %v2014_v39 = vld [vmem:[#allocation4 + $0xd8] sm:$0xff] }
 0x19d   : > { %14999 = vst [vmem:[#allocation84_spill] sm:$0xff] %v11090_v15  ;;  %2612 = vperm.xlu1 %10212, %v10652_v30   ;;  %1582 = vperm.xlu0 %10211, %v1491_v29   ;;  %v1674_v30 = vmul.f32 %v11100_v47, %v1513_v46  ;;  %v11120_v46 = vld [vmem:[%s14881_s1 + $0x7] ss:$0 sm:$0xff] }
 0x19f   : > { %v1518_v43 = vpop.permute.xlu0 %1517  ;;  %v1706_v6 = vadd.f32 %v1674_v30, %v1445_v18  ;;  %v1153_v30 = vmul.f32 %v11075_v51, %v10837_v4  ;;  %v1753_v4 = vld [vmem:[#allocation4 + $0xca] sm:$0xff] }
 0x1a0   : > { %v1774_v15 = vpop.permute.xlu1 %1773 }
 0x1a1   : > { %2356 = vperm.xlu1 %10212, %v1491_v29   ;;  %v1935_v56 = vmul.f32 %v11107_v40, %v1774_v15  ;;  %2617 = vperm.xlu0 %10211, %v2534_v5   ;;  %v892_v29 = vmul.f32 %v11068_v20, %v10693_v0  ;;  %v11127_v15 = vld [vmem:[%s14881_s1 + $0x8] ss:$0 sm:$0xff] }
 0x1a3   : > { %v1779_v9 = vpop.permute.xlu0 %1778  ;;  %v1967_v21 = vadd.f32 %v1935_v56, %v1706_v6  ;;  %v1414_v6 = vmul.f32 %v11088_v14, %v11010_v24  ;;  %v632_v24 = vmul.f32 %v11083_v38, %v10588_v62 }
 0x1a4   : > { %v2036_v41 = vpop.permute.xlu1 %2035 }
 0x1a5   : > { %v2197_v42 = vmul.f32 %v11113_v53, %v2036_v41  ;;  %2100 = vperm.xlu1 %10212, %v2013_v36   ;;  %2361 = vperm.xlu0 %10211, %v2274_v48   ;;  %v631_v41 = vmul.f32 %v11083_v38, %v10585_v60  ;;  %v11142_v60 = vld [vmem:[%s14884_s4] ss:$0 sm:$0xff] }
 0x1a7   : > { %v1523_v45 = vpop.permute.xlu0 %1522  ;;  %v2229_v36 = vadd.f32 %v2197_v42, %v1967_v21  ;;  %v924_v56 = vadd.f32 %v892_v29, %v631_v41  ;;  %v1675_v29 = vmul.f32 %v11100_v47, %v1518_v43  ;;  %v1936_v41 = vmul.f32 %v11107_v40, %v1779_v9 }
 0x1a8   : > { %v2297_v44 = vpop.permute.xlu1 %2296  ;;  %v1415_v43 = vmul.f32 %v11088_v14, %v11002_v49 }
 0x1a9   : > { %v2458_v18 = vmul.f32 %v11120_v46, %v2297_v44  ;;  %1843 = vperm.xlu1 %10212, %v2534_v5   ;;  %2105 = vperm.xlu0 %10211, %v2014_v39   ;;  %v1185_v5 = vadd.f32 %v1153_v30, %v924_v56  ;;  %v1154_v39 = vmul.f32 %v11075_v51, %v10834_v27  ;;  %v1493_v30 = vld [vmem:[#allocation4 + $0xd9] sm:$0xff] }
 0x1ab   : > { %v2558_v0 = vpop.permute.xlu0 %2557  ;;  %v2490_v50 = vadd.f32 %v2458_v18, %v2229_v36  ;;  %v1446_v35 = vadd.f32 %v1414_v6, %v1185_v5  ;;  %v925_v18 = vadd.f32 %v893_v33, %v632_v24  ;;  %v1676_v6 = vmul.f32 %v11100_v47, %v1523_v45  ;;  %v2536_v33 = vld [vmem:[#allocation4 + $0xda] sm:$0xff] }
 0x1ac   : > { %v2719_v55 = vmul.f32 %v11127_v15, %v2558_v0  ;;  %v2041_v42 = vpop.permute.xlu1 %2040 }
 0x1ad   : > { %1587 = vperm.xlu1 %10212, %v2274_v48   ;;  %1848 = vperm.xlu0 %10211, %v1753_v4   ;;  %v1707_v48 = vadd.f32 %v1675_v29, %v1446_v35  ;;  %v2198_v62 = vmul.f32 %v11113_v53, %v2041_v42  ;;  %v1186_v56 = vadd.f32 %v1154_v39, %v925_v18  ;;  %v2015_v42 = vld [vmem:[#allocation4 + $0xe0] sm:$0xff] }
 0x1ae   : > { %v2751_v21 = vadd.f32 %v2719_v55, %v2490_v50  ;;  %v894_v39 = vmul.f32 %v11068_v20, %v10699_v25  ;;  %v2276_v35 = vld [vmem:[#allocation4 + $0xe1] sm:$0xff] }
 0x1af   : > { %v2302_v44 = vpop.permute.xlu0 %2301  ;;  %v1968_v27 = vadd.f32 %v1936_v41, %v1707_v48  ;;  %v1447_v5 = vadd.f32 %v1415_v43, %v1186_v56  ;;  %v4136_v25 = vld [vmem:[%s14882_s2] sm:$0xff]  ;;  %v2016_v56 = vld [vmem:[#allocation4 + $0xf0] sm:$0xff] }
 0x1b0   : > { %v2790_v36 = vadd.f32 %v11142_v60, %v2751_v21  ;;  %v1784_v0 = vpop.permute.xlu1 %1783  ;;  %v2459_v24 = vmul.f32 %v11120_v46, %v2302_v44  ;;  %v633_v44 = vmul.f32 %v11083_v38, %v10597_v12 }
 0x1b1   : > { %2622 = vperm.xlu1 %10212, %v1753_v4   ;;  %1592 = vperm.xlu0 %10211, %v1493_v30   ;;  %v2230_v21 = vadd.f32 %v2198_v62, %v1968_v27  ;;  %v1937_v49 = vmul.f32 %v11107_v40, %v1784_v0  ;;  %v1708_v4 = vadd.f32 %v1676_v6, %v1447_v5  ;;  %v14889_v27 = vmov 0.0|0.0  }
 0x1b2   : > { %v2822_v55 = vmax.f32 %v2790_v36, 0.0  ;;  %v1155_v0 = vmul.f32 %v11075_v51, %v10907_v31  ;;  %v926_v62 = vadd.f32 %v894_v39, %v633_v44  ;;  %9559 = vmatprep.subr.bf16.mxu0 %v14889_v27  ;;  %9671 = vmatprep.subr.bf16.mxu1 %v14889_v27  ;;  %v1416_v31 = vmul.f32 %v11088_v14, %v11022_v8  ;;  %v4139_v39 = vld [vmem:[%s14882_s2 + $0x18] sm:$0xff] }
 0x1b3   : > { %v2046_v50 = vpop.permute.xlu0 %2045  ;;  %v2491_v41 = vadd.f32 %v2459_v24, %v2230_v21  ;;  %v1969_v36 = vadd.f32 %v1937_v49, %v1708_v4  ;;  %v4138_v4 = vld [vmem:[%s14882_s2 + $0x10] sm:$0xff] }
 0x1b4   : > { %2854 = vst.msk [vmem:[#allocation2 + $0x64] sm:$0xff] %vm252_vm2, %v2822_v55  ;;  %v1528_v9 = vpop.permute.xlu1 %1527  ;;  %v2199_v18 = vmul.f32 %v11113_v53, %v2046_v50  ;;  %v4137_v55 = vld [vmem:[%s14882_s2 + $0x8] sm:$0xff]  ;;  %v1187_v24 = vadd.f32 %v1155_v0, %v926_v62  ;;  %v15000_v0 = vld [vmem:[#allocation5_spill] sm:$0xff]  ;;  %v4140_v62 = vld [vmem:[%s14882_s2 + $0x20] sm:$0xff] }
 0x1b5   : > { %2366 = vperm.xlu1 %10212, %v1493_v30   ;;  %2627 = vperm.xlu0 %10211, %v2536_v33   ;;  %v9560_v12 = vpack.c.bf16 %v4137_v55, %v4136_v25  ;;  %v1677_v49 = vmul.f32 %v11100_v47, %v1528_v9  ;;  %v895_v9 = vmul.f32 %v11068_v20, %v10696_v23  ;;  %v4141_v23 = vld [vmem:[%s14882_s2 + $0x28] sm:$0xff] }
 0x1b6   : > { %v2231_v6 = vadd.f32 %v2199_v18, %v1969_v36  ;;  %v1755_v18 = vld [vmem:[#allocation4 + $0xe2] sm:$0xff]  ;;  %v634_v25 = vmul.f32 %v11083_v38, %v15000_v0 }
 0x1b7   : > { %v1789_v29 = vpop.permute.xlu0 %1788  ;;  %9561 = vmatpush1.bf16.msra.mxu0 %v9560_v12  ;;  %v4145_v0 = vld [vmem:[%s14882_s2 + $0x48] sm:$0xff] }
 0x1b8   : > { %v2563_v45 = vpop.permute.xlu1 %2562  ;;  %9562 = vmatprep.subr.bf16.mxu0 %v14889_v27  ;;  %v927_v12 = vadd.f32 %v895_v9, %v634_v25 }
 0x1b9   : > { %v2720_v43 = vmul.f32 %v11127_v15, %v2563_v45  ;;  %2110 = vperm.xlu1 %10212, %v2015_v42   ;;  %2371 = vperm.xlu0 %10211, %v2276_v35  }
 0x1bb   : > { %v1533_v30 = vpop.permute.xlu0 %1532  ;;  %v2752_v48 = vadd.f32 %v2720_v43, %v2491_v41  ;;  %v1448_v43 = vadd.f32 %v1416_v31, %v1187_v24  ;;  %v1495_v31 = vld [vmem:[#allocation4 + $0xf1] sm:$0xff] }
 0x1bc   : > { %v2307_v50 = vpop.permute.xlu1 %2306 }
 0x1bd   : > { %v2791_v5 = vadd.f32 %v11142_v60, %v2752_v48  ;;  %v2460_v21 = vmul.f32 %v11120_v46, %v2307_v50  ;;  %1853 = vperm.xlu1 %10212, %v2536_v33   ;;  %2115 = vperm.xlu0 %10211, %v2016_v56   ;;  %v9563_v33 = vpack.c.bf16 %v4139_v39, %v4138_v4  ;;  %v4143_v4 = vld [vmem:[%s14882_s2 + $0x38] sm:$0xff] }
 0x1be   : > { %v1156_v48 = vmul.f32 %v11075_v51, %v10840_v59  ;;  %v1709_v50 = vadd.f32 %v1677_v49, %v1448_v43  ;;  %v1938_v56 = vmul.f32 %v11107_v40, %v1789_v29  ;;  %v4142_v29 = vld [vmem:[%s14882_s2 + $0x30] sm:$0xff] }
 0x1bf   : > { %v2568_v42 = vpop.permute.xlu0 %2567  ;;  %v2823_v8 = vmax.f32 %v2791_v5, 0.0  ;;  %v2492_v45 = vadd.f32 %v2460_v21, %v2231_v6  ;;  %9564 = vmatpush1.bf16.msra.mxu0 %v9563_v33  ;;  %v9566_v6 = vpack.c.bf16 %v4141_v23, %v4140_v62  ;;  %v1417_v5 = vmul.f32 %v11088_v14, %v11013_v52  ;;  %v2278_v23 = vld [vmem:[#allocation4 + $0xf9] sm:$0xff] }
 0x1c0   : > { %v2721_v41 = vmul.f32 %v11127_v15, %v2568_v42  ;;  %v2051_v36 = vpop.permute.xlu1 %2050  ;;  %9565 = vmatprep.subr.bf16.mxu0 %v14889_v27  ;;  %v1188_v42 = vadd.f32 %v1156_v48, %v927_v12  ;;  %v1970_v39 = vadd.f32 %v1938_v56, %v1709_v50  ;;  %v9569_v52 = vpack.c.bf16 %v4143_v4, %v4142_v29  ;;  %v2018_v29 = vld [vmem:[#allocation4 + $0x108] sm:$0xff] }
 0x1c1   : > { %2855 = vst.msk [vmem:[#allocation2 + $0x6c] sm:$0xff] %vm252_vm2, %v2823_v8  ;;  %1597 = vperm.xlu1 %10212, %v2276_v35   ;;  %1858 = vperm.xlu0 %10211, %v1755_v18   ;;  %v2200_v24 = vmul.f32 %v11113_v53, %v2051_v36  ;;  %v1678_v8 = vmul.f32 %v11100_v47, %v1533_v30  ;;  %v4144_v30 = vld [vmem:[%s14882_s2 + $0x40] sm:$0xff] }
 0x1c2   : > { %v2753_v44 = vadd.f32 %v2721_v41, %v2492_v45  ;;  %v2538_v41 = vld [vmem:[#allocation4 + $0xf2] sm:$0xff]  ;;  %v1449_v33 = vadd.f32 %v1417_v5, %v1188_v42  ;;  %v9572_v48 = vpack.c.bf16 %v4145_v0, %v4144_v30 }
 0x1c3   : > { %v2312_v55 = vpop.permute.xlu0 %2311  ;;  %9567 = vmatpush1.bf16.msra.mxu0 %v9566_v6  ;;  %v2232_v9 = vadd.f32 %v2200_v24, %v1970_v39  ;;  %v1157_v6 = vmul.f32 %v11075_v51, %v10913_v63  ;;  %v4147_v24 = vld [vmem:[%s14882_s2 + $0x58] sm:$0xff]  ;;  %v1418_v63 = vmul.f32 %v11088_v14, %v11027_v54  ;;  %v4148_v54 = vld [vmem:[%s14882_s2 + $0x60] sm:$0xff] }
 0x1c4   : > { %v2792_v35 = vadd.f32 %v11142_v60, %v2753_v44  ;;  %v1794_v59 = vpop.permute.xlu1 %1793  ;;  %9568 = vmatprep.subr.bf16.mxu0 %v14889_v27  ;;  %v2461_v36 = vmul.f32 %v11120_v46, %v2312_v55  ;;  %v2017_v44 = vld [vmem:[#allocation4 + $0xf8] sm:$0xff]  ;;  %v1710_v25 = vadd.f32 %v1678_v8, %v1449_v33  ;;  %v896_v55 = vmul.f32 %v11068_v20, %v10705_v57  ;;  %v4146_v57 = vld [vmem:[%s14882_s2 + $0x50] sm:$0xff] }
 0x1c5   : > { %2632 = vperm.xlu1 %10212, %v1755_v18   ;;  %1602 = vperm.xlu0 %10211, %v1495_v31   ;;  %v1939_v18 = vmul.f32 %v11107_v40, %v1794_v59  ;;  %v15001_v59 = vld [vmem:[#allocation7_spill] sm:$0xff]  ;;  %v9575_v4 = vpack.c.bf16 %v4147_v24, %v4146_v57  ;;  %v4151_v57 = vld [vmem:[%s14882_s2 + $0x78] sm:$0xff] }
 0x1c6   : > { %v2824_v21 = vmax.f32 %v2792_v35, 0.0  ;;  %v2493_v50 = vadd.f32 %v2461_v36, %v2232_v9 }
 0x1c7   : > { %v2056_v49 = vpop.permute.xlu0 %2055  ;;  %9570 = vmatpush1.bf16.msra.mxu0 %v9569_v52  ;;  %v1971_v56 = vadd.f32 %v1939_v18, %v1710_v25  ;;  %v1757_v25 = vld [vmem:[#allocation4 + $0xfa] sm:$0xff] }
 0x1c8   : > { %2856 = vst.msk [vmem:[#allocation2 + $0x7c] sm:$0xff] %vm252_vm2, %v2824_v21  ;;  %v1538_v45 = vpop.permute.xlu1 %1537  ;;  %9571 = vmatprep.subr.bf16.mxu0 %v14889_v27  ;;  %v2201_v35 = vmul.f32 %v11113_v53, %v2056_v49 }
 0x1c9   : > { %2376 = vperm.xlu1 %10212, %v1495_v31   ;;  %2637 = vperm.xlu0 %10211, %v2538_v41   ;;  %v635_v31 = vmul.f32 %v11083_v38, %v15001_v59  ;;  %v1679_v36 = vmul.f32 %v11100_v47, %v1538_v45  ;;  %v897_v45 = vmul.f32 %v11068_v20, %v10702_v26  ;;  %v398_v26 = vld [vmem:[%s10417_s27 + $0xf0] sm:$0xff] }
 0x1ca   : > { %v2233_v39 = vadd.f32 %v2201_v35, %v1971_v56  ;;  %v1158_v35 = vmul.f32 %v11075_v51, %v10910_v32  ;;  %431 = vst.msk [vmem:[#allocation4 + $0x181] sm:$0xff] %vm312_vm0, %v398_v26  ;;  %v1159_v26 = vmul.f32 %v11075_v51, %v10919_v58  ;;  %v1420_v58 = vmul.f32 %v11088_v14, %v11032_v17  ;;  %v4158_v17 = vld [vmem:[%s14882_s2 + $0xb0] sm:$0xff] }
 0x1cb   : > { %v1799_v43 = vpop.permute.xlu0 %1798  ;;  %9573 = vmatpush1.bf16.msra.mxu0 %v9572_v48  ;;  %v928_v42 = vadd.f32 %v896_v55, %v635_v31 }
 0x1cc   : > { %v2573_v62 = vpop.permute.xlu1 %2572  ;;  %9574 = vmatprep.subr.bf16.mxu0 %v14889_v27  ;;  %v1940_v31 = vmul.f32 %v11107_v40, %v1799_v43 }
 0x1cd   : > { %v2722_v12 = vmul.f32 %v11127_v15, %v2573_v62  ;;  %2120 = vperm.xlu1 %10212, %v2017_v44   ;;  %2381 = vperm.xlu0 %10211, %v2278_v23   ;;  %v1189_v33 = vadd.f32 %v1157_v6, %v928_v42  ;;  %v1419_v42 = vmul.f32 %v11088_v14, %v11025_v13  ;;  %v4153_v13 = vld [vmem:[%s14882_s2 + $0x88] sm:$0xff] }
 0x1cf   : > { %v1543_v5 = vpop.permute.xlu0 %1542  ;;  %v2754_v21 = vadd.f32 %v2722_v12, %v2493_v50  ;;  %9576 = vmatpush1.bf16.msra.mxu0 %v9575_v4  ;;  %v1450_v55 = vadd.f32 %v1418_v63, %v1189_v33  ;;  %v15002_v50 = vld [vmem:[#allocation6_spill] sm:$0xff] }
 0x1d0   : > { %v2317_v49 = vpop.permute.xlu1 %2316  ;;  %9577 = vmatprep.subr.bf16.mxu0 %v14889_v27  ;;  %v636_v56 = vmul.f32 %v11083_v38, %v15002_v50 }
 0x1d1   : > { %v2793_v8 = vadd.f32 %v11142_v60, %v2754_v21  ;;  %v2462_v52 = vmul.f32 %v11120_v46, %v2317_v49  ;;  %1863 = vperm.xlu1 %10212, %v2538_v41   ;;  %2125 = vperm.xlu0 %10211, %v2018_v29   ;;  %v4149_v41 = vld [vmem:[%s14882_s2 + $0x68] sm:$0xff]  ;;  %v1711_v59 = vadd.f32 %v1679_v36, %v1450_v55 }
 0x1d2   : > { %v9578_v48 = vpack.c.bf16 %v4149_v41, %v4148_v54  ;;  %v1497_v21 = vld [vmem:[#allocation4 + $0x109] sm:$0xff]  ;;  %v929_v43 = vadd.f32 %v897_v45, %v636_v56  ;;  %v898_v45 = vmul.f32 %v11068_v20, %v10711_v28  ;;  %v4156_v28 = vld [vmem:[%s14882_s2 + $0xa0] sm:$0xff] }
 0x1d3   : > { %v2578_v9 = vpop.permute.xlu0 %2577  ;;  %v2825_v18 = vmax.f32 %v2793_v8, 0.0  ;;  %v2494_v44 = vadd.f32 %v2462_v52, %v2233_v39  ;;  %v1972_v39 = vadd.f32 %v1940_v31, %v1711_v59  ;;  %v1680_v8 = vmul.f32 %v11100_v47, %v1543_v5  ;;  %v4152_v52 = vld [vmem:[%s14882_s2 + $0x80] sm:$0xff]  ;;  %v2019_v41 = vld [vmem:[#allocation4 + $0x110] sm:$0xff] }
 0x1d4   : > { %v2723_v30 = vmul.f32 %v11127_v15, %v2578_v9  ;;  %v2061_v0 = vpop.permute.xlu1 %2060  ;;  %9579 = vmatpush1.bf16.msra.mxu0 %v9578_v48  ;;  %v1190_v63 = vadd.f32 %v1158_v35, %v929_v43  ;;  %v2540_v9 = vld [vmem:[#allocation4 + $0x10a] sm:$0xff]  ;;  %v9584_v36 = vpack.c.bf16 %v4153_v13, %v4152_v52  ;;  %v4155_v48 = vld [vmem:[%s14882_s2 + $0x98] sm:$0xff]  ;;  %v2020_v43 = vld [vmem:[#allocation4 + $0x120] sm:$0xff] }
 0x1d5   : > { %2857 = vst.msk [vmem:[#allocation2 + $0x84] sm:$0xff] %vm252_vm2, %v2825_v18  ;;  %1607 = vperm.xlu1 %10212, %v2278_v23   ;;  %1868 = vperm.xlu0 %10211, %v1757_v25   ;;  %v4150_v23 = vld [vmem:[%s14882_s2 + $0x70] sm:$0xff]  ;;  %v2202_v29 = vmul.f32 %v11113_v53, %v2061_v0 }
 0x1d6   : > { %v2755_v62 = vadd.f32 %v2723_v30, %v2494_v44  ;;  %9580 = vmatprep.subr.bf16.mxu0 %v14889_v27  ;;  %v9581_v24 = vpack.c.bf16 %v4151_v57, %v4150_v23  ;;  %v1451_v18 = vadd.f32 %v1419_v42, %v1190_v63  ;;  %v15003_v31 = vld [vmem:[#allocation9_spill] sm:$0xff] }
 0x1d7   : > { %v2322_v12 = vpop.permute.xlu0 %2321  ;;  %v2234_v44 = vadd.f32 %v2202_v29, %v1972_v39 }
 0x1d8   : > { %v2794_v6 = vadd.f32 %v11142_v60, %v2755_v62  ;;  %v1804_v32 = vpop.permute.xlu1 %1803  ;;  %9582 = vmatpush1.bf16.msra.mxu0 %v9581_v24  ;;  %v2463_v5 = vmul.f32 %v11120_v46, %v2322_v12  ;;  %v1712_v0 = vadd.f32 %v1680_v8, %v1451_v18  ;;  %v2280_v62 = vld [vmem:[#allocation4 + $0x111] sm:$0xff] }
 0x1d9   : > { %2642 = vperm.xlu1 %10212, %v1757_v25   ;;  %1612 = vperm.xlu0 %10211, %v1497_v21   ;;  %v1941_v30 = vmul.f32 %v11107_v40, %v1804_v32  ;;  %v4154_v25 = vld [vmem:[%s14882_s2 + $0x90] sm:$0xff]  ;;  %v4157_v32 = vld [vmem:[%s14882_s2 + $0xa8] sm:$0xff]  ;;  %v399_v18 = vld [vmem:[%s10417_s27 + $0xf8] sm:$0xff] }
 0x1da   : > { %v2826_v49 = vmax.f32 %v2794_v6, 0.0  ;;  %9583 = vmatprep.subr.bf16.mxu0 %v14889_v27  ;;  %v9587_v50 = vpack.c.bf16 %v4155_v48, %v4154_v25  ;;  %v2495_v56 = vadd.f32 %v2463_v5, %v2234_v44  ;;  %v637_v6 = vmul.f32 %v11083_v38, %v15003_v31  ;;  %v1759_v5 = vld [vmem:[#allocation4 + $0x112] sm:$0xff]  ;;  %432 = vst.msk [vmem:[#allocation4 + $0x189] sm:$0xff] %vm312_vm0, %v399_v18  ;;  %v15004_v25 = vld [vmem:[#allocation8_spill] sm:$0xff] }
 0x1db   : > { %v2066_v4 = vpop.permute.xlu0 %2065  ;;  %v1973_v35 = vadd.f32 %v1941_v30, %v1712_v0  ;;  %v9590_v42 = vpack.c.bf16 %v4157_v32, %v4156_v28  ;;  %v899_v30 = vmul.f32 %v11068_v20, %v10708_v1  ;;  %v638_v48 = vmul.f32 %v11083_v38, %v15004_v25  ;;  %v4160_v1 = vld [vmem:[%s14882_s2 + $0xc0] sm:$0xff]  ;;  %v4165_v18 = vld [vmem:[%s14882_s2 + $0xe8] sm:$0xff] }
 0x1dc   : > { %2858 = vst.msk [vmem:[#allocation2 + $0x94] sm:$0xff] %vm252_vm2, %v2826_v49  ;;  %v1548_v33 = vpop.permute.xlu1 %1547  ;;  %9585 = vmatpush1.bf16.msra.mxu0 %v9584_v36  ;;  %v2203_v12 = vmul.f32 %v11113_v53, %v2066_v4 }
 0x1dd   : > { %2386 = vperm.xlu1 %10212, %v1497_v21   ;;  %2647 = vperm.xlu0 %10211, %v2540_v9   ;;  %v930_v21 = vadd.f32 %v898_v45, %v637_v6  ;;  %v1681_v8 = vmul.f32 %v11100_v47, %v1548_v33  ;;  %v1160_v45 = vmul.f32 %v11075_v51, %v10916_v2  ;;  %v1499_v2 = vld [vmem:[#allocation4 + $0x121] sm:$0xff] }
 0x1de   : > { %9586 = vmatprep.subr.bf16.mxu0 %v14889_v27  ;;  %v2235_v49 = vadd.f32 %v2203_v12, %v1973_v35  ;;  %v931_v31 = vadd.f32 %v899_v30, %v638_v48  ;;  %v1161_v48 = vmul.f32 %v11075_v51, %v10925_v7 }
 0x1df   : > { %v1809_v54 = vpop.permute.xlu0 %1808  ;;  %v1191_v63 = vadd.f32 %v1159_v26, %v930_v21 }
 0x1e0   : > { %v2583_v55 = vpop.permute.xlu1 %2582  ;;  %9588 = vmatpush1.bf16.msra.mxu0 %v9587_v50  ;;  %v1192_v28 = vadd.f32 %v1160_v45, %v931_v31 }
 0x1e1   : > { %v2724_v59 = vmul.f32 %v11127_v15, %v2583_v55  ;;  %2130 = vperm.xlu1 %10212, %v2019_v41   ;;  %2391 = vperm.xlu0 %10211, %v2280_v62   ;;  %v1452_v41 = vadd.f32 %v1420_v58, %v1191_v63 }
 0x1e2   : > { %9589 = vmatprep.subr.bf16.mxu0 %v14889_v27 }
 0x1e3   : > { %v1553_v23 = vpop.permute.xlu0 %1552  ;;  %v2756_v57 = vadd.f32 %v2724_v59, %v2495_v56  ;;  %v1713_v50 = vadd.f32 %v1681_v8, %v1452_v41  ;;  %v1942_v56 = vmul.f32 %v11107_v40, %v1809_v54  ;;  %v1421_v54 = vmul.f32 %v11088_v14, %v11029_v11  ;;  %v4163_v11 = vld [vmem:[%s14882_s2 + $0xd8] sm:$0xff] }
 0x1e4   : > { %v2327_v24 = vpop.permute.xlu1 %2326  ;;  %9591 = vmatpush1.bf16.msra.mxu0 %v9590_v42  ;;  %v1682_v21 = vmul.f32 %v11100_v47, %v1553_v23  ;;  %v2542_v42 = vld [vmem:[#allocation4 + $0x122] sm:$0xff] }
 0x1e5   : > { %v2795_v29 = vadd.f32 %v11142_v60, %v2756_v57  ;;  %v2464_v4 = vmul.f32 %v11120_v46, %v2327_v24  ;;  %1873 = vperm.xlu1 %10212, %v2540_v9   ;;  %2135 = vperm.xlu0 %10211, %v2020_v43   ;;  %v4159_v9 = vld [vmem:[%s14882_s2 + $0xb8] sm:$0xff]  ;;  %v1974_v32 = vadd.f32 %v1942_v56, %v1713_v50  ;;  %v4162_v24 = vld [vmem:[%s14882_s2 + $0xd0] sm:$0xff] }
 0x1e6   : > { %9592 = vmatprep.subr.bf16.mxu0 %v14889_v27  ;;  %v9593_v33 = vpack.c.bf16 %v4159_v9, %v4158_v17  ;;  %v900_v17 = vmul.f32 %v11068_v20, %v10717_v19  ;;  %v2919_v19 = vld [vmem:[#allocation2 + $0x34] sm:$0xff] }
 0x1e7   : > { %v2588_v39 = vpop.permute.xlu0 %2587  ;;  %v2827_v52 = vmax.f32 %v2795_v29, 0.0  ;;  %v2496_v13 = vadd.f32 %v2464_v4, %v2235_v49  ;;  %v9599_v29 = vpack.c.bf16 %v4163_v11, %v4162_v24  ;;  %v1453_v4 = vadd.f32 %v1421_v54, %v1192_v28  ;;  %v4166_v50 = vld [vmem:[%s14882_s2 + $0xf0] sm:$0xff]  ;;  %v4167_v56 = vld [vmem:[%s14882_s2 + $0xf8] sm:$0xff] }
 0x1e8   : > { %v2725_v36 = vmul.f32 %v11127_v15, %v2588_v39  ;;  %v2071_v44 = vpop.permute.xlu1 %2070  ;;  %9594 = vmatpush1.bf16.msra.mxu0 %v9593_v33 }
 0x1e9   : > { %2859 = vst.msk [vmem:[#allocation2 + $0x9c] sm:$0xff] %vm252_vm2, %v2827_v52  ;;  %1617 = vperm.xlu1 %10212, %v2280_v62   ;;  %1878 = vperm.xlu0 %10211, %v1759_v5   ;;  %v4161_v62 = vld [vmem:[%s14882_s2 + $0xc8] sm:$0xff]  ;;  %v2204_v26 = vmul.f32 %v11113_v53, %v2071_v44 }
 0x1ea   : > { %v2757_v0 = vadd.f32 %v2725_v36, %v2496_v13  ;;  %9595 = vmatprep.subr.bf16.mxu0 %v14889_v27  ;;  %v9596_v59 = vpack.c.bf16 %v4161_v62, %v4160_v1  ;;  %v2021_v52 = vld [vmem:[#allocation4 + $0x128] sm:$0xff]  ;;  %v1714_v13 = vadd.f32 %v1682_v21, %v1453_v4  ;;  %v4164_v36 = vld [vmem:[%s14882_s2 + $0xe0] sm:$0xff]  ;;  %v1422_v1 = vmul.f32 %v11088_v14, %v11036_v34  ;;  %v15006_v4 = vld [vmem:[#allocation10_spill] sm:$0xff] }
 0x1eb   : > { %v2332_v55 = vpop.permute.xlu0 %2331  ;;  %v2236_v23 = vadd.f32 %v2204_v26, %v1974_v32  ;;  %v9602_v44 = vpack.c.bf16 %v4165_v18, %v4164_v36  ;;  %v3175_v62 = vld [vmem:[#allocation2 + $0x62] sm:$0xff]  ;;  %v1423_v18 = vmul.f32 %v11088_v14, %v11034_v22 }
 0x1ec   : > { %v2796_v35 = vadd.f32 %v11142_v60, %v2757_v0  ;;  %v1814_v12 = vpop.permute.xlu1 %1813  ;;  %9597 = vmatpush1.bf16.msra.mxu0 %v9596_v59  ;;  %v2465_v63 = vmul.f32 %v11120_v46, %v2332_v55  ;;  %v15005_v0 = vld [vmem:[#allocation11_spill] sm:$0xff]  ;;  %v9605_v59 = vpack.c.bf16 %v4167_v56, %v4166_v50  ;;  %v2282_v34 = vld [vmem:[#allocation4 + $0x129] sm:$0xff]  ;;  %v902_v56 = vmul.f32 %v11068_v20, %v10723_v61 }
 0x1ed   : > { %2652 = vperm.xlu1 %10212, %v1759_v5   ;;  %1622 = vperm.xlu0 %10211, %v1499_v2   ;;  %v1943_v39 = vmul.f32 %v11107_v40, %v1814_v12  ;;  %v639_v25 = vmul.f32 %v11083_v38, %v15005_v0 }
 0x1ee   : > { %v2828_v6 = vmax.f32 %v2796_v35, 0.0  ;;  %9598 = vmatprep.subr.bf16.mxu0 %v14889_v27  ;;  %v2497_v5 = vadd.f32 %v2465_v63, %v2236_v23  ;;  %v1162_v63 = vmul.f32 %v11075_v51, %v10922_v3 }
 0x1ef   : > { %v2076_v57 = vpop.permute.xlu0 %2075  ;;  %v1975_v33 = vadd.f32 %v1943_v39, %v1714_v13  ;;  %v932_v35 = vadd.f32 %v900_v17, %v639_v25 }
 0x1f0   : > { %2860 = vst.msk [vmem:[#allocation2 + $0xac] sm:$0xff] %vm252_vm2, %v2828_v6  ;;  %v1558_v43 = vpop.permute.xlu1 %1557  ;;  %v3912_v58 = vld [vmem:[#allocation2 + $0x96] sm:$0xff]  ;;  %v3913_v49 = vld [vmem:[#allocation2 + $0x9e] sm:$0xff]  ;;  %9600 = vmatpush1.bf16.msra.mxu0 %v9599_v29  ;;  %v2205_v30 = vmul.f32 %v11113_v53, %v2076_v57 }
 0x1f1   : > { %2396 = vperm.xlu1 %10212, %v1499_v2   ;;  %3944 = vst.msk [vmem:[#allocation3 + $0x20] sm:$0xff] %vm252_vm2, %v3912_v58  ;;  %3945 = vst.msk [vmem:[#allocation3 + $0x48] sm:$0xff] %vm252_vm2, %v3913_v49  ;;  %2657 = vperm.xlu0 %10211, %v2542_v42   ;;  %v1193_v26 = vadd.f32 %v1161_v48, %v932_v35  ;;  %v1683_v28 = vmul.f32 %v11100_v47, %v1558_v43 }
 0x1f2   : > { %9601 = vmatprep.subr.bf16.mxu0 %v14889_v27  ;;  %v2237_v31 = vadd.f32 %v2205_v30, %v1975_v33  ;;  %v901_v58 = vmul.f32 %v11068_v20, %v10714_v37  ;;  %v640_v43 = vmul.f32 %v11083_v38, %v15006_v4  ;;  %v2543_v33 = vld [vmem:[#allocation4 + $0x12a] sm:$0xff] }
 0x1f3   : > { %v1819_v8 = vpop.permute.xlu0 %1818  ;;  %v1454_v49 = vadd.f32 %v1422_v1, %v1193_v26  ;;  %v2920_v1 = vld [vmem:[#allocation2 + $0x3c] sm:$0xff] }
 0x1f4   : > { %v2593_v9 = vpop.permute.xlu1 %2592  ;;  %9603 = vmatpush1.bf16.msra.mxu0 %v9602_v44  ;;  %v933_v37 = vadd.f32 %v901_v58, %v640_v43  ;;  %v2283_v26 = vld [vmem:[#allocation4 + $0x139] sm:$0xff] }
 0x1f5   : > { %v2726_v41 = vmul.f32 %v11127_v15, %v2593_v9  ;;  %2140 = vperm.xlu1 %10212, %v2021_v52   ;;  %1883 = vperm.xlu0 %10211, %v2542_v42   ;;  %v2022_v42 = vld [vmem:[#allocation4 + $0x138] sm:$0xff]  ;;  %v1715_v39 = vadd.f32 %v1683_v28, %v1454_v49  ;;  %v1944_v52 = vmul.f32 %v11107_v40, %v1819_v8 }
 0x1f6   : > { %9604 = vmatprep.subr.bf16.mxu0 %v14889_v27  ;;  %v1194_v30 = vadd.f32 %v1162_v63, %v933_v37  ;;  %v15008_v63 = vld [vmem:[#allocation33_spill] sm:$0xff] }
 0x1f7   : > { %v1563_v45 = vpop.permute.xlu0 %1562  ;;  %v2758_v55 = vadd.f32 %v2726_v41, %v2497_v5  ;;  %v3176_v5 = vld [vmem:[#allocation2 + $0x6a] sm:$0xff]  ;;  %v1976_v3 = vadd.f32 %v1944_v52, %v1715_v39  ;;  %v903_v39 = vmul.f32 %v11068_v20, %v15008_v63  ;;  %v11481_v63 = vld [vmem:[%s14881_s1 + $0x7] ss:$0 sm:$0xff] }
 0x1f8   : > { %v2337_v7 = vpop.permute.xlu1 %2336  ;;  %v3980_v12 = vld [vmem:[#allocation3 + $0x20] sm:$0xff]  ;;  %v3985_v2 = vld [vmem:[#allocation3 + $0x48] sm:$0xff]  ;;  %9606 = vmatpush1.bf16.msra.mxu0 %v9605_v59  ;;  %v1684_v41 = vmul.f32 %v11100_v47, %v1563_v45  ;;  %v1455_v48 = vadd.f32 %v1423_v18, %v1194_v30  ;;  %v15007_v59 = vld [vmem:[#allocation13_spill] sm:$0xff] }
 0x1f9   : > { %v2797_v54 = vadd.f32 %v11142_v60, %v2758_v55  ;;  %v2466_v6 = vmul.f32 %v11120_v46, %v2337_v7  ;;  %3239 = vrot.lane.b32.xlu1 %v3175_v62, %s10249_s19  ;;  %9447 = vmatprep.mubr.msk.f32.mxu1 %vm252_vm2, %v3980_v12 }
 0x1fa   : > { %9448 = vmatmul.mubr.msk.f32.vlgmr.msra.gmra.mrb[0].mxu1 %vm252_vm2, %v3985_v2  ;;  %2983 = vrot.lane.b32.xlu0 %v2919_v19, %s10249_s19  ;;  %v1716_v45 = vadd.f32 %v1684_v41, %v1455_v48 }
 0x1fb   : > { %v2598_v57 = vpop.permute.xlu0 %2597  ;;  %v2829_v32 = vmax.f32 %v2797_v54, 0.0  ;;  %v2498_v21 = vadd.f32 %v2466_v6, %v2237_v31  ;;  %9607 = vmatprep.subr.bf16.mxu0 %v14889_v27  ;;  %v641_v31 = vmul.f32 %v11083_v38, %v15007_v59  ;;  %v1163_v54 = vmul.f32 %v11075_v51, %v10931_v16 }
 0x1fc   : > { %v2727_v24 = vmul.f32 %v11127_v15, %v2598_v57  ;;  %v2081_v11 = vpop.permute.xlu1 %2080 }
 0x1fd   : > { %2861 = vst.msk [vmem:[#allocation2 + $0xb4] sm:$0xff] %vm252_vm2, %v2829_v32  ;;  %2401 = vperm.xlu1 %10212, %v2282_v34   ;;  %v2206_v9 = vmul.f32 %v11113_v53, %v2081_v11  ;;  %v934_v61 = vadd.f32 %v902_v56, %v641_v31 }
 0x1fe   : > { %v2759_v29 = vadd.f32 %v2727_v24, %v2498_v21  ;;  %2145 = vperm.xlu0 %10211, %v2022_v42   ;;  %v2023_v24 = vld [vmem:[#allocation4 + $0x140] sm:$0xff] }
 0x1ff   : > { %v2342_v23 = vpop.permute.xlu0 %2341  ;;  %v2238_v22 = vadd.f32 %v2206_v9, %v1976_v3  ;;  %v1195_v16 = vadd.f32 %v1163_v54, %v934_v61  ;;  %v2544_v9 = vld [vmem:[#allocation4 + $0x13a] sm:$0xff] }
 0x200   : > { %v2798_v13 = vadd.f32 %v11142_v60, %v2759_v29  ;;  %v1824_v36 = vpop.permute.xlu1 %1823  ;;  %v2467_v55 = vmul.f32 %v11120_v46, %v2342_v23  ;;  %v11459_v61 = vld [vmem:[%s14881_s1] ss:$0 sm:$0xff] }
 0x201   : > { %1627 = vperm.xlu1 %10212, %v2282_v34   ;;  %v1945_v19 = vmul.f32 %v11107_v40, %v1824_v36  ;;  %v1424_v34 = vmul.f32 %v11088_v14, %v11041_v10  ;;  %v15009_v36 = vld [vmem:[#allocation12_spill] sm:$0xff] }
 0x202   : > { %v2830_v17 = vmax.f32 %v2798_v13, 0.0  ;;  %3241 = vrot.lane.b32.xlu0 %v3176_v5, %s10249_s19  ;;  %v2499_v7 = vadd.f32 %v2467_v55, %v2238_v22  ;;  %v642_v37 = vmul.f32 %v11083_v38, %v15009_v36  ;;  %v3178_v36 = vld [vmem:[#allocation2 + $0x82] sm:$0xff] }
 0x203   : > { %v2086_v44 = vpop.permute.xlu0 %2085  ;;  %v1977_v62 = vadd.f32 %v1945_v19, %v1716_v45  ;;  %v1456_v52 = vadd.f32 %v1424_v34, %v1195_v16  ;;  %v2921_v45 = vld [vmem:[#allocation2 + $0x4c] sm:$0xff]  ;;  %v15013_v34 = vld [vmem:[#allocation15_spill] sm:$0xff] }
 0x204   : > { %2862 = vst.msk [vmem:[#allocation2 + $0xc4] sm:$0xff] %vm252_vm2, %v2830_v17  ;;  %v3914_v8 = vld [vmem:[#allocation2 + $0xae] sm:$0xff]  ;;  %v1568_v0 = vpop.permute.xlu1 %1567  ;;  %v3915_v25 = vld [vmem:[#allocation2 + $0xb6] sm:$0xff]  ;;  %v2207_v12 = vmul.f32 %v11113_v53, %v2086_v44  ;;  %v935_v41 = vadd.f32 %v903_v39, %v642_v37  ;;  %v15015_v16 = vld [vmem:[#allocation75_spill] sm:$0xff] }
 0x205   : > { %3946 = vst.msk [vmem:[#allocation3 + $0x70] sm:$0xff] %vm252_vm2, %v3914_v8  ;;  %2662 = vperm.xlu1 %10212, %v2543_v33   ;;  %3947 = vst.msk [vmem:[#allocation3 + $0x98] sm:$0xff] %vm252_vm2, %v3915_v25  ;;  %v1685_v29 = vmul.f32 %v11100_v47, %v1568_v0  ;;  %v3177_v17 = vld [vmem:[#allocation2 + $0x7a] sm:$0xff]  ;;  %v15010_v44 = vld [vmem:[#allocation53_spill] sm:$0xff] }
 0x206   : > { %1888 = vperm.xlu0 %10211, %v2543_v33   ;;  %v2239_v11 = vadd.f32 %v2207_v12, %v1977_v62  ;;  %v1164_v5 = vmul.f32 %v11075_v51, %v15010_v44  ;;  %v15011_v8 = vld [vmem:[#allocation73_spill] sm:$0xff]  ;;  %v11445_v12 = vld [vmem:[%s14881_s1 + $0x1] ss:$0 sm:$0xff]  ;;  %v2545_v37 = vld [vmem:[#allocation4 + $0x142] sm:$0xff] }
 0x207   : > { %v1829_v50 = vpop.permute.xlu0 %1828  ;;  %v1717_v33 = vadd.f32 %v1685_v29, %v1456_v52  ;;  %v1425_v0 = vmul.f32 %v11088_v14, %v15011_v8  ;;  %v11495_v44 = vld [vmem:[%s14881_s1 + $0x8] ss:$0 sm:$0xff]  ;;  %v15017_v8 = vld [vmem:[#allocation14_spill] sm:$0xff] }
 0x208   : > { %v2603_v35 = vpop.permute.xlu1 %2602  ;;  %v1946_v30 = vmul.f32 %v11107_v40, %v1829_v50  ;;  %v1196_v22 = vadd.f32 %v1164_v5, %v935_v41 }
 0x209   : > { %v2728_v2 = vmul.f32 %v11127_v15, %v2603_v35  ;;  %1371 = vperm.xlu1 %10212, %v2022_v42  }
 0x20a   : > { %2985 = vrot.lane.b32.xlu0 %v2920_v1, %s10249_s19  ;;  %v1978_v55 = vadd.f32 %v1946_v30, %v1717_v33  ;;  %v1457_v35 = vadd.f32 %v1425_v0, %v1196_v22  ;;  %v15016_v30 = vld [vmem:[#allocation34_spill] sm:$0xff]  ;;  %v644_v0 = vmul.f32 %v11459_v61, %v15017_v8 }
 0x20b   : > { %v1573_v6 = vpop.permute.xlu0 %1572  ;;  %v2760_v57 = vadd.f32 %v2728_v2, %v2499_v7  ;;  %v15012_v2 = vld [vmem:[#allocation35_spill] sm:$0xff] }
 0x20c   : > { %v2347_v28 = vpop.permute.xlu1 %2346  ;;  %v3990_v32 = vld [vmem:[#allocation3 + $0x70] sm:$0xff]  ;;  %v3995_v21 = vld [vmem:[#allocation3 + $0x98] sm:$0xff]  ;;  %v1686_v51 = vmul.f32 %v11100_v47, %v1573_v6  ;;  %v2284_v47 = vld [vmem:[#allocation4 + $0x141] sm:$0xff]  ;;  %v904_v59 = vmul.f32 %v11445_v12, %v15012_v2 }
 0x20d   : > { %v2799_v42 = vadd.f32 %v11142_v60, %v2760_v57  ;;  %v2468_v58 = vmul.f32 %v11120_v46, %v2347_v28  ;;  %2406 = vperm.xlu1 %10212, %v2283_v26   ;;  %9450 = vmatprep.mubr.msk.f32.mxu1 %vm252_vm2, %v3990_v32  ;;  %v11452_v6 = vld [vmem:[%s14881_s1 + $0x6] ss:$0 sm:$0xff]  ;;  %v643_v28 = vmul.f32 %v11459_v61, %v15013_v34  ;;  %v11466_v32 = vld [vmem:[%s14881_s1 + $0x2] ss:$0 sm:$0xff] }
 0x20e   : > { %9451 = vmatmul.mubr.msk.f32.gmra.mrb[2].mxu1 %vm252_vm2, %v3995_v21  ;;  %2150 = vperm.xlu0 %10211, %v2023_v24   ;;  %v1718_v62 = vadd.f32 %v1686_v51, %v1457_v35  ;;  %v15014_v21 = vld [vmem:[#allocation55_spill] sm:$0xff] }
 0x20f   : > { %v2608_v49 = vpop.permute.xlu0 %2607  ;;  %v2831_v4 = vmax.f32 %v2799_v42, 0.0  ;;  %v2500_v10 = vadd.f32 %v2468_v58, %v2239_v11  ;;  %v11473_v58 = vld [vmem:[%s14881_s1 + $0x3] ss:$0 sm:$0xff] }
 0x210   : > { %v2729_v43 = vmul.f32 %v11127_v15, %v2608_v49  ;;  %v2091_v23 = vpop.permute.xlu1 %2090  ;;  %v1426_v49 = vmul.f32 %v11473_v58, %v15015_v16 }
 0x211   : > { %2863 = vst.msk [vmem:[#allocation2 + $0xcc] sm:$0xff] %vm252_vm2, %v2831_v4  ;;  %1632 = vperm.xlu1 %10212, %v2283_v26   ;;  %v2208_v38 = vmul.f32 %v11113_v53, %v2091_v23 }
 0x212   : > { %v2761_v13 = vadd.f32 %v2729_v43, %v2500_v10  ;;  %3243 = vrot.lane.b32.xlu0 %v3177_v17, %s10249_s19 }
 0x213   : > { %v2352_v18 = vpop.permute.xlu0 %2351  ;;  %v2240_v14 = vadd.f32 %v2208_v38, %v1978_v55  ;;  %v15018_v38 = vld [vmem:[#allocation54_spill] sm:$0xff]  ;;  %v11509_v55 = vld [vmem:[%s14881_s1 + $0x5] ss:$0 sm:$0xff] }
 0x214   : > { %v2800_v3 = vadd.f32 %v11142_v60, %v2761_v13  ;;  %v1834_v20 = vpop.permute.xlu1 %1833  ;;  %v2469_v1 = vmul.f32 %v11120_v46, %v2352_v18  ;;  %v2024_v46 = vld [vmem:[#allocation4 + $0x150] sm:$0xff] }
 0x215   : > { %2667 = vperm.xlu1 %10212, %v2544_v9   ;;  %v1947_v53 = vmul.f32 %v11107_v40, %v1834_v20 }
 0x216   : > { %v2832_v25 = vmax.f32 %v2800_v3, 0.0  ;;  %1893 = vperm.xlu0 %10211, %v2544_v9   ;;  %v2501_v54 = vadd.f32 %v2469_v1, %v2240_v14  ;;  %v905_v3 = vmul.f32 %v11445_v12, %v15016_v30  ;;  %v15019_v14 = vld [vmem:[#allocation74_spill] sm:$0xff] }
 0x217   : > { %v2096_v48 = vpop.permute.xlu0 %2095  ;;  %v1979_v40 = vadd.f32 %v1947_v53, %v1718_v62  ;;  %v1427_v1 = vmul.f32 %v11473_v58, %v15019_v14 }
 0x218   : > { %2864 = vst.msk [vmem:[#allocation2 + $0xdc] sm:$0xff] %vm252_vm2, %v2832_v25  ;;  %v3916_v19 = vld [vmem:[#allocation2 + $0xc6] sm:$0xff]  ;;  %v1578_v50 = vpop.permute.xlu1 %1577  ;;  %v3917_v56 = vld [vmem:[#allocation2 + $0xce] sm:$0xff]  ;;  %v2209_v26 = vmul.f32 %v11452_v6, %v2096_v48  ;;  %v1166_v48 = vmul.f32 %v11466_v32, %v15018_v38  ;;  %v937_v35 = vadd.f32 %v905_v3, %v644_v0 }
 0x219   : > { %3948 = vst.msk [vmem:[#allocation3 + $0xc0] sm:$0xff] %vm252_vm2, %v3916_v19  ;;  %1376 = vperm.xlu1 %10212, %v2023_v24   ;;  %3949 = vst.msk [vmem:[#allocation3 + $0xe8] sm:$0xff] %vm252_vm2, %v3917_v56  ;;  %v1165_v24 = vmul.f32 %v11466_v32, %v15014_v21  ;;  %v11515_v19 = vld [vmem:[%s14884_s4] ss:$0 sm:$0xff]  ;;  %v2922_v56 = vld [vmem:[#allocation2 + $0x54] sm:$0xff] }
 0x21a   : > { %2987 = vrot.lane.b32.xlu0 %v2921_v45, %s10249_s19  ;;  %v2241_v43 = vadd.f32 %v2209_v26, %v1979_v40  ;;  %v1198_v2 = vadd.f32 %v1166_v48, %v937_v35  ;;  %v2025_v26 = vld [vmem:[#allocation4 + $0x158] sm:$0xff] }
 0x21b   : > { %v1839_v7 = vpop.permute.xlu0 %1838 }
 0x21c   : > { %v2613_v31 = vpop.permute.xlu1 %2612  ;;  %v1948_v51 = vmul.f32 %v11509_v55, %v1839_v7  ;;  %v2285_v7 = vld [vmem:[#allocation4 + $0x151] sm:$0xff]  ;;  %v1459_v34 = vadd.f32 %v1427_v1, %v1198_v2  ;;  %v15025_v1 = vld [vmem:[#allocation16_spill] sm:$0xff] }
 0x21d   : > { %v2730_v57 = vmul.f32 %v11127_v15, %v2613_v31  ;;  %2411 = vperm.xlu1 %10212, %v2284_v47   ;;  %v936_v15 = vadd.f32 %v904_v59, %v643_v28  ;;  %v15026_v2 = vld [vmem:[#allocation56_spill] sm:$0xff] }
 0x21e   : > { %2155 = vperm.xlu0 %10211, %v2024_v46  }
 0x21f   : > { %v1583_v11 = vpop.permute.xlu0 %1582  ;;  %v2762_v42 = vadd.f32 %v2730_v57, %v2501_v54  ;;  %v1197_v52 = vadd.f32 %v1165_v24, %v936_v15 }
 0x220   : > { %v2357_v29 = vpop.permute.xlu1 %2356  ;;  %v4000_v4 = vld [vmem:[#allocation3 + $0xc0] sm:$0xff]  ;;  %v4005_v10 = vld [vmem:[#allocation3 + $0xe8] sm:$0xff] }
 0x221   : > { %v2801_v23 = vadd.f32 %v11142_v60, %v2762_v42  ;;  %v2470_v39 = vmul.f32 %v11481_v63, %v2357_v29  ;;  %1637 = vperm.xlu1 %10212, %v2284_v47   ;;  %9453 = vmatprep.mubr.msk.f32.mxu1 %vm252_vm2, %v4000_v4  ;;  %v11489_v60 = vld [vmem:[%s14881_s1 + $0x4] ss:$0 sm:$0xff]  ;;  %v1458_v20 = vadd.f32 %v1426_v49, %v1197_v52  ;;  %v15020_v42 = vld [vmem:[#allocation37_spill] sm:$0xff] }
 0x222   : > { %9454 = vmatmul.mubr.msk.f32.gmra.mrb[4].mxu1 %vm252_vm2, %v4005_v10  ;;  %v1687_v18 = vmul.f32 %v11489_v60, %v1578_v50  ;;  %3245 = vrot.lane.b32.xlu0 %v3178_v36, %s10249_s19  ;;  %v1688_v31 = vmul.f32 %v11489_v60, %v1583_v11  ;;  %v906_v15 = vmul.f32 %v11445_v12, %v15020_v42  ;;  %v3179_v36 = vld [vmem:[#allocation2 + $0x92] sm:$0xff] }
 0x223   : > { %v2618_v13 = vpop.permute.xlu0 %2617  ;;  %v2833_v17 = vmax.f32 %v2801_v23, 0.0  ;;  %v2502_v9 = vadd.f32 %v2470_v39, %v2241_v43  ;;  %v15021_v43 = vld [vmem:[#allocation17_spill] sm:$0xff] }
 0x224   : > { %v2731_v5 = vmul.f32 %v11495_v44, %v2618_v13  ;;  %v2101_v33 = vpop.permute.xlu1 %2100  ;;  %v1719_v22 = vadd.f32 %v1687_v18, %v1458_v20  ;;  %v1720_v11 = vadd.f32 %v1688_v31, %v1459_v34  ;;  %v645_v23 = vmul.f32 %v11459_v61, %v15021_v43  ;;  %v15022_v39 = vld [vmem:[#allocation57_spill] sm:$0xff]  ;;  %v2026_v34 = vld [vmem:[#allocation4 + $0x168] sm:$0xff] }
 0x225   : > { %2865 = vst.msk [vmem:[#allocation2 + $0xe4] sm:$0xff] %vm252_vm2, %v2833_v17  ;;  %2672 = vperm.xlu1 %10212, %v2545_v37   ;;  %v2210_v47 = vmul.f32 %v11452_v6, %v2101_v33  ;;  %v1167_v52 = vmul.f32 %v11466_v32, %v15022_v39 }
 0x226   : > { %v2763_v41 = vadd.f32 %v2731_v5, %v2502_v9  ;;  %1898 = vperm.xlu0 %10211, %v2545_v37   ;;  %v1980_v59 = vadd.f32 %v1948_v51, %v1719_v22  ;;  %v2546_v37 = vld [vmem:[#allocation4 + $0x152] sm:$0xff]  ;;  %v938_v17 = vadd.f32 %v906_v15, %v645_v23 }
 0x227   : > { %v2362_v25 = vpop.permute.xlu0 %2361  ;;  %v15023_v9 = vld [vmem:[#allocation77_spill] sm:$0xff] }
 0x228   : > { %v2802_v50 = vadd.f32 %v11515_v19, %v2763_v41  ;;  %v1844_v45 = vpop.permute.xlu1 %1843  ;;  %v2242_v28 = vadd.f32 %v2210_v47, %v1980_v59  ;;  %v1428_v5 = vmul.f32 %v11473_v58, %v15023_v9  ;;  %v1199_v0 = vadd.f32 %v1167_v52, %v938_v17 }
 0x229   : > { %1381 = vperm.xlu1 %10212, %v2024_v46   ;;  %v2471_v46 = vmul.f32 %v11481_v63, %v2362_v25  ;;  %v1949_v21 = vmul.f32 %v11509_v55, %v1844_v45  ;;  %v15024_v45 = vld [vmem:[#allocation36_spill] sm:$0xff]  ;;  %v1168_v59 = vmul.f32 %v11466_v32, %v15026_v2 }
 0x22a   : > { %v2834_v53 = vmax.f32 %v2802_v50, 0.0  ;;  %2989 = vrot.lane.b32.xlu0 %v2922_v56, %s10249_s19  ;;  %v907_v56 = vmul.f32 %v11445_v12, %v15024_v45  ;;  %v1460_v35 = vadd.f32 %v1428_v5, %v1199_v0 }
 0x22b   : > { %v2106_v62 = vpop.permute.xlu0 %2105  ;;  %v2503_v49 = vadd.f32 %v2471_v46, %v2242_v28  ;;  %v1981_v29 = vadd.f32 %v1949_v21, %v1720_v11 }
 0x22c   : > { %2866 = vst.msk [vmem:[#allocation2 + $0xf4] sm:$0xff] %vm252_vm2, %v2834_v53  ;;  %v3918_v54 = vld [vmem:[#allocation2 + $0xde] sm:$0xff]  ;;  %v1588_v40 = vpop.permute.xlu1 %1587  ;;  %v3919_v57 = vld [vmem:[#allocation2 + $0xe6] sm:$0xff]  ;;  %v2211_v4 = vmul.f32 %v11452_v6, %v2106_v62  ;;  %v646_v53 = vmul.f32 %v11459_v61, %v15025_v1 }
 0x22d   : > { %3950 = vst.msk [vmem:[#allocation3 + $0x110] sm:$0xff] %vm252_vm2, %v3918_v54  ;;  %2416 = vperm.xlu1 %10212, %v2285_v7   ;;  %3951 = vst.msk [vmem:[#allocation3 + $0x138] sm:$0xff] %vm252_vm2, %v3919_v57  ;;  %v1689_v38 = vmul.f32 %v11489_v60, %v1588_v40  ;;  %v2923_v62 = vld [vmem:[#allocation2 + $0x64] sm:$0xff] }
 0x22e   : > { %2160 = vperm.xlu0 %10211, %v2025_v26   ;;  %v2243_v20 = vadd.f32 %v2211_v4, %v1981_v29  ;;  %v939_v28 = vadd.f32 %v907_v56, %v646_v53 }
 0x22f   : > { %v1849_v24 = vpop.permute.xlu0 %1848  ;;  %v1721_v31 = vadd.f32 %v1689_v38, %v1460_v35 }
 0x230   : > { %v2623_v16 = vpop.permute.xlu1 %2622  ;;  %v1950_v54 = vmul.f32 %v11509_v55, %v1849_v24  ;;  %v1200_v15 = vadd.f32 %v1168_v59, %v939_v28  ;;  %v15032_v28 = vld [vmem:[#allocation38_spill] sm:$0xff] }
 0x231   : > { %v2732_v10 = vmul.f32 %v11495_v44, %v2623_v16  ;;  %1642 = vperm.xlu1 %10212, %v2285_v7   ;;  %v2286_v7 = vld [vmem:[#allocation4 + $0x159] sm:$0xff] }
 0x232   : > { %3247 = vrot.lane.b32.xlu0 %v3179_v36, %s10249_s19  ;;  %v1982_v16 = vadd.f32 %v1950_v54, %v1721_v31  ;;  %v3180_v36 = vld [vmem:[#allocation2 + $0x9a] sm:$0xff] }
 0x233   : > { %v1593_v13 = vpop.permute.xlu0 %1592  ;;  %v2764_v18 = vadd.f32 %v2732_v10, %v2503_v49 }
 0x234   : > { %v2367_v33 = vpop.permute.xlu1 %2366  ;;  %v4010_v30 = vld [vmem:[#allocation3 + $0x110] sm:$0xff]  ;;  %v4015_v3 = vld [vmem:[#allocation3 + $0x138] sm:$0xff]  ;;  %v1690_v49 = vmul.f32 %v11489_v60, %v1593_v13 }
 0x235   : > { %v2803_v41 = vadd.f32 %v11515_v19, %v2764_v18  ;;  %v2472_v8 = vmul.f32 %v11481_v63, %v2367_v33  ;;  %2677 = vperm.xlu1 %10212, %v2546_v37   ;;  %9456 = vmatprep.mubr.msk.f32.mxu1 %vm252_vm2, %v4010_v30  ;;  %v2547_v13 = vld [vmem:[#allocation4 + $0x15a] sm:$0xff] }
 0x236   : > { %9457 = vmatmul.mubr.msk.f32.gmra.mrb[6].mxu1 %vm252_vm2, %v4015_v3  ;;  %1903 = vperm.xlu0 %10211, %v2546_v37   ;;  %v15028_v18 = vld [vmem:[#allocation39_spill] sm:$0xff] }
 0x237   : > { %v2628_v25 = vpop.permute.xlu0 %2627  ;;  %v2835_v48 = vmax.f32 %v2803_v41, 0.0  ;;  %v2504_v22 = vadd.f32 %v2472_v8, %v2243_v20  ;;  %v908_v17 = vmul.f32 %v11445_v12, %v15028_v18  ;;  %v15029_v20 = vld [vmem:[#allocation19_spill] sm:$0xff]  ;;  %v2548_v18 = vld [vmem:[#allocation4 + $0x16a] sm:$0xff] }
 0x238   : > { %v2733_v51 = vmul.f32 %v11495_v44, %v2628_v25  ;;  %v2111_v50 = vpop.permute.xlu1 %2110  ;;  %v647_v41 = vmul.f32 %v11459_v61, %v15029_v20  ;;  %v15030_v8 = vld [vmem:[#allocation59_spill] sm:$0xff] }
 0x239   : > { %2867 = vst.msk [vmem:[#allocation2 + $0xfc] sm:$0xff] %vm252_vm2, %v2835_v48  ;;  %1386 = vperm.xlu1 %10212, %v2025_v26   ;;  %v15027_v26 = vld [vmem:[#allocation76_spill] sm:$0xff]  ;;  %v2212_v11 = vmul.f32 %v11452_v6, %v2111_v50  ;;  %v1169_v0 = vmul.f32 %v11466_v32, %v15030_v8 }
 0x23a   : > { %v2765_v14 = vadd.f32 %v2733_v51, %v2504_v22  ;;  %2991 = vrot.lane.b32.xlu0 %v2923_v62, %s10249_s19  ;;  %v1429_v46 = vmul.f32 %v11473_v58, %v15027_v26  ;;  %v940_v48 = vadd.f32 %v908_v17, %v647_v41  ;;  %v15031_v22 = vld [vmem:[#allocation79_spill] sm:$0xff]  ;;  %v2924_v62 = vld [vmem:[#allocation2 + $0x6c] sm:$0xff] }
 0x23b   : > { %v2372_v47 = vpop.permute.xlu0 %2371  ;;  %v2244_v43 = vadd.f32 %v2212_v11, %v1982_v16  ;;  %v1430_v51 = vmul.f32 %v11473_v58, %v15031_v22 }
 0x23c   : > { %v2804_v40 = vadd.f32 %v11515_v19, %v2765_v14  ;;  %v1854_v57 = vpop.permute.xlu1 %1853  ;;  %v1461_v10 = vadd.f32 %v1429_v46, %v1200_v15  ;;  %v2473_v23 = vmul.f32 %v11481_v63, %v2372_v47  ;;  %v1201_v53 = vadd.f32 %v1169_v0, %v940_v48  ;;  %v15034_v15 = vld [vmem:[#allocation58_spill] sm:$0xff] }
 0x23d   : > { %2421 = vperm.xlu1 %10212, %v2286_v7   ;;  %v1951_v39 = vmul.f32 %v11509_v55, %v1854_v57  ;;  %v2027_v57 = vld [vmem:[#allocation4 + $0x170] sm:$0xff]  ;;  %v1170_v16 = vmul.f32 %v11466_v32, %v15034_v15 }
 0x23e   : > { %v2836_v21 = vmax.f32 %v2804_v40, 0.0  ;;  %2165 = vperm.xlu0 %10211, %v2026_v34   ;;  %v1722_v37 = vadd.f32 %v1690_v49, %v1461_v10  ;;  %v2505_v5 = vadd.f32 %v2473_v23, %v2244_v43  ;;  %v1462_v26 = vadd.f32 %v1430_v51, %v1201_v53  ;;  %v15035_v43 = vld [vmem:[#allocation78_spill] sm:$0xff] }
 0x23f   : > { %v2116_v42 = vpop.permute.xlu0 %2115  ;;  %v1431_v23 = vmul.f32 %v11473_v58, %v15035_v43 }
 0x240   : > { %2868 = vst.msk [vmem:[#allocation2 + $0x10c] sm:$0xff] %vm252_vm2, %v2836_v21  ;;  %v3920_v24 = vld [vmem:[#allocation2 + $0xf6] sm:$0xff]  ;;  %v1598_v29 = vpop.permute.xlu1 %1597  ;;  %v3921_v4 = vld [vmem:[#allocation2 + $0xfe] sm:$0xff]  ;;  %v1983_v33 = vadd.f32 %v1951_v39, %v1722_v37  ;;  %v2213_v30 = vmul.f32 %v11452_v6, %v2116_v42  ;;  %v3181_v37 = vld [vmem:[#allocation2 + $0xaa] sm:$0xff] }
 0x241   : > { %3952 = vst.msk [vmem:[#allocation3 + $0x160] sm:$0xff] %vm252_vm2, %v3920_v24  ;;  %1647 = vperm.xlu1 %10212, %v2286_v7   ;;  %3953 = vst.msk [vmem:[#allocation3 + $0x188] sm:$0xff] %vm252_vm2, %v3921_v4  ;;  %v2287_v7 = vld [vmem:[#allocation4 + $0x169] sm:$0xff]  ;;  %v1691_v2 = vmul.f32 %v11489_v60, %v1598_v29  ;;  %v15033_v21 = vld [vmem:[#allocation18_spill] sm:$0xff] }
 0x242   : > { %3249 = vrot.lane.b32.xlu0 %v3180_v36, %s10249_s19  ;;  %v2245_v35 = vadd.f32 %v2213_v30, %v1983_v33  ;;  %v648_v11 = vmul.f32 %v11459_v61, %v15033_v21 }
 0x243   : > { %v1859_v52 = vpop.permute.xlu0 %1858  ;;  %v1723_v49 = vadd.f32 %v1691_v2, %v1462_v26 }
 0x244   : > { %v2633_v9 = vpop.permute.xlu1 %2632  ;;  %v1952_v24 = vmul.f32 %v11509_v55, %v1859_v52 }
 0x245   : > { %v2734_v3 = vmul.f32 %v11495_v44, %v2633_v9  ;;  %2682 = vperm.xlu1 %10212, %v2547_v13  }
 0x246   : > { %1908 = vperm.xlu0 %10211, %v2547_v13   ;;  %v1984_v9 = vadd.f32 %v1952_v24, %v1723_v49 }
 0x247   : > { %v1603_v25 = vpop.permute.xlu0 %1602  ;;  %v2766_v38 = vadd.f32 %v2734_v3, %v2505_v5 }
 0x248   : > { %v2377_v50 = vpop.permute.xlu1 %2376  ;;  %v4020_v45 = vld [vmem:[#allocation3 + $0x160] sm:$0xff]  ;;  %v4025_v56 = vld [vmem:[#allocation3 + $0x188] sm:$0xff]  ;;  %v1692_v5 = vmul.f32 %v11489_v60, %v1603_v25 }
 0x249   : > { %v2805_v14 = vadd.f32 %v11515_v19, %v2766_v38  ;;  %v2474_v1 = vmul.f32 %v11481_v63, %v2377_v50  ;;  %1391 = vperm.xlu1 %10212, %v2026_v34   ;;  %9459 = vmatprep.mubr.msk.f32.mxu1 %vm252_vm2, %v4020_v45  ;;  %v909_v34 = vmul.f32 %v11445_v12, %v15032_v28  ;;  %v15036_v38 = vld [vmem:[#allocation41_spill] sm:$0xff] }
 0x24a   : > { %9460 = vmatmul.mubr.msk.f32.gmra.mrb[8].mxu1 %vm252_vm2, %v4025_v56  ;;  %2993 = vrot.lane.b32.xlu0 %v2924_v62, %s10249_s19  ;;  %v910_v48 = vmul.f32 %v11445_v12, %v15036_v38  ;;  %v2925_v62 = vld [vmem:[#allocation2 + $0x7c] sm:$0xff] }
 0x24b   : > { %v2638_v47 = vpop.permute.xlu0 %2637  ;;  %v2837_v59 = vmax.f32 %v2805_v14, 0.0  ;;  %v2506_v31 = vadd.f32 %v2474_v1, %v2245_v35  ;;  %v941_v10 = vadd.f32 %v909_v34, %v648_v11  ;;  %v15037_v35 = vld [vmem:[#allocation21_spill] sm:$0xff] }
 0x24c   : > { %v2735_v54 = vmul.f32 %v11495_v44, %v2638_v47  ;;  %v2121_v40 = vpop.permute.xlu1 %2120  ;;  %v649_v14 = vmul.f32 %v11459_v61, %v15037_v35  ;;  %v15038_v1 = vld [vmem:[#allocation61_spill] sm:$0xff] }
 0x24d   : > { %2869 = vst.msk [vmem:[#allocation2 + $0x114] sm:$0xff] %vm252_vm2, %v2837_v59  ;;  %2426 = vperm.xlu1 %10212, %v2287_v7   ;;  %v2214_v36 = vmul.f32 %v11452_v6, %v2121_v40  ;;  %v1202_v17 = vadd.f32 %v1170_v16, %v941_v10  ;;  %v1171_v53 = vmul.f32 %v11466_v32, %v15038_v1 }
 0x24e   : > { %v2767_v46 = vadd.f32 %v2735_v54, %v2506_v31  ;;  %2170 = vperm.xlu0 %10211, %v2027_v57   ;;  %v942_v59 = vadd.f32 %v910_v48, %v649_v14  ;;  %v15039_v31 = vld [vmem:[#allocation81_spill] sm:$0xff] }
 0x24f   : > { %v2382_v42 = vpop.permute.xlu0 %2381  ;;  %v1463_v3 = vadd.f32 %v1431_v23, %v1202_v17  ;;  %v2246_v20 = vadd.f32 %v2214_v36, %v1984_v9  ;;  %v1432_v54 = vmul.f32 %v11473_v58, %v15039_v31  ;;  %v15042_v17 = vld [vmem:[#allocation60_spill] sm:$0xff] }
 0x250   : > { %v2806_v29 = vadd.f32 %v11515_v19, %v2767_v46  ;;  %v1864_v4 = vpop.permute.xlu1 %1863  ;;  %v2475_v41 = vmul.f32 %v11481_v63, %v2382_v42  ;;  %v1203_v11 = vadd.f32 %v1171_v53, %v942_v59  ;;  %v1172_v9 = vmul.f32 %v11466_v32, %v15042_v17  ;;  %v2029_v59 = vld [vmem:[#allocation4 + $0x188] sm:$0xff] }
 0x251   : > { %1652 = vperm.xlu1 %10212, %v2287_v7   ;;  %v1953_v8 = vmul.f32 %v11509_v55, %v1864_v4  ;;  %v1724_v25 = vadd.f32 %v1692_v5, %v1463_v3  ;;  %v2288_v7 = vld [vmem:[#allocation4 + $0x171] sm:$0xff]  ;;  %v15040_v4 = vld [vmem:[#allocation40_spill] sm:$0xff] }
 0x252   : > { %v2838_v39 = vmax.f32 %v2806_v29, 0.0  ;;  %3251 = vrot.lane.b32.xlu0 %v3181_v37, %s10249_s19  ;;  %v2507_v51 = vadd.f32 %v2475_v41, %v2246_v20  ;;  %v911_v10 = vmul.f32 %v11445_v12, %v15040_v4  ;;  %v1464_v43 = vadd.f32 %v1432_v54, %v1203_v11  ;;  %v3182_v37 = vld [vmem:[#allocation2 + $0xb2] sm:$0xff]  ;;  %v15043_v20 = vld [vmem:[#allocation80_spill] sm:$0xff] }
 0x253   : > { %v2126_v13 = vpop.permute.xlu0 %2125  ;;  %v1985_v50 = vadd.f32 %v1953_v8, %v1724_v25  ;;  %v1433_v41 = vmul.f32 %v11473_v58, %v15043_v20 }
 0x254   : > { %2870 = vst.msk [vmem:[#allocation2 + $0x124] sm:$0xff] %vm252_vm2, %v2838_v39  ;;  %v3922_v52 = vld [vmem:[#allocation2 + $0x10e] sm:$0xff]  ;;  %v1608_v33 = vpop.permute.xlu1 %1607  ;;  %v3923_v30 = vld [vmem:[#allocation2 + $0x116] sm:$0xff]  ;;  %v2215_v45 = vmul.f32 %v11452_v6, %v2126_v13 }
 0x255   : > { %3954 = vst.msk [vmem:[#allocation3 + $0x1b0] sm:$0xff] %vm252_vm2, %v3922_v52  ;;  %2687 = vperm.xlu1 %10212, %v2548_v18   ;;  %3955 = vst.msk [vmem:[#allocation3 + $0x1d8] sm:$0xff] %vm252_vm2, %v3923_v30  ;;  %v1693_v15 = vmul.f32 %v11489_v60, %v1608_v33  ;;  %v15041_v39 = vld [vmem:[#allocation20_spill] sm:$0xff] }
 0x256   : > { %1913 = vperm.xlu0 %10211, %v2548_v18   ;;  %v2247_v26 = vadd.f32 %v2215_v45, %v1985_v50  ;;  %v650_v36 = vmul.f32 %v11459_v61, %v15041_v39  ;;  %v2549_v18 = vld [vmem:[#allocation4 + $0x172] sm:$0xff] }
 0x257   : > { %v1869_v0 = vpop.permute.xlu0 %1868  ;;  %v1725_v5 = vadd.f32 %v1693_v15, %v1464_v43 }
 0x258   : > { %v2643_v22 = vpop.permute.xlu1 %2642  ;;  %v1954_v52 = vmul.f32 %v11509_v55, %v1869_v0  ;;  %v943_v3 = vadd.f32 %v911_v10, %v650_v36  ;;  %v15045_v36 = vld [vmem:[#allocation23_spill] sm:$0xff] }
 0x259   : > { %v2736_v56 = vmul.f32 %v11495_v44, %v2643_v22  ;;  %1396 = vperm.xlu1 %10212, %v2027_v57   ;;  %v2028_v57 = vld [vmem:[#allocation4 + $0x180] sm:$0xff] }
 0x25a   : > { %2995 = vrot.lane.b32.xlu0 %v2925_v62, %s10249_s19  ;;  %v1204_v48 = vadd.f32 %v1172_v9, %v943_v3  ;;  %v1986_v22 = vadd.f32 %v1954_v52, %v1725_v5  ;;  %v2289_v62 = vld [vmem:[#allocation4 + $0x181] sm:$0xff]  ;;  %v3143_v5 = vld [vmem:[#allocation2 + $0x36] sm:$0xff] }
 0x25b   : > { %v1613_v47 = vpop.permute.xlu0 %1612  ;;  %v2768_v2 = vadd.f32 %v2736_v56, %v2507_v51 }
 0x25c   : > { %v2387_v40 = vpop.permute.xlu1 %2386  ;;  %v4030_v28 = vld [vmem:[#allocation3 + $0x1b0] sm:$0xff]  ;;  %v4035_v34 = vld [vmem:[#allocation3 + $0x1d8] sm:$0xff]  ;;  %v1694_v51 = vmul.f32 %v11489_v60, %v1613_v47  ;;  %v1465_v56 = vadd.f32 %v1433_v41, %v1204_v48  ;;  %v2926_v47 = vld [vmem:[#allocation2 + $0x84] sm:$0xff] }
 0x25d   : > { %v2807_v46 = vadd.f32 %v11515_v19, %v2768_v2  ;;  %v2476_v21 = vmul.f32 %v11481_v63, %v2387_v40  ;;  %2431 = vperm.xlu1 %10212, %v2288_v7   ;;  %9462 = vmatprep.mubr.msk.f32.mxu1 %vm252_vm2, %v4030_v28  ;;  %v2887_v41 = vld [vmem:[#allocation2 + $0x32] sm:$0xff] }
 0x25e   : > { %9463 = vmatmul.mubr.msk.f32.gmra.mrb[10].mxu1 %vm252_vm2, %v4035_v34  ;;  %2175 = vperm.xlu0 %10211, %v2028_v57  }
 0x25f   : > { %v2648_v42 = vpop.permute.xlu0 %2647  ;;  %v2839_v16 = vmax.f32 %v2807_v46, 0.0  ;;  %v2508_v49 = vadd.f32 %v2476_v21, %v2247_v26 }
 0x260   : > { %v2737_v24 = vmul.f32 %v11495_v44, %v2648_v42  ;;  %v2131_v29 = vpop.permute.xlu1 %2130 }
 0x261   : > { %2871 = vst.msk [vmem:[#allocation2 + $0x12c] sm:$0xff] %vm252_vm2, %v2839_v16  ;;  %1657 = vperm.xlu1 %10212, %v2288_v7   ;;  %v2216_v25 = vmul.f32 %v11452_v6, %v2131_v29  ;;  %v1726_v7 = vadd.f32 %v1694_v51, %v1465_v56  ;;  %v15044_v29 = vld [vmem:[#allocation43_spill] sm:$0xff]  ;;  %v2927_v51 = vld [vmem:[#allocation2 + $0x94] sm:$0xff] }
 0x262   : > { %v2769_v23 = vadd.f32 %v2737_v24, %v2508_v49  ;;  %3253 = vrot.lane.b32.xlu0 %v3182_v37, %s10249_s19  ;;  %v3183_v49 = vld [vmem:[#allocation2 + $0xc2] sm:$0xff]  ;;  %v912_v4 = vmul.f32 %v11445_v12, %v15044_v29 }
 0x263   : > { %v2392_v13 = vpop.permute.xlu0 %2391  ;;  %v2248_v35 = vadd.f32 %v2216_v25, %v1986_v22  ;;  %v2550_v24 = vld [vmem:[#allocation4 + $0x182] sm:$0xff] }
 0x264   : > { %v2808_v33 = vadd.f32 %v11515_v19, %v2769_v23  ;;  %v1874_v30 = vpop.permute.xlu1 %1873  ;;  %v2477_v14 = vmul.f32 %v11481_v63, %v2392_v13  ;;  %v651_v13 = vmul.f32 %v11459_v61, %v15045_v36  ;;  %v15046_v37 = vld [vmem:[#allocation63_spill] sm:$0xff] }
 0x265   : > { %2692 = vperm.xlu1 %10212, %v2549_v18   ;;  %v1955_v1 = vmul.f32 %v11509_v55, %v1874_v30 }
 0x266   : > { %v2840_v8 = vmax.f32 %v2808_v33, 0.0  ;;  %1918 = vperm.xlu0 %10211, %v2549_v18   ;;  %v2509_v31 = vadd.f32 %v2477_v14, %v2248_v35  ;;  %v1173_v18 = vmul.f32 %v11466_v32, %v15046_v37  ;;  %v944_v52 = vadd.f32 %v912_v4, %v651_v13  ;;  %v15047_v33 = vld [vmem:[#allocation83_spill] sm:$0xff] }
 0x267   : > { %v2136_v38 = vpop.permute.xlu0 %2135  ;;  %v1987_v54 = vadd.f32 %v1955_v1, %v1726_v7  ;;  %v1434_v30 = vmul.f32 %v11473_v58, %v15047_v33  ;;  %v2030_v1 = vld [vmem:[#allocation4 + $0x198] sm:$0xff] }
 0x268   : > { %2872 = vst.msk [vmem:[#allocation2 + $0x13c] sm:$0xff] %vm252_vm2, %v2840_v8  ;;  %v3924_v0 = vld [vmem:[#allocation2 + $0x126] sm:$0xff]  ;;  %v1618_v50 = vpop.permute.xlu1 %1617  ;;  %v3925_v45 = vld [vmem:[#allocation2 + $0x12e] sm:$0xff]  ;;  %v2217_v40 = vmul.f32 %v11452_v6, %v2136_v38  ;;  %v1205_v8 = vadd.f32 %v1173_v18, %v944_v52  ;;  %v2888_v37 = vld [vmem:[#allocation2 + $0x3a] sm:$0xff] }
 0x269   : > { %3956 = vst.msk [vmem:[#allocation3 + $0x200] sm:$0xff] %vm252_vm2, %v3924_v0  ;;  %1401 = vperm.xlu1 %10212, %v2028_v57   ;;  %3957 = vst.msk [vmem:[#allocation3 + $0x228] sm:$0xff] %vm252_vm2, %v3925_v45  ;;  %v1695_v25 = vmul.f32 %v11489_v60, %v1618_v50  ;;  %v2290_v0 = vld [vmem:[#allocation4 + $0x189] sm:$0xff]  ;;  %v2031_v18 = vld [vmem:[#allocation4 + $0x1a0] sm:$0xff] }
 0x26a   : > { %2997 = vrot.lane.b32.xlu0 %v2926_v47, %s10249_s19  ;;  %v2249_v11 = vadd.f32 %v2217_v40, %v1987_v54  ;;  %v1466_v45 = vadd.f32 %v1434_v30, %v1205_v8 }
 0x26b   : > { %v11637_v53 = vpop.permute.xlu0 %1878 }
 0x26c   : > { %v2653_v2 = vpop.permute.xlu1 %2652  ;;  %v1727_v47 = vadd.f32 %v1695_v25, %v1466_v45  ;;  %v2552_v45 = vld [vmem:[#allocation4 + $0x19a] sm:$0xff] }
 0x26d   : > { %v2738_v28 = vmul.f32 %v11495_v44, %v2653_v2  ;;  %2436 = vperm.xlu1 %10212, %v2289_v62  }
 0x26e   : > { %2180 = vperm.xlu0 %10211, %v2029_v59  }
 0x26f   : > { %v11642_v34 = vpop.permute.xlu0 %1622  ;;  %v2770_v57 = vadd.f32 %v2738_v28, %v2509_v31  ;;  %v3144_v31 = vld [vmem:[#allocation2 + $0x3e] sm:$0xff] }
 0x270   : > { %v2397_v26 = vpop.permute.xlu1 %2396  ;;  %v4040_v46 = vld [vmem:[#allocation3 + $0x200] sm:$0xff]  ;;  %v4045_v21 = vld [vmem:[#allocation3 + $0x228] sm:$0xff] }
 0x271   : > { %v2809_v42 = vadd.f32 %v11515_v19, %v2770_v57  ;;  %v2478_v15 = vmul.f32 %v11481_v63, %v2397_v26  ;;  %1662 = vperm.xlu1 %10212, %v2289_v62   ;;  %9465 = vmatprep.mubr.msk.f32.mxu1 %vm252_vm2, %v4040_v46  ;;  %v1956_v62 = vmul.f32 %v11509_v55, %v11637_v53  ;;  %v3184_v57 = vld [vmem:[#allocation2 + $0xca] sm:$0xff] }
 0x272   : > { %9466 = vmatmul.mubr.msk.f32.gmra.mrb[12].mxu1 %vm252_vm2, %v4045_v21  ;;  %3255 = vrot.lane.b32.xlu0 %v3183_v49, %s10249_s19  ;;  %v2551_v26 = vld [vmem:[#allocation4 + $0x18a] sm:$0xff] }
 0x273   : > { %v2658_v16 = vpop.permute.xlu0 %2657  ;;  %v2841_v10 = vmax.f32 %v2809_v42, 0.0  ;;  %v2510_v43 = vadd.f32 %v2478_v15, %v2249_v11  ;;  %v1988_v54 = vadd.f32 %v1956_v62, %v1727_v47  ;;  %v2291_v15 = vld [vmem:[#allocation4 + $0x199] sm:$0xff]  ;;  %v2929_v47 = vld [vmem:[#allocation2 + $0xac] sm:$0xff]  ;;  %v2292_v62 = vld [vmem:[#allocation4 + $0x1a1] sm:$0xff] }
 0x274   : > { %v2739_v23 = vmul.f32 %v11495_v44, %v2658_v16  ;;  %v2141_v39 = vpop.permute.xlu1 %2140  ;;  %v15048_v16 = vld [vmem:[#allocation42_spill] sm:$0xff] }
 0x275   : > { %2873 = vst.msk [vmem:[#allocation2 + $0x144] sm:$0xff] %vm252_vm2, %v2841_v10  ;;  %2697 = vperm.xlu1 %10212, %v2550_v24   ;;  %v2218_v2 = vmul.f32 %v11452_v6, %v2141_v39  ;;  %v913_v49 = vmul.f32 %v11445_v12, %v15048_v16  ;;  %v15049_v10 = vld [vmem:[#allocation22_spill] sm:$0xff]  ;;  %v15054_v16 = vld [vmem:[#allocation65_spill] sm:$0xff] }
 0x276   : > { %v2771_v17 = vadd.f32 %v2739_v23, %v2510_v43  ;;  %1923 = vperm.xlu0 %10211, %v2550_v24   ;;  %v652_v43 = vmul.f32 %v11459_v61, %v15049_v10  ;;  %v15050_v23 = vld [vmem:[#allocation62_spill] sm:$0xff]  ;;  %v2889_v10 = vld [vmem:[#allocation2 + $0x4a] sm:$0xff] }
 0x277   : > { %v11657_v9 = vpop.permute.xlu0 %1883  ;;  %v2250_v53 = vadd.f32 %v2218_v2, %v1988_v54  ;;  %v1174_v39 = vmul.f32 %v11466_v32, %v15050_v23  ;;  %v15055_v23 = vld [vmem:[#allocation84_spill] sm:$0xff] }
 0x278   : > { %v2810_v3 = vadd.f32 %v11515_v19, %v2771_v17  ;;  %v3240_v20 = vpop.permute.xlu1 %3239  ;;  %v945_v17 = vadd.f32 %v913_v49, %v652_v43  ;;  %v1175_v49 = vmul.f32 %v11466_v32, %v15054_v16 }
 0x279   : > { %v3335_v48 = vsel %vm252_vm2, %v3143_v5, %v3240_v20  ;;  %1406 = vperm.xlu1 %10212, %v2029_v59   ;;  %v15051_v5 = vld [vmem:[#allocation82_spill] sm:$0xff]  ;;  %v1696_v20 = vmul.f32 %v11489_v60, %v11642_v34 }
 0x27a   : > { %v2842_v38 = vmax.f32 %v2810_v3, 0.0  ;;  %4376 = vmatprep.mubr.f32.mxu0 %v3335_v48  ;;  %2999 = vrot.lane.b32.xlu0 %v2927_v51, %s10249_s19  ;;  %v1435_v52 = vmul.f32 %v11473_v58, %v15051_v5  ;;  %v1206_v3 = vadd.f32 %v1174_v39, %v945_v17  ;;  %v1436_v39 = vmul.f32 %v11473_v58, %v15055_v23 }
 0x27b   : > { %v2984_v22 = vpop.permute.xlu0 %2983 }
 0x27c   : > { %2874 = vst.msk [vmem:[#allocation2 + $0x154] sm:$0xff] %vm252_vm2, %v2842_v38  ;;  %v3079_v56 = vsel %vm252_vm2, %v2887_v41, %v2984_v22  ;;  %v3926_v35 = vld [vmem:[#allocation2 + $0x13e] sm:$0xff]  ;;  %v2402_v14 = vpop.permute.xlu1 %2401  ;;  %v3927_v50 = vld [vmem:[#allocation2 + $0x146] sm:$0xff]  ;;  %v1467_v48 = vadd.f32 %v1435_v52, %v1206_v3  ;;  %v1957_v22 = vmul.f32 %v11509_v55, %v11657_v9  ;;  %v2930_v3 = vld [vmem:[#allocation2 + $0xb4] sm:$0xff] }
 0x27d   : > { %4377 = vmatmul.mubr.f32.vlgmr.msra.gmra.mrb[0].mxu0 %v3079_v56  ;;  %3958 = vst.msk [vmem:[#allocation3 + $0x250] sm:$0xff] %vm252_vm2, %v3926_v35  ;;  %2441 = vperm.xlu1 %10212, %v2290_v0   ;;  %3959 = vst.msk [vmem:[#allocation3 + $0x278] sm:$0xff] %vm252_vm2, %v3927_v50  ;;  %v2479_v40 = vmul.f32 %v11481_v63, %v2402_v14  ;;  %v2928_v38 = vld [vmem:[#allocation2 + $0x9c] sm:$0xff]  ;;  %v3145_v14 = vld [vmem:[#allocation2 + $0x4e] sm:$0xff] }
 0x27e   : > { %2185 = vperm.xlu0 %10211, %v2030_v1   ;;  %v1728_v56 = vadd.f32 %v1696_v20, %v1467_v48 }
 0x27f   : > { %v2146_v7 = vpop.permute.xlu0 %2145  ;;  %v2511_v24 = vadd.f32 %v2479_v40, %v2250_v53 }
 0x280   : > { %v11672_v59 = vpop.permute.xlu1 %1627  ;;  %v2219_v34 = vmul.f32 %v11452_v6, %v2146_v7  ;;  %v1989_v1 = vadd.f32 %v1957_v22, %v1728_v56  ;;  %v3146_v56 = vld [vmem:[#allocation2 + $0x56] sm:$0xff] }
 0x281   : > { %1667 = vperm.xlu1 %10212, %v2290_v0   ;;  %v3185_v0 = vld [vmem:[#allocation2 + $0xda] sm:$0xff]  ;;  %v1697_v5 = vmul.f32 %v11489_v60, %v11672_v59 }
 0x282   : > { %3257 = vrot.lane.b32.xlu0 %v3184_v57, %s10249_s19  ;;  %v2251_v2 = vadd.f32 %v2219_v34, %v1989_v1  ;;  %v3189_v1 = vld [vmem:[#allocation2 + $0x10a] sm:$0xff] }
 0x283   : > { %v3242_v28 = vpop.permute.xlu0 %3241 }
 0x284   : > { %v3336_v46 = vsel %vm252_vm2, %v3144_v31, %v3242_v28  ;;  %v2663_v21 = vpop.permute.xlu1 %2662  ;;  %v4050_v11 = vld [vmem:[#allocation3 + $0x250] sm:$0xff]  ;;  %v4055_v42 = vld [vmem:[#allocation3 + $0x278] sm:$0xff] }
 0x285   : > { %4381 = vmatprep.mubr.f32.mxu0 %v3336_v46  ;;  %v2740_v29 = vmul.f32 %v11495_v44, %v2663_v21  ;;  %2702 = vperm.xlu1 %10212, %v2551_v26   ;;  %v15052_v28 = vld [vmem:[#allocation45_spill] sm:$0xff]  ;;  %v3186_v21 = vld [vmem:[#allocation2 + $0xe2] sm:$0xff] }
 0x286   : > { %9468 = vmatprep.mubr.msk.f32.mxu1 %vm252_vm2, %v4050_v11  ;;  %2446 = vperm.xlu0 %10211, %v2291_v15   ;;  %v914_v57 = vmul.f32 %v11445_v12, %v15052_v28  ;;  %v2553_v11 = vld [vmem:[#allocation4 + $0x1a2] sm:$0xff] }
 0x287   : > { %v11681_v4 = vpop.permute.xlu0 %1888  ;;  %9469 = vmatmul.mubr.msk.f32.gmra.mrb[14].mxu1 %vm252_vm2, %v4055_v42  ;;  %v2772_v36 = vadd.f32 %v2740_v29, %v2511_v24  ;;  %v15053_v42 = vld [vmem:[#allocation25_spill] sm:$0xff]  ;;  %v15058_v28 = vld [vmem:[#allocation64_spill] sm:$0xff] }
 0x288   : > { %v11688_v13 = vpop.permute.xlu1 %1371  ;;  %v653_v15 = vmul.f32 %v11459_v61, %v15053_v42 }
 0x289   : > { %v2811_v33 = vadd.f32 %v11515_v19, %v2772_v36  ;;  %1928 = vperm.xlu1 %10212, %v2551_v26  }
 0x28a   : > { %2190 = vperm.xlu0 %10211, %v2031_v18   ;;  %v946_v43 = vadd.f32 %v914_v57, %v653_v15  ;;  %v3187_v18 = vld [vmem:[#allocation2 + $0xf2] sm:$0xff]  ;;  %v1176_v57 = vmul.f32 %v11466_v32, %v15058_v28 }
 0x28b   : > { %v2986_v30 = vpop.permute.xlu0 %2985  ;;  %v2843_v41 = vmax.f32 %v2811_v33, 0.0  ;;  %v2937_v28 = vld [vmem:[#allocation2 + $0x10c] sm:$0xff] }
 0x28c   : > { %v3080_v8 = vsel %vm252_vm2, %v2888_v37, %v2986_v30  ;;  %v2407_v25 = vpop.permute.xlu1 %2406  ;;  %v1207_v17 = vadd.f32 %v1175_v49, %v946_v43 }
 0x28d   : > { %4382 = vmatmul.mubr.f32.gmra.mrb[2].mxu0 %v3080_v8  ;;  %2875 = vst.msk [vmem:[#allocation2 + $0x15c] sm:$0xff] %vm252_vm2, %v2843_v41  ;;  %3001 = vrot.lane.b32.xlu1 %v2928_v38, %s10249_s19  ;;  %v2480_v50 = vmul.f32 %v11481_v63, %v2407_v25  ;;  %v1958_v25 = vmul.f32 %v11509_v55, %v11681_v4  ;;  %v3188_v38 = vld [vmem:[#allocation2 + $0xfa] sm:$0xff] }
 0x28e   : > { %3259 = vrot.lane.b32.xlu0 %v3185_v0, %s10249_s19  ;;  %v1468_v8 = vadd.f32 %v1436_v39, %v1207_v17  ;;  %v3192_v39 = vld [vmem:[#allocation2 + $0x12a] sm:$0xff] }
 0x28f   : > { %v2151_v51 = vpop.permute.xlu0 %2150  ;;  %v2512_v26 = vadd.f32 %v2480_v50, %v2251_v2 }
 0x290   : > { %v11702_v35 = vpop.permute.xlu1 %1632  ;;  %v1729_v48 = vadd.f32 %v1697_v5, %v1468_v8  ;;  %v2220_v22 = vmul.f32 %v11452_v6, %v2151_v51  ;;  %v2932_v6 = vld [vmem:[#allocation2 + $0xcc] sm:$0xff]  ;;  %v11788_v5 = vld [vmem:[%s14881_s1 + $0x7] ss:$0 sm:$0xff] }
 0x291   : > { %2707 = vperm.xlu1 %10212, %v2552_v45   ;;  %v2931_v45 = vld [vmem:[#allocation2 + $0xc4] sm:$0xff]  ;;  %v1698_v32 = vmul.f32 %v11489_v60, %v11702_v35  ;;  %v4170_v8 = vld [vmem:[%s14882_s2 + $0x110] sm:$0xff] }
 0x292   : > { %3003 = vrot.lane.b32.xlu0 %v2929_v47, %s10249_s19  ;;  %v1990_v4 = vadd.f32 %v1958_v25, %v1729_v48  ;;  %v15056_v51 = vld [vmem:[#allocation44_spill] sm:$0xff]  ;;  %v4171_v25 = vld [vmem:[%s14882_s2 + $0x118] sm:$0xff] }
 0x293   : > { %v3244_v9 = vpop.permute.xlu0 %3243  ;;  %v2936_v48 = vld [vmem:[#allocation2 + $0xfc] sm:$0xff] }
 0x294   : > { %v3337_v31 = vsel %vm252_vm2, %v3145_v14, %v3244_v9  ;;  %v3928_v54 = vld [vmem:[#allocation2 + $0x156] sm:$0xff]  ;;  %v2668_v40 = vpop.permute.xlu1 %2667  ;;  %v3929_v7 = vld [vmem:[#allocation2 + $0x15e] sm:$0xff]  ;;  %v2252_v50 = vadd.f32 %v2220_v22, %v1990_v4 }
 0x295   : > { %4386 = vmatprep.mubr.f32.mxu0 %v3337_v31  ;;  %3960 = vst.msk [vmem:[#allocation3 + $0x2a0] sm:$0xff] %vm252_vm2, %v3928_v54  ;;  %v2741_v53 = vmul.f32 %v11495_v44, %v2668_v40  ;;  %2451 = vperm.xlu1 %10212, %v2292_v62   ;;  %3961 = vst.msk [vmem:[#allocation3 + $0x2c8] sm:$0xff] %vm252_vm2, %v3929_v7  ;;  %v915_v62 = vmul.f32 %v11445_v12, %v15056_v51  ;;  %v3190_v54 = vld [vmem:[#allocation2 + $0x112] sm:$0xff]  ;;  %v15057_v40 = vld [vmem:[#allocation24_spill] sm:$0xff] }
 0x296   : > { %3261 = vrot.lane.b32.xlu0 %v3186_v21, %s10249_s19  ;;  %v654_v7 = vmul.f32 %v11459_v61, %v15057_v40  ;;  %v2933_v12 = vld [vmem:[#allocation2 + $0xdc] sm:$0xff]  ;;  %v2890_v21 = vld [vmem:[#allocation2 + $0x52] sm:$0xff] }
 0x297   : > { %v11712_v46 = vpop.permute.xlu0 %1893  ;;  %v2773_v24 = vadd.f32 %v2741_v53, %v2512_v26  ;;  %v3191_v61 = vld [vmem:[#allocation2 + $0x122] sm:$0xff] }
 0x298   : > { %v11719_v29 = vpop.permute.xlu1 %1376  ;;  %v1959_v60 = vmul.f32 %v11509_v55, %v11712_v46  ;;  %v2935_v46 = vld [vmem:[#allocation2 + $0xf4] sm:$0xff]  ;;  %v15059_v4 = vld [vmem:[#allocation47_spill] sm:$0xff] }
 0x299   : > { %v2812_v36 = vadd.f32 %v11515_v19, %v2773_v24  ;;  %2712 = vperm.xlu1 %10212, %v2553_v11   ;;  %v947_v11 = vadd.f32 %v915_v62, %v654_v7  ;;  %v15060_v51 = vld [vmem:[#allocation27_spill] sm:$0xff] }
 0x29a   : > { %3263 = vrot.lane.b32.xlu0 %v3187_v18, %s10249_s19 }
 0x29b   : > { %v2988_v37 = vpop.permute.xlu0 %2987  ;;  %v2844_v52 = vmax.f32 %v2812_v36, 0.0  ;;  %v1208_v16 = vadd.f32 %v1176_v57, %v947_v11 }
 0x29c   : > { %v3081_v33 = vsel %vm252_vm2, %v2889_v10, %v2988_v37  ;;  %v2412_v30 = vpop.permute.xlu1 %2411  ;;  %v4060_v20 = vld [vmem:[#allocation3 + $0x2a0] sm:$0xff]  ;;  %v4065_v41 = vld [vmem:[#allocation3 + $0x2c8] sm:$0xff] }
 0x29d   : > { %4387 = vmatmul.mubr.f32.gmra.mrb[4].mxu0 %v3081_v33  ;;  %2876 = vst.msk [vmem:[#allocation2 + $0x16c] sm:$0xff] %vm252_vm2, %v2844_v52  ;;  %3005 = vrot.lane.b32.xlu1 %v2930_v3, %s10249_s19  ;;  %v2481_v34 = vmul.f32 %v11481_v63, %v2412_v30  ;;  %v4168_v10 = vld [vmem:[%s14882_s2 + $0x100] sm:$0xff] }
 0x29e   : > { %9471 = vmatprep.mubr.msk.f32.mxu1 %vm252_vm2, %v4060_v20  ;;  %3265 = vrot.lane.b32.xlu0 %v3188_v38, %s10249_s19  ;;  %v11778_v37 = vld [vmem:[%s14881_s1 + $0x6] ss:$0 sm:$0xff]  ;;  %v3193_v3 = vld [vmem:[#allocation2 + $0x13a] sm:$0xff] }
 0x29f   : > { %v2156_v59 = vpop.permute.xlu0 %2155  ;;  %9472 = vmatmul.mubr.msk.f32.gmra.mrb[16].mxu1 %vm252_vm2, %v4065_v41  ;;  %v2513_v2 = vadd.f32 %v2481_v34, %v2252_v50  ;;  %v11792_v33 = vld [vmem:[#allocation2 + $0x66] sm:$0xff] }
 0x2a0   : > { %v11736_v0 = vpop.permute.xlu1 %1637  ;;  %v2221_v18 = vmul.f32 %v11778_v37, %v2156_v59 }
 0x2a1   : > { %3007 = vrot.lane.b32.xlu1 %v2931_v45, %s10249_s19  ;;  %v9611_v45 = vpack.c.bf16 %v4171_v25, %v4170_v8  ;;  %v4175_v25 = vld [vmem:[%s14882_s2 + $0x138] sm:$0xff] }
 0x2a2   : > { %3267 = vrot.lane.b32.xlu0 %v3189_v1, %s10249_s19  ;;  %v11814_v1 = vld [vmem:[%s14881_s1 + $0x8] ss:$0 sm:$0xff] }
 0x2a3   : > { %v3246_v14 = vpop.permute.xlu0 %3245 }
 0x2a4   : > { %v3338_v9 = vsel %vm252_vm2, %v3146_v56, %v3246_v14  ;;  %v2673_v47 = vpop.permute.xlu1 %2672  ;;  %v11806_v56 = vld [vmem:[%s14881_s1 + $0x1] ss:$0 sm:$0xff]  ;;  %v3197_v8 = vld [vmem:[#allocation2 + $0x16a] sm:$0xff] }
 0x2a5   : > { %4391 = vmatprep.mubr.f32.mxu0 %v3338_v9  ;;  %v2742_v31 = vmul.f32 %v11495_v44, %v2673_v47  ;;  %3009 = vrot.lane.b32.xlu1 %v2932_v6, %s10249_s19  ;;  %v1437_v44 = vmul.f32 %v11473_v58, %v11688_v13  ;;  %v4169_v58 = vld [vmem:[%s14882_s2 + $0x108] sm:$0xff]  ;;  %v916_v34 = vmul.f32 %v11806_v56, %v15059_v4  ;;  %v11824_v6 = vld [vmem:[%s14881_s1] ss:$0 sm:$0xff] }
 0x2a6   : > { %3269 = vrot.lane.b32.xlu0 %v3190_v54, %s10249_s19  ;;  %v2934_v13 = vld [vmem:[#allocation2 + $0xe4] sm:$0xff]  ;;  %v9608_v43 = vpack.c.bf16 %v4169_v58, %v4168_v10  ;;  %v655_v62 = vmul.f32 %v11824_v6, %v15060_v51 }
 0x2a7   : > { %v11746_v63 = vpop.permute.xlu0 %1898  ;;  %v2774_v26 = vadd.f32 %v2742_v31, %v2513_v2  ;;  %v1469_v23 = vadd.f32 %v1437_v44, %v1208_v16  ;;  %v3194_v47 = vld [vmem:[#allocation2 + $0x142] sm:$0xff] }
 0x2a8   : > { %v11753_v53 = vpop.permute.xlu1 %1381  ;;  %9609 = vmatpush1.bf16.msra.mxu0 %v9608_v43  ;;  %v11831_v2 = vld [vmem:[%s14881_s1 + $0x2] ss:$0 sm:$0xff]  ;;  %v948_v57 = vadd.f32 %v916_v34, %v655_v62  ;;  %v11856_v16 = vld [vmem:[%s14881_s1 + $0x4] ss:$0 sm:$0xff]  ;;  %v4173_v10 = vld [vmem:[%s14882_s2 + $0x128] sm:$0xff] }
 0x2a9   : > { %v2813_v42 = vadd.f32 %v11515_v19, %v2774_v26  ;;  %3011 = vrot.lane.b32.xlu1 %v2933_v12, %s10249_s19  ;;  %v1730_v36 = vadd.f32 %v1698_v32, %v1469_v23  ;;  %9610 = vmatprep.subr.bf16.mxu0 %v14889_v27  ;;  %v15061_v31 = vld [vmem:[#allocation67_spill] sm:$0xff]  ;;  %v2940_v34 = vld [vmem:[#allocation2 + $0x12c] sm:$0xff]  ;;  %v15064_v62 = vld [vmem:[#allocation66_spill] sm:$0xff] }
 0x2aa   : > { %3271 = vrot.lane.b32.xlu0 %v3191_v61, %s10249_s19  ;;  %v1177_v54 = vmul.f32 %v11831_v2, %v15061_v31  ;;  %v11842_v26 = vld [vmem:[%s14881_s1 + $0x3] ss:$0 sm:$0xff]  ;;  %v1178_v31 = vmul.f32 %v11831_v2, %v15064_v62  ;;  %v15068_v62 = vld [vmem:[#allocation29_spill] sm:$0xff] }
 0x2ab   : > { %v2990_v15 = vpop.permute.xlu0 %2989  ;;  %v2845_v49 = vmax.f32 %v2813_v42, 0.0  ;;  %v1991_v17 = vadd.f32 %v1959_v60, %v1730_v36  ;;  %v1438_v12 = vmul.f32 %v11842_v26, %v11719_v29  ;;  %v2891_v44 = vld [vmem:[#allocation2 + $0x62] sm:$0xff]  ;;  %v1699_v29 = vmul.f32 %v11856_v16, %v11736_v0 }
 0x2ac   : > { %v3082_v24 = vsel %vm252_vm2, %v2890_v21, %v2990_v15  ;;  %v2417_v19 = vpop.permute.xlu1 %2416  ;;  %9612 = vmatpush1.bf16.msra.mxu0 %v9611_v45  ;;  %v11849_v21 = vld [vmem:[%s14884_s4] ss:$0 sm:$0xff]  ;;  %v3195_v15 = vld [vmem:[#allocation2 + $0x152] sm:$0xff]  ;;  %v1209_v61 = vadd.f32 %v1177_v54, %v948_v57  ;;  %v11871_v60 = vld [vmem:[%s14881_s1 + $0x5] ss:$0 sm:$0xff] }
 0x2ad   : > { %4392 = vmatmul.mubr.f32.gmra.mrb[6].mxu0 %v3082_v24  ;;  %2877 = vst.msk [vmem:[#allocation2 + $0x174] sm:$0xff] %vm252_vm2, %v2845_v49  ;;  %3013 = vrot.lane.b32.xlu1 %v2934_v13, %s10249_s19  ;;  %v2482_v52 = vmul.f32 %v11788_v5, %v2417_v19  ;;  %v2253_v20 = vadd.f32 %v2221_v18, %v1991_v17  ;;  %v4172_v24 = vld [vmem:[%s14882_s2 + $0x120] sm:$0xff]  ;;  %v2938_v19 = vld [vmem:[#allocation2 + $0x114] sm:$0xff] }
 0x2ae   : > { %3273 = vrot.lane.b32.xlu0 %v3192_v39, %s10249_s19  ;;  %9613 = vmatprep.subr.bf16.mxu0 %v14889_v27  ;;  %v9614_v23 = vpack.c.bf16 %v4173_v10, %v4172_v24  ;;  %v1470_v0 = vadd.f32 %v1438_v12, %v1209_v61  ;;  %v1960_v39 = vmul.f32 %v11871_v60, %v11746_v63  ;;  %v3196_v18 = vld [vmem:[#allocation2 + $0x15a] sm:$0xff]  ;;  %v4177_v24 = vld [vmem:[%s14882_s2 + $0x148] sm:$0xff] }
 0x2af   : > { %v11773_v35 = vpop.permute.xlu0 %2160  ;;  %v2514_v14 = vadd.f32 %v2482_v52, %v2253_v20  ;;  %v2939_v52 = vld [vmem:[#allocation2 + $0x124] sm:$0xff]  ;;  %v11889_v20 = vld [vmem:[#allocation2 + $0x6e] sm:$0xff] }
 0x2b0   : > { %v11783_v55 = vpop.permute.xlu1 %1642  ;;  %9615 = vmatpush1.bf16.msra.mxu0 %v9614_v23  ;;  %v2222_v17 = vmul.f32 %v11778_v37, %v11773_v35  ;;  %v4174_v35 = vld [vmem:[%s14882_s2 + $0x130] sm:$0xff] }
 0x2b1   : > { %3015 = vrot.lane.b32.xlu1 %v2935_v46, %s10249_s19  ;;  %v1731_v46 = vadd.f32 %v1699_v29, %v1470_v0  ;;  %9616 = vmatprep.subr.bf16.mxu0 %v14889_v27  ;;  %v1700_v10 = vmul.f32 %v11856_v16, %v11783_v55 }
 0x2b2   : > { %3275 = vrot.lane.b32.xlu0 %v3193_v3, %s10249_s19 }
 0x2b3   : > { %v3248_v30 = vpop.permute.xlu0 %3247 }
 0x2b4   : > { %v3339_v41 = vsel %vm252_vm2, %v11792_v33, %v3248_v30  ;;  %v3930_v59 = vld [vmem:[#allocation2 + $0x16e] sm:$0xff]  ;;  %v2678_v38 = vpop.permute.xlu1 %2677  ;;  %v3931_v22 = vld [vmem:[#allocation2 + $0x176] sm:$0xff]  ;;  %v1992_v30 = vadd.f32 %v1960_v39, %v1731_v46 }
 0x2b5   : > { %4396 = vmatprep.mubr.f32.mxu0 %v3339_v41  ;;  %3962 = vst.msk [vmem:[#allocation3 + $0x2f0] sm:$0xff] %vm252_vm2, %v3930_v59  ;;  %v2743_v50 = vmul.f32 %v11814_v1, %v2678_v38  ;;  %3017 = vrot.lane.b32.xlu1 %v2936_v48, %s10249_s19  ;;  %3963 = vst.msk [vmem:[#allocation3 + $0x318] sm:$0xff] %vm252_vm2, %v3931_v22  ;;  %v9617_v48 = vpack.c.bf16 %v4175_v25, %v4174_v35  ;;  %v15062_v22 = vld [vmem:[#allocation46_spill] sm:$0xff]  ;;  %v4178_v35 = vld [vmem:[%s14882_s2 + $0x150] sm:$0xff] }
 0x2b6   : > { %3277 = vrot.lane.b32.xlu0 %v3194_v47, %s10249_s19  ;;  %v2254_v59 = vadd.f32 %v2222_v17, %v1992_v30  ;;  %v917_v45 = vmul.f32 %v11806_v56, %v15062_v22  ;;  %v15063_v47 = vld [vmem:[#allocation26_spill] sm:$0xff]  ;;  %v15067_v22 = vld [vmem:[#allocation49_spill] sm:$0xff] }
 0x2b7   : > { %v11819_v9 = vpop.permute.xlu0 %1903  ;;  %v2775_v40 = vadd.f32 %v2743_v50, %v2514_v14  ;;  %9618 = vmatpush1.bf16.msra.mxu0 %v9617_v48  ;;  %v656_v51 = vmul.f32 %v11824_v6, %v15063_v47  ;;  %v4179_v25 = vld [vmem:[%s14882_s2 + $0x158] sm:$0xff] }
 0x2b8   : > { %v11837_v7 = vpop.permute.xlu1 %1386  ;;  %9619 = vmatprep.subr.bf16.mxu0 %v14889_v27  ;;  %v1961_v0 = vmul.f32 %v11871_v60, %v11819_v9  ;;  %v2943_v9 = vld [vmem:[#allocation2 + $0x154] sm:$0xff]  ;;  %v9623_v48 = vpack.c.bf16 %v4179_v25, %v4178_v35 }
 0x2b9   : > { %v2814_v11 = vadd.f32 %v11849_v21, %v2775_v40  ;;  %3019 = vrot.lane.b32.xlu1 %v2937_v28, %s10249_s19  ;;  %v3198_v40 = vld [vmem:[#allocation2 + $0x172] sm:$0xff]  ;;  %v949_v57 = vadd.f32 %v917_v45, %v656_v51  ;;  %v918_v45 = vmul.f32 %v11806_v56, %v15067_v22 }
 0x2ba   : > { %3279 = vrot.lane.b32.xlu0 %v3195_v15, %s10249_s19  ;;  %v2892_v15 = vld [vmem:[#allocation2 + $0x6a] sm:$0xff]  ;;  %v4183_v22 = vld [vmem:[%s14882_s2 + $0x178] sm:$0xff] }
 0x2bb   : > { %v2992_v42 = vpop.permute.xlu0 %2991  ;;  %v2846_v32 = vmax.f32 %v2814_v11, 0.0  ;;  %v2941_v11 = vld [vmem:[#allocation2 + $0x13c] sm:$0xff]  ;;  %v1210_v61 = vadd.f32 %v1178_v31, %v949_v57  ;;  %v657_v31 = vmul.f32 %v11824_v6, %v15068_v62 }
 0x2bc   : > { %v3083_v49 = vsel %vm252_vm2, %v2891_v44, %v2992_v42  ;;  %v2422_v58 = vpop.permute.xlu1 %2421  ;;  %v4070_v13 = vld [vmem:[#allocation3 + $0x2f0] sm:$0xff]  ;;  %v4075_v43 = vld [vmem:[#allocation3 + $0x318] sm:$0xff]  ;;  %v1439_v44 = vmul.f32 %v11842_v26, %v11753_v53 }
 0x2bd   : > { %4397 = vmatmul.mubr.f32.gmra.mrb[8].mxu0 %v3083_v49  ;;  %2878 = vst.msk [vmem:[#allocation2 + $0x184] sm:$0xff] %vm252_vm2, %v2846_v32  ;;  %3021 = vrot.lane.b32.xlu1 %v2938_v19, %s10249_s19  ;;  %v2483_v3 = vmul.f32 %v11788_v5, %v2422_v58  ;;  %v4176_v49 = vld [vmem:[%s14882_s2 + $0x140] sm:$0xff] }
 0x2be   : > { %9474 = vmatprep.mubr.msk.f32.mxu1 %vm252_vm2, %v4070_v13  ;;  %3281 = vrot.lane.b32.xlu0 %v3196_v18, %s10249_s19  ;;  %v9620_v19 = vpack.c.bf16 %v4177_v24, %v4176_v49  ;;  %v1471_v23 = vadd.f32 %v1439_v44, %v1210_v61  ;;  %v950_v44 = vadd.f32 %v918_v45, %v657_v31  ;;  %v2893_v49 = vld [vmem:[#allocation2 + $0x7a] sm:$0xff] }
 0x2bf   : > { %v11878_v36 = vpop.permute.xlu0 %2165  ;;  %9475 = vmatmul.mubr.msk.f32.gmra.mrb[18].mxu1 %vm252_vm2, %v4075_v43  ;;  %v2515_v14 = vadd.f32 %v2483_v3, %v2254_v59  ;;  %v2942_v43 = vld [vmem:[#allocation2 + $0x144] sm:$0xff]  ;;  %v1440_v61 = vmul.f32 %v11842_v26, %v11837_v7 }
 0x2c0   : > { %v11885_v63 = vpop.permute.xlu1 %1647  ;;  %9621 = vmatpush1.bf16.msra.mxu0 %v9620_v19  ;;  %v1732_v46 = vadd.f32 %v1700_v10, %v1471_v23  ;;  %v2223_v17 = vmul.f32 %v11778_v37, %v11878_v36  ;;  %v4180_v10 = vld [vmem:[%s14882_s2 + $0x160] sm:$0xff]  ;;  %v2946_v23 = vld [vmem:[#allocation2 + $0x174] sm:$0xff] }
 0x2c1   : > { %3023 = vrot.lane.b32.xlu1 %v2939_v52, %s10249_s19  ;;  %9622 = vmatprep.subr.bf16.mxu0 %v14889_v27 }
 0x2c2   : > { %3283 = vrot.lane.b32.xlu0 %v3197_v8, %s10249_s19  ;;  %v1993_v30 = vadd.f32 %v1961_v0, %v1732_v46 }
 0x2c3   : > { %v3250_v41 = vpop.permute.xlu0 %3249 }
 0x2c4   : > { %v3340_v38 = vsel %vm252_vm2, %v11889_v20, %v3250_v41  ;;  %v2683_v4 = vpop.permute.xlu1 %2682  ;;  %v3199_v32 = vld [vmem:[#allocation2 + $0x182] sm:$0xff]  ;;  %v2255_v36 = vadd.f32 %v2223_v17, %v1993_v30  ;;  %9624 = vmatpush1.bf16.msra.mxu0 %v9623_v48 }
 0x2c5   : > { %4401 = vmatprep.mubr.f32.mxu0 %v3340_v38  ;;  %v2744_v50 = vmul.f32 %v11814_v1, %v2683_v4  ;;  %3025 = vrot.lane.b32.xlu1 %v2940_v34, %s10249_s19  ;;  %v11945_v41 = vld [vmem:[#allocation2 + $0x7e] sm:$0xff] }
 0x2c6   : > { %3285 = vrot.lane.b32.xlu0 %v3198_v40, %s10249_s19  ;;  %v2944_v38 = vld [vmem:[#allocation2 + $0x15c] sm:$0xff]  ;;  %v15069_v40 = vld [vmem:[#allocation69_spill] sm:$0xff]  ;;  %9625 = vmatprep.subr.bf16.mxu0 %v14889_v27  ;;  %v2947_v35 = vld [vmem:[#allocation2 + $0x184] sm:$0xff] }
 0x2c7   : > { %v11908_v54 = vpop.permute.xlu0 %1908  ;;  %v2776_v28 = vadd.f32 %v2744_v50, %v2515_v14 }
 0x2c8   : > { %v11912_v12 = vpop.permute.xlu1 %1391 }
 0x2c9   : > { %v2815_v42 = vadd.f32 %v11849_v21, %v2776_v28  ;;  %3027 = vrot.lane.b32.xlu1 %v2941_v11, %s10249_s19  ;;  %v1179_v28 = vmul.f32 %v11831_v2, %v15069_v40 }
 0x2ca   : > { %3287 = vrot.lane.b32.xlu0 %v3199_v32, %s10249_s19 }
 0x2cb   : > { %v2994_v29 = vpop.permute.xlu0 %2993  ;;  %v2847_v53 = vmax.f32 %v2815_v42, 0.0  ;;  %v1211_v32 = vadd.f32 %v1179_v28, %v950_v44 }
 0x2cc   : > { %v3084_v58 = vsel %vm252_vm2, %v2892_v15, %v2994_v29  ;;  %v2427_v13 = vpop.permute.xlu1 %2426  ;;  %v2945_v15 = vld [vmem:[#allocation2 + $0x16c] sm:$0xff] }
 0x2cd   : > { %4402 = vmatmul.mubr.f32.gmra.mrb[10].mxu0 %v3084_v58  ;;  %2879 = vst.msk [vmem:[#allocation2 + $0x18c] sm:$0xff] %vm252_vm2, %v2847_v53  ;;  %v11931_v39 = vpop.f32.mrb[0].mxu1  ;;  %3029 = vrot.lane.b32.xlu1 %v2942_v43, %s10249_s19  ;;  %v2484_v3 = vmul.f32 %v11788_v5, %v2427_v13  ;;  %v4181_v53 = vld [vmem:[%s14882_s2 + $0x168] sm:$0xff]  ;;  %v1701_v58 = vmul.f32 %v11856_v16, %v11885_v63 }
 0x2ce   : > { %15065 = vst [vmem:[#allocation5_spill] sm:$0xff] %v11931_v39  ;;  %v11934_v55 = vpop.f32.mrb[1].mxu1  ;;  %v9626_v13 = vpack.c.bf16 %v4181_v53, %v4180_v10  ;;  %v1472_v17 = vadd.f32 %v1440_v61, %v1211_v32  ;;  %v1441_v53 = vmul.f32 %v11842_v26, %v11912_v12  ;;  %v6107_v39 = vld [vmem:[#allocation2 + $0x217] sm:$0xff] }
 0x2cf   : > { %15066 = vst [vmem:[#allocation7_spill] sm:$0xff] %v11934_v55  ;;  %v11936_v18 = vpop.permute.xlu0 %2170  ;;  %v2516_v47 = vadd.f32 %v2484_v3, %v2255_v36  ;;  %v3399_v55 = vld [vmem:[#allocation2 + $0x64] sm:$0xff] }
 0x2d0   : > { %v11941_v52 = vpop.permute.xlu1 %1652  ;;  %9627 = vmatpush1.bf16.msra.mxu0 %v9626_v13  ;;  %v1733_v30 = vadd.f32 %v1701_v58, %v1472_v17  ;;  %v2224_v3 = vmul.f32 %v11778_v37, %v11936_v18  ;;  %v4182_v18 = vld [vmem:[%s14882_s2 + $0x170] sm:$0xff] }
 0x2d1   : > { %3031 = vrot.lane.b32.xlu1 %v2943_v9, %s10249_s19  ;;  %v1962_v9 = vmul.f32 %v11871_v60, %v11908_v54  ;;  %9628 = vmatprep.subr.bf16.mxu0 %v14889_v27 }
 0x2d3   : > { %v3252_v8 = vpop.permute.xlu0 %3251  ;;  %v1994_v54 = vadd.f32 %v1962_v9, %v1733_v30 }
 0x2d4   : > { %v3341_v59 = vsel %vm252_vm2, %v11945_v41, %v3252_v8  ;;  %v3932_v4 = vld [vmem:[#allocation2 + $0x186] sm:$0xff]  ;;  %v2688_v34 = vpop.permute.xlu1 %2687  ;;  %v11957_v50 = vld [vmem:[#allocation2 + $0x18e] sm:$0xff] }
 0x2d5   : > { %v3200_v14 = vld [vmem:[#allocation2 + $0x18a] sm:$0xff]  ;;  %4406 = vmatprep.mubr.f32.mxu0 %v3341_v59  ;;  %3964 = vst.msk [vmem:[#allocation3 + $0x340] sm:$0xff] %vm252_vm2, %v3932_v4  ;;  %v2745_v51 = vmul.f32 %v11814_v1, %v2688_v34  ;;  %3033 = vrot.lane.b32.xlu1 %v2944_v38, %s10249_s19  ;;  %3965 = vst.msk [vmem:[#allocation3 + $0x368] sm:$0xff] %vm252_vm2, %v11957_v50  ;;  %v2256_v45 = vadd.f32 %v2224_v3, %v1994_v54 }
 0x2d6   : > { %3289 = vrot.lane.b32.xlu0 %v3200_v14, %s10249_s19  ;;  %v12004_v38 = vld [vmem:[#allocation2 + $0x86] sm:$0xff]  ;;  %v9629_v34 = vpack.c.bf16 %v4183_v22, %v4182_v18  ;;  %v12052_v22 = vld [vmem:[#allocation2 + $0x96] sm:$0xff] }
 0x2d7   : > { %v11969_v57 = vpop.permute.xlu0 %1913  ;;  %v2777_v11 = vadd.f32 %v2745_v51, %v2516_v47  ;;  %v15072_v14 = vld [vmem:[#allocation48_spill] sm:$0xff] }
 0x2d8   : > { %v11972_v42 = vpop.permute.xlu1 %1396  ;;  %v919_v47 = vmul.f32 %v11806_v56, %v15072_v14  ;;  %v2948_v62 = vld [vmem:[#allocation2 + $0x18c] sm:$0xff]  ;;  %9630 = vmatpush1.bf16.msra.mxu0 %v9629_v34  ;;  %v1963_v3 = vmul.f32 %v11871_v60, %v11969_v57 }
 0x2d9   : > { %v2816_v29 = vadd.f32 %v11849_v21, %v2777_v11  ;;  %3035 = vrot.lane.b32.xlu1 %v2945_v15, %s10249_s19  ;;  %v15073_v11 = vld [vmem:[#allocation28_spill] sm:$0xff]  ;;  %9631 = vmatprep.subr.bf16.mxu0 %v14889_v27  ;;  %v4186_v57 = vld [vmem:[%s14882_s2 + $0x190] sm:$0xff] }
 0x2da   : > { %v658_v44 = vmul.f32 %v11824_v6, %v15073_v11  ;;  %v15074_v15 = vld [vmem:[#allocation68_spill] sm:$0xff] }
 0x2db   : > { %v2996_v24 = vpop.permute.xlu0 %2995  ;;  %v2848_v19 = vmax.f32 %v2816_v29, 0.0  ;;  %v1180_v61 = vmul.f32 %v11831_v2, %v15074_v15 }
 0x2dc   : > { %v3085_v7 = vsel %vm252_vm2, %v2893_v49, %v2996_v24  ;;  %v2432_v43 = vpop.permute.xlu1 %2431  ;;  %v4080_v0 = vld [vmem:[#allocation3 + $0x340] sm:$0xff]  ;;  %v4085_v46 = vld [vmem:[#allocation3 + $0x368] sm:$0xff]  ;;  %v951_v49 = vadd.f32 %v919_v47, %v658_v44 }
 0x2dd   : > { %4407 = vmatmul.mubr.f32.gmra.mrb[12].mxu0 %v3085_v7  ;;  %2880 = vst.msk [vmem:[#allocation2 + $0x19c] sm:$0xff] %vm252_vm2, %v2848_v19  ;;  %3037 = vrot.lane.b32.xlu1 %v2946_v23, %s10249_s19  ;;  %v2485_v25 = vmul.f32 %v11788_v5, %v2432_v43  ;;  %v2894_v7 = vld [vmem:[#allocation2 + $0x82] sm:$0xff] }
 0x2de   : > { %9477 = vmatprep.mubr.msk.f32.mxu1 %vm252_vm2, %v4080_v0  ;;  %v1212_v19 = vadd.f32 %v1180_v61, %v951_v49  ;;  %v4184_v43 = vld [vmem:[%s14882_s2 + $0x180] sm:$0xff]  ;;  %v4185_v23 = vld [vmem:[%s14882_s2 + $0x188] sm:$0xff]  ;;  %v1702_v0 = vmul.f32 %v11856_v16, %v11941_v52 }
 0x2df   : > { %v2176_v63 = vpop.permute.xlu0 %2175  ;;  %9478 = vmatmul.mubr.msk.f32.gmra.mrb[20].mxu1 %vm252_vm2, %v4085_v46  ;;  %v2517_v40 = vadd.f32 %v2485_v25, %v2256_v45  ;;  %v9632_v17 = vpack.c.bf16 %v4185_v23, %v4184_v43  ;;  %v15075_v47 = vld [vmem:[#allocation51_spill] sm:$0xff] }
 0x2e0   : > { %v11996_v8 = vpop.permute.xlu1 %1657  ;;  %v1473_v30 = vadd.f32 %v1441_v53, %v1212_v19  ;;  %v2225_v25 = vmul.f32 %v11778_v37, %v2176_v63  ;;  %v15077_v49 = vld [vmem:[#allocation31_spill] sm:$0xff] }
 0x2e1   : > { %v11999_v36 = vpop.f32.mrb[2].mxu1  ;;  %3039 = vrot.lane.b32.xlu1 %v2947_v35, %s10249_s19  ;;  %9633 = vmatpush1.bf16.msra.mxu0 %v9632_v17  ;;  %v15078_v53 = vld [vmem:[#allocation71_spill] sm:$0xff]  ;;  %v2895_v17 = vld [vmem:[#allocation2 + $0x92] sm:$0xff] }
 0x2e2   : > { %15070 = vst [vmem:[#allocation6_spill] sm:$0xff] %v11999_v36  ;;  %v12002_v59 = vpop.f32.mrb[3].mxu1  ;;  %9634 = vmatprep.subr.bf16.mxu0 %v14889_v27  ;;  %v1734_v54 = vadd.f32 %v1702_v0, %v1473_v30  ;;  %v1442_v0 = vmul.f32 %v11842_v26, %v11972_v42  ;;  %v4188_v30 = vld [vmem:[%s14882_s2 + $0x1a0] sm:$0xff] }
 0x2e3   : > { %15071 = vst [vmem:[#allocation9_spill] sm:$0xff] %v12002_v59  ;;  %v3254_v48 = vpop.permute.xlu0 %3253 }
 0x2e4   : > { %v3342_v4 = vsel %vm252_vm2, %v12004_v38, %v3254_v48  ;;  %v2693_v51 = vpop.permute.xlu1 %2692  ;;  %v12016_v31 = vld [vmem:[#allocation2 + $0x19a] sm:$0xff]  ;;  %v1995_v48 = vadd.f32 %v1963_v3, %v1734_v54  ;;  %v4189_v3 = vld [vmem:[%s14882_s2 + $0x1a8] sm:$0xff]  ;;  %v1703_v54 = vmul.f32 %v11856_v16, %v11996_v8 }
 0x2e5   : > { %4411 = vmatprep.mubr.f32.mxu0 %v3342_v4  ;;  %v2746_v28 = vmul.f32 %v11814_v1, %v2693_v51  ;;  %3041 = vrot.lane.b32.xlu1 %v2948_v62, %s10249_s19  ;;  %v2949_v10 = vld [vmem:[#allocation2 + $0x19c] sm:$0xff]  ;;  %v920_v51 = vmul.f32 %v11806_v56, %v15075_v47 }
 0x2e6   : > { %3291 = vrot.lane.b32.xlu0 %v12016_v31, %s10249_s19  ;;  %v4187_v4 = vld [vmem:[%s14882_s2 + $0x198] sm:$0xff]  ;;  %v2257_v34 = vadd.f32 %v2225_v25, %v1995_v48  ;;  %v9638_v48 = vpack.c.bf16 %v4189_v3, %v4188_v30  ;;  %v15083_v30 = vld [vmem:[#allocation52_spill] sm:$0xff] }
 0x2e7   : > { %v12026_v29 = vpop.permute.xlu0 %1918  ;;  %v2778_v32 = vadd.f32 %v2746_v28, %v2517_v40  ;;  %v9635_v14 = vpack.c.bf16 %v4187_v4, %v4186_v57  ;;  %v922_v3 = vmul.f32 %v11806_v56, %v15083_v30 }
 0x2e8   : > { %v12029_v24 = vpop.permute.xlu1 %1401  ;;  %v1964_v57 = vmul.f32 %v11871_v60, %v12026_v29 }
 0x2e9   : > { %v2817_v58 = vadd.f32 %v11849_v21, %v2778_v32  ;;  %3043 = vrot.lane.b32.xlu1 %v2949_v10, %s10249_s19  ;;  %v659_v10 = vmul.f32 %v11824_v6, %v15077_v49  ;;  %9636 = vmatpush1.bf16.msra.mxu0 %v9635_v14  ;;  %v15080_v14 = vld [vmem:[#allocation50_spill] sm:$0xff] }
 0x2ea   : > { %9637 = vmatprep.subr.bf16.mxu0 %v14889_v27  ;;  %v921_v29 = vmul.f32 %v11806_v56, %v15080_v14  ;;  %v4191_v49 = vld [vmem:[%s14882_s2 + $0x1b8] sm:$0xff] }
 0x2eb   : > { %v2998_v13 = vpop.permute.xlu0 %2997  ;;  %v2849_v46 = vmax.f32 %v2817_v58, 0.0  ;;  %v1181_v58 = vmul.f32 %v11831_v2, %v15078_v53  ;;  %v952_v43 = vadd.f32 %v920_v51, %v659_v10  ;;  %v15082_v10 = vld [vmem:[#allocation70_spill] sm:$0xff] }
 0x2ec   : > { %v3086_v12 = vsel %vm252_vm2, %v2894_v7, %v2998_v13  ;;  %v2437_v9 = vpop.permute.xlu1 %2436  ;;  %v1182_v53 = vmul.f32 %v11831_v2, %v15082_v10 }
 0x2ed   : > { %4412 = vmatmul.mubr.f32.gmra.mrb[14].mxu0 %v3086_v12  ;;  %2881 = vst.msk [vmem:[#allocation2 + $0x1a4] sm:$0xff] %vm252_vm2, %v2849_v46  ;;  %v2486_v18 = vmul.f32 %v11788_v5, %v2437_v9  ;;  %v1213_v12 = vadd.f32 %v1181_v58, %v952_v43 }
 0x2ee   : > { %9639 = vmatpush1.bf16.msra.mxu0 %v9638_v48 }
 0x2ef   : > { %v2181_v35 = vpop.permute.xlu0 %2180  ;;  %v2518_v44 = vadd.f32 %v2486_v18, %v2257_v34  ;;  %9640 = vmatprep.subr.bf16.mxu0 %v14889_v27 }
 0x2f0   : > { %v12049_v52 = vpop.permute.xlu1 %1662 }
 0x2f3   : > { %v3256_v45 = vpop.permute.xlu0 %3255 }
 0x2f4   : > { %v3343_v63 = vsel %vm252_vm2, %v12052_v22, %v3256_v45  ;;  %v12064_v62 = vld [vmem:[#allocation2 + $0x19e] sm:$0xff]  ;;  %v2698_v40 = vpop.permute.xlu1 %2697  ;;  %v12076_v32 = vld [vmem:[#allocation2 + $0x1a6] sm:$0xff]  ;;  %v1474_v45 = vadd.f32 %v1442_v0, %v1213_v12  ;;  %v1443_v12 = vmul.f32 %v11842_v26, %v12029_v24 }
 0x2f5   : > { %v12066_v28 = vld [vmem:[#allocation2 + $0x1a2] sm:$0xff]  ;;  %4416 = vmatprep.mubr.f32.mxu0 %v3343_v63  ;;  %3966 = vst.msk [vmem:[#allocation3 + $0x390] sm:$0xff] %vm252_vm2, %v12064_v62  ;;  %v2747_v15 = vmul.f32 %v11814_v1, %v2698_v40  ;;  %v12071_v61 = vpop.f32.mrb[4].mxu1  ;;  %3967 = vst.msk [vmem:[#allocation3 + $0x3b8] sm:$0xff] %vm252_vm2, %v12076_v32  ;;  %v2226_v63 = vmul.f32 %v11778_v37, %v2181_v35  ;;  %v4190_v35 = vld [vmem:[%s14882_s2 + $0x1b0] sm:$0xff] }
 0x2f6   : > { %v2950_v11 = vld [vmem:[#allocation2 + $0x1a4] sm:$0xff]  ;;  %15076 = vst [vmem:[#allocation8_spill] sm:$0xff] %v12071_v61  ;;  %3293 = vrot.lane.b32.xlu0 %v12066_v28, %s10249_s19  ;;  %v12084_v7 = vpop.f32.mrb[5].mxu1  ;;  %v1735_v34 = vadd.f32 %v1703_v54, %v1474_v45 }
 0x2f7   : > { %3045 = vrot.lane.b32.xlu1 %v2950_v11, %s10249_s19  ;;  %v12082_v19 = vpop.permute.xlu0 %1923  ;;  %15079 = vst [vmem:[#allocation11_spill] sm:$0xff] %v12084_v7  ;;  %v2779_v13 = vadd.f32 %v2747_v15, %v2518_v44  ;;  %v3152_v44 = vld [vmem:[#allocation2 + $0x9e] sm:$0xff]  ;;  %v15084_v24 = vld [vmem:[#allocation32_spill] sm:$0xff] }
 0x2f8   : > { %v12089_v23 = vpop.permute.xlu1 %1406  ;;  %v1996_v51 = vadd.f32 %v1964_v57, %v1735_v34  ;;  %v1965_v56 = vmul.f32 %v11871_v60, %v12082_v19  ;;  %v4193_v19 = vld [vmem:[%s14882_s2 + $0x1c8] sm:$0xff] }
 0x2f9   : > { %v2818_v46 = vadd.f32 %v11849_v21, %v2779_v13  ;;  %v3943_v7 = vld [vmem:[#allocation2 + $0x206] sm:$0xff] }
 0x2fa   : > { %v2258_v58 = vadd.f32 %v2226_v63, %v1996_v51  ;;  %v1444_v63 = vmul.f32 %v11842_v26, %v12089_v23  ;;  %v2896_v26 = vld [vmem:[#allocation2 + $0x9a] sm:$0xff]  ;;  %3975 = vst.msk [vmem:[#allocation3 + $0x4f8] sm:$0xff] %vm252_vm2, %v3943_v7  ;;  %v3716_v7 = vld [vmem:[#allocation2 + $0x1e4] sm:$0xff] }
 0x2fb   : > { %3495 = vrot.lane.b32.xlu1 %v11792_v33, %s10249_s19  ;;  %v3000_v9 = vpop.permute.xlu0 %2999  ;;  %v2850_v42 = vmax.f32 %v2818_v46, 0.0 }
 0x2fc   : > { %v3087_v25 = vsel %vm252_vm2, %v2895_v17, %v3000_v9  ;;  %v2442_v18 = vpop.permute.xlu1 %2441  ;;  %v4090_v33 = vld [vmem:[#allocation3 + $0x390] sm:$0xff]  ;;  %v4095_v4 = vld [vmem:[#allocation3 + $0x3b8] sm:$0xff] }
 0x2fd   : > { %4417 = vmatmul.mubr.f32.gmra.mrb[16].mxu0 %v3087_v25  ;;  %2882 = vst.msk [vmem:[#allocation2 + $0x1b4] sm:$0xff] %vm252_vm2, %v2850_v42  ;;  %9480 = vmatprep.mubr.msk.f32.mxu1 %vm252_vm2, %v4090_v33  ;;  %v2487_v40 = vmul.f32 %v11788_v5, %v2442_v18  ;;  %v1704_v25 = vmul.f32 %v11856_v16, %v12049_v52  ;;  %v15085_v33 = vld [vmem:[#allocation72_spill] sm:$0xff] }
 0x2fe   : > { %9481 = vmatmul.mubr.msk.f32.gmra.mrb[22].mxu1 %vm252_vm2, %v4095_v4  ;;  %v661_v18 = vmul.f32 %v11824_v6, %v15084_v24 }
 0x2ff   : > { %3497 = vrot.lane.b32.xlu1 %v11889_v20, %s10249_s19  ;;  %v2186_v8 = vpop.permute.xlu0 %2185  ;;  %v15081_v20 = vld [vmem:[#allocation30_spill] sm:$0xff]  ;;  %v2519_v17 = vadd.f32 %v2487_v40, %v2258_v58 }
 0x300   : > { %v1668_v47 = vpop.permute.xlu1 %1667  ;;  %v660_v11 = vmul.f32 %v11824_v6, %v15081_v20  ;;  %v954_v52 = vadd.f32 %v922_v3, %v661_v18  ;;  %v2227_v51 = vmul.f32 %v11778_v37, %v2186_v8 }
 0x302   : > { %v953_v43 = vadd.f32 %v921_v29, %v660_v11  ;;  %v1705_v11 = vmul.f32 %v11856_v16, %v1668_v47 }
 0x303   : > { %3499 = vrot.lane.b32.xlu1 %v11945_v41, %s10249_s19  ;;  %v3258_v15 = vpop.permute.xlu0 %3257  ;;  %v9641_v41 = vpack.c.bf16 %v4191_v49, %v4190_v35 }
 0x304   : > { %v3344_v13 = vsel %vm252_vm2, %v3152_v44, %v3258_v15  ;;  %v2703_v0 = vpop.permute.xlu1 %2702  ;;  %v3203_v46 = vld [vmem:[#allocation2 + $0x1b2] sm:$0xff]  ;;  %v1214_v42 = vadd.f32 %v1182_v53, %v953_v43 }
 0x305   : > { %4421 = vmatprep.mubr.f32.mxu0 %v3344_v13  ;;  %v2748_v9 = vmul.f32 %v11814_v1, %v2703_v0  ;;  %3295 = vrot.lane.b32.xlu0 %v3203_v46, %s10249_s19  ;;  %v3153_v53 = vld [vmem:[#allocation2 + $0xae] sm:$0xff] }
 0x306   : > { %9642 = vmatpush1.bf16.msra.mxu0 %v9641_v41  ;;  %v1475_v57 = vadd.f32 %v1443_v12, %v1214_v42  ;;  %v2897_v46 = vld [vmem:[#allocation2 + $0xaa] sm:$0xff] }
 0x307   : > { %3501 = vrot.lane.b32.xlu1 %v12004_v38, %s10249_s19  ;;  %v2447_v54 = vpop.permute.xlu0 %2446  ;;  %v2780_v48 = vadd.f32 %v2748_v9, %v2519_v17  ;;  %9643 = vmatprep.subr.bf16.mxu0 %v14889_v27  ;;  %v1183_v38 = vmul.f32 %v11831_v2, %v15085_v33  ;;  %v4192_v2 = vld [vmem:[%s14882_s2 + $0x1c0] sm:$0xff]  ;;  %v4195_v17 = vld [vmem:[%s14882_s2 + $0x1d8] sm:$0xff] }
 0x308   : > { %v1929_v45 = vpop.permute.xlu1 %1928  ;;  %v1736_v29 = vadd.f32 %v1704_v25, %v1475_v57  ;;  %v2488_v35 = vmul.f32 %v11788_v5, %v2447_v54  ;;  %v3438_v54 = vld [vmem:[#allocation2 + $0xb6] sm:$0xff] }
 0x309   : > { %v2819_v4 = vadd.f32 %v11849_v21, %v2780_v48  ;;  %v12148_v34 = vpop.f32.mrb[6].mxu1  ;;  %v1215_v20 = vadd.f32 %v1183_v38, %v954_v52  ;;  %v1966_v8 = vmul.f32 %v11871_v60, %v1929_v45  ;;  %v4194_v60 = vld [vmem:[%s14882_s2 + $0x1d0] sm:$0xff]  ;;  %v3439_v52 = vld [vmem:[#allocation2 + $0xc6] sm:$0xff] }
 0x30a   : > { %15086 = vst [vmem:[#allocation10_spill] sm:$0xff] %v12148_v34  ;;  %v12154_v14 = vpop.f32.mrb[7].mxu1  ;;  %v1997_v15 = vadd.f32 %v1965_v56, %v1736_v29  ;;  %v9647_v42 = vpack.c.bf16 %v4195_v17, %v4194_v60  ;;  %v3442_v60 = vld [vmem:[#allocation2 + $0xe6] sm:$0xff] }
 0x30b   : > { %3503 = vrot.lane.b32.xlu1 %v12052_v22, %s10249_s19  ;;  %v2191_v6 = vpop.permute.xlu0 %2190  ;;  %15087 = vst [vmem:[#allocation13_spill] sm:$0xff] %v12154_v14  ;;  %v2851_v40 = vmax.f32 %v2819_v4, 0.0  ;;  %v9644_v22 = vpack.c.bf16 %v4193_v19, %v4192_v2  ;;  %v1476_v10 = vadd.f32 %v1444_v63, %v1215_v20  ;;  %v4196_v2 = vld [vmem:[%s14882_s2 + $0x1e0] sm:$0xff]  ;;  %v4197_v19 = vld [vmem:[%s14882_s2 + $0x1e8] sm:$0xff] }
 0x30c   : > { %v3002_v23 = vpop.permute.xlu1 %3001  ;;  %v2259_v16 = vadd.f32 %v2227_v51, %v1997_v15  ;;  %v2228_v9 = vmul.f32 %v11778_v37, %v2191_v6  ;;  %v2898_v51 = vld [vmem:[#allocation2 + $0xb2] sm:$0xff]  ;;  %v3942_v14 = vld [vmem:[#allocation2 + $0x1fe] sm:$0xff] }
 0x30d   : > { %2883 = vst.msk [vmem:[#allocation2 + $0x1bc] sm:$0xff] %vm252_vm2, %v2851_v40  ;;  %v3088_v49 = vsel %vm252_vm2, %v2896_v26, %v3002_v23  ;;  %9645 = vmatpush1.bf16.msra.mxu0 %v9644_v22  ;;  %v1737_v13 = vadd.f32 %v1705_v11, %v1476_v10  ;;  %v9650_v40 = vpack.c.bf16 %v4197_v19, %v4196_v2  ;;  %v3440_v20 = vld [vmem:[#allocation2 + $0xce] sm:$0xff]  ;;  %3974 = vst.msk [vmem:[#allocation3 + $0x4d0] sm:$0xff] %vm252_vm2, %v3942_v14  ;;  %v6105_v14 = vld [vmem:[#allocation2 + $0x1ff] sm:$0xff] }
 0x30e   : > { %4422 = vmatmul.mubr.f32.gmra.mrb[18].mxu0 %v3088_v49  ;;  %9646 = vmatprep.subr.bf16.mxu0 %v14889_v27  ;;  %v2520_v43 = vadd.f32 %v2488_v35, %v2259_v16  ;;  %v2899_v16 = vld [vmem:[#allocation2 + $0xc2] sm:$0xff]  ;;  %v6104_v19 = vld [vmem:[#allocation2 + $0x1ef] sm:$0xff] }
 0x30f   : > { %3505 = vrot.lane.b32.xlu1 %v3152_v44, %s10249_s19  ;;  %v3260_v58 = vpop.permute.xlu0 %3259  ;;  %v1998_v44 = vadd.f32 %v1966_v8, %v1737_v13  ;;  %v4199_v8 = vld [vmem:[%s14882_s2 + $0x1f8] sm:$0xff]  ;;  %v6103_v2 = vld [vmem:[#allocation2 + $0x1e7] sm:$0xff] }
 0x310   : > { %v3345_v47 = vsel %vm252_vm2, %v3153_v53, %v3260_v58  ;;  %v2708_v41 = vpop.permute.xlu1 %2707  ;;  %v3441_v13 = vld [vmem:[#allocation2 + $0xde] sm:$0xff] }
 0x311   : > { %4426 = vmatprep.mubr.f32.mxu0 %v3345_v47  ;;  %v2749_v0 = vmul.f32 %v11814_v1, %v2708_v41  ;;  %9648 = vmatpush1.bf16.msra.mxu0 %v9647_v42  ;;  %v2260_v45 = vadd.f32 %v2228_v9, %v1998_v44 }
 0x312   : > { %9649 = vmatprep.subr.bf16.mxu0 %v14889_v27 }
 0x313   : > { %3507 = vrot.lane.b32.xlu1 %v3153_v53, %s10249_s19  ;;  %v3004_v12 = vpop.permute.xlu0 %3003  ;;  %v2781_v30 = vadd.f32 %v2749_v0, %v2520_v43 }
 0x314   : > { %v3089_v3 = vsel %vm252_vm2, %v2897_v46, %v3004_v12  ;;  %v12181_v25 = vld [vmem:[#allocation2 + $0x1b6] sm:$0xff]  ;;  %v2452_v48 = vpop.permute.xlu1 %2451  ;;  %v12183_v18 = vld [vmem:[#allocation2 + $0x1be] sm:$0xff]  ;;  %v2900_v46 = vld [vmem:[#allocation2 + $0xca] sm:$0xff] }
 0x315   : > { %v3204_v24 = vld [vmem:[#allocation2 + $0x1ba] sm:$0xff]  ;;  %4427 = vmatmul.mubr.f32.gmra.mrb[20].mxu0 %v3089_v3  ;;  %3968 = vst.msk [vmem:[#allocation3 + $0x3e0] sm:$0xff] %vm252_vm2, %v12181_v25  ;;  %v2820_v33 = vadd.f32 %v11849_v21, %v2781_v30  ;;  %v2489_v38 = vmul.f32 %v11788_v5, %v2452_v48  ;;  %3969 = vst.msk [vmem:[#allocation3 + $0x408] sm:$0xff] %vm252_vm2, %v12183_v18 }
 0x316   : > { %3297 = vrot.lane.b32.xlu0 %v3204_v24, %s10249_s19  ;;  %9651 = vmatpush1.bf16.msra.mxu0 %v9650_v40  ;;  %v3443_v3 = vld [vmem:[#allocation2 + $0xf6] sm:$0xff] }
 0x317   : > { %3509 = vrot.lane.b32.xlu1 %v3438_v54, %s10249_s19  ;;  %v3262_v37 = vpop.permute.xlu0 %3261  ;;  %v2852_v57 = vmax.f32 %v2820_v33, 0.0  ;;  %v2521_v5 = vadd.f32 %v2489_v38, %v2260_v45  ;;  %9652 = vmatprep.subr.bf16.mxu0 %v14889_v27  ;;  %v10233_v33 = vld [vmem:[#allocation2 + $0xda] sm:$0xff]  ;;  %v12439_v27 = vld [vmem:[#allocation2 + $0x184] sm:$0xff] }
 0x318   : > { %v3346_v56 = vsel %vm252_vm2, %v3438_v54, %v3262_v37  ;;  %v2713_v4 = vpop.permute.xlu1 %2712 }
 0x319   : > { %4431 = vmatprep.mubr.f32.mxu0 %v3346_v56  ;;  %2884 = vst.msk [vmem:[#allocation2 + $0x1cc] sm:$0xff] %vm252_vm2, %v2852_v57  ;;  %v2750_v63 = vmul.f32 %v11814_v1, %v2713_v4  ;;  %v3444_v56 = vld [vmem:[#allocation2 + $0xfe] sm:$0xff]  ;;  %v12241_v4 = vld [vmem:[#allocation2 + $0x94] sm:$0xff] }
 0x31b   : > { %3511 = vrot.lane.b32.xlu1 %v3439_v52, %s10249_s19  ;;  %v3264_v6 = vpop.permute.xlu0 %3263  ;;  %v2782_v29 = vadd.f32 %v2750_v63, %v2521_v5 }
 0x31c   : > { %v3006_v22 = vpop.permute.xlu1 %3005  ;;  %v4100_v11 = vld [vmem:[#allocation3 + $0x3e0] sm:$0xff]  ;;  %v4105_v26 = vld [vmem:[#allocation3 + $0x408] sm:$0xff]  ;;  %v3347_v35 = vsel %vm252_vm2, %v3439_v52, %v3264_v6 }
 0x31d   : > { %v2821_v1 = vadd.f32 %v11849_v21, %v2782_v29  ;;  %v3090_v23 = vsel %vm252_vm2, %v2898_v51, %v3006_v22  ;;  %v12206_v15 = vpop.f32.mrb[8].mxu1  ;;  %9483 = vmatprep.mubr.msk.f32.mxu1 %vm252_vm2, %v4100_v11  ;;  %v4198_v21 = vld [vmem:[%s14882_s2 + $0x1f0] sm:$0xff]  ;;  %v10234_v52 = vld [vmem:[#allocation2 + $0xe2] sm:$0xff] }
 0x31e   : > { %15088 = vst [vmem:[#allocation33_spill] sm:$0xff] %v12206_v15  ;;  %v12211_v49 = vpop.f32.mrb[9].mxu1  ;;  %9484 = vmatmul.mubr.msk.f32.gmra.mrb[24].mxu1 %vm252_vm2, %v4105_v26  ;;  %4432 = vmatmul.mubr.f32.gmra.mrb[22].mxu0 %v3090_v23  ;;  %v9653_v58 = vpack.c.bf16 %v4199_v8, %v4198_v21  ;;  %v3445_v51 = vld [vmem:[#allocation2 + $0x10e] sm:$0xff]  ;;  %v3446_v8 = vld [vmem:[#allocation2 + $0x116] sm:$0xff] }
 0x31f   : > { %3513 = vrot.lane.b32.xlu1 %v3440_v20, %s10249_s19  ;;  %15089 = vst [vmem:[#allocation12_spill] sm:$0xff] %v12211_v49  ;;  %v3266_v10 = vpop.permute.xlu0 %3265  ;;  %v2853_v53 = vmax.f32 %v2821_v1, 0.0  ;;  %4436 = vmatprep.mubr.f32.mxu0 %v3347_v35  ;;  %v12254_v1 = vld [vmem:[#allocation2 + $0x9c] sm:$0xff]  ;;  %v3941_v15 = vld [vmem:[#allocation2 + $0x1ee] sm:$0xff] }
 0x320   : > { %v3008_v47 = vpop.permute.xlu1 %3007  ;;  %v3205_v41 = vld [vmem:[#allocation2 + $0x1ca] sm:$0xff]  ;;  %v3348_v0 = vsel %vm252_vm2, %v3440_v20, %v3266_v10  ;;  %9654 = vmatpush1.bf16.msra.mxu0 %v9653_v58  ;;  %v10235_v20 = vld [vmem:[#allocation2 + $0xf2] sm:$0xff]  ;;  %3973 = vst.msk [vmem:[#allocation3 + $0x4a8] sm:$0xff] %vm252_vm2, %v3941_v15 }
 0x321   : > { %2885 = vst.msk [vmem:[#allocation2 + $0x1d4] sm:$0xff] %vm252_vm2, %v2853_v53  ;;  %v3091_v43 = vsel %vm252_vm2, %v2899_v16, %v3008_v47  ;;  %3299 = vrot.lane.b32.xlu0 %v3205_v41, %s10249_s19  ;;  %v10236_v53 = vld [vmem:[#allocation2 + $0xfa] sm:$0xff]  ;;  %v12265_v16 = vld [vmem:[#allocation2 + $0xac] sm:$0xff] }
 0x322   : > { %4437 = vmatmul.mubr.f32.gmra.mrb[24].mxu0 %v3091_v43  ;;  %v12270_v41 = vld [vmem:[#allocation2 + $0x10a] sm:$0xff]  ;;  %v12469_v49 = vld [vmem:[#allocation2 + $0x1b4] sm:$0xff] }
 0x323   : > { %3515 = vrot.lane.b32.xlu1 %v3441_v13, %s10249_s19  ;;  %v3268_v44 = vpop.permute.xlu0 %3267  ;;  %4441 = vmatprep.mubr.f32.mxu0 %v3348_v0  ;;  %v3447_v0 = vld [vmem:[#allocation2 + $0x126] sm:$0xff] }
 0x324   : > { %v3010_v12 = vpop.permute.xlu1 %3009  ;;  %v3349_v9 = vsel %vm252_vm2, %v3441_v13, %v3268_v44  ;;  %v12490_v36 = vld [vmem:[#allocation2 + $0x1cc] sm:$0xff] }
 0x325   : > { %v3092_v17 = vsel %vm252_vm2, %v2900_v46, %v3010_v12  ;;  %v12275_v46 = vld [vmem:[#allocation2 + $0xb4] sm:$0xff] }
 0x326   : > { %4442 = vmatmul.mubr.f32.gmra.mrb[26].mxu0 %v3092_v17  ;;  %v12280_v17 = vld [vmem:[#allocation2 + $0x112] sm:$0xff] }
 0x327   : > { %3517 = vrot.lane.b32.xlu1 %v3442_v60, %s10249_s19  ;;  %v3270_v30 = vpop.permute.xlu0 %3269  ;;  %4446 = vmatprep.mubr.f32.mxu0 %v3349_v9  ;;  %v4125_v61 = vld [vmem:[#allocation3 + $0x4a8] sm:$0xff] }
 0x328   : > { %v3012_v54 = vpop.permute.xlu1 %3011  ;;  %v3206_v42 = vld [vmem:[#allocation2 + $0x1d2] sm:$0xff]  ;;  %v3350_v37 = vsel %vm252_vm2, %v3442_v60, %v3270_v30 }
 0x329   : > { %v12229_v48 = vld [vmem:[#allocation2 + $0x1ce] sm:$0xff]  ;;  %v12231_v24 = vld [vmem:[#allocation2 + $0x1d6] sm:$0xff]  ;;  %v3093_v38 = vsel %vm252_vm2, %v10233_v33, %v3012_v54  ;;  %3301 = vrot.lane.b32.xlu0 %v3206_v42, %s10249_s19  ;;  %v12285_v54 = vld [vmem:[#allocation2 + $0xc4] sm:$0xff] }
 0x32a   : > { %3970 = vst.msk [vmem:[#allocation3 + $0x430] sm:$0xff] %vm252_vm2, %v12229_v48  ;;  %3971 = vst.msk [vmem:[#allocation3 + $0x458] sm:$0xff] %vm252_vm2, %v12231_v24  ;;  %4447 = vmatmul.mubr.f32.gmra.mrb[28].mxu0 %v3093_v38  ;;  %v3448_v30 = vld [vmem:[#allocation2 + $0x12e] sm:$0xff]  ;;  %v12290_v38 = vld [vmem:[#allocation2 + $0x122] sm:$0xff] }
 0x32b   : > { %3519 = vrot.lane.b32.xlu1 %v3443_v3, %s10249_s19  ;;  %v3272_v45 = vpop.permute.xlu0 %3271  ;;  %4451 = vmatprep.mubr.f32.mxu0 %v3350_v37 }
 0x32c   : > { %v3014_v57 = vpop.permute.xlu1 %3013  ;;  %v3351_v63 = vsel %vm252_vm2, %v3443_v3, %v3272_v45  ;;  %v3449_v45 = vld [vmem:[#allocation2 + $0x13e] sm:$0xff] }
 0x32d   : > { %v3094_v5 = vsel %vm252_vm2, %v10234_v52, %v3014_v57  ;;  %3752 = vrot.lane.b32.xlu0 %v12241_v4, %s10249_s19 }
 0x32e   : > { %4452 = vmatmul.mubr.f32.gmra.mrb[30].mxu0 %v3094_v5 }
 0x32f   : > { %3521 = vrot.lane.b32.xlu1 %v3444_v56, %s10249_s19  ;;  %v3274_v6 = vpop.permute.xlu0 %3273  ;;  %4456 = vmatprep.mubr.f32.mxu0 %v3351_v63  ;;  %v12300_v63 = vld [vmem:[#allocation2 + $0x12a] sm:$0xff] }
 0x330   : > { %v3016_v29 = vpop.permute.xlu1 %3015  ;;  %v3352_v10 = vsel %vm252_vm2, %v3444_v56, %v3274_v6  ;;  %v12295_v56 = vld [vmem:[#allocation2 + $0xcc] sm:$0xff] }
 0x331   : > { %v4110_v40 = vld [vmem:[#allocation3 + $0x430] sm:$0xff]  ;;  %v4115_v22 = vld [vmem:[#allocation3 + $0x458] sm:$0xff]  ;;  %v3095_v11 = vsel %vm252_vm2, %v10235_v20, %v3016_v29  ;;  %v12249_v26 = vpop.f32.mrb[10].mxu1  ;;  %3754 = vrot.lane.b32.xlu0 %v12254_v1, %s10249_s19 }
 0x332   : > { %15090 = vst [vmem:[#allocation53_spill] sm:$0xff] %v12249_v26  ;;  %9486 = vmatprep.mubr.msk.f32.mxu1 %vm252_vm2, %v4110_v40  ;;  %6135 = vst.msk [vmem:[#allocation3 + $0x430] sm:$0xff] %vm252_vm2, %v6103_v2  ;;  %v12259_v23 = vpop.f32.mrb[11].mxu1  ;;  %4457 = vmatmul.mubr.f32.gmra.mrb[32].mxu0 %v3095_v11  ;;  %v3450_v2 = vld [vmem:[#allocation2 + $0x146] sm:$0xff]  ;;  %v12314_v11 = vld [vmem:[#allocation2 + $0x13a] sm:$0xff] }
 0x333   : > { %3523 = vrot.lane.b32.xlu1 %v3445_v51, %s10249_s19  ;;  %6136 = vst.msk [vmem:[#allocation3 + $0x458] sm:$0xff] %vm252_vm2, %v6104_v19  ;;  %15091 = vst [vmem:[#allocation73_spill] sm:$0xff] %v12259_v23  ;;  %v3276_v35 = vpop.permute.xlu0 %3275  ;;  %9487 = vmatmul.mubr.msk.f32.gmra.mrb[26].mxu1 %vm252_vm2, %v4115_v22  ;;  %v3940_v26 = vld [vmem:[#allocation2 + $0x1e6] sm:$0xff] }
 0x334   : > { %v3018_v21 = vpop.permute.xlu1 %3017  ;;  %4461 = vmatprep.mubr.f32.mxu0 %v3352_v10  ;;  %v3353_v13 = vsel %vm252_vm2, %v3445_v51, %v3276_v35  ;;  %v12307_v51 = vld [vmem:[#allocation2 + $0xdc] sm:$0xff]  ;;  %3972 = vst.msk [vmem:[#allocation3 + $0x480] sm:$0xff] %vm252_vm2, %v3940_v26 }
 0x335   : > { %v3096_v58 = vsel %vm252_vm2, %v10236_v53, %v3018_v21  ;;  %3756 = vrot.lane.b32.xlu0 %v12265_v16, %s10249_s19  ;;  %v3451_v10 = vld [vmem:[#allocation2 + $0x156] sm:$0xff]  ;;  %v3173_v26 = vld [vmem:[#allocation2 + $0x19e] sm:$0xff] }
 0x336   : > { %4462 = vmatmul.mubr.f32.gmra.mrb[34].mxu0 %v3096_v58 }
 0x337   : > { %3525 = vrot.lane.b32.xlu1 %v3446_v8, %s10249_s19  ;;  %v3278_v47 = vpop.permute.xlu0 %3277  ;;  %4466 = vmatprep.mubr.f32.mxu0 %v3353_v13 }
 0x338   : > { %v3020_v43 = vpop.permute.xlu1 %3019  ;;  %v3354_v60 = vsel %vm252_vm2, %v3446_v8, %v3278_v47  ;;  %v12319_v8 = vld [vmem:[#allocation2 + $0xe4] sm:$0xff] }
 0x339   : > { %v3097_v44 = vsel %vm252_vm2, %v12270_v41, %v3020_v43  ;;  %3758 = vrot.lane.b32.xlu0 %v12275_v46, %s10249_s19  ;;  %v12324_v47 = vld [vmem:[#allocation2 + $0x142] sm:$0xff] }
 0x33a   : > { %4467 = vmatmul.mubr.f32.gmra.mrb[36].mxu0 %v3097_v44  ;;  %v3452_v43 = vld [vmem:[#allocation2 + $0x15e] sm:$0xff]  ;;  %v12329_v44 = vld [vmem:[#allocation2 + $0xf4] sm:$0xff] }
 0x33b   : > { %3527 = vrot.lane.b32.xlu1 %v3447_v0, %s10249_s19  ;;  %v3280_v12 = vpop.permute.xlu0 %3279  ;;  %4471 = vmatprep.mubr.f32.mxu0 %v3354_v60  ;;  %v4120_v34 = vld [vmem:[#allocation3 + $0x480] sm:$0xff] }
 0x33c   : > { %v3022_v9 = vpop.permute.xlu1 %3021  ;;  %v3355_v33 = vsel %vm252_vm2, %v3447_v0, %v3280_v12  ;;  %9489 = vmatprep.mubr.msk.f32.mxu1 %vm252_vm2, %v4120_v34  ;;  %6137 = vst.msk [vmem:[#allocation3 + $0x480] sm:$0xff] %vm252_vm2, %v6105_v14  ;;  %v6108_v14 = vld [vmem:[#allocation2 + $0x21f] sm:$0xff] }
 0x33d   : > { %v3098_v3 = vsel %vm252_vm2, %v12280_v17, %v3022_v9  ;;  %3760 = vrot.lane.b32.xlu0 %v12285_v54, %s10249_s19  ;;  %v12334_v9 = vld [vmem:[#allocation2 + $0x152] sm:$0xff]  ;;  %9490 = vmatmul.mubr.msk.f32.gmra.mrb[28].mxu1 %vm252_vm2, %v4125_v61 }
 0x33e   : > { %4472 = vmatmul.mubr.f32.gmra.mrb[38].mxu0 %v3098_v3  ;;  %v3453_v3 = vld [vmem:[#allocation2 + $0x16e] sm:$0xff] }
 0x33f   : > { %3529 = vrot.lane.b32.xlu1 %v3448_v30, %s10249_s19  ;;  %v3282_v42 = vpop.permute.xlu0 %3281  ;;  %4476 = vmatprep.mubr.f32.mxu0 %v3355_v33  ;;  %v12339_v33 = vld [vmem:[#allocation2 + $0xfc] sm:$0xff] }
 0x340   : > { %v3024_v37 = vpop.permute.xlu1 %3023  ;;  %v3356_v5 = vsel %vm252_vm2, %v3448_v30, %v3282_v42 }
 0x341   : > { %v3099_v57 = vsel %vm252_vm2, %v12290_v38, %v3024_v37  ;;  %3762 = vrot.lane.b32.xlu0 %v12295_v56, %s10249_s19 }
 0x342   : > { %4477 = vmatmul.mubr.f32.gmra.mrb[40].mxu0 %v3099_v57 }
 0x343   : > { %3531 = vrot.lane.b32.xlu1 %v3449_v45, %s10249_s19  ;;  %v3284_v52 = vpop.permute.xlu0 %3283  ;;  %4481 = vmatprep.mubr.f32.mxu0 %v3356_v5 }
 0x344   : > { %v3026_v6 = vpop.permute.xlu1 %3025  ;;  %v3357_v20 = vsel %vm252_vm2, %v3449_v45, %v3284_v52  ;;  %v12344_v45 = vld [vmem:[#allocation2 + $0x15a] sm:$0xff] }
 0x345   : > { %v3100_v19 = vsel %vm252_vm2, %v12300_v63, %v3026_v6  ;;  %v12304_v29 = vpop.f32.mrb[12].mxu1  ;;  %3764 = vrot.lane.b32.xlu0 %v12307_v51, %s10249_s19  ;;  %v3454_v52 = vld [vmem:[#allocation2 + $0x176] sm:$0xff]  ;;  %v12349_v6 = vld [vmem:[#allocation2 + $0x10c] sm:$0xff] }
 0x346   : > { %15092 = vst [vmem:[#allocation35_spill] sm:$0xff] %v12304_v29  ;;  %v12311_v40 = vpop.f32.mrb[13].mxu1  ;;  %4482 = vmatmul.mubr.f32.gmra.mrb[42].mxu0 %v3100_v19 }
 0x347   : > { %3533 = vrot.lane.b32.xlu1 %v3450_v2, %s10249_s19  ;;  %15093 = vst [vmem:[#allocation15_spill] sm:$0xff] %v12311_v40  ;;  %v3286_v22 = vpop.permute.xlu0 %3285  ;;  %4486 = vmatprep.mubr.f32.mxu0 %v3357_v20  ;;  %v12462_v40 = vld [vmem:[#allocation2 + $0x1a4] sm:$0xff] }
 0x348   : > { %v3028_v35 = vpop.permute.xlu1 %3027  ;;  %v3358_v58 = vsel %vm252_vm2, %v3450_v2, %v3286_v22  ;;  %v12354_v22 = vld [vmem:[#allocation2 + $0x16a] sm:$0xff] }
 0x349   : > { %v3101_v21 = vsel %vm252_vm2, %v12314_v11, %v3028_v35  ;;  %3766 = vrot.lane.b32.xlu0 %v12319_v8, %s10249_s19  ;;  %v3455_v35 = vld [vmem:[#allocation2 + $0x186] sm:$0xff] }
 0x34a   : > { %4487 = vmatmul.mubr.f32.gmra.mrb[44].mxu0 %v3101_v21 }
 0x34b   : > { %3535 = vrot.lane.b32.xlu1 %v3451_v10, %s10249_s19  ;;  %v3288_v53 = vpop.permute.xlu0 %3287  ;;  %4491 = vmatprep.mubr.f32.mxu0 %v3358_v58 }
 0x34c   : > { %v3030_v13 = vpop.permute.xlu1 %3029  ;;  %v3359_v12 = vsel %vm252_vm2, %v3451_v10, %v3288_v53  ;;  %v12361_v53 = vld [vmem:[#allocation2 + $0x114] sm:$0xff] }
 0x34d   : > { %v3102_v0 = vsel %vm252_vm2, %v12324_v47, %v3030_v13  ;;  %3768 = vrot.lane.b32.xlu0 %v12329_v44, %s10249_s19 }
 0x34e   : > { %4492 = vmatmul.mubr.f32.gmra.mrb[46].mxu0 %v3102_v0 }
 0x34f   : > { %3537 = vrot.lane.b32.xlu1 %v3452_v43, %s10249_s19  ;;  %v3290_v60 = vpop.permute.xlu0 %3289  ;;  %4496 = vmatprep.mubr.f32.mxu0 %v3359_v12  ;;  %v12375_v12 = vld [vmem:[#allocation2 + $0x12c] sm:$0xff] }
 0x350   : > { %v3032_v30 = vpop.permute.xlu1 %3031  ;;  %v3360_v37 = vsel %vm252_vm2, %v3452_v43, %v3290_v60  ;;  %v12369_v43 = vld [vmem:[#allocation2 + $0x124] sm:$0xff] }
 0x351   : > { %v3103_v42 = vsel %vm252_vm2, %v12334_v9, %v3032_v30  ;;  %3770 = vrot.lane.b32.xlu0 %v12339_v33, %s10249_s19  ;;  %v12379_v30 = vld [vmem:[#allocation2 + $0x13c] sm:$0xff] }
 0x352   : > { %4497 = vmatmul.mubr.f32.gmra.mrb[48].mxu0 %v3103_v42 }
 0x353   : > { %3539 = vrot.lane.b32.xlu1 %v3453_v3, %s10249_s19  ;;  %4501 = vmatprep.mubr.f32.mxu0 %v3360_v37 }
 0x354   : > { %v3034_v57 = vpop.permute.xlu1 %3033 }
 0x355   : > { %v3104_v5 = vsel %vm252_vm2, %v12344_v45, %v3034_v57  ;;  %3772 = vrot.lane.b32.xlu0 %v12349_v6, %s10249_s19  ;;  %v12392_v57 = vld [vmem:[#allocation2 + $0x144] sm:$0xff] }
 0x356   : > { %4502 = vmatmul.mubr.f32.gmra.mrb[50].mxu0 %v3104_v5  ;;  %v12400_v5 = vld [vmem:[#allocation2 + $0x154] sm:$0xff] }
 0x357   : > { %3541 = vrot.lane.b32.xlu1 %v3454_v52, %s10249_s19 }
 0x358   : > { %v3292_v2 = vpop.permute.xlu0 %3291  ;;  %v3036_v20 = vpop.permute.xlu1 %3035 }
 0x359   : > { %v3361_v19 = vsel %vm252_vm2, %v3453_v3, %v3292_v2  ;;  %v3105_v10 = vsel %vm252_vm2, %v12354_v22, %v3036_v20  ;;  %3774 = vrot.lane.b32.xlu0 %v12361_v53, %s10249_s19  ;;  %v12385_v3 = vld [vmem:[#allocation2 + $0x172] sm:$0xff] }
 0x35a   : > { %v12358_v21 = vpop.f32.mrb[14].mxu1  ;;  %4506 = vmatprep.mubr.f32.mxu0 %v3361_v19 }
 0x35b   : > { %15094 = vst [vmem:[#allocation55_spill] sm:$0xff] %v12358_v21  ;;  %3543 = vrot.lane.b32.xlu1 %v3455_v35, %s10249_s19  ;;  %v12365_v58 = vpop.f32.mrb[15].mxu1  ;;  %4507 = vmatmul.mubr.f32.gmra.mrb[52].mxu0 %v3105_v10 }
 0x35c   : > { %15095 = vst [vmem:[#allocation75_spill] sm:$0xff] %v12365_v58  ;;  %v3038_v13 = vpop.permute.xlu1 %3037 }
 0x35d   : > { %3776 = vrot.lane.b32.xlu0 %v12369_v43, %s10249_s19  ;;  %v3106_v37 = vsel %vm252_vm2, %v12385_v3, %v3038_v13  ;;  %v12426_v13 = vld [vmem:[#allocation2 + $0x182] sm:$0xff] }
 0x35f   : > { %3545 = vrot.lane.b32.xlu1 %v11957_v50, %s10249_s19 }
 0x360   : > { %v3040_v0 = vpop.permute.xlu1 %3039 }
 0x361   : > { %3778 = vrot.lane.b32.xlu0 %v12375_v12, %s10249_s19 }
 0x363   : > { %3547 = vrot.lane.b32.xlu1 %v12064_v62, %s10249_s19 }
 0x364   : > { %v3042_v60 = vpop.permute.xlu1 %3041 }
 0x365   : > { %3780 = vrot.lane.b32.xlu0 %v12379_v30, %s10249_s19 }
 0x367   : > { %3549 = vrot.lane.b32.xlu1 %v12076_v32, %s10249_s19 }
 0x368   : > { %v3294_v50 = vpop.permute.xlu0 %3293  ;;  %v12388_v62 = vpop.permute.xlu1 %3043 }
 0x369   : > { %v3362_v42 = vsel %vm252_vm2, %v3454_v52, %v3294_v50  ;;  %3782 = vrot.lane.b32.xlu0 %v12392_v57, %s10249_s19 }
 0x36a   : > { %4511 = vmatprep.mubr.f32.mxu0 %v3362_v42  ;;  %v3107_v42 = vsel %vm252_vm2, %v12426_v13, %v3040_v0 }
 0x36b   : > { %3551 = vrot.lane.b32.xlu1 %v12181_v25, %s10249_s19  ;;  %4512 = vmatmul.mubr.f32.gmra.mrb[54].mxu0 %v3106_v37  ;;  %v12410_v25 = vld [vmem:[#allocation2 + $0x15c] sm:$0xff]  ;;  %v12433_v37 = vld [vmem:[#allocation2 + $0x174] sm:$0xff] }
 0x36c   : > { %v12398_v32 = vpop.permute.xlu1 %3045 }
 0x36d   : > { %3784 = vrot.lane.b32.xlu0 %v12400_v5, %s10249_s19 }
 0x36f   : > { %3553 = vrot.lane.b32.xlu1 %v12183_v18, %s10249_s19  ;;  %v12420_v18 = vld [vmem:[#allocation2 + $0x16c] sm:$0xff] }
 0x370   : > { %v12406_v52 = vpop.permute.xlu1 %3495 }
 0x371   : > { %3786 = vrot.lane.b32.xlu0 %v12410_v25, %s10249_s19 }
 0x372   : > { %v12408_v2 = vpop.f32.mrb[16].mxu1 }
 0x373   : > { %15096 = vst [vmem:[#allocation34_spill] sm:$0xff] %v12408_v2  ;;  %3555 = vrot.lane.b32.xlu1 %v12229_v48, %s10249_s19  ;;  %v12416_v19 = vpop.f32.mrb[17].mxu1 }
 0x374   : > { %15097 = vst [vmem:[#allocation14_spill] sm:$0xff] %v12416_v19  ;;  %v12418_v20 = vpop.permute.xlu1 %3497  ;;  %v12455_v19 = vld [vmem:[#allocation2 + $0x18a] sm:$0xff] }
 0x375   : > { %3788 = vrot.lane.b32.xlu0 %v12420_v18, %s10249_s19  ;;  %v3108_v29 = vsel %vm252_vm2, %v12455_v19, %v3042_v60 }
 0x377   : > { %3557 = vrot.lane.b32.xlu1 %v12231_v24, %s10249_s19  ;;  %v3296_v10 = vpop.permute.xlu0 %3295 }
 0x378   : > { %v3363_v48 = vsel %vm252_vm2, %v3455_v35, %v3296_v10  ;;  %v12429_v50 = vpop.permute.xlu1 %3499  ;;  %v12445_v10 = vld [vmem:[#allocation2 + $0x18c] sm:$0xff] }
 0x379   : > { %4516 = vmatprep.mubr.f32.mxu0 %v3363_v48  ;;  %3790 = vrot.lane.b32.xlu0 %v12433_v37, %s10249_s19  ;;  %v12451_v48 = vld [vmem:[#allocation2 + $0x19c] sm:$0xff] }
 0x37a   : > { %4517 = vmatmul.mubr.f32.gmra.mrb[56].mxu0 %v3107_v42  ;;  %v3172_v42 = vld [vmem:[#allocation2 + $0x18e] sm:$0xff] }
 0x37c   : > { %v12437_v24 = vpop.permute.xlu1 %3501 }
 0x37d   : > { %3792 = vrot.lane.b32.xlu0 %v12439_v27, %s10249_s19 }
 0x380   : > { %v12443_v35 = vpop.permute.xlu1 %3503 }
 0x381   : > { %3794 = vrot.lane.b32.xlu0 %v12445_v10, %s10249_s19 }
 0x384   : > { %v12449_v0 = vpop.permute.xlu1 %3505 }
 0x385   : > { %3796 = vrot.lane.b32.xlu0 %v12451_v48, %s10249_s19 }
 0x388   : > { %v3298_v2 = vpop.permute.xlu0 %3297  ;;  %v12458_v58 = vpop.permute.xlu1 %3507 }
 0x389   : > { %v3364_v21 = vsel %vm252_vm2, %v3172_v42, %v3298_v2  ;;  %3798 = vrot.lane.b32.xlu0 %v12462_v40, %s10249_s19  ;;  %v12478_v2 = vld [vmem:[#allocation2 + $0x1bc] sm:$0xff] }
 0x38a   : > { %4521 = vmatprep.mubr.f32.mxu0 %v3364_v21 }
 0x38b   : > { %4522 = vmatmul.mubr.f32.gmra.mrb[58].mxu0 %v3108_v29 }
 0x38c   : > { %v12466_v23 = vpop.permute.xlu1 %3509 }
 0x38d   : > { %3800 = vrot.lane.b32.xlu0 %v12469_v49, %s10249_s19 }
 0x390   : > { %v12474_v60 = vpop.permute.xlu1 %3511 }
 0x391   : > { %3802 = vrot.lane.b32.xlu0 %v12478_v2, %s10249_s19 }
 0x392   : > { %v12476_v21 = vpop.f32.mrb[18].mxu1 }
 0x393   : > { %15098 = vst [vmem:[#allocation54_spill] sm:$0xff] %v12476_v21  ;;  %v12482_v29 = vpop.f32.mrb[19].mxu1  ;;  %v3300_v42 = vpop.permute.xlu0 %3299  ;;  %v3109_v21 = vsel %vm252_vm2, %v12016_v31, %v12388_v62  ;;  %v3174_v31 = vld [vmem:[#allocation2 + $0x1a6] sm:$0xff]  ;;  %v4130_v62 = vld [vmem:[#allocation3 + $0x4d0] sm:$0xff] }
 0x394   : > { %15099 = vst [vmem:[#allocation74_spill] sm:$0xff] %v12482_v29  ;;  %v3365_v15 = vsel %vm252_vm2, %v3173_v26, %v3300_v42  ;;  %v12496_v34 = vpop.permute.xlu1 %3513  ;;  %v12498_v26 = vld [vmem:[#allocation2 + $0x1d4] sm:$0xff]  ;;  %v6106_v42 = vld [vmem:[#allocation2 + $0x207] sm:$0xff]  ;;  %9492 = vmatprep.mubr.msk.f32.mxu1 %vm252_vm2, %v4130_v62  ;;  %v3110_v29 = vsel %vm252_vm2, %v12066_v28, %v12398_v32  ;;  %6139 = vst.msk [vmem:[#allocation3 + $0x4d0] sm:$0xff] %vm252_vm2, %v6107_v39  ;;  %v3591_v32 = vsel %vm252_vm2, %v3399_v55, %v12406_v52 }
 0x395   : > { %4526 = vmatprep.mubr.f32.mxu0 %v3365_v15  ;;  %3804 = vrot.lane.b32.xlu0 %v12490_v36, %s10249_s19  ;;  %6138 = vst.msk [vmem:[#allocation3 + $0x4a8] sm:$0xff] %vm252_vm2, %v6106_v42  ;;  %v3656_v42 = vld [vmem:[#allocation2 + $0x92] sm:$0xff]  ;;  %v5084_v62 = vld [vmem:[#allocation2 + $0x1c] sm:$0xff]  ;;  %v3719_v55 = vld [vmem:[#allocation2 + $0x204] sm:$0xff] }
 0x396   : > { %4527 = vmatmul.mubr.f32.gmra.mrb[60].mxu0 %v3109_v21  ;;  %v4135_v21 = vld [vmem:[#allocation3 + $0x4f8] sm:$0xff]  ;;  %5148 = vrot.lane.b32.xlu1 %v5084_v62, %s10249_s19  ;;  %v3658_v52 = vld [vmem:[#allocation2 + $0xaa] sm:$0xff] }
 0x397   : > { %9493 = vmatmul.mubr.msk.f32.gmra.mrb[30].mxu1 %vm252_vm2, %v4135_v21  ;;  %6140 = vst.msk [vmem:[#allocation3 + $0x4f8] sm:$0xff] %vm252_vm2, %v6108_v14  ;;  %v3400_v14 = vld [vmem:[#allocation2 + $0x6c] sm:$0xff] }
 0x398   : > { %v12509_v59 = vpop.permute.xlu1 %3515  ;;  %v3592_v62 = vsel %vm252_vm2, %v3400_v14, %v12418_v20  ;;  %v3659_v20 = vld [vmem:[#allocation2 + $0xb2] sm:$0xff] }
 0x399   : > { %3806 = vrot.lane.b32.xlu0 %v12498_v26, %s10249_s19 }
 0x39b   : > { %v3302_v61 = vpop.permute.xlu0 %3301 }
 0x39c   : > { %v3366_v15 = vsel %vm252_vm2, %v3174_v31, %v3302_v61  ;;  %v3717_v61 = vld [vmem:[#allocation2 + $0x1ec] sm:$0xff]  ;;  %v12520_v39 = vpop.permute.xlu1 %3517 }
 0x39d   : > { %4531 = vmatprep.mubr.f32.mxu0 %v3366_v15  ;;  %3808 = vrot.lane.b32.xlu0 %v3716_v7, %s10249_s19  ;;  %v5085_v15 = vld [vmem:[#allocation2 + $0x24] sm:$0xff]  ;;  %v3657_v7 = vld [vmem:[#allocation2 + $0x9a] sm:$0xff] }
 0x39e   : > { %4532 = vmatmul.mubr.f32.gmra.mrb[62].mxu0 %v3110_v29  ;;  %v3718_v29 = vld [vmem:[#allocation2 + $0x1fc] sm:$0xff]  ;;  %5150 = vrot.lane.b32.xlu1 %v5085_v15, %s10249_s19 }
 0x39f   : > { %v3753_v31 = vpop.permute.xlu0 %3752 }
 0x3a0   : > { %v3848_v28 = vsel %vm252_vm2, %v3656_v42, %v3753_v31  ;;  %v5086_v31 = vld [vmem:[#allocation2 + $0x34] sm:$0xff] }
 0x3a1   : > { %4601 = vmatprep.mubr.f32.mxu0 %v3848_v28  ;;  %3810 = vrot.lane.b32.xlu0 %v3717_v61, %s10249_s19  ;;  %v3401_v28 = vld [vmem:[#allocation2 + $0x7c] sm:$0xff] }
 0x3a2   : > { %4602 = vmatmul.mubr.f32.vlgmr.msra.gmra.mrb[0].mxu0 %v3591_v32  ;;  %5152 = vrot.lane.b32.xlu1 %v5086_v31, %s10249_s19  ;;  %v12528_v32 = vpop.permute.xlu1 %3519 }
 0x3a3   : > { %v3755_v21 = vpop.permute.xlu0 %3754 }
 0x3a4   : > { %v3849_v42 = vsel %vm252_vm2, %v3657_v7, %v3755_v21  ;;  %v3593_v7 = vsel %vm252_vm2, %v3401_v28, %v12429_v50  ;;  %v3402_v21 = vld [vmem:[#allocation2 + $0x84] sm:$0xff] }
 0x3a5   : > { %3812 = vrot.lane.b32.xlu0 %v3718_v29, %s10249_s19  ;;  %4606 = vmatprep.mubr.f32.mxu0 %v3849_v42  ;;  %v3594_v42 = vsel %vm252_vm2, %v3402_v21, %v12437_v24  ;;  %v3662_v21 = vld [vmem:[#allocation2 + $0xda] sm:$0xff] }
 0x3a6   : > { %4607 = vmatmul.mubr.f32.gmra.mrb[2].mxu0 %v3592_v62  ;;  %v12537_v31 = vpop.permute.xlu1 %3521  ;;  %v3660_v62 = vld [vmem:[#allocation2 + $0xc2] sm:$0xff] }
 0x3a7   : > { %v3757_v61 = vpop.permute.xlu0 %3756 }
 0x3a8   : > { %v3850_v15 = vsel %vm252_vm2, %v3658_v52, %v3757_v61 }
 0x3a9   : > { %3814 = vrot.lane.b32.xlu0 %v3719_v55, %s10249_s19  ;;  %4611 = vmatprep.mubr.f32.mxu0 %v3850_v15  ;;  %v3595_v55 = vsel %vm252_vm2, %v12241_v4, %v12443_v35  ;;  %v3661_v15 = vld [vmem:[#allocation2 + $0xca] sm:$0xff]  ;;  %v3597_v4 = vsel %vm252_vm2, %v12265_v16, %v12458_v58  ;;  %v3599_v16 = vsel %vm252_vm2, %v12285_v54, %v12474_v60  ;;  %v3665_v58 = vld [vmem:[#allocation2 + $0xfa] sm:$0xff] }
 0x3aa   : > { %4612 = vmatmul.mubr.f32.gmra.mrb[4].mxu0 %v3593_v7  ;;  %v3524_v7 = vpop.permute.xlu1 %3523  ;;  %v3601_v54 = vsel %vm252_vm2, %v12307_v51, %v12509_v59  ;;  %v3603_v59 = vsel %vm252_vm2, %v12329_v44, %v12528_v32 }
 0x3ab   : > { %v3759_v29 = vpop.permute.xlu0 %3758  ;;  %v3605_v32 = vsel %vm252_vm2, %v12349_v6, %v3524_v7 }
 0x3ac   : > { %v3851_v14 = vsel %vm252_vm2, %v3659_v20, %v3759_v29  ;;  %v3596_v29 = vsel %vm252_vm2, %v12254_v1, %v12449_v0  ;;  %v3598_v1 = vsel %vm252_vm2, %v12275_v46, %v12466_v23  ;;  %v3664_v0 = vld [vmem:[#allocation2 + $0xf2] sm:$0xff]  ;;  %v3600_v23 = vsel %vm252_vm2, %v12295_v56, %v12496_v34 }
 0x3ad   : > { %4616 = vmatprep.mubr.f32.mxu0 %v3851_v14  ;;  %v3602_v56 = vsel %vm252_vm2, %v12319_v8, %v12520_v39  ;;  %v3604_v39 = vsel %vm252_vm2, %v12339_v33, %v12537_v31 }
 0x3ae   : > { %4617 = vmatmul.mubr.f32.gmra.mrb[6].mxu0 %v3594_v42  ;;  %v3526_v35 = vpop.permute.xlu1 %3525 }
 0x3af   : > { %v3761_v52 = vpop.permute.xlu0 %3760 }
 0x3b0   : > { %v3852_v50 = vsel %vm252_vm2, %v3660_v62, %v3761_v52  ;;  %v3663_v62 = vld [vmem:[#allocation2 + $0xe2] sm:$0xff] }
 0x3b1   : > { %4621 = vmatprep.mubr.f32.mxu0 %v3852_v50 }
 0x3b2   : > { %v12540_v61 = vpop.f32.mrb[20].mxu1  ;;  %4622 = vmatmul.mubr.f32.gmra.mrb[8].mxu0 %v3595_v55 }
 0x3b3   : > { %v12545_v28 = vpop.f32.mrb[21].mxu1  ;;  %v3763_v24 = vpop.permute.xlu0 %3762 }
 0x3b4   : > { %v3853_v20 = vsel %vm252_vm2, %v3661_v15, %v3763_v24  ;;  %v3528_v15 = vpop.permute.xlu1 %3527 }
 0x3b5   : > { %4626 = vmatprep.mubr.f32.mxu0 %v3853_v20 }
 0x3b6   : > { %4627 = vmatmul.mubr.f32.gmra.mrb[10].mxu0 %v3596_v29 }
 0x3b7   : > { %v3765_v14 = vpop.permute.xlu0 %3764 }
 0x3b8   : > { %v3854_v42 = vsel %vm252_vm2, %v3662_v21, %v3765_v14  ;;  %v3530_v46 = vpop.permute.xlu1 %3529 }
 0x3b9   : > { %4631 = vmatprep.mubr.f32.mxu0 %v3854_v42 }
 0x3ba   : > { %4632 = vmatmul.mubr.f32.gmra.mrb[12].mxu0 %v3597_v4 }
 0x3bb   : > { %v3767_v52 = vpop.permute.xlu0 %3766 }
 0x3bc   : > { %v3855_v50 = vsel %vm252_vm2, %v3663_v62, %v3767_v52  ;;  %v3532_v42 = vpop.permute.xlu1 %3531 }
 0x3bd   : > { %4636 = vmatprep.mubr.f32.mxu0 %v3855_v50 }
 0x3be   : > { %4637 = vmatmul.mubr.f32.gmra.mrb[14].mxu0 %v3598_v1 }
 0x3bf   : > { %v3769_v55 = vpop.permute.xlu0 %3768 }
 0x3c0   : > { %v3856_v24 = vsel %vm252_vm2, %v3664_v0, %v3769_v55  ;;  %v3606_v0 = vsel %vm252_vm2, %v12361_v53, %v3526_v35  ;;  %v3608_v53 = vsel %vm252_vm2, %v12375_v12, %v3530_v46 }
 0x3c1   : > { %4641 = vmatprep.mubr.f32.mxu0 %v3856_v24 }
 0x3c2   : > { %4642 = vmatmul.mubr.f32.gmra.mrb[16].mxu0 %v3599_v16 }
 0x3c3   : > { %v3771_v20 = vpop.permute.xlu0 %3770 }
 0x3c4   : > { %v3857_v29 = vsel %vm252_vm2, %v3665_v58, %v3771_v20 }
 0x3c5   : > { %4646 = vmatprep.mubr.f32.mxu0 %v3857_v29 }
 0x3c6   : > { %4647 = vmatmul.mubr.f32.gmra.mrb[18].mxu0 %v3600_v23 }
 0x3c7   : > { %v3773_v21 = vpop.permute.xlu0 %3772 }
 0x3c8   : > { %v3858_v14 = vsel %vm252_vm2, %v12270_v41, %v3773_v21 }
 0x3c9   : > { %4651 = vmatprep.mubr.f32.mxu0 %v3858_v14 }
 0x3ca   : > { %4652 = vmatmul.mubr.f32.gmra.mrb[20].mxu0 %v3601_v54  ;;  %v5087_v54 = vld [vmem:[#allocation2 + $0x3c] sm:$0xff] }
 0x3cb   : > { %v3775_v60 = vpop.permute.xlu0 %3774  ;;  %5154 = vrot.lane.b32.xlu1 %v5087_v54, %s10249_s19 }
 0x3cc   : > { %v3859_v4 = vsel %vm252_vm2, %v12280_v17, %v3775_v60  ;;  %v3534_v17 = vpop.permute.xlu1 %3533  ;;  %v3679_v60 = vld [vmem:[#allocation2 + $0x1a2] sm:$0xff] }
 0x3cd   : > { %4656 = vmatprep.mubr.f32.mxu0 %v3859_v4 }
 0x3ce   : > { %4657 = vmatmul.mubr.f32.gmra.mrb[22].mxu0 %v3602_v56  ;;  %v5088_v56 = vld [vmem:[#allocation2 + $0x4c] sm:$0xff] }
 0x3cf   : > { %v3777_v34 = vpop.permute.xlu0 %3776  ;;  %5156 = vrot.lane.b32.xlu1 %v5088_v56, %s10249_s19  ;;  %v9156_v56 = vld [vmem:[%s14882_s2 + $0x258] sm:$0xff] }
 0x3d0   : > { %v3860_v41 = vsel %vm252_vm2, %v12290_v38, %v3777_v34  ;;  %v3536_v50 = vpop.permute.xlu1 %3535  ;;  %v3680_v34 = vld [vmem:[#allocation2 + $0x1b2] sm:$0xff] }
 0x3d1   : > { %v12579_v62 = vpop.f32.mrb[22].mxu1  ;;  %4661 = vmatprep.mubr.f32.mxu0 %v3860_v41 }
 0x3d2   : > { %v12584_v51 = vpop.f32.mrb[23].mxu1  ;;  %4662 = vmatmul.mubr.f32.gmra.mrb[24].mxu0 %v3603_v59 }
 0x3d3   : > { %v3779_v52 = vpop.permute.xlu0 %3778 }
 0x3d4   : > { %v3861_v8 = vsel %vm252_vm2, %v12300_v63, %v3779_v52  ;;  %v3538_v33 = vpop.permute.xlu1 %3537 }
 0x3d5   : > { %4666 = vmatprep.mubr.f32.mxu0 %v3861_v8  ;;  %v3612_v23 = vsel %vm252_vm2, %v12410_v25, %v3538_v33  ;;  %v3681_v8 = vld [vmem:[#allocation2 + $0x1ba] sm:$0xff]  ;;  %v3683_v33 = vld [vmem:[#allocation2 + $0x1d2] sm:$0xff] }
 0x3d6   : > { %4667 = vmatmul.mubr.f32.gmra.mrb[26].mxu0 %v3604_v39 }
 0x3d7   : > { %v3781_v38 = vpop.permute.xlu0 %3780 }
 0x3d8   : > { %v3862_v44 = vsel %vm252_vm2, %v12314_v11, %v3781_v38  ;;  %v3607_v11 = vsel %vm252_vm2, %v12369_v43, %v3528_v15  ;;  %v3540_v7 = vpop.permute.xlu1 %3539 }
 0x3d9   : > { %4671 = vmatprep.mubr.f32.mxu0 %v3862_v44 }
 0x3da   : > { %4672 = vmatmul.mubr.f32.gmra.mrb[28].mxu0 %v3605_v32 }
 0x3db   : > { %v3783_v1 = vpop.permute.xlu0 %3782 }
 0x3dc   : > { %v3863_v63 = vsel %vm252_vm2, %v12324_v47, %v3783_v1  ;;  %v3542_v43 = vpop.permute.xlu1 %3541 }
 0x3dd   : > { %4676 = vmatprep.mubr.f32.mxu0 %v3863_v63  ;;  %v3614_v4 = vsel %vm252_vm2, %v12433_v37, %v3542_v43  ;;  %v3686_v43 = vld [vmem:[#allocation2 + $0x1fa] sm:$0xff] }
 0x3de   : > { %4677 = vmatmul.mubr.f32.gmra.mrb[30].mxu0 %v3606_v0 }
 0x3df   : > { %v3785_v31 = vpop.permute.xlu0 %3784 }
 0x3e0   : > { %v3864_v55 = vsel %vm252_vm2, %v12334_v9, %v3785_v31  ;;  %v3609_v9 = vsel %vm252_vm2, %v12379_v30, %v3532_v42  ;;  %v3544_v58 = vpop.permute.xlu1 %3543  ;;  %v3611_v30 = vsel %vm252_vm2, %v12400_v5, %v3536_v50  ;;  %v3613_v5 = vsel %vm252_vm2, %v12420_v18, %v3540_v7 }
 0x3e1   : > { %4681 = vmatprep.mubr.f32.mxu0 %v3864_v55  ;;  %v3615_v59 = vsel %vm252_vm2, %v12439_v27, %v3544_v58  ;;  %v3682_v27 = vld [vmem:[#allocation2 + $0x1ca] sm:$0xff]  ;;  %v3687_v58 = vld [vmem:[#allocation2 + $0x202] sm:$0xff] }
 0x3e2   : > { %4682 = vmatmul.mubr.f32.gmra.mrb[32].mxu0 %v3607_v11  ;;  %v3684_v11 = vld [vmem:[#allocation2 + $0x1e2] sm:$0xff] }
 0x3e3   : > { %v3787_v6 = vpop.permute.xlu0 %3786 }
 0x3e4   : > { %v3865_v47 = vsel %vm252_vm2, %v12344_v45, %v3787_v6  ;;  %v3610_v45 = vsel %vm252_vm2, %v12392_v57, %v3534_v17  ;;  %v3546_v46 = vpop.permute.xlu1 %3545  ;;  %v5089_v17 = vld [vmem:[#allocation2 + $0x54] sm:$0xff] }
 0x3e5   : > { %4686 = vmatprep.mubr.f32.mxu0 %v3865_v47  ;;  %5158 = vrot.lane.b32.xlu1 %v5089_v17, %s10249_s19  ;;  %v3616_v50 = vsel %vm252_vm2, %v12445_v10, %v3546_v46  ;;  %v9159_v17 = vld [vmem:[%s14882_s2 + $0x270] sm:$0xff] }
 0x3e6   : > { %4687 = vmatmul.mubr.f32.gmra.mrb[34].mxu0 %v3608_v53 }
 0x3e7   : > { %v3789_v35 = vpop.permute.xlu0 %3788 }
 0x3e8   : > { %v3866_v24 = vsel %vm252_vm2, %v12354_v22, %v3789_v35  ;;  %v3548_v42 = vpop.permute.xlu1 %3547 }
 0x3e9   : > { %4691 = vmatprep.mubr.f32.mxu0 %v3866_v24  ;;  %v3617_v0 = vsel %vm252_vm2, %v12451_v48, %v3548_v42  ;;  %v3685_v48 = vld [vmem:[#allocation2 + $0x1ea] sm:$0xff] }
 0x3ea   : > { %4692 = vmatmul.mubr.f32.gmra.mrb[36].mxu0 %v3609_v9 }
 0x3eb   : > { %v3791_v15 = vpop.permute.xlu0 %3790 }
 0x3ec   : > { %v3867_v16 = vsel %vm252_vm2, %v12385_v3, %v3791_v15  ;;  %v3550_v52 = vpop.permute.xlu1 %3549 }
 0x3ed   : > { %4696 = vmatprep.mubr.f32.mxu0 %v3867_v16  ;;  %v3618_v10 = vsel %vm252_vm2, %v12462_v40, %v3550_v52  ;;  %v9160_v52 = vld [vmem:[%s14882_s2 + $0x278] sm:$0xff] }
 0x3ee   : > { %4697 = vmatmul.mubr.f32.gmra.mrb[38].mxu0 %v3610_v45  ;;  %v9218_v45 = vld [vmem:[%s14882_s2 + $0x448] sm:$0xff] }
 0x3ef   : > { %v3793_v12 = vpop.permute.xlu0 %3792 }
 0x3f0   : > { %v3868_v22 = vsel %vm252_vm2, %v12426_v13, %v3793_v12  ;;  %v3678_v13 = vld [vmem:[#allocation2 + $0x19a] sm:$0xff]  ;;  %v3552_v1 = vpop.permute.xlu1 %3551 }
 0x3f1   : > { %v12617_v20 = vpop.f32.mrb[24].mxu1  ;;  %4701 = vmatprep.mubr.f32.mxu0 %v3868_v22  ;;  %v3619_v53 = vsel %vm252_vm2, %v12469_v49, %v3552_v1  ;;  %v9217_v49 = vld [vmem:[%s14882_s2 + $0x440] sm:$0xff] }
 0x3f2   : > { %v12621_v29 = vpop.f32.mrb[25].mxu1  ;;  %4702 = vmatmul.mubr.f32.gmra.mrb[40].mxu0 %v3611_v30 }
 0x3f3   : > { %v3795_v3 = vpop.permute.xlu0 %3794 }
 0x3f4   : > { %v3869_v57 = vsel %vm252_vm2, %v12455_v19, %v3795_v3  ;;  %v3554_v6 = vpop.permute.xlu1 %3553 }
 0x3f5   : > { %4706 = vmatprep.mubr.f32.mxu0 %v3869_v57  ;;  %v3620_v40 = vsel %vm252_vm2, %v12478_v2, %v3554_v6  ;;  %v9767_v2 = vpack.c.bf16 %v9218_v45, %v9217_v49  ;;  %v9219_v57 = vld [vmem:[%s14882_s2 + $0x450] sm:$0xff]  ;;  %v9170_v6 = vld [vmem:[%s14882_s2 + $0x2c8] sm:$0xff]  ;;  %v9177_v45 = vld [vmem:[%s14882_s2 + $0x300] sm:$0xff] }
 0x3f6   : > { %4707 = vmatmul.mubr.f32.gmra.mrb[42].mxu0 %v3612_v23  ;;  %v9220_v23 = vld [vmem:[%s14882_s2 + $0x458] sm:$0xff] }
 0x3f7   : > { %v3797_v21 = vpop.permute.xlu0 %3796  ;;  %9768 = vmatprep.subr.bf16.mxu0 %v9767_v2  ;;  %v9771_v46 = vpack.c.bf16 %v9220_v23, %v9219_v57  ;;  %v9181_v23 = vld [vmem:[%s14882_s2 + $0x320] sm:$0xff] }
 0x3f8   : > { %v3870_v14 = vsel %vm252_vm2, %v3678_v13, %v3797_v21  ;;  %v3556_v24 = vpop.permute.xlu1 %3555  ;;  %9770 = vmatpush3.bf16.msra.mxu0 %v9767_v2  ;;  %v9221_v13 = vld [vmem:[%s14882_s2 + $0x460] sm:$0xff]  ;;  %v9222_v21 = vld [vmem:[%s14882_s2 + $0x468] sm:$0xff]  ;;  %v9179_v2 = vld [vmem:[%s14882_s2 + $0x310] sm:$0xff] }
 0x3f9   : > { %4711 = vmatprep.mubr.f32.mxu0 %v3870_v14  ;;  %v3621_v12 = vsel %vm252_vm2, %v12490_v36, %v3556_v24  ;;  %9772 = vmatprep.subr.bf16.mxu0 %v9771_v46  ;;  %v9775_v14 = vpack.c.bf16 %v9222_v21, %v9221_v13  ;;  %v9174_v24 = vld [vmem:[%s14882_s2 + $0x2e8] sm:$0xff] }
 0x3fa   : > { %4712 = vmatmul.mubr.f32.gmra.mrb[44].mxu0 %v3613_v5  ;;  %v9224_v5 = vld [vmem:[%s14882_s2 + $0x478] sm:$0xff] }
 0x3fb   : > { %v3799_v19 = vpop.permute.xlu0 %3798 }
 0x3fc   : > { %v3871_v25 = vsel %vm252_vm2, %v3679_v60, %v3799_v19  ;;  %v3558_v22 = vpop.permute.xlu1 %3557  ;;  %9774 = vmatpush3.bf16.msra.mxu0 %v9771_v46  ;;  %v9153_v60 = vld [vmem:[%s14882_s2 + $0x240] sm:$0xff]  ;;  %v9154_v19 = vld [vmem:[%s14882_s2 + $0x248] sm:$0xff] }
 0x3fd   : > { %4716 = vmatprep.mubr.f32.mxu0 %v3871_v25  ;;  %v3622_v36 = vsel %vm252_vm2, %v12498_v26, %v3558_v22  ;;  %9776 = vmatprep.subr.bf16.mxu0 %v9775_v14  ;;  %v9223_v26 = vld [vmem:[%s14882_s2 + $0x470] sm:$0xff]  ;;  %v9672_v42 = vpack.c.bf16 %v9154_v19, %v9153_v60  ;;  %v15100_v25 = vmov 0.0|0.0   ;;  %v9180_v22 = vld [vmem:[%s14882_s2 + $0x318] sm:$0xff]  ;;  %v12803_v46 = vld [vmem:[%s14884_s4 + $0x1] ss:$0 sm:$0xff] }
 0x3fe   : > { %4717 = vmatmul.mubr.f32.gmra.mrb[46].mxu0 %v3614_v4  ;;  %v9779_v54 = vpack.c.bf16 %v9224_v5, %v9223_v26  ;;  %v9155_v4 = vld [vmem:[%s14882_s2 + $0x250] sm:$0xff]  ;;  %v15101_v19 = vld [vmem:[#allocation7_spill] sm:$0xff] }
 0x3ff   : > { %v3801_v18 = vpop.permute.xlu0 %3800  ;;  %9673 = vmatpush1.bf16.msra.mxu1 %v9672_v42  ;;  %v9183_v5 = vld [vmem:[%s14882_s2 + $0x330] sm:$0xff] }
 0x400   : > { %v3872_v41 = vsel %vm252_vm2, %v3680_v34, %v3801_v18  ;;  %9778 = vmatpush3.bf16.msra.mxu0 %v9775_v14  ;;  %9674 = vmatprep.subr.bf16.mxu1 %v15100_v25  ;;  %v9675_v34 = vpack.c.bf16 %v9156_v56, %v9155_v4  ;;  %v9157_v18 = vld [vmem:[%s14882_s2 + $0x260] sm:$0xff] }
 0x401   : > { %4721 = vmatprep.mubr.f32.mxu0 %v3872_v41  ;;  %9780 = vmatprep.subr.bf16.mxu0 %v9779_v54  ;;  %v9158_v41 = vld [vmem:[%s14882_s2 + $0x268] sm:$0xff] }
 0x402   : > { %4722 = vmatmul.mubr.f32.gmra.mrb[48].mxu0 %v3615_v59  ;;  %v9678_v59 = vpack.c.bf16 %v9158_v41, %v9157_v18  ;;  %v15102_v41 = vld [vmem:[#allocation5_spill] sm:$0xff] }
 0x403   : > { %v3803_v37 = vpop.permute.xlu0 %3802  ;;  %9676 = vmatpush1.bf16.msra.mxu1 %v9675_v34 }
 0x404   : > { %v3873_v39 = vsel %vm252_vm2, %v3681_v8, %v3803_v37  ;;  %9782 = vmatpush3.bf16.msra.mxu0 %v9779_v54  ;;  %9677 = vmatprep.subr.bf16.mxu1 %v15100_v25  ;;  %v9681_v8 = vpack.c.bf16 %v9160_v52, %v9159_v17  ;;  %v9161_v37 = vld [vmem:[%s14882_s2 + $0x280] sm:$0xff]  ;;  %v9184_v54 = vld [vmem:[%s14882_s2 + $0x338] sm:$0xff] }
 0x405   : > { %4726 = vmatprep.mubr.f32.mxu0 %v3873_v39  ;;  %v9162_v39 = vld [vmem:[%s14882_s2 + $0x288] sm:$0xff]  ;;  %v9717_v60 = vpack.c.bf16 %v9184_v54, %v9183_v5 }
 0x406   : > { %v12640_v38 = vpop.f32.mrb[26].mxu1  ;;  %4727 = vmatmul.mubr.f32.gmra.mrb[50].mxu0 %v3616_v50  ;;  %v9684_v50 = vpack.c.bf16 %v9162_v39, %v9161_v37  ;;  %v15103_v39 = vld [vmem:[#allocation9_spill] sm:$0xff] }
 0x407   : > { %v12644_v44 = vpop.f32.mrb[27].mxu1  ;;  %v3805_v32 = vpop.permute.xlu0 %3804  ;;  %9679 = vmatpush1.bf16.msra.mxu1 %v9678_v59 }
 0x408   : > { %v3874_v63 = vsel %vm252_vm2, %v3682_v27, %v3805_v32  ;;  %9680 = vmatprep.subr.bf16.mxu1 %v15100_v25  ;;  %v9163_v27 = vld [vmem:[%s14882_s2 + $0x290] sm:$0xff]  ;;  %v9164_v32 = vld [vmem:[%s14882_s2 + $0x298] sm:$0xff] }
 0x409   : > { %4731 = vmatprep.mubr.f32.mxu0 %v3874_v63  ;;  %v9687_v1 = vpack.c.bf16 %v9164_v32, %v9163_v27  ;;  %v9165_v63 = vld [vmem:[%s14882_s2 + $0x2a0] sm:$0xff] }
 0x40a   : > { %4732 = vmatmul.mubr.f32.gmra.mrb[52].mxu0 %v3617_v0  ;;  %v9166_v0 = vld [vmem:[%s14882_s2 + $0x2a8] sm:$0xff] }
 0x40b   : > { %v3807_v31 = vpop.permute.xlu0 %3806  ;;  %9682 = vmatpush1.bf16.msra.mxu1 %v9681_v8 }
 0x40c   : > { %v3875_v55 = vsel %vm252_vm2, %v3683_v33, %v3807_v31  ;;  %9683 = vmatprep.subr.bf16.mxu1 %v15100_v25  ;;  %v9690_v33 = vpack.c.bf16 %v9166_v0, %v9165_v63  ;;  %v9167_v31 = vld [vmem:[%s14882_s2 + $0x2b0] sm:$0xff] }
 0x40d   : > { %4736 = vmatprep.mubr.f32.mxu0 %v3875_v55  ;;  %v9168_v55 = vld [vmem:[%s14882_s2 + $0x2b8] sm:$0xff] }
 0x40e   : > { %4737 = vmatmul.mubr.f32.gmra.mrb[54].mxu0 %v3618_v10  ;;  %v9693_v10 = vpack.c.bf16 %v9168_v55, %v9167_v31  ;;  %v15104_v31 = vld [vmem:[#allocation6_spill] sm:$0xff] }
 0x40f   : > { %v3809_v7 = vpop.permute.xlu0 %3808  ;;  %9685 = vmatpush1.bf16.msra.mxu1 %v9684_v50 }
 0x410   : > { %v3876_v47 = vsel %vm252_vm2, %v3684_v11, %v3809_v7  ;;  %9686 = vmatprep.subr.bf16.mxu1 %v15100_v25  ;;  %v9169_v11 = vld [vmem:[%s14882_s2 + $0x2c0] sm:$0xff] }
 0x411   : > { %4741 = vmatprep.mubr.f32.mxu0 %v3876_v47  ;;  %v9696_v7 = vpack.c.bf16 %v9170_v6, %v9169_v11  ;;  %v9171_v47 = vld [vmem:[%s14882_s2 + $0x2d0] sm:$0xff] }
 0x412   : > { %4742 = vmatmul.mubr.f32.gmra.mrb[56].mxu0 %v3619_v53  ;;  %v9172_v53 = vld [vmem:[%s14882_s2 + $0x2d8] sm:$0xff] }
 0x413   : > { %v3811_v35 = vpop.permute.xlu0 %3810  ;;  %9688 = vmatpush1.bf16.msra.mxu1 %v9687_v1 }
 0x414   : > { %v3877_v9 = vsel %vm252_vm2, %v3685_v48, %v3811_v35  ;;  %9689 = vmatprep.subr.bf16.mxu1 %v15100_v25  ;;  %v9699_v48 = vpack.c.bf16 %v9172_v53, %v9171_v47  ;;  %v9173_v35 = vld [vmem:[%s14882_s2 + $0x2e0] sm:$0xff] }
 0x415   : > { %4746 = vmatprep.mubr.f32.mxu0 %v3877_v9  ;;  %v9702_v9 = vpack.c.bf16 %v9174_v24, %v9173_v35 }
 0x416   : > { %4747 = vmatmul.mubr.f32.gmra.mrb[58].mxu0 %v3620_v40  ;;  %v9175_v40 = vld [vmem:[%s14882_s2 + $0x2f0] sm:$0xff] }
 0x417   : > { %v3813_v15 = vpop.permute.xlu0 %3812  ;;  %9691 = vmatpush1.bf16.msra.mxu1 %v9690_v33 }
 0x418   : > { %v3878_v16 = vsel %vm252_vm2, %v3686_v43, %v3813_v15  ;;  %9692 = vmatprep.subr.bf16.mxu1 %v15100_v25  ;;  %v9176_v43 = vld [vmem:[%s14882_s2 + $0x2f8] sm:$0xff] }
 0x419   : > { %4751 = vmatprep.mubr.f32.mxu0 %v3878_v16  ;;  %v9705_v15 = vpack.c.bf16 %v9176_v43, %v9175_v40  ;;  %v12771_v16 = vpop.f32.mrb[28].mxu1 }
 0x41a   : > { %4752 = vmatmul.mubr.f32.gmra.mrb[60].mxu0 %v3621_v12  ;;  %v12773_v49 = vpop.f32.mrb[29].mxu1  ;;  %v9178_v12 = vld [vmem:[%s14882_s2 + $0x308] sm:$0xff] }
 0x41b   : > { %v3815_v30 = vpop.permute.xlu0 %3814  ;;  %9694 = vmatpush1.bf16.msra.mxu1 %v9693_v10 }
 0x41c   : > { %v3879_v3 = vsel %vm252_vm2, %v3687_v58, %v3815_v30  ;;  %9695 = vmatprep.subr.bf16.mxu1 %v15100_v25  ;;  %v9708_v58 = vpack.c.bf16 %v9178_v12, %v9177_v45  ;;  %v9711_v30 = vpack.c.bf16 %v9180_v22, %v9179_v2  ;;  %v15106_v12 = vld [vmem:[#allocation8_spill] sm:$0xff] }
 0x41d   : > { %4756 = vmatprep.mubr.f32.mxu0 %v3879_v3 }
 0x41e   : > { %4757 = vmatmul.mubr.f32.gmra.mrb[62].mxu0 %v3622_v36  ;;  %v9182_v36 = vld [vmem:[%s14882_s2 + $0x328] sm:$0xff] }
 0x41f   : > { %9697 = vmatpush1.bf16.msra.mxu1 %v9696_v7  ;;  %v9714_v13 = vpack.c.bf16 %v9182_v36, %v9181_v23 }
 0x420   : > { %9698 = vmatprep.subr.bf16.mxu1 %v15100_v25 }
 0x423   : > { %9700 = vmatpush1.bf16.msra.mxu1 %v9699_v48  ;;  %v15105_v48 = vld [vmem:[#allocation11_spill] sm:$0xff] }
 0x424   : > { %9701 = vmatprep.subr.bf16.mxu1 %v15100_v25 }
 0x427   : > { %9703 = vmatpush1.bf16.msra.mxu1 %v9702_v9 }
 0x428   : > { %9704 = vmatprep.subr.bf16.mxu1 %v15100_v25 }
 0x42b   : > { %9706 = vmatpush1.bf16.msra.mxu1 %v9705_v15 }
 0x42c   : > { %9707 = vmatprep.subr.bf16.mxu1 %v15100_v25 }
 0x42f   : > { %9709 = vmatpush1.bf16.msra.mxu1 %v9708_v58 }
 0x430   : > { %9710 = vmatprep.subr.bf16.mxu1 %v15100_v25 }
 0x433   : > { %9712 = vmatpush1.bf16.msra.mxu1 %v9711_v30 }
 0x434   : > { %9713 = vmatprep.subr.bf16.mxu1 %v15100_v25 }
 0x437   : > { %9715 = vmatpush1.bf16.msra.mxu1 %v9714_v13 }
 0x438   : > { %9716 = vmatprep.subr.bf16.mxu1 %v15100_v25 }
 0x43b   : > { %9718 = vmatpush1.bf16.msra.mxu1 %v9717_v60 }
 0x43c   : > { %9719 = vmatprep.subr.bf16.mxu1 %v15100_v25 }
 0x46a   : > { %v12789_v3 = vpop.f32.mrb[30].mxu1 }
 0x46b   : > { %v12791_v57 = vpop.f32.mrb[31].mxu1 }
 0x475   : > { %v4603_v21 = vpop.f32.mrb[0].mxu0 }
 0x476   : > { %v9959_v14 = vadd.f32 %v12803_v46, %v4603_v21  ;;  %v4605_v26 = vpop.f32.mrb[1].mxu0  ;;  %v15107_v21 = vld [vmem:[#allocation13_spill] sm:$0xff] }
 0x478   : > { %v4829_v42 = vadd.f32 %v9959_v14, %v15101_v19 }
 0x479   : > { %v4608_v56 = vpop.f32.mrb[2].mxu0 }
 0x47a   : > { %v4987_v4 = vmax.f32 %v4829_v42, 0.0  ;;  %v9960_v34 = vadd.f32 %v12803_v46, %v4608_v56  ;;  %v4610_v18 = vpop.f32.mrb[3].mxu0 }
 0x47c   : > { %5019 = vst.msk [vmem:[#allocation2 + $0x64] sm:$0xff] %vm252_vm2, %v4987_v4  ;;  %v4834_v59 = vadd.f32 %v9960_v34, %v15102_v41  ;;  %v15108_v4 = vld [vmem:[#allocation10_spill] sm:$0xff] }
 0x47d   : > { %v4613_v17 = vpop.f32.mrb[4].mxu0 }
 0x47e   : > { %v4988_v52 = vmax.f32 %v4834_v59, 0.0  ;;  %v9961_v8 = vadd.f32 %v12803_v46, %v4613_v17  ;;  %v4615_v37 = vpop.f32.mrb[5].mxu0 }
 0x480   : > { %5020 = vst.msk [vmem:[#allocation2 + $0x6c] sm:$0xff] %vm252_vm2, %v4988_v52  ;;  %v4839_v50 = vadd.f32 %v9961_v8, %v15103_v39  ;;  %v15109_v8 = vld [vmem:[#allocation12_spill] sm:$0xff] }
 0x481   : > { %v4618_v27 = vpop.f32.mrb[6].mxu0 }
 0x482   : > { %v4989_v32 = vmax.f32 %v4839_v50, 0.0  ;;  %v9962_v1 = vadd.f32 %v12803_v46, %v4618_v27  ;;  %v4620_v63 = vpop.f32.mrb[7].mxu0 }
 0x483   : > { %v12822_v0 = vld [vmem:[#allocation2 + $0x61] sm:$0xff] }
 0x484   : > { %v5090_v33 = vld [vmem:[#allocation2 + $0x64] sm:$0xff]  ;;  %5404 = vrot.lane.b32.xlu0 %v12822_v0, %s10249_s19  ;;  %5021 = vst.msk [vmem:[#allocation2 + $0x7c] sm:$0xff] %vm252_vm2, %v4989_v32  ;;  %v4844_v55 = vadd.f32 %v9962_v1, %v15104_v31 }
 0x485   : > { %5160 = vrot.lane.b32.xlu1 %v5090_v33, %s10249_s19  ;;  %v4623_v10 = vpop.f32.mrb[8].mxu0  ;;  %v15110_v33 = vld [vmem:[#allocation33_spill] sm:$0xff] }
 0x486   : > { %v4990_v11 = vmax.f32 %v4844_v55, 0.0  ;;  %v9963_v6 = vadd.f32 %v12803_v46, %v4623_v10  ;;  %v4625_v7 = vpop.f32.mrb[9].mxu0 }
 0x487   : > { %v12830_v47 = vld [vmem:[#allocation2 + $0x69] sm:$0xff] }
 0x488   : > { %v5091_v53 = vld [vmem:[#allocation2 + $0x6c] sm:$0xff]  ;;  %5022 = vst.msk [vmem:[#allocation2 + $0x84] sm:$0xff] %vm252_vm2, %v4990_v11  ;;  %v4849_v35 = vadd.f32 %v9963_v6, %v15105_v48  ;;  %5406 = vrot.lane.b32.xlu0 %v12830_v47, %s10249_s19 }
 0x489   : > { %5162 = vrot.lane.b32.xlu1 %v5091_v53, %s10249_s19  ;;  %v4628_v24 = vpop.f32.mrb[10].mxu0 }
 0x48a   : > { %v4991_v9 = vmax.f32 %v4849_v35, 0.0  ;;  %v9964_v40 = vadd.f32 %v12803_v46, %v4628_v24  ;;  %v4630_v43 = vpop.f32.mrb[11].mxu0  ;;  %v15111_v35 = vld [vmem:[#allocation73_spill] sm:$0xff] }
 0x48b   : > { %v5342_v15 = vld [vmem:[#allocation2 + $0x79] sm:$0xff] }
 0x48c   : > { %v5092_v45 = vld [vmem:[#allocation2 + $0x7c] sm:$0xff]  ;;  %5023 = vst.msk [vmem:[#allocation2 + $0x94] sm:$0xff] %vm252_vm2, %v4991_v9  ;;  %v4854_v58 = vadd.f32 %v9964_v40, %v15106_v12  ;;  %5408 = vrot.lane.b32.xlu0 %v5342_v15, %s10249_s19 }
 0x48d   : > { %5164 = vrot.lane.b32.xlu1 %v5092_v45, %s10249_s19  ;;  %v4633_v2 = vpop.f32.mrb[12].mxu0 }
 0x48e   : > { %v4992_v22 = vmax.f32 %v4854_v58, 0.0  ;;  %v9965_v30 = vadd.f32 %v12803_v46, %v4633_v2  ;;  %v4635_v23 = vpop.f32.mrb[13].mxu0  ;;  %v15112_v2 = vld [vmem:[#allocation53_spill] sm:$0xff] }
 0x48f   : > { %v5343_v36 = vld [vmem:[#allocation2 + $0x81] sm:$0xff] }
 0x490   : > { %v5093_v13 = vld [vmem:[#allocation2 + $0x84] sm:$0xff]  ;;  %5024 = vst.msk [vmem:[#allocation2 + $0x9c] sm:$0xff] %vm252_vm2, %v4992_v22  ;;  %v4859_v14 = vadd.f32 %v9965_v30, %v15107_v21  ;;  %5410 = vrot.lane.b32.xlu0 %v5343_v36, %s10249_s19 }
 0x491   : > { %5166 = vrot.lane.b32.xlu1 %v5093_v13, %s10249_s19  ;;  %v4638_v26 = vpop.f32.mrb[14].mxu0 }
 0x492   : > { %v4993_v5 = vmax.f32 %v4859_v14, 0.0  ;;  %v9966_v54 = vadd.f32 %v12803_v46, %v4638_v26  ;;  %v4640_v60 = vpop.f32.mrb[15].mxu0 }
 0x493   : > { %v5344_v19 = vld [vmem:[#allocation2 + $0x91] sm:$0xff] }
 0x494   : > { %v5094_v42 = vld [vmem:[#allocation2 + $0x94] sm:$0xff]  ;;  %5025 = vst.msk [vmem:[#allocation2 + $0xac] sm:$0xff] %vm252_vm2, %v4993_v5  ;;  %v4864_v56 = vadd.f32 %v9966_v54, %v15108_v4  ;;  %5412 = vrot.lane.b32.xlu0 %v5344_v19, %s10249_s19  ;;  %v15113_v5 = vld [vmem:[#allocation15_spill] sm:$0xff] }
 0x495   : > { %5168 = vrot.lane.b32.xlu1 %v5094_v42, %s10249_s19  ;;  %v4643_v34 = vpop.f32.mrb[16].mxu0 }
 0x496   : > { %v4994_v18 = vmax.f32 %v4864_v56, 0.0  ;;  %v9967_v41 = vadd.f32 %v12803_v46, %v4643_v34  ;;  %v4645_v59 = vpop.f32.mrb[17].mxu0 }
 0x497   : > { %v5345_v17 = vld [vmem:[#allocation2 + $0x99] sm:$0xff] }
 0x498   : > { %v5095_v52 = vld [vmem:[#allocation2 + $0x9c] sm:$0xff]  ;;  %5026 = vst.msk [vmem:[#allocation2 + $0xb4] sm:$0xff] %vm252_vm2, %v4994_v18  ;;  %v4869_v37 = vadd.f32 %v9967_v41, %v15109_v8  ;;  %5414 = vrot.lane.b32.xlu0 %v5345_v17, %s10249_s19 }
 0x499   : > { %5170 = vrot.lane.b32.xlu1 %v5095_v52, %s10249_s19  ;;  %v4648_v39 = vpop.f32.mrb[18].mxu0  ;;  %v15114_v17 = vld [vmem:[#allocation35_spill] sm:$0xff] }
 0x49a   : > { %v4995_v50 = vmax.f32 %v4869_v37, 0.0  ;;  %v9968_v27 = vadd.f32 %v12803_v46, %v4648_v39  ;;  %v4650_v32 = vpop.f32.mrb[19].mxu0 }
 0x49b   : > { %v5346_v1 = vld [vmem:[#allocation2 + $0xa9] sm:$0xff] }
 0x49c   : > { %v12858_v63 = vld [vmem:[#allocation2 + $0xac] sm:$0xff]  ;;  %5027 = vst.msk [vmem:[#allocation2 + $0xc4] sm:$0xff] %vm252_vm2, %v4995_v50  ;;  %v4874_v31 = vadd.f32 %v9968_v27, %v15110_v33  ;;  %5416 = vrot.lane.b32.xlu0 %v5346_v1, %s10249_s19  ;;  %v15115_v33 = vld [vmem:[#allocation75_spill] sm:$0xff] }
 0x49d   : > { %5172 = vrot.lane.b32.xlu1 %v12858_v63, %s10249_s19  ;;  %v4653_v55 = vpop.f32.mrb[20].mxu0 }
 0x49e   : > { %v4996_v10 = vmax.f32 %v4874_v31, 0.0  ;;  %v9969_v11 = vadd.f32 %v12803_v46, %v4653_v55  ;;  %v4655_v6 = vpop.f32.mrb[21].mxu0 }
 0x49f   : > { %v5347_v7 = vld [vmem:[#allocation2 + $0xb1] sm:$0xff] }
 0x4a0   : > { %v12866_v53 = vld [vmem:[#allocation2 + $0xb4] sm:$0xff]  ;;  %5028 = vst.msk [vmem:[#allocation2 + $0xcc] sm:$0xff] %vm252_vm2, %v4996_v10  ;;  %v4879_v24 = vadd.f32 %v9969_v11, %v15111_v35  ;;  %5418 = vrot.lane.b32.xlu0 %v5347_v7, %s10249_s19 }
 0x4a1   : > { %v12868_v48 = vld [vmem:[#allocation2 + $0xaf] sm:$0xff]  ;;  %5174 = vrot.lane.b32.xlu1 %v12866_v53, %s10249_s19  ;;  %v12877_v9 = vld [vmem:[#allocation2 + $0xb7] sm:$0xff]  ;;  %v4658_v40 = vpop.f32.mrb[22].mxu0 }
 0x4a2   : > { %6109 = vst.msk [vmem:[#allocation3 + $0x20] sm:$0xff] %vm252_vm2, %v12868_v48  ;;  %6110 = vst.msk [vmem:[#allocation3 + $0x48] sm:$0xff] %vm252_vm2, %v12877_v9  ;;  %v4997_v43 = vmax.f32 %v4879_v24, 0.0  ;;  %v9970_v15 = vadd.f32 %v12803_v46, %v4658_v40  ;;  %v4660_v45 = vpop.f32.mrb[23].mxu0 }
 0x4a3   : > { %v5348_v12 = vld [vmem:[#allocation2 + $0xc1] sm:$0xff] }
 0x4a4   : > { %v5098_v58 = vld [vmem:[#allocation2 + $0xc4] sm:$0xff]  ;;  %5029 = vst.msk [vmem:[#allocation2 + $0xdc] sm:$0xff] %vm252_vm2, %v4997_v43  ;;  %v4884_v22 = vadd.f32 %v9970_v15, %v15112_v2  ;;  %5420 = vrot.lane.b32.xlu0 %v5348_v12, %s10249_s19 }
 0x4a5   : > { %5176 = vrot.lane.b32.xlu1 %v5098_v58, %s10249_s19  ;;  %v4663_v30 = vpop.f32.mrb[24].mxu0  ;;  %v15116_v15 = vld [vmem:[#allocation55_spill] sm:$0xff] }
 0x4a6   : > { %v4998_v23 = vmax.f32 %v4884_v22, 0.0  ;;  %v9971_v36 = vadd.f32 %v12803_v46, %v4663_v30  ;;  %v4665_v13 = vpop.f32.mrb[25].mxu0 }
 0x4a7   : > { %v5349_v21 = vld [vmem:[#allocation2 + $0xc9] sm:$0xff]  ;;  %v15117_v13 = vld [vmem:[#allocation14_spill] sm:$0xff] }
 0x4a8   : > { %v5099_v14 = vld [vmem:[#allocation2 + $0xcc] sm:$0xff]  ;;  %5030 = vst.msk [vmem:[#allocation2 + $0xe4] sm:$0xff] %vm252_vm2, %v4998_v23  ;;  %v4889_v54 = vadd.f32 %v9971_v36, %v15113_v5  ;;  %5422 = vrot.lane.b32.xlu0 %v5349_v21, %s10249_s19 }
 0x4a9   : > { %v6145_v26 = vld [vmem:[#allocation3 + $0x20] sm:$0xff]  ;;  %5178 = vrot.lane.b32.xlu1 %v5099_v14, %s10249_s19  ;;  %v6150_v60 = vld [vmem:[#allocation3 + $0x48] sm:$0xff]  ;;  %v4668_v4 = vpop.f32.mrb[26].mxu0 }
 0x4aa   : > { %v12891_v19 = vld [vmem:[#allocation2 + $0xc7] sm:$0xff]  ;;  %v12893_v42 = vld [vmem:[#allocation2 + $0xcf] sm:$0xff]  ;;  %9511 = vmatprep.mubr.msk.f32.mxu0 %vm252_vm2, %v6145_v26  ;;  %v4999_v56 = vmax.f32 %v4889_v54, 0.0  ;;  %v9972_v34 = vadd.f32 %v12803_v46, %v4668_v4  ;;  %v4670_v18 = vpop.f32.mrb[27].mxu0 }
 0x4ab   : > { %6111 = vst.msk [vmem:[#allocation3 + $0x70] sm:$0xff] %vm252_vm2, %v12891_v19  ;;  %6112 = vst.msk [vmem:[#allocation3 + $0x98] sm:$0xff] %vm252_vm2, %v12893_v42  ;;  %9512 = vmatmul.mubr.msk.f32.vlgmr.msra.gmra.mrb[64].mxu0 %vm252_vm2, %v6150_v60  ;;  %v5350_v41 = vld [vmem:[#allocation2 + $0xd9] sm:$0xff] }
 0x4ac   : > { %v5100_v59 = vld [vmem:[#allocation2 + $0xdc] sm:$0xff]  ;;  %5031 = vst.msk [vmem:[#allocation2 + $0xf4] sm:$0xff] %vm252_vm2, %v4999_v56  ;;  %v4894_v52 = vadd.f32 %v9972_v34, %v15114_v17  ;;  %5424 = vrot.lane.b32.xlu0 %v5350_v41, %s10249_s19 }
 0x4ad   : > { %5180 = vrot.lane.b32.xlu1 %v5100_v59, %s10249_s19  ;;  %v4673_v8 = vpop.f32.mrb[28].mxu0  ;;  %v15118_v41 = vld [vmem:[#allocation34_spill] sm:$0xff] }
 0x4ae   : > { %v5000_v37 = vmax.f32 %v4894_v52, 0.0  ;;  %v9973_v39 = vadd.f32 %v12803_v46, %v4673_v8  ;;  %v4675_v50 = vpop.f32.mrb[29].mxu0 }
 0x4af   : > { %v5351_v27 = vld [vmem:[#allocation2 + $0xe1] sm:$0xff] }
 0x4b0   : > { %v5101_v32 = vld [vmem:[#allocation2 + $0xe4] sm:$0xff]  ;;  %5032 = vst.msk [vmem:[#allocation2 + $0xfc] sm:$0xff] %vm252_vm2, %v5000_v37  ;;  %v4899_v31 = vadd.f32 %v9973_v39, %v15115_v33  ;;  %5426 = vrot.lane.b32.xlu0 %v5351_v27, %s10249_s19 }
 0x4b1   : > { %v12907_v1 = vld [vmem:[#allocation2 + $0xdf] sm:$0xff]  ;;  %5182 = vrot.lane.b32.xlu1 %v5101_v32, %s10249_s19  ;;  %v12915_v11 = vld [vmem:[#allocation2 + $0xe7] sm:$0xff]  ;;  %v4678_v6 = vpop.f32.mrb[30].mxu0 }
 0x4b2   : > { %v6155_v55 = vld [vmem:[#allocation3 + $0x70] sm:$0xff]  ;;  %v6160_v10 = vld [vmem:[#allocation3 + $0x98] sm:$0xff]  ;;  %6113 = vst.msk [vmem:[#allocation3 + $0xc0] sm:$0xff] %vm252_vm2, %v12907_v1  ;;  %6114 = vst.msk [vmem:[#allocation3 + $0xe8] sm:$0xff] %vm252_vm2, %v12915_v11  ;;  %v5001_v7 = vmax.f32 %v4899_v31, 0.0  ;;  %v9974_v35 = vadd.f32 %v12803_v46, %v4678_v6  ;;  %v4680_v24 = vpop.f32.mrb[31].mxu0 }
 0x4b3   : > { %9514 = vmatprep.mubr.msk.f32.mxu0 %vm252_vm2, %v6155_v55  ;;  %v5352_v40 = vld [vmem:[#allocation2 + $0xf1] sm:$0xff] }
 0x4b4   : > { %9515 = vmatmul.mubr.msk.f32.gmra.mrb[66].mxu0 %vm252_vm2, %v6160_v10  ;;  %v5102_v43 = vld [vmem:[#allocation2 + $0xf4] sm:$0xff]  ;;  %5033 = vst.msk [vmem:[#allocation2 + $0x10c] sm:$0xff] %vm252_vm2, %v5001_v7  ;;  %v4904_v45 = vadd.f32 %v9974_v35, %v15116_v15  ;;  %5428 = vrot.lane.b32.xlu0 %v5352_v40, %s10249_s19 }
 0x4b5   : > { %5184 = vrot.lane.b32.xlu1 %v5102_v43, %s10249_s19  ;;  %v4683_v12 = vpop.f32.mrb[32].mxu0  ;;  %v15119_v32 = vld [vmem:[#allocation74_spill] sm:$0xff] }
 0x4b6   : > { %v5002_v58 = vmax.f32 %v4904_v45, 0.0  ;;  %v9975_v2 = vadd.f32 %v12803_v46, %v4683_v12  ;;  %v4685_v22 = vpop.f32.mrb[33].mxu0  ;;  %v15120_v15 = vld [vmem:[#allocation54_spill] sm:$0xff] }
 0x4b7   : > { %v5353_v30 = vld [vmem:[#allocation2 + $0xf9] sm:$0xff] }
 0x4b8   : > { %v5103_v23 = vld [vmem:[#allocation2 + $0xfc] sm:$0xff]  ;;  %5034 = vst.msk [vmem:[#allocation2 + $0x114] sm:$0xff] %vm252_vm2, %v5002_v58  ;;  %v4909_v21 = vadd.f32 %v9975_v2, %v15117_v13  ;;  %5430 = vrot.lane.b32.xlu0 %v5353_v30, %s10249_s19 }
 0x4b9   : > { %v6165_v36 = vld [vmem:[#allocation3 + $0xc0] sm:$0xff]  ;;  %5186 = vrot.lane.b32.xlu1 %v5103_v23, %s10249_s19  ;;  %v6170_v14 = vld [vmem:[#allocation3 + $0xe8] sm:$0xff]  ;;  %v12931_v26 = vld [vmem:[#allocation2 + $0xf7] sm:$0xff]  ;;  %v4688_v54 = vpop.f32.mrb[34].mxu0 }
 0x4ba   : > { %v12933_v5 = vld [vmem:[#allocation2 + $0xff] sm:$0xff]  ;;  %9517 = vmatprep.mubr.msk.f32.mxu0 %vm252_vm2, %v6165_v36  ;;  %6115 = vst.msk [vmem:[#allocation3 + $0x110] sm:$0xff] %vm252_vm2, %v12931_v26  ;;  %v5003_v60 = vmax.f32 %v4909_v21, 0.0  ;;  %v9976_v4 = vadd.f32 %v12803_v46, %v4688_v54  ;;  %v4690_v56 = vpop.f32.mrb[35].mxu0 }
 0x4bb   : > { %6116 = vst.msk [vmem:[#allocation3 + $0x138] sm:$0xff] %vm252_vm2, %v12933_v5  ;;  %9518 = vmatmul.mubr.msk.f32.gmra.mrb[68].mxu0 %vm252_vm2, %v6170_v14  ;;  %v5354_v34 = vld [vmem:[#allocation2 + $0x109] sm:$0xff] }
 0x4bc   : > { %v5104_v18 = vld [vmem:[#allocation2 + $0x10c] sm:$0xff]  ;;  %5035 = vst.msk [vmem:[#allocation2 + $0x124] sm:$0xff] %vm252_vm2, %v5003_v60  ;;  %v4914_v59 = vadd.f32 %v9976_v4, %v15118_v41  ;;  %5432 = vrot.lane.b32.xlu0 %v5354_v34, %s10249_s19 }
 0x4bd   : > { %5188 = vrot.lane.b32.xlu1 %v5104_v18, %s10249_s19  ;;  %v4693_v17 = vpop.f32.mrb[36].mxu0 }
 0x4be   : > { %v5004_v52 = vmax.f32 %v4914_v59, 0.0  ;;  %v9977_v8 = vadd.f32 %v12803_v46, %v4693_v17  ;;  %v4695_v37 = vpop.f32.mrb[37].mxu0 }
 0x4bf   : > { %v5355_v39 = vld [vmem:[#allocation2 + $0x111] sm:$0xff] }
 0x4c0   : > { %v5105_v50 = vld [vmem:[#allocation2 + $0x114] sm:$0xff]  ;;  %5036 = vst.msk [vmem:[#allocation2 + $0x12c] sm:$0xff] %vm252_vm2, %v5004_v52  ;;  %v4919_v33 = vadd.f32 %v9977_v8, %v15119_v32  ;;  %5434 = vrot.lane.b32.xlu0 %v5355_v39, %s10249_s19 }
 0x4c1   : > { %v12947_v27 = vld [vmem:[#allocation2 + $0x10f] sm:$0xff]  ;;  %5190 = vrot.lane.b32.xlu1 %v5105_v50, %s10249_s19  ;;  %v12955_v10 = vld [vmem:[#allocation2 + $0x117] sm:$0xff]  ;;  %v4698_v6 = vpop.f32.mrb[38].mxu0 }
 0x4c2   : > { %v6175_v31 = vld [vmem:[#allocation3 + $0x110] sm:$0xff]  ;;  %v6180_v55 = vld [vmem:[#allocation3 + $0x138] sm:$0xff]  ;;  %6117 = vst.msk [vmem:[#allocation3 + $0x160] sm:$0xff] %vm252_vm2, %v12947_v27  ;;  %6118 = vst.msk [vmem:[#allocation3 + $0x188] sm:$0xff] %vm252_vm2, %v12955_v10  ;;  %v5005_v7 = vmax.f32 %v4919_v33, 0.0  ;;  %v9978_v35 = vadd.f32 %v12803_v46, %v4698_v6  ;;  %v4700_v24 = vpop.f32.mrb[39].mxu0  ;;  %v13000_v6 = vpop.permute.xlu1 %5148 }
 0x4c3   : > { %9520 = vmatprep.mubr.msk.f32.mxu0 %vm252_vm2, %v6175_v31  ;;  %v5356_v40 = vld [vmem:[#allocation2 + $0x121] sm:$0xff] }
 0x4c4   : > { %9521 = vmatmul.mubr.msk.f32.gmra.mrb[70].mxu0 %vm252_vm2, %v6180_v55  ;;  %v5106_v43 = vld [vmem:[#allocation2 + $0x124] sm:$0xff]  ;;  %5037 = vst.msk [vmem:[#allocation2 + $0x13c] sm:$0xff] %vm252_vm2, %v5005_v7  ;;  %v4924_v45 = vadd.f32 %v9978_v35, %v15120_v15  ;;  %5436 = vrot.lane.b32.xlu0 %v5356_v40, %s10249_s19 }
 0x4c5   : > { %5192 = vrot.lane.b32.xlu1 %v5106_v43, %s10249_s19  ;;  %v4703_v12 = vpop.f32.mrb[40].mxu0 }
 0x4c6   : > { %v5006_v58 = vmax.f32 %v4924_v45, 0.0  ;;  %v9979_v2 = vadd.f32 %v12803_v46, %v4703_v12  ;;  %v4705_v22 = vpop.f32.mrb[41].mxu0 }
 0x4c7   : > { %v5357_v30 = vld [vmem:[#allocation2 + $0x129] sm:$0xff] }
 0x4c8   : > { %v5107_v23 = vld [vmem:[#allocation2 + $0x12c] sm:$0xff]  ;;  %5038 = vst.msk [vmem:[#allocation2 + $0x144] sm:$0xff] %vm252_vm2, %v5006_v58  ;;  %v4929_v13 = vadd.f32 %v9979_v2, %v12545_v28  ;;  %5438 = vrot.lane.b32.xlu0 %v5357_v30, %s10249_s19 }
 0x4c9   : > { %v6185_v36 = vld [vmem:[#allocation3 + $0x160] sm:$0xff]  ;;  %5194 = vrot.lane.b32.xlu1 %v5107_v23, %s10249_s19  ;;  %v6190_v21 = vld [vmem:[#allocation3 + $0x188] sm:$0xff]  ;;  %v4708_v60 = vpop.f32.mrb[42].mxu0  ;;  %v13009_v23 = vpop.permute.xlu1 %5150 }
 0x4ca   : > { %v12971_v14 = vld [vmem:[#allocation2 + $0x127] sm:$0xff]  ;;  %v12973_v54 = vld [vmem:[#allocation2 + $0x12f] sm:$0xff]  ;;  %9523 = vmatprep.mubr.msk.f32.mxu0 %vm252_vm2, %v6185_v36  ;;  %v5007_v4 = vmax.f32 %v4929_v13, 0.0  ;;  %v9980_v28 = vadd.f32 %v12803_v46, %v4708_v60  ;;  %v4710_v56 = vpop.f32.mrb[43].mxu0 }
 0x4cb   : > { %6119 = vst.msk [vmem:[#allocation3 + $0x1b0] sm:$0xff] %vm252_vm2, %v12971_v14  ;;  %6120 = vst.msk [vmem:[#allocation3 + $0x1d8] sm:$0xff] %vm252_vm2, %v12973_v54  ;;  %9524 = vmatmul.mubr.msk.f32.gmra.mrb[72].mxu0 %vm252_vm2, %v6190_v21  ;;  %v5358_v34 = vld [vmem:[#allocation2 + $0x139] sm:$0xff] }
 0x4cc   : > { %v5108_v18 = vld [vmem:[#allocation2 + $0x13c] sm:$0xff]  ;;  %5039 = vst.msk [vmem:[#allocation2 + $0x154] sm:$0xff] %vm252_vm2, %v5007_v4  ;;  %v4934_v41 = vadd.f32 %v9980_v28, %v12540_v61  ;;  %5440 = vrot.lane.b32.xlu0 %v5358_v34, %s10249_s19 }
 0x4cd   : > { %5196 = vrot.lane.b32.xlu1 %v5108_v18, %s10249_s19  ;;  %v4713_v59 = vpop.f32.mrb[44].mxu0 }
 0x4ce   : > { %v5008_v17 = vmax.f32 %v4934_v41, 0.0  ;;  %v9981_v52 = vadd.f32 %v12803_v46, %v4713_v59  ;;  %v4715_v8 = vpop.f32.mrb[45].mxu0  ;;  %v13030_v59 = vpop.permute.xlu1 %5152 }
 0x4cf   : > { %v5359_v37 = vld [vmem:[#allocation2 + $0x141] sm:$0xff] }
 0x4d0   : > { %v5109_v39 = vld [vmem:[#allocation2 + $0x144] sm:$0xff]  ;;  %5040 = vst.msk [vmem:[#allocation2 + $0x15c] sm:$0xff] %vm252_vm2, %v5008_v17  ;;  %v4939_v32 = vadd.f32 %v9981_v52, %v12584_v51  ;;  %5442 = vrot.lane.b32.xlu0 %v5359_v37, %s10249_s19 }
 0x4d1   : > { %v12987_v50 = vld [vmem:[#allocation2 + $0x13f] sm:$0xff]  ;;  %5198 = vrot.lane.b32.xlu1 %v5109_v39, %s10249_s19  ;;  %v12995_v31 = vld [vmem:[#allocation2 + $0x147] sm:$0xff]  ;;  %v4718_v55 = vpop.f32.mrb[46].mxu0 }
 0x4d2   : > { %v6195_v61 = vld [vmem:[#allocation3 + $0x1b0] sm:$0xff]  ;;  %v6200_v33 = vld [vmem:[#allocation3 + $0x1d8] sm:$0xff]  ;;  %6121 = vst.msk [vmem:[#allocation3 + $0x200] sm:$0xff] %vm252_vm2, %v12987_v50  ;;  %6122 = vst.msk [vmem:[#allocation3 + $0x228] sm:$0xff] %vm252_vm2, %v12995_v31  ;;  %v5009_v51 = vmax.f32 %v4939_v32, 0.0  ;;  %v9982_v7 = vadd.f32 %v12803_v46, %v4718_v55  ;;  %v4720_v35 = vpop.f32.mrb[47].mxu0 }
 0x4d3   : > { %9526 = vmatprep.mubr.msk.f32.mxu0 %vm252_vm2, %v6195_v61  ;;  %v5360_v24 = vld [vmem:[#allocation2 + $0x151] sm:$0xff] }
 0x4d4   : > { %9527 = vmatmul.mubr.msk.f32.gmra.mrb[74].mxu0 %vm252_vm2, %v6200_v33  ;;  %v5110_v40 = vld [vmem:[#allocation2 + $0x154] sm:$0xff]  ;;  %5041 = vst.msk [vmem:[#allocation2 + $0x16c] sm:$0xff] %vm252_vm2, %v5009_v51  ;;  %v4944_v43 = vadd.f32 %v9982_v7, %v12579_v62  ;;  %5444 = vrot.lane.b32.xlu0 %v5360_v24, %s10249_s19 }
 0x4d5   : > { %5200 = vrot.lane.b32.xlu1 %v5110_v40, %s10249_s19  ;;  %v4723_v15 = vpop.f32.mrb[48].mxu0 }
 0x4d6   : > { %v5010_v45 = vmax.f32 %v4944_v43, 0.0  ;;  %v9983_v12 = vadd.f32 %v12803_v46, %v4723_v15  ;;  %v4725_v58 = vpop.f32.mrb[49].mxu0  ;;  %v13048_v43 = vpop.permute.xlu1 %5154 }
 0x4d7   : > { %v5361_v2 = vld [vmem:[#allocation2 + $0x159] sm:$0xff] }
 0x4d8   : > { %v5111_v22 = vld [vmem:[#allocation2 + $0x15c] sm:$0xff]  ;;  %5042 = vst.msk [vmem:[#allocation2 + $0x174] sm:$0xff] %vm252_vm2, %v5010_v45  ;;  %v4949_v36 = vadd.f32 %v9983_v12, %v12621_v29  ;;  %5446 = vrot.lane.b32.xlu0 %v5361_v2, %s10249_s19 }
 0x4d9   : > { %v6205_v30 = vld [vmem:[#allocation3 + $0x200] sm:$0xff]  ;;  %5202 = vrot.lane.b32.xlu1 %v5111_v22, %s10249_s19  ;;  %v6210_v62 = vld [vmem:[#allocation3 + $0x228] sm:$0xff]  ;;  %v13015_v13 = vld [vmem:[#allocation2 + $0x157] sm:$0xff]  ;;  %v4728_v60 = vpop.f32.mrb[50].mxu0 }
 0x4da   : > { %v13017_v21 = vld [vmem:[#allocation2 + $0x15f] sm:$0xff]  ;;  %9529 = vmatprep.mubr.msk.f32.mxu0 %vm252_vm2, %v6205_v30  ;;  %6123 = vst.msk [vmem:[#allocation3 + $0x250] sm:$0xff] %vm252_vm2, %v13015_v13  ;;  %v5011_v4 = vmax.f32 %v4949_v36, 0.0  ;;  %v9984_v29 = vadd.f32 %v12803_v46, %v4728_v60  ;;  %v4730_v28 = vpop.f32.mrb[51].mxu0 }
 0x4db   : > { %6124 = vst.msk [vmem:[#allocation3 + $0x278] sm:$0xff] %vm252_vm2, %v13017_v21  ;;  %9530 = vmatmul.mubr.msk.f32.gmra.mrb[76].mxu0 %vm252_vm2, %v6210_v62  ;;  %v5362_v56 = vld [vmem:[#allocation2 + $0x169] sm:$0xff]  ;;  %v13064_v28 = vpop.permute.xlu1 %5156 }
 0x4dc   : > { %v5112_v34 = vld [vmem:[#allocation2 + $0x16c] sm:$0xff]  ;;  %5043 = vst.msk [vmem:[#allocation2 + $0x184] sm:$0xff] %vm252_vm2, %v5011_v4  ;;  %v4954_v18 = vadd.f32 %v9984_v29, %v12617_v20  ;;  %5448 = vrot.lane.b32.xlu0 %v5362_v56, %s10249_s19 }
 0x4dd   : > { %5204 = vrot.lane.b32.xlu1 %v5112_v34, %s10249_s19  ;;  %v4733_v41 = vpop.f32.mrb[52].mxu0 }
 0x4de   : > { %v5012_v17 = vmax.f32 %v4954_v18, 0.0  ;;  %v9985_v52 = vadd.f32 %v12803_v46, %v4733_v41  ;;  %v4735_v8 = vpop.f32.mrb[53].mxu0  ;;  %v13072_v18 = vld [vmem:[#allocation2 + $0x67] sm:$0xff] }
 0x4df   : > { %v5363_v37 = vld [vmem:[#allocation2 + $0x171] sm:$0xff] }
 0x4e0   : > { %v5113_v39 = vld [vmem:[#allocation2 + $0x174] sm:$0xff]  ;;  %5044 = vst.msk [vmem:[#allocation2 + $0x18c] sm:$0xff] %vm252_vm2, %v5012_v17  ;;  %v4959_v61 = vadd.f32 %v9985_v52, %v12644_v44  ;;  %5450 = vrot.lane.b32.xlu0 %v5363_v37, %s10249_s19 }
 0x4e1   : > { %v13033_v32 = vld [vmem:[#allocation2 + $0x16f] sm:$0xff]  ;;  %5206 = vrot.lane.b32.xlu1 %v5113_v39, %s10249_s19  ;;  %v13041_v55 = vld [vmem:[#allocation2 + $0x177] sm:$0xff]  ;;  %v4738_v51 = vpop.f32.mrb[54].mxu0 }
 0x4e2   : > { %v6215_v20 = vld [vmem:[#allocation3 + $0x250] sm:$0xff]  ;;  %v6220_v33 = vld [vmem:[#allocation3 + $0x278] sm:$0xff]  ;;  %6125 = vst.msk [vmem:[#allocation3 + $0x2a0] sm:$0xff] %vm252_vm2, %v13033_v32  ;;  %6126 = vst.msk [vmem:[#allocation3 + $0x2c8] sm:$0xff] %vm252_vm2, %v13041_v55  ;;  %v5013_v7 = vmax.f32 %v4959_v61, 0.0  ;;  %v9986_v44 = vadd.f32 %v12803_v46, %v4738_v51  ;;  %v4740_v35 = vpop.f32.mrb[55].mxu0 }
 0x4e3   : > { %9532 = vmatprep.mubr.msk.f32.mxu0 %vm252_vm2, %v6215_v20  ;;  %v5364_v24 = vld [vmem:[#allocation2 + $0x181] sm:$0xff]  ;;  %v13080_v61 = vld [vmem:[#allocation2 + $0x6f] sm:$0xff] }
 0x4e4   : > { %9533 = vmatmul.mubr.msk.f32.gmra.mrb[78].mxu0 %vm252_vm2, %v6220_v33  ;;  %v5114_v40 = vld [vmem:[#allocation2 + $0x184] sm:$0xff]  ;;  %5045 = vst.msk [vmem:[#allocation2 + $0x19c] sm:$0xff] %vm252_vm2, %v5013_v7  ;;  %v4964_v15 = vadd.f32 %v9986_v44, %v12640_v38  ;;  %5452 = vrot.lane.b32.xlu0 %v5364_v24, %s10249_s19  ;;  %v13082_v33 = vpop.permute.xlu1 %5158 }
 0x4e5   : > { %5208 = vrot.lane.b32.xlu1 %v5114_v40, %s10249_s19  ;;  %v4743_v45 = vpop.f32.mrb[56].mxu0  ;;  %v5052_v40 = vld [vmem:[#allocation2 + $0x19] sm:$0xff] }
 0x4e6   : > { %v5014_v12 = vmax.f32 %v4964_v15, 0.0  ;;  %v9987_v58 = vadd.f32 %v12803_v46, %v4743_v45  ;;  %v4745_v2 = vpop.f32.mrb[57].mxu0 }
 0x4e7   : > { %v5365_v22 = vld [vmem:[#allocation2 + $0x189] sm:$0xff]  ;;  %v13103_v2 = vld [vmem:[#allocation2 + $0x7f] sm:$0xff] }
 0x4e8   : > { %v5115_v30 = vld [vmem:[#allocation2 + $0x18c] sm:$0xff]  ;;  %5046 = vst.msk [vmem:[#allocation2 + $0x1a4] sm:$0xff] %vm252_vm2, %v5014_v12  ;;  %v4969_v62 = vadd.f32 %v9987_v58, %v12773_v49  ;;  %5454 = vrot.lane.b32.xlu0 %v5365_v22, %s10249_s19  ;;  %v5308_v12 = vld [vmem:[#allocation2 + $0x1f] sm:$0xff] }
 0x4e9   : > { %v6225_v36 = vld [vmem:[#allocation3 + $0x2a0] sm:$0xff]  ;;  %5210 = vrot.lane.b32.xlu1 %v5115_v30, %s10249_s19  ;;  %v6230_v38 = vld [vmem:[#allocation3 + $0x2c8] sm:$0xff]  ;;  %v4748_v29 = vpop.f32.mrb[58].mxu0 }
 0x4ea   : > { %v13059_v60 = vld [vmem:[#allocation2 + $0x187] sm:$0xff]  ;;  %v13061_v4 = vld [vmem:[#allocation2 + $0x18f] sm:$0xff]  ;;  %9535 = vmatprep.mubr.msk.f32.mxu0 %vm252_vm2, %v6225_v36  ;;  %v5015_v49 = vmax.f32 %v4969_v62, 0.0  ;;  %v9988_v56 = vadd.f32 %v12803_v46, %v4748_v29  ;;  %v4750_v34 = vpop.f32.mrb[59].mxu0 }
 0x4eb   : > { %6127 = vst.msk [vmem:[#allocation3 + $0x2f0] sm:$0xff] %vm252_vm2, %v13059_v60  ;;  %6128 = vst.msk [vmem:[#allocation3 + $0x318] sm:$0xff] %vm252_vm2, %v13061_v4  ;;  %9536 = vmatmul.mubr.msk.f32.gmra.mrb[80].mxu0 %vm252_vm2, %v6230_v38  ;;  %v5366_v41 = vld [vmem:[#allocation2 + $0x199] sm:$0xff]  ;;  %v9186_v30 = vld [vmem:[%s14882_s2 + $0x348] sm:$0xff]  ;;  %v5244_v38 = vsel %vm252_vm2, %v5052_v40, %v13000_v6 }
 0x4ec   : > { %5047 = vst.msk [vmem:[#allocation2 + $0x1b4] sm:$0xff] %vm252_vm2, %v5015_v49  ;;  %v4974_v17 = vadd.f32 %v9988_v56, %v12771_v16  ;;  %5456 = vrot.lane.b32.xlu0 %v5366_v41, %s10249_s19  ;;  %v9185_v58 = vld [vmem:[%s14882_s2 + $0x340] sm:$0xff]  ;;  %v13145_v40 = vld [vmem:[#allocation2 + $0x97] sm:$0xff] }
 0x4ed   : > { %5660 = vrot.lane.b32.xlu1 %v13072_v18, %s10249_s19  ;;  %v4753_v52 = vpop.f32.mrb[60].mxu0  ;;  %v5053_v29 = vld [vmem:[#allocation2 + $0x21] sm:$0xff] }
 0x4ee   : > { %v5016_v8 = vmax.f32 %v4974_v17, 0.0  ;;  %v9989_v37 = vadd.f32 %v12803_v46, %v4753_v52  ;;  %v4755_v39 = vpop.f32.mrb[61].mxu0  ;;  %v13118_v34 = vld [vmem:[#allocation2 + $0x87] sm:$0xff]  ;;  %v9720_v17 = vpack.c.bf16 %v9186_v30, %v9185_v58  ;;  %v5055_v58 = vld [vmem:[#allocation2 + $0x39] sm:$0xff] }
 0x4ef   : > { %v5367_v20 = vld [vmem:[#allocation2 + $0x1a1] sm:$0xff] }
 0x4f0   : > { %v13084_v51 = vld [vmem:[#allocation2 + $0x19f] sm:$0xff]  ;;  %v13086_v7 = vld [vmem:[#allocation2 + $0x1a7] sm:$0xff]  ;;  %5048 = vst.msk [vmem:[#allocation2 + $0x1bc] sm:$0xff] %vm252_vm2, %v5016_v8  ;;  %v4979_v16 = vadd.f32 %v9989_v37, %v12791_v57  ;;  %5458 = vrot.lane.b32.xlu0 %v5367_v20, %s10249_s19 }
 0x4f1   : > { %5662 = vrot.lane.b32.xlu1 %v13080_v61, %s10249_s19  ;;  %6129 = vst.msk [vmem:[#allocation3 + $0x340] sm:$0xff] %vm252_vm2, %v13084_v51  ;;  %6130 = vst.msk [vmem:[#allocation3 + $0x368] sm:$0xff] %vm252_vm2, %v13086_v7  ;;  %v4758_v24 = vpop.f32.mrb[62].mxu0  ;;  %v5309_v41 = vld [vmem:[#allocation2 + $0x27] sm:$0xff]  ;;  %v9188_v20 = vld [vmem:[%s14882_s2 + $0x358] sm:$0xff] }
 0x4f2   : > { %v6235_v44 = vld [vmem:[#allocation3 + $0x2f0] sm:$0xff]  ;;  %v6240_v35 = vld [vmem:[#allocation3 + $0x318] sm:$0xff]  ;;  %v5017_v15 = vmax.f32 %v4979_v16, 0.0  ;;  %v9990_v57 = vadd.f32 %v12803_v46, %v4758_v24  ;;  %v4760_v45 = vpop.f32.mrb[63].mxu0 }
 0x4f3   : > { %9538 = vmatprep.mubr.msk.f32.mxu0 %vm252_vm2, %v6235_v44  ;;  %v5368_v22 = vld [vmem:[#allocation2 + $0x1b1] sm:$0xff] }
 0x4f4   : > { %9539 = vmatmul.mubr.msk.f32.gmra.mrb[82].mxu0 %vm252_vm2, %v6240_v35  ;;  %5049 = vst.msk [vmem:[#allocation2 + $0x1cc] sm:$0xff] %vm252_vm2, %v5017_v15  ;;  %v4984_v36 = vadd.f32 %v9990_v57, %v12789_v3  ;;  %5460 = vrot.lane.b32.xlu0 %v5368_v22, %s10249_s19  ;;  %v9187_v3 = vld [vmem:[%s14882_s2 + $0x350] sm:$0xff]  ;;  %v5245_v35 = vsel %vm252_vm2, %v5053_v29, %v13009_v23  ;;  %v13153_v23 = vld [vmem:[#allocation2 + $0x9f] sm:$0xff] }
 0x4f5   : > { %5664 = vrot.lane.b32.xlu1 %v13103_v2, %s10249_s19  ;;  %v9723_v57 = vpack.c.bf16 %v9188_v20, %v9187_v3  ;;  %v5054_v45 = vld [vmem:[#allocation2 + $0x31] sm:$0xff]  ;;  %v5247_v20 = vsel %vm252_vm2, %v5055_v58, %v13048_v43  ;;  %v5056_v43 = vld [vmem:[#allocation2 + $0x49] sm:$0xff] }
 0x4f6   : > { %v5405_v46 = vpop.permute.xlu0 %5404  ;;  %v5018_v49 = vmax.f32 %v4984_v36, 0.0  ;;  %v9189_v36 = vld [vmem:[%s14882_s2 + $0x360] sm:$0xff] }
 0x4f7   : > { %v13113_v62 = vpop.permute.xlu1 %5160  ;;  %v5500_v56 = vsel %vm252_vm2, %v5308_v12, %v5405_v46  ;;  %v5369_v52 = vld [vmem:[#allocation2 + $0x1b9] sm:$0xff]  ;;  %v9190_v46 = vld [vmem:[%s14882_s2 + $0x368] sm:$0xff] }
 0x4f8   : > { %v6245_v8 = vld [vmem:[#allocation3 + $0x340] sm:$0xff]  ;;  %v6250_v37 = vld [vmem:[#allocation3 + $0x368] sm:$0xff]  ;;  %6542 = vmatprep.mubr.f32.mxu1 %v5500_v56  ;;  %5050 = vst.msk [vmem:[#allocation2 + $0x1d4] sm:$0xff] %vm252_vm2, %v5018_v49  ;;  %5462 = vrot.lane.b32.xlu0 %v5369_v52, %s10249_s19  ;;  %v13127_v6 = vld [vmem:[#allocation2 + $0x1b7] sm:$0xff] }
 0x4f9   : > { %5666 = vrot.lane.b32.xlu1 %v13118_v34, %s10249_s19  ;;  %v13129_v39 = vld [vmem:[#allocation2 + $0x1bf] sm:$0xff]  ;;  %9541 = vmatprep.mubr.msk.f32.mxu0 %vm252_vm2, %v6245_v8  ;;  %6131 = vst.msk [vmem:[#allocation3 + $0x390] sm:$0xff] %vm252_vm2, %v13127_v6  ;;  %v5310_v12 = vld [vmem:[#allocation2 + $0x37] sm:$0xff] }
 0x4fa   : > { %6543 = vmatmul.mubr.f32.vlgmr.msra.gmra.mrb[32].mxu1 %v5244_v38  ;;  %6132 = vst.msk [vmem:[#allocation3 + $0x3b8] sm:$0xff] %vm252_vm2, %v13129_v39  ;;  %9542 = vmatmul.mubr.msk.f32.gmra.mrb[84].mxu0 %vm252_vm2, %v6250_v37  ;;  %v5407_v16 = vpop.permute.xlu0 %5406  ;;  %v5246_v38 = vsel %vm252_vm2, %v5054_v45, %v13030_v59  ;;  %v5311_v52 = vld [vmem:[#allocation2 + $0x3f] sm:$0xff]  ;;  %v9726_v59 = vpack.c.bf16 %v9190_v46, %v9189_v36  ;;  %v8267_v45 = vld [vmem:[#allocation2 + $0x1f0] sm:$0xff] }
 0x4fb   : > { %v13140_v44 = vpop.permute.xlu1 %5162  ;;  %9721 = vmatpush1.bf16.msra.mxu1 %v9720_v17  ;;  %v5501_v24 = vsel %vm252_vm2, %v5309_v41, %v5407_v16  ;;  %v5370_v15 = vld [vmem:[#allocation2 + $0x1c9] sm:$0xff] }
 0x4fc   : > { %9722 = vmatprep.subr.bf16.mxu1 %v15100_v25  ;;  %5464 = vrot.lane.b32.xlu0 %v5370_v15, %s10249_s19  ;;  %v5312_v15 = vld [vmem:[#allocation2 + $0x4f] sm:$0xff] }
 0x4fd   : > { %5668 = vrot.lane.b32.xlu1 %v13145_v40, %s10249_s19  ;;  %6547 = vmatprep.mubr.f32.mxu1 %v5501_v24  ;;  %v9192_v24 = vld [vmem:[%s14882_s2 + $0x378] sm:$0xff] }
 0x4fe   : > { %v5409_v22 = vpop.permute.xlu0 %5408  ;;  %6548 = vmatmul.mubr.f32.gmra.mrb[34].mxu1 %v5245_v35  ;;  %v9191_v35 = vld [vmem:[%s14882_s2 + $0x370] sm:$0xff] }
 0x4ff   : > { %v13151_v30 = vpop.permute.xlu1 %5164  ;;  %v5502_v29 = vsel %vm252_vm2, %v5310_v12, %v5409_v22  ;;  %v5371_v49 = vld [vmem:[#allocation2 + $0x1d1] sm:$0xff]  ;;  %9724 = vmatpush1.bf16.msra.mxu1 %v9723_v57  ;;  %v8266_v57 = vld [vmem:[#allocation2 + $0x1e8] sm:$0xff]  ;;  %v9729_v22 = vpack.c.bf16 %v9192_v24, %v9191_v35 }
 0x500   : > { %v13164_v56 = vld [vmem:[#allocation2 + $0x1cf] sm:$0xff]  ;;  %v13166_v41 = vld [vmem:[#allocation2 + $0x1d7] sm:$0xff]  ;;  %5466 = vrot.lane.b32.xlu0 %v5371_v49, %s10249_s19  ;;  %6552 = vmatprep.mubr.f32.mxu1 %v5502_v29  ;;  %v5248_v29 = vsel %vm252_vm2, %v5056_v43, %v13064_v28 }
 0x501   : > { %5670 = vrot.lane.b32.xlu1 %v13153_v23, %s10249_s19  ;;  %v6255_v17 = vld [vmem:[#allocation3 + $0x390] sm:$0xff]  ;;  %v6260_v3 = vld [vmem:[#allocation3 + $0x3b8] sm:$0xff]  ;;  %6133 = vst.msk [vmem:[#allocation3 + $0x3e0] sm:$0xff] %vm252_vm2, %v13164_v56  ;;  %6134 = vst.msk [vmem:[#allocation3 + $0x408] sm:$0xff] %vm252_vm2, %v13166_v41  ;;  %9725 = vmatprep.subr.bf16.mxu1 %v15100_v25 }
 0x502   : > { %9544 = vmatprep.mubr.msk.f32.mxu0 %vm252_vm2, %v6255_v17  ;;  %v5411_v8 = vpop.permute.xlu0 %5410  ;;  %6553 = vmatmul.mubr.f32.gmra.mrb[36].mxu1 %v5246_v38  ;;  %v9194_v38 = vld [vmem:[%s14882_s2 + $0x388] sm:$0xff]  ;;  %v5313_v49 = vld [vmem:[#allocation2 + $0x57] sm:$0xff] }
 0x503   : > { %9545 = vmatmul.mubr.msk.f32.gmra.mrb[86].mxu0 %vm252_vm2, %v6260_v3  ;;  %v13177_v37 = vpop.permute.xlu1 %5166  ;;  %v5503_v16 = vsel %vm252_vm2, %v5311_v52, %v5411_v8  ;;  %9727 = vmatpush1.bf16.msra.mxu1 %v9726_v59  ;;  %v5057_v17 = vld [vmem:[#allocation2 + $0x51] sm:$0xff] }
 0x504   : > { %5917 = vrot.lane.b32.xlu0 %v12858_v63, %s10249_s19  ;;  %6557 = vmatprep.mubr.f32.mxu1 %v5503_v16  ;;  %v9195_v59 = vld [vmem:[%s14882_s2 + $0x390] sm:$0xff]  ;;  %v5249_v8 = vsel %vm252_vm2, %v5057_v17, %v13082_v33  ;;  %v9197_v33 = vld [vmem:[%s14882_s2 + $0x3a0] sm:$0xff] }
 0x505   : > { %5672 = vrot.lane.b32.xlu1 %v12868_v48, %s10249_s19  ;;  %9728 = vmatprep.subr.bf16.mxu1 %v15100_v25  ;;  %v9193_v48 = vld [vmem:[%s14882_s2 + $0x380] sm:$0xff]  ;;  %v5856_v43 = vld [vmem:[#allocation2 + $0xcc] sm:$0xff] }
 0x506   : > { %v5413_v12 = vpop.permute.xlu0 %5412  ;;  %6558 = vmatmul.mubr.f32.gmra.mrb[38].mxu1 %v5247_v20  ;;  %v9732_v28 = vpack.c.bf16 %v9194_v38, %v9193_v48  ;;  %v5855_v20 = vld [vmem:[#allocation2 + $0xc4] sm:$0xff]  ;;  %v9200_v48 = vld [vmem:[%s14882_s2 + $0x3b8] sm:$0xff] }
 0x507   : > { %v13193_v58 = vpop.permute.xlu1 %5168  ;;  %v5504_v36 = vsel %vm252_vm2, %v5312_v15, %v5413_v12  ;;  %9730 = vmatpush1.bf16.msra.mxu1 %v9729_v22  ;;  %v9202_v38 = vld [vmem:[%s14882_s2 + $0x3c8] sm:$0xff] }
 0x508   : > { %v6265_v63 = vld [vmem:[#allocation3 + $0x3e0] sm:$0xff]  ;;  %v6270_v46 = vld [vmem:[#allocation3 + $0x408] sm:$0xff]  ;;  %5919 = vrot.lane.b32.xlu0 %v12866_v53, %s10249_s19  ;;  %6562 = vmatprep.mubr.f32.mxu1 %v5504_v36  ;;  %v9196_v53 = vld [vmem:[%s14882_s2 + $0x398] sm:$0xff] }
 0x509   : > { %5674 = vrot.lane.b32.xlu1 %v12877_v9, %s10249_s19  ;;  %9547 = vmatprep.mubr.msk.f32.mxu0 %vm252_vm2, %v6265_v63  ;;  %8298 = vst.msk [vmem:[#allocation3 + $0x3e0] sm:$0xff] %vm252_vm2, %v8266_v57  ;;  %8299 = vst.msk [vmem:[#allocation3 + $0x408] sm:$0xff] %vm252_vm2, %v8267_v45  ;;  %v9735_v24 = vpack.c.bf16 %v9196_v53, %v9195_v59 }
 0x50a   : > { %9548 = vmatmul.mubr.msk.f32.gmra.mrb[88].mxu0 %vm252_vm2, %v6270_v46  ;;  %v5415_v3 = vpop.permute.xlu0 %5414  ;;  %6563 = vmatmul.mubr.f32.gmra.mrb[40].mxu1 %v5248_v29 }
 0x50b   : > { %v13213_v52 = vpop.permute.xlu1 %5170  ;;  %v5505_v9 = vsel %vm252_vm2, %v5313_v49, %v5415_v3  ;;  %9731 = vmatprep.subr.bf16.mxu1 %v15100_v25 }
 0x50c   : > { %6567 = vmatprep.mubr.f32.mxu1 %v5505_v9  ;;  %5921 = vrot.lane.b32.xlu0 %v5855_v20, %s10249_s19  ;;  %v5061_v9 = vld [vmem:[#allocation2 + $0x81] sm:$0xff] }
 0x50d   : > { %5676 = vrot.lane.b32.xlu1 %v12891_v19, %s10249_s19  ;;  %9733 = vmatpush1.bf16.msra.mxu1 %v9732_v28  ;;  %v9198_v19 = vld [vmem:[%s14882_s2 + $0x3a8] sm:$0xff]  ;;  %v9204_v28 = vld [vmem:[%s14882_s2 + $0x3d8] sm:$0xff] }
 0x50e   : > { %v5417_v16 = vpop.permute.xlu0 %5416  ;;  %6568 = vmatmul.mubr.f32.gmra.mrb[42].mxu1 %v5249_v8  ;;  %9734 = vmatprep.subr.bf16.mxu1 %v15100_v25  ;;  %v9738_v12 = vpack.c.bf16 %v9198_v19, %v9197_v33 }
 0x50f   : > { %v13228_v35 = vpop.permute.xlu1 %5172  ;;  %v5506_v15 = vsel %vm252_vm2, %v13072_v18, %v5417_v16  ;;  %v5250_v18 = vsel %vm252_vm2, %v12822_v0, %v13113_v62  ;;  %v13258_v0 = vld [vmem:[#allocation2 + $0xdc] sm:$0xff]  ;;  %v9206_v16 = vld [vmem:[%s14882_s2 + $0x3e8] sm:$0xff] }
 0x510   : > { %6572 = vmatprep.mubr.f32.mxu1 %v5506_v15  ;;  %5923 = vrot.lane.b32.xlu0 %v5856_v43, %s10249_s19 }
 0x511   : > { %5678 = vrot.lane.b32.xlu1 %v12893_v42, %s10249_s19  ;;  %9736 = vmatpush1.bf16.msra.mxu1 %v9735_v24  ;;  %v9199_v42 = vld [vmem:[%s14882_s2 + $0x3b0] sm:$0xff] }
 0x512   : > { %v5419_v57 = vpop.permute.xlu0 %5418  ;;  %6573 = vmatmul.mubr.f32.gmra.mrb[44].mxu1 %v5250_v18  ;;  %9737 = vmatprep.subr.bf16.mxu1 %v15100_v25  ;;  %v9741_v63 = vpack.c.bf16 %v9200_v48, %v9199_v42  ;;  %v5062_v24 = vld [vmem:[#allocation2 + $0x91] sm:$0xff] }
 0x513   : > { %v13245_v45 = vpop.permute.xlu1 %5174  ;;  %v5507_v22 = vsel %vm252_vm2, %v13080_v61, %v5419_v57  ;;  %v5251_v61 = vsel %vm252_vm2, %v12830_v47, %v13140_v44  ;;  %v13278_v47 = vld [vmem:[#allocation2 + $0xe4] sm:$0xff]  ;;  %v9208_v18 = vld [vmem:[%s14882_s2 + $0x3f8] sm:$0xff] }
 0x514   : > { %6577 = vmatprep.mubr.f32.mxu1 %v5507_v22  ;;  %5925 = vrot.lane.b32.xlu0 %v13258_v0, %s10249_s19  ;;  %v5063_v57 = vld [vmem:[#allocation2 + $0x99] sm:$0xff] }
 0x515   : > { %5680 = vrot.lane.b32.xlu1 %v12907_v1, %s10249_s19  ;;  %9739 = vmatpush1.bf16.msra.mxu1 %v9738_v12  ;;  %v9201_v1 = vld [vmem:[%s14882_s2 + $0x3c0] sm:$0xff]  ;;  %v5320_v12 = vld [vmem:[#allocation2 + $0xaf] sm:$0xff] }
 0x516   : > { %v5421_v62 = vpop.permute.xlu0 %5420  ;;  %6578 = vmatmul.mubr.f32.gmra.mrb[46].mxu1 %v5251_v61  ;;  %9740 = vmatprep.subr.bf16.mxu1 %v15100_v25  ;;  %v9744_v17 = vpack.c.bf16 %v9202_v38, %v9201_v1  ;;  %v5321_v1 = vld [vmem:[#allocation2 + $0xb7] sm:$0xff] }
 0x517   : > { %v13265_v36 = vpop.permute.xlu1 %5176  ;;  %v5508_v46 = vsel %vm252_vm2, %v13103_v2, %v5421_v62  ;;  %v10237_v2 = vld [vmem:[#allocation2 + $0x79] sm:$0xff]  ;;  %v9210_v62 = vld [vmem:[%s14882_s2 + $0x408] sm:$0xff] }
 0x518   : > { %6582 = vmatprep.mubr.f32.mxu1 %v5508_v46  ;;  %5927 = vrot.lane.b32.xlu0 %v13278_v47, %s10249_s19  ;;  %v5252_v44 = vsel %vm252_vm2, %v10237_v2, %v13151_v30  ;;  %v13297_v30 = vld [vmem:[#allocation2 + $0xf4] sm:$0xff] }
 0x519   : > { %5682 = vrot.lane.b32.xlu1 %v12915_v11, %s10249_s19  ;;  %9742 = vmatpush1.bf16.msra.mxu1 %v9741_v63  ;;  %v9203_v11 = vld [vmem:[%s14882_s2 + $0x3d0] sm:$0xff] }
 0x51a   : > { %v5423_v29 = vpop.permute.xlu0 %5422  ;;  %6583 = vmatmul.mubr.f32.gmra.mrb[48].mxu1 %v5252_v44  ;;  %9743 = vmatprep.subr.bf16.mxu1 %v15100_v25  ;;  %v9747_v8 = vpack.c.bf16 %v9204_v28, %v9203_v11  ;;  %v13355_v63 = vld [vmem:[#allocation2 + $0xa9] sm:$0xff] }
 0x51b   : > { %v13284_v49 = vpop.permute.xlu1 %5178  ;;  %v5509_v3 = vsel %vm252_vm2, %v13118_v34, %v5423_v29  ;;  %v5253_v34 = vsel %vm252_vm2, %v5061_v9, %v13177_v37  ;;  %v13316_v37 = vld [vmem:[#allocation2 + $0xfc] sm:$0xff]  ;;  %v5256_v46 = vsel %vm252_vm2, %v13355_v63, %v13228_v35  ;;  %v9211_v29 = vld [vmem:[%s14882_s2 + $0x410] sm:$0xff]  ;;  %v13372_v35 = vld [vmem:[#allocation2 + $0x124] sm:$0xff] }
 0x51c   : > { %6587 = vmatprep.mubr.f32.mxu1 %v5509_v3  ;;  %5929 = vrot.lane.b32.xlu0 %v13297_v30, %s10249_s19  ;;  %v13376_v3 = vld [vmem:[#allocation2 + $0xb1] sm:$0xff]  ;;  %v5322_v28 = vld [vmem:[#allocation2 + $0xc7] sm:$0xff] }
 0x51d   : > { %5684 = vrot.lane.b32.xlu1 %v12931_v26, %s10249_s19  ;;  %9745 = vmatpush1.bf16.msra.mxu1 %v9744_v17  ;;  %v9205_v26 = vld [vmem:[%s14882_s2 + $0x3e0] sm:$0xff]  ;;  %v9212_v17 = vld [vmem:[%s14882_s2 + $0x418] sm:$0xff]  ;;  %v5257_v11 = vsel %vm252_vm2, %v13376_v3, %v13245_v45  ;;  %v13393_v45 = vld [vmem:[#allocation2 + $0x12c] sm:$0xff] }
 0x51e   : > { %v5425_v59 = vpop.permute.xlu0 %5424  ;;  %6588 = vmatmul.mubr.f32.gmra.mrb[50].mxu1 %v5253_v34  ;;  %9746 = vmatprep.subr.bf16.mxu1 %v15100_v25  ;;  %v9750_v19 = vpack.c.bf16 %v9206_v16, %v9205_v26  ;;  %v13397_v26 = vld [vmem:[#allocation2 + $0xc1] sm:$0xff] }
 0x51f   : > { %v13303_v53 = vpop.permute.xlu1 %5180  ;;  %v5510_v20 = vsel %vm252_vm2, %v13145_v40, %v5425_v59  ;;  %v5254_v40 = vsel %vm252_vm2, %v5062_v24, %v13193_v58  ;;  %v13335_v58 = vld [vmem:[#allocation2 + $0x10c] sm:$0xff]  ;;  %v9759_v59 = vpack.c.bf16 %v9212_v17, %v9211_v29  ;;  %v5258_v16 = vsel %vm252_vm2, %v13397_v26, %v13265_v36  ;;  %v13414_v36 = vld [vmem:[#allocation2 + $0x13c] sm:$0xff] }
 0x520   : > { %6592 = vmatprep.mubr.f32.mxu1 %v5510_v20  ;;  %5931 = vrot.lane.b32.xlu0 %v13316_v37, %s10249_s19  ;;  %v9214_v20 = vld [vmem:[%s14882_s2 + $0x428] sm:$0xff] }
 0x521   : > { %5686 = vrot.lane.b32.xlu1 %v12933_v5, %s10249_s19  ;;  %9748 = vmatpush1.bf16.msra.mxu1 %v9747_v8  ;;  %v9207_v5 = vld [vmem:[%s14882_s2 + $0x3f0] sm:$0xff] }
 0x522   : > { %v5427_v15 = vpop.permute.xlu0 %5426  ;;  %6593 = vmatmul.mubr.f32.gmra.mrb[52].mxu1 %v5254_v40  ;;  %9749 = vmatprep.subr.bf16.mxu1 %v15100_v25  ;;  %v9753_v48 = vpack.c.bf16 %v9208_v18, %v9207_v5  ;;  %v5323_v24 = vld [vmem:[#allocation2 + $0xcf] sm:$0xff]  ;;  %v9216_v5 = vld [vmem:[%s14882_s2 + $0x438] sm:$0xff] }
 0x523   : > { %v13322_v33 = vpop.permute.xlu1 %5182  ;;  %v5511_v43 = vsel %vm252_vm2, %v13153_v23, %v5427_v15  ;;  %v5255_v23 = vsel %vm252_vm2, %v5063_v57, %v13213_v52  ;;  %v13353_v52 = vld [vmem:[#allocation2 + $0x114] sm:$0xff]  ;;  %v13418_v18 = vld [vmem:[#allocation2 + $0xc9] sm:$0xff] }
 0x524   : > { %6597 = vmatprep.mubr.f32.mxu1 %v5511_v43  ;;  %5933 = vrot.lane.b32.xlu0 %v13335_v58, %s10249_s19  ;;  %v5259_v57 = vsel %vm252_vm2, %v13418_v18, %v13284_v49 }
 0x525   : > { %5688 = vrot.lane.b32.xlu1 %v12947_v27, %s10249_s19  ;;  %9751 = vmatpush1.bf16.msra.mxu1 %v9750_v19  ;;  %v9209_v27 = vld [vmem:[%s14882_s2 + $0x400] sm:$0xff] }
 0x526   : > { %v5429_v22 = vpop.permute.xlu0 %5428  ;;  %6598 = vmatmul.mubr.f32.gmra.mrb[54].mxu1 %v5255_v23  ;;  %9752 = vmatprep.subr.bf16.mxu1 %v15100_v25  ;;  %v9756_v44 = vpack.c.bf16 %v9210_v62, %v9209_v27  ;;  %v5324_v23 = vld [vmem:[#allocation2 + $0xdf] sm:$0xff]  ;;  %v5325_v62 = vld [vmem:[#allocation2 + $0xe7] sm:$0xff] }
 0x527   : > { %v13341_v42 = vpop.permute.xlu1 %5184  ;;  %v5512_v61 = vsel %vm252_vm2, %v5320_v12, %v5429_v22  ;;  %v13433_v27 = vld [vmem:[#allocation2 + $0xd9] sm:$0xff] }
 0x528   : > { %6602 = vmatprep.mubr.f32.mxu1 %v5512_v61  ;;  %5935 = vrot.lane.b32.xlu0 %v13353_v52, %s10249_s19  ;;  %v5260_v49 = vsel %vm252_vm2, %v13433_v27, %v13303_v53 }
 0x529   : > { %5690 = vrot.lane.b32.xlu1 %v12955_v10, %s10249_s19  ;;  %9754 = vmatpush1.bf16.msra.mxu1 %v9753_v48 }
 0x52a   : > { %v5431_v38 = vpop.permute.xlu0 %5430  ;;  %6603 = vmatmul.mubr.f32.gmra.mrb[56].mxu1 %v5256_v46  ;;  %9755 = vmatprep.subr.bf16.mxu1 %v15100_v25 }
 0x52b   : > { %v13362_v2 = vpop.permute.xlu1 %5186  ;;  %v5513_v10 = vsel %vm252_vm2, %v5321_v1, %v5431_v38  ;;  %v13443_v38 = vld [vmem:[#allocation2 + $0x154] sm:$0xff] }
 0x52c   : > { %6607 = vmatprep.mubr.f32.mxu1 %v5513_v10  ;;  %5937 = vrot.lane.b32.xlu0 %v13372_v35, %s10249_s19 }
 0x52d   : > { %5692 = vrot.lane.b32.xlu1 %v12971_v14, %s10249_s19  ;;  %9757 = vmatpush1.bf16.msra.mxu1 %v9756_v44  ;;  %v9213_v14 = vld [vmem:[%s14882_s2 + $0x420] sm:$0xff]  ;;  %v5326_v44 = vld [vmem:[#allocation2 + $0xf7] sm:$0xff] }
 0x52e   : > { %v5433_v9 = vpop.permute.xlu0 %5432  ;;  %6608 = vmatmul.mubr.f32.gmra.mrb[58].mxu1 %v5257_v11  ;;  %9758 = vmatprep.subr.bf16.mxu1 %v15100_v25  ;;  %v9762_v19 = vpack.c.bf16 %v9214_v20, %v9213_v14  ;;  %v13457_v11 = vld [vmem:[#allocation2 + $0x15c] sm:$0xff]  ;;  %v13471_v14 = vld [vmem:[#allocation2 + $0x16c] sm:$0xff] }
 0x52f   : > { %v13383_v34 = vpop.permute.xlu1 %5188  ;;  %v5514_v8 = vsel %vm252_vm2, %v5322_v28, %v5433_v9  ;;  %v5327_v28 = vld [vmem:[#allocation2 + $0xff] sm:$0xff]  ;;  %v5328_v20 = vld [vmem:[#allocation2 + $0x10f] sm:$0xff] }
 0x530   : > { %6612 = vmatprep.mubr.f32.mxu1 %v5514_v8  ;;  %5939 = vrot.lane.b32.xlu0 %v13393_v45, %s10249_s19 }
 0x531   : > { %5694 = vrot.lane.b32.xlu1 %v12973_v54, %s10249_s19  ;;  %9760 = vmatpush1.bf16.msra.mxu1 %v9759_v59  ;;  %v9215_v54 = vld [vmem:[%s14882_s2 + $0x430] sm:$0xff] }
 0x532   : > { %v5435_v40 = vpop.permute.xlu0 %5434  ;;  %6613 = vmatmul.mubr.f32.gmra.mrb[60].mxu1 %v5258_v16  ;;  %9761 = vmatprep.subr.bf16.mxu1 %v15100_v25  ;;  %v9765_v48 = vpack.c.bf16 %v9216_v5, %v9215_v54 }
 0x533   : > { %v13404_v15 = vpop.permute.xlu1 %5190  ;;  %v5515_v43 = vsel %vm252_vm2, %v5323_v24, %v5435_v40 }
 0x534   : > { %6617 = vmatprep.mubr.f32.mxu1 %v5515_v43  ;;  %5941 = vrot.lane.b32.xlu0 %v13414_v36, %s10249_s19  ;;  %v5329_v43 = vld [vmem:[#allocation2 + $0x117] sm:$0xff] }
 0x535   : > { %5696 = vrot.lane.b32.xlu1 %v12987_v50, %s10249_s19  ;;  %9763 = vmatpush1.bf16.msra.mxu1 %v9762_v19  ;;  %v13429_v50 = vld [vmem:[#allocation2 + $0x144] sm:$0xff]  ;;  %v13485_v19 = vld [vmem:[#allocation2 + $0x174] sm:$0xff] }
 0x536   : > { %v5437_v12 = vpop.permute.xlu0 %5436  ;;  %6618 = vmatmul.mubr.f32.gmra.mrb[62].mxu1 %v5259_v57  ;;  %9764 = vmatprep.subr.bf16.mxu1 %v15100_v25 }
 0x537   : > { %v13425_v22 = vpop.permute.xlu1 %5192  ;;  %v5516_v61 = vsel %vm252_vm2, %v5324_v23, %v5437_v12  ;;  %v13499_v23 = vld [vmem:[#allocation2 + $0x184] sm:$0xff] }
 0x538   : > { %6622 = vmatprep.mubr.f32.mxu1 %v5516_v61  ;;  %5943 = vrot.lane.b32.xlu0 %v13429_v50, %s10249_s19  ;;  %v5330_v12 = vld [vmem:[#allocation2 + $0x127] sm:$0xff] }
 0x539   : > { %5698 = vrot.lane.b32.xlu1 %v12995_v31, %s10249_s19  ;;  %9766 = vmatpush1.bf16.msra.mxu1 %v9765_v48  ;;  %v13447_v31 = vld [vmem:[#allocation2 + $0xe1] sm:$0xff] }
 0x53a   : > { %v5439_v46 = vpop.permute.xlu0 %5438  ;;  %6623 = vmatmul.mubr.f32.gmra.mrb[64].mxu1 %v5260_v49  ;;  %v5261_v53 = vsel %vm252_vm2, %v13447_v31, %v13322_v33 }
 0x53b   : > { %v13440_v1 = vpop.permute.xlu1 %5194  ;;  %v5517_v25 = vsel %vm252_vm2, %v5325_v62, %v5439_v46  ;;  %v13513_v62 = vld [vmem:[#allocation2 + $0x18c] sm:$0xff] }
 0x53c   : > { %6627 = vmatprep.mubr.f32.mxu1 %v5517_v25  ;;  %5945 = vrot.lane.b32.xlu0 %v13443_v38, %s10249_s19  ;;  %v5331_v46 = vld [vmem:[#allocation2 + $0x12f] sm:$0xff] }
 0x53d   : > { %5700 = vrot.lane.b32.xlu1 %v13015_v13, %s10249_s19  ;;  %v13461_v13 = vld [vmem:[#allocation2 + $0xf1] sm:$0xff] }
 0x53e   : > { %v5441_v10 = vpop.permute.xlu0 %5440  ;;  %6628 = vmatmul.mubr.f32.gmra.mrb[66].mxu1 %v5261_v53  ;;  %v5262_v33 = vsel %vm252_vm2, %v13461_v13, %v13341_v42 }
 0x53f   : > { %v13454_v29 = vpop.permute.xlu1 %5196  ;;  %v5518_v17 = vsel %vm252_vm2, %v5326_v44, %v5441_v10  ;;  %v13527_v10 = vld [vmem:[#allocation2 + $0x19c] sm:$0xff] }
 0x540   : > { %6632 = vmatprep.mubr.f32.mxu1 %v5518_v17  ;;  %5947 = vrot.lane.b32.xlu0 %v13457_v11, %s10249_s19  ;;  %v5332_v17 = vld [vmem:[#allocation2 + $0x13f] sm:$0xff] }
 0x541   : > { %5702 = vrot.lane.b32.xlu1 %v13017_v21, %s10249_s19  ;;  %v13475_v21 = vld [vmem:[#allocation2 + $0xf9] sm:$0xff] }
 0x542   : > { %v5443_v9 = vpop.permute.xlu0 %5442  ;;  %6633 = vmatmul.mubr.f32.gmra.mrb[68].mxu1 %v5262_v33  ;;  %v5263_v42 = vsel %vm252_vm2, %v13475_v21, %v13362_v2 }
 0x543   : > { %v13468_v59 = vpop.permute.xlu1 %5198  ;;  %v5519_v8 = vsel %vm252_vm2, %v5327_v28, %v5443_v9 }
 0x544   : > { %6637 = vmatprep.mubr.f32.mxu1 %v5519_v8  ;;  %5949 = vrot.lane.b32.xlu0 %v13471_v14, %s10249_s19  ;;  %v13541_v8 = vld [vmem:[#allocation2 + $0x1a4] sm:$0xff] }
 0x545   : > { %5704 = vrot.lane.b32.xlu1 %v13033_v32, %s10249_s19  ;;  %v13489_v32 = vld [vmem:[#allocation2 + $0x109] sm:$0xff] }
 0x546   : > { %v5445_v16 = vpop.permute.xlu0 %5444  ;;  %6638 = vmatmul.mubr.f32.gmra.mrb[70].mxu1 %v5263_v42  ;;  %v5264_v2 = vsel %vm252_vm2, %v13489_v32, %v13383_v34  ;;  %v5333_v42 = vld [vmem:[#allocation2 + $0x147] sm:$0xff] }
 0x547   : > { %v13482_v24 = vpop.permute.xlu1 %5200  ;;  %v5520_v40 = vsel %vm252_vm2, %v5328_v20, %v5445_v16 }
 0x548   : > { %6642 = vmatprep.mubr.f32.mxu1 %v5520_v40  ;;  %5951 = vrot.lane.b32.xlu0 %v13485_v19, %s10249_s19 }
 0x549   : > { %5706 = vrot.lane.b32.xlu1 %v13041_v55, %s10249_s19  ;;  %v13503_v55 = vld [vmem:[#allocation2 + $0x111] sm:$0xff] }
 0x54a   : > { %v5447_v54 = vpop.permute.xlu0 %5446  ;;  %6643 = vmatmul.mubr.f32.gmra.mrb[72].mxu1 %v5264_v2  ;;  %v5265_v34 = vsel %vm252_vm2, %v13503_v55, %v13404_v15  ;;  %v13555_v2 = vld [vmem:[#allocation2 + $0x1b4] sm:$0xff] }
 0x54b   : > { %v13496_v5 = vpop.permute.xlu1 %5202  ;;  %v5521_v57 = vsel %vm252_vm2, %v5329_v43, %v5447_v54  ;;  %v5334_v43 = vld [vmem:[#allocation2 + $0x157] sm:$0xff] }
 0x54c   : > { %6647 = vmatprep.mubr.f32.mxu1 %v5521_v57  ;;  %5953 = vrot.lane.b32.xlu0 %v13499_v23, %s10249_s19 }
 0x54d   : > { %5708 = vrot.lane.b32.xlu1 %v13059_v60, %s10249_s19  ;;  %v13517_v60 = vld [vmem:[#allocation2 + $0x121] sm:$0xff] }
 0x54e   : > { %v5449_v48 = vpop.permute.xlu0 %5448  ;;  %6648 = vmatmul.mubr.f32.gmra.mrb[74].mxu1 %v5265_v34  ;;  %v5266_v15 = vsel %vm252_vm2, %v13517_v60, %v13425_v22 }
 0x54f   : > { %v13510_v61 = vpop.permute.xlu1 %5204  ;;  %v5522_v49 = vsel %vm252_vm2, %v5330_v12, %v5449_v48  ;;  %v13569_v12 = vld [vmem:[#allocation2 + $0x1bc] sm:$0xff] }
 0x550   : > { %6652 = vmatprep.mubr.f32.mxu1 %v5522_v49  ;;  %5955 = vrot.lane.b32.xlu0 %v13513_v62, %s10249_s19  ;;  %v5335_v48 = vld [vmem:[#allocation2 + $0x15f] sm:$0xff] }
 0x551   : > { %5710 = vrot.lane.b32.xlu1 %v13061_v4, %s10249_s19  ;;  %v13531_v4 = vld [vmem:[#allocation2 + $0x129] sm:$0xff] }
 0x552   : > { %v5451_v25 = vpop.permute.xlu0 %5450  ;;  %6653 = vmatmul.mubr.f32.gmra.mrb[76].mxu1 %v5266_v15  ;;  %v5267_v22 = vsel %vm252_vm2, %v13531_v4, %v13440_v1 }
 0x553   : > { %v13524_v53 = vpop.permute.xlu1 %5206  ;;  %v5523_v44 = vsel %vm252_vm2, %v5331_v46, %v5451_v25  ;;  %v13583_v25 = vld [vmem:[#allocation2 + $0x1cc] sm:$0xff] }
 0x554   : > { %6657 = vmatprep.mubr.f32.mxu1 %v5523_v44  ;;  %5957 = vrot.lane.b32.xlu0 %v13527_v10, %s10249_s19  ;;  %v6275_v44 = vld [vmem:[#allocation3 + $0x430] sm:$0xff] }
 0x555   : > { %5712 = vrot.lane.b32.xlu1 %v13084_v51, %s10249_s19  ;;  %v13545_v51 = vld [vmem:[#allocation2 + $0x139] sm:$0xff]  ;;  %9550 = vmatprep.mubr.msk.f32.mxu0 %vm252_vm2, %v6275_v44 }
 0x556   : > { %v5453_v33 = vpop.permute.xlu0 %5452  ;;  %6658 = vmatmul.mubr.f32.gmra.mrb[78].mxu1 %v5267_v22  ;;  %v5268_v1 = vsel %vm252_vm2, %v13545_v51, %v13454_v29  ;;  %v5336_v22 = vld [vmem:[#allocation2 + $0x16f] sm:$0xff] }
 0x557   : > { %v13538_v28 = vpop.permute.xlu1 %5208  ;;  %v5524_v9 = vsel %vm252_vm2, %v5332_v17, %v5453_v33 }
 0x558   : > { %6662 = vmatprep.mubr.f32.mxu1 %v5524_v9  ;;  %5959 = vrot.lane.b32.xlu0 %v13541_v8, %s10249_s19  ;;  %v6280_v9 = vld [vmem:[#allocation3 + $0x458] sm:$0xff] }
 0x559   : > { %5714 = vrot.lane.b32.xlu1 %v13086_v7, %s10249_s19  ;;  %v13559_v7 = vld [vmem:[#allocation2 + $0x141] sm:$0xff]  ;;  %9551 = vmatmul.mubr.msk.f32.gmra.mrb[90].mxu0 %vm252_vm2, %v6280_v9  ;;  %v8270_v9 = vld [vmem:[#allocation2 + $0x218] sm:$0xff] }
 0x55a   : > { %v5455_v20 = vpop.permute.xlu0 %5454  ;;  %6663 = vmatmul.mubr.f32.gmra.mrb[80].mxu1 %v5268_v1  ;;  %v5269_v29 = vsel %vm252_vm2, %v13559_v7, %v13468_v59  ;;  %v13599_v1 = vld [vmem:[#allocation2 + $0x1d4] sm:$0xff] }
 0x55b   : > { %v13552_v16 = vpop.permute.xlu1 %5210  ;;  %v5525_v40 = vsel %vm252_vm2, %v5333_v42, %v5455_v20  ;;  %v8268_v42 = vld [vmem:[#allocation2 + $0x200] sm:$0xff]  ;;  %v13603_v20 = vld [vmem:[#allocation2 + $0x169] sm:$0xff] }
 0x55c   : > { %6667 = vmatprep.mubr.f32.mxu1 %v5525_v40  ;;  %5961 = vrot.lane.b32.xlu0 %v13555_v2, %s10249_s19  ;;  %8300 = vst.msk [vmem:[#allocation3 + $0x430] sm:$0xff] %vm252_vm2, %v8268_v42  ;;  %v5272_v40 = vsel %vm252_vm2, %v13603_v20, %v13510_v61  ;;  %v13631_v42 = vld [vmem:[#allocation2 + $0x181] sm:$0xff] }
 0x55d   : > { %5716 = vrot.lane.b32.xlu1 %v13127_v6, %s10249_s19  ;;  %v13573_v6 = vld [vmem:[#allocation2 + $0x151] sm:$0xff] }
 0x55e   : > { %v5457_v54 = vpop.permute.xlu0 %5456  ;;  %6668 = vmatmul.mubr.f32.gmra.mrb[82].mxu1 %v5269_v29  ;;  %v5270_v59 = vsel %vm252_vm2, %v13573_v6, %v13482_v24  ;;  %v5337_v29 = vld [vmem:[#allocation2 + $0x177] sm:$0xff] }
 0x55f   : > { %v13566_v57 = vpop.permute.xlu1 %5660  ;;  %v5526_v34 = vsel %vm252_vm2, %v5334_v43, %v5457_v54 }
 0x560   : > { %6672 = vmatprep.mubr.f32.mxu1 %v5526_v34  ;;  %5963 = vrot.lane.b32.xlu0 %v13569_v12, %s10249_s19 }
 0x561   : > { %5718 = vrot.lane.b32.xlu1 %v13129_v39, %s10249_s19  ;;  %v13587_v39 = vld [vmem:[#allocation2 + $0x159] sm:$0xff] }
 0x562   : > { %v5459_v49 = vpop.permute.xlu0 %5458  ;;  %6673 = vmatmul.mubr.f32.gmra.mrb[84].mxu1 %v5270_v59  ;;  %v5271_v24 = vsel %vm252_vm2, %v13587_v39, %v13496_v5  ;;  %v8269_v5 = vld [vmem:[#allocation2 + $0x208] sm:$0xff]  ;;  %v13617_v59 = vld [vmem:[#allocation2 + $0x171] sm:$0xff] }
 0x563   : > { %v13580_v15 = vpop.permute.xlu1 %5662  ;;  %v5527_v46 = vsel %vm252_vm2, %v5335_v48, %v5459_v49  ;;  %8301 = vst.msk [vmem:[#allocation3 + $0x458] sm:$0xff] %vm252_vm2, %v8269_v5  ;;  %v6285_v48 = vld [vmem:[#allocation3 + $0x480] sm:$0xff]  ;;  %v5273_v61 = vsel %vm252_vm2, %v13617_v59, %v13524_v53  ;;  %v5274_v53 = vsel %vm252_vm2, %v13631_v42, %v13538_v28  ;;  %v5339_v5 = vld [vmem:[#allocation2 + $0x18f] sm:$0xff]  ;;  %v8273_v28 = vld [vmem:[#allocation2 + $0x238] sm:$0xff] }
 0x564   : > { %6677 = vmatprep.mubr.f32.mxu1 %v5527_v46  ;;  %5965 = vrot.lane.b32.xlu0 %v13583_v25, %s10249_s19  ;;  %v5338_v49 = vld [vmem:[#allocation2 + $0x187] sm:$0xff]  ;;  %8302 = vst.msk [vmem:[#allocation3 + $0x480] sm:$0xff] %vm252_vm2, %v8270_v9 }
 0x565   : > { %5720 = vrot.lane.b32.xlu1 %v13164_v56, %s10249_s19  ;;  %9553 = vmatprep.mubr.msk.f32.mxu0 %vm252_vm2, %v6285_v48  ;;  %v6295_v48 = vld [vmem:[#allocation3 + $0x4d0] sm:$0xff] }
 0x566   : > { %v5461_v17 = vpop.permute.xlu0 %5460  ;;  %6678 = vmatmul.mubr.f32.gmra.mrb[86].mxu1 %v5271_v24  ;;  %v13626_v24 = vld [vmem:[#allocation2 + $0x1ec] sm:$0xff] }
 0x567   : > { %v13594_v33 = vpop.permute.xlu1 %5664  ;;  %v5528_v56 = vsel %vm252_vm2, %v5336_v22, %v5461_v17  ;;  %v6290_v22 = vld [vmem:[#allocation3 + $0x4a8] sm:$0xff] }
 0x568   : > { %6682 = vmatprep.mubr.f32.mxu1 %v5528_v56  ;;  %5967 = vrot.lane.b32.xlu0 %v13599_v1, %s10249_s19  ;;  %v8271_v56 = vld [vmem:[#allocation2 + $0x220] sm:$0xff] }
 0x569   : > { %5722 = vrot.lane.b32.xlu1 %v13166_v41, %s10249_s19  ;;  %v13614_v41 = vld [vmem:[#allocation2 + $0x1e4] sm:$0xff]  ;;  %9554 = vmatmul.mubr.msk.f32.gmra.mrb[92].mxu0 %vm252_vm2, %v6290_v22  ;;  %8303 = vst.msk [vmem:[#allocation3 + $0x4a8] sm:$0xff] %vm252_vm2, %v8271_v56 }
 0x56a   : > { %v5463_v43 = vpop.permute.xlu0 %5462  ;;  %6683 = vmatmul.mubr.f32.gmra.mrb[88].mxu1 %v5272_v40  ;;  %9556 = vmatprep.mubr.msk.f32.mxu0 %vm252_vm2, %v6295_v48  ;;  %v5882_v56 = vld [vmem:[#allocation2 + $0x204] sm:$0xff] }
 0x56b   : > { %v13612_v54 = vpop.permute.xlu1 %5666  ;;  %v5529_v34 = vsel %vm252_vm2, %v5337_v29, %v5463_v43  ;;  %v5881_v43 = vld [vmem:[#allocation2 + $0x1fc] sm:$0xff] }
 0x56c   : > { %6687 = vmatprep.mubr.f32.mxu1 %v5529_v34  ;;  %5969 = vrot.lane.b32.xlu0 %v13614_v41, %s10249_s19 }
 0x56e   : > { %v5465_v46 = vpop.permute.xlu0 %5464  ;;  %6688 = vmatmul.mubr.f32.gmra.mrb[90].mxu1 %v5273_v61  ;;  %v8272_v61 = vld [vmem:[#allocation2 + $0x230] sm:$0xff] }
 0x56f   : > { %v13624_v44 = vpop.permute.xlu1 %5668  ;;  %v5530_v17 = vsel %vm252_vm2, %v5338_v49, %v5465_v46  ;;  %v6300_v49 = vld [vmem:[#allocation3 + $0x4f8] sm:$0xff]  ;;  %v13643_v46 = vld [vmem:[#allocation2 + $0x189] sm:$0xff]  ;;  %8304 = vst.msk [vmem:[#allocation3 + $0x4d0] sm:$0xff] %vm252_vm2, %v8272_v61 }
 0x570   : > { %6692 = vmatprep.mubr.f32.mxu1 %v5530_v17  ;;  %5971 = vrot.lane.b32.xlu0 %v13626_v24, %s10249_s19  ;;  %v5275_v22 = vsel %vm252_vm2, %v13643_v46, %v13552_v16  ;;  %8305 = vst.msk [vmem:[#allocation3 + $0x4f8] sm:$0xff] %vm252_vm2, %v8273_v28 }
 0x571   : > { %9557 = vmatmul.mubr.msk.f32.gmra.mrb[94].mxu0 %vm252_vm2, %v6300_v49 }
 0x572   : > { %v5467_v40 = vpop.permute.xlu0 %5466  ;;  %6693 = vmatmul.mubr.f32.gmra.mrb[92].mxu1 %v5274_v53 }
 0x573   : > { %v13640_v29 = vpop.permute.xlu1 %5670  ;;  %v5531_v34 = vsel %vm252_vm2, %v5339_v5, %v5467_v40  ;;  %v7250_v5 = vld [vmem:[#allocation2 + $0xc] sm:$0xff]  ;;  %v5564_v40 = vld [vmem:[#allocation2 + $0x64] sm:$0xff] }
 0x574   : > { %6697 = vmatprep.mubr.f32.mxu1 %v5531_v34  ;;  %5973 = vrot.lane.b32.xlu0 %v5881_v43, %s10249_s19  ;;  %v5756_v16 = vsel %vm252_vm2, %v5564_v40, %v13566_v57  ;;  %v5883_v34 = vld [vmem:[#allocation2 + $0x214] sm:$0xff] }
 0x575   : > { %7315 = vrot.lane.b32.xlu1 %v7250_v5, %s10249_s19  ;;  %v5566_v5 = vld [vmem:[#allocation2 + $0x7c] sm:$0xff] }
 0x576   : > { %v5918_v17 = vpop.permute.xlu0 %5917  ;;  %6698 = vmatmul.mubr.f32.gmra.mrb[94].mxu1 %v5275_v22 }
 0x577   : > { %v13651_v9 = vpop.permute.xlu1 %5672  ;;  %v6013_v53 = vsel %vm252_vm2, %v13355_v63, %v5918_v17  ;;  %v5565_v63 = vld [vmem:[#allocation2 + $0x6c] sm:$0xff]  ;;  %v5884_v17 = vld [vmem:[#allocation2 + $0x21c] sm:$0xff] }
 0x578   : > { %6767 = vmatprep.mubr.f32.mxu1 %v6013_v53  ;;  %5975 = vrot.lane.b32.xlu0 %v5882_v56, %s10249_s19  ;;  %v5757_v28 = vsel %vm252_vm2, %v5565_v63, %v13580_v15 }
 0x57a   : > { %v5920_v48 = vpop.permute.xlu0 %5919  ;;  %6768 = vmatmul.mubr.f32.vlgmr.msra.gmra.mrb[32].mxu1 %v5756_v16  ;;  %v7249_v16 = vld [vmem:[#allocation2 + $0x4] sm:$0xff] }
 0x57b   : > { %v13661_v43 = vpop.permute.xlu1 %5674  ;;  %v6014_v61 = vsel %vm252_vm2, %v13376_v3, %v5920_v48  ;;  %v5758_v3 = vsel %vm252_vm2, %v5566_v5, %v13594_v33  ;;  %v5567_v48 = vld [vmem:[#allocation2 + $0x84] sm:$0xff]  ;;  %v7251_v33 = vld [vmem:[#allocation2 + $0x1c] sm:$0xff] }
 0x57c   : > { %5977 = vrot.lane.b32.xlu0 %v5883_v34, %s10249_s19  ;;  %6772 = vmatprep.mubr.f32.mxu1 %v6014_v61 }
 0x57e   : > { %v13665_v49 = vpop.f32.mrb[64].mxu0  ;;  %v5922_v56 = vpop.permute.xlu0 %5921  ;;  %6773 = vmatmul.mubr.f32.gmra.mrb[34].mxu1 %v5757_v28 }
 0x57f   : > { %v13670_v22 = vpop.f32.mrb[65].mxu0  ;;  %v5677_v57 = vpop.permute.xlu1 %5676  ;;  %v6015_v53 = vsel %vm252_vm2, %v13397_v26, %v5922_v56  ;;  %v5759_v26 = vsel %vm252_vm2, %v5567_v48, %v13612_v54 }
 0x580   : > { %5979 = vrot.lane.b32.xlu0 %v5884_v17, %s10249_s19  ;;  %6777 = vmatprep.mubr.f32.mxu1 %v6015_v53  ;;  %v5568_v53 = vld [vmem:[#allocation2 + $0x94] sm:$0xff] }
 0x582   : > { %v5924_v34 = vpop.permute.xlu0 %5923  ;;  %6778 = vmatmul.mubr.f32.gmra.mrb[36].mxu1 %v5758_v3 }
 0x583   : > { %v5679_v40 = vpop.permute.xlu1 %5678  ;;  %v6016_v15 = vsel %vm252_vm2, %v13418_v18, %v5924_v34  ;;  %v5760_v18 = vsel %vm252_vm2, %v5568_v53, %v13624_v44 }
 0x584   : > { %6782 = vmatprep.mubr.f32.mxu1 %v6016_v15  ;;  %7313 = vrot.lane.b32.xlu0 %v7249_v16, %s10249_s19  ;;  %v5569_v16 = vld [vmem:[#allocation2 + $0x9c] sm:$0xff] }
 0x586   : > { %v5926_v17 = vpop.permute.xlu0 %5925  ;;  %6783 = vmatmul.mubr.f32.gmra.mrb[38].mxu1 %v5759_v26 }
 0x587   : > { %v13679_v61 = vpop.f32.mrb[66].mxu0  ;;  %v5681_v28 = vpop.permute.xlu1 %5680  ;;  %v6017_v56 = vsel %vm252_vm2, %v13433_v27, %v5926_v17  ;;  %v5761_v27 = vsel %vm252_vm2, %v5569_v16, %v13640_v29  ;;  %v5571_v29 = vld [vmem:[#allocation2 + $0xb4] sm:$0xff] }
 0x588   : > { %v13684_v63 = vpop.f32.mrb[67].mxu0  ;;  %6787 = vmatprep.mubr.f32.mxu1 %v6017_v56  ;;  %7317 = vrot.lane.b32.xlu0 %v7251_v33, %s10249_s19  ;;  %v5570_v33 = vld [vmem:[#allocation2 + $0xac] sm:$0xff] }
 0x58a   : > { %v5928_v3 = vpop.permute.xlu0 %5927  ;;  %6788 = vmatmul.mubr.f32.gmra.mrb[40].mxu1 %v5760_v18 }
 0x58b   : > { %v5683_v5 = vpop.permute.xlu1 %5682  ;;  %v6018_v54 = vsel %vm252_vm2, %v13447_v31, %v5928_v3  ;;  %v5762_v31 = vsel %vm252_vm2, %v5570_v33, %v13651_v9  ;;  %v5763_v3 = vsel %vm252_vm2, %v5571_v29, %v13661_v43 }
 0x58c   : > { %6792 = vmatprep.mubr.f32.mxu1 %v6018_v54 }
 0x58e   : > { %v13693_v34 = vpop.f32.mrb[68].mxu0  ;;  %v5930_v26 = vpop.permute.xlu0 %5929  ;;  %6793 = vmatmul.mubr.f32.gmra.mrb[42].mxu1 %v5761_v27  ;;  %v5572_v27 = vld [vmem:[#allocation2 + $0xc4] sm:$0xff] }
 0x58f   : > { %v13697_v15 = vpop.f32.mrb[69].mxu0  ;;  %v5685_v48 = vpop.permute.xlu1 %5684  ;;  %v6019_v44 = vsel %vm252_vm2, %v13461_v13, %v5930_v26  ;;  %v5764_v26 = vsel %vm252_vm2, %v5572_v27, %v5677_v57 }
 0x590   : > { %6797 = vmatprep.mubr.f32.mxu1 %v6019_v44 }
 0x592   : > { %v5932_v56 = vpop.permute.xlu0 %5931  ;;  %6798 = vmatmul.mubr.f32.gmra.mrb[44].mxu1 %v5762_v31  ;;  %v5573_v31 = vld [vmem:[#allocation2 + $0xcc] sm:$0xff] }
 0x593   : > { %v5687_v17 = vpop.permute.xlu1 %5686  ;;  %v6020_v53 = vsel %vm252_vm2, %v13475_v21, %v5932_v56  ;;  %v5765_v56 = vsel %vm252_vm2, %v5573_v31, %v5679_v40  ;;  %v5767_v40 = vsel %vm252_vm2, %v13278_v47, %v5683_v5 }
 0x594   : > { %6802 = vmatprep.mubr.f32.mxu1 %v6020_v53  ;;  %v5769_v47 = vsel %vm252_vm2, %v13316_v37, %v5687_v17 }
 0x596   : > { %v5934_v16 = vpop.permute.xlu0 %5933  ;;  %6803 = vmatmul.mubr.f32.gmra.mrb[46].mxu1 %v5763_v3  ;;  %v5766_v3 = vsel %vm252_vm2, %v13258_v0, %v5681_v28  ;;  %v5768_v28 = vsel %vm252_vm2, %v13297_v30, %v5685_v48 }
 0x597   : > { %v13705_v18 = vpop.f32.mrb[70].mxu0  ;;  %v5689_v13 = vpop.permute.xlu1 %5688  ;;  %v6021_v9 = vsel %vm252_vm2, %v13489_v32, %v5934_v16 }
 0x598   : > { %v13709_v54 = vpop.f32.mrb[71].mxu0  ;;  %6807 = vmatprep.mubr.f32.mxu1 %v6021_v9  ;;  %v5770_v48 = vsel %vm252_vm2, %v13335_v58, %v5689_v13 }
 0x59a   : > { %v5936_v44 = vpop.permute.xlu0 %5935  ;;  %6808 = vmatmul.mubr.f32.gmra.mrb[48].mxu1 %v5764_v26 }
 0x59b   : > { %v5691_v21 = vpop.permute.xlu1 %5690  ;;  %v6022_v33 = vsel %vm252_vm2, %v13503_v55, %v5936_v44 }
 0x59c   : > { %6812 = vmatprep.mubr.f32.mxu1 %v6022_v33  ;;  %v5771_v37 = vsel %vm252_vm2, %v13353_v52, %v5691_v21 }
 0x59e   : > { %v13716_v43 = vpop.f32.mrb[72].mxu0  ;;  %v5938_v32 = vpop.permute.xlu0 %5937  ;;  %6813 = vmatmul.mubr.f32.gmra.mrb[50].mxu1 %v5765_v56 }
 0x59f   : > { %v13719_v53 = vpop.f32.mrb[73].mxu0  ;;  %v5693_v29 = vpop.permute.xlu1 %5692  ;;  %v6023_v57 = vsel %vm252_vm2, %v13517_v60, %v5938_v32 }
 0x5a0   : > { %6817 = vmatprep.mubr.f32.mxu1 %v6023_v57  ;;  %v5772_v58 = vsel %vm252_vm2, %v13372_v35, %v5693_v29 }
 0x5a2   : > { %v5940_v55 = vpop.permute.xlu0 %5939  ;;  %6818 = vmatmul.mubr.f32.gmra.mrb[52].mxu1 %v5766_v3 }
 0x5a3   : > { %v5695_v16 = vpop.permute.xlu1 %5694  ;;  %v6024_v9 = vsel %vm252_vm2, %v13531_v4, %v5940_v55 }
 0x5a4   : > { %6822 = vmatprep.mubr.f32.mxu1 %v6024_v9  ;;  %v5773_v52 = vsel %vm252_vm2, %v13393_v45, %v5695_v16 }
 0x5a6   : > { %v5942_v60 = vpop.permute.xlu0 %5941  ;;  %6823 = vmatmul.mubr.f32.gmra.mrb[54].mxu1 %v5767_v40 }
 0x5a7   : > { %v13727_v27 = vpop.f32.mrb[74].mxu0  ;;  %v5697_v44 = vpop.permute.xlu1 %5696  ;;  %v6025_v0 = vsel %vm252_vm2, %v13545_v51, %v5942_v60 }
 0x5a8   : > { %v13731_v26 = vpop.f32.mrb[75].mxu0  ;;  %6827 = vmatprep.mubr.f32.mxu1 %v6025_v0  ;;  %v5774_v35 = vsel %vm252_vm2, %v13414_v36, %v5697_v44 }
 0x5aa   : > { %v5944_v33 = vpop.permute.xlu0 %5943  ;;  %6828 = vmatmul.mubr.f32.gmra.mrb[56].mxu1 %v5768_v28 }
 0x5ab   : > { %v5699_v4 = vpop.permute.xlu1 %5698  ;;  %v6026_v31 = vsel %vm252_vm2, %v13559_v7, %v5944_v33 }
 0x5ac   : > { %6832 = vmatprep.mubr.f32.mxu1 %v6026_v31  ;;  %v5775_v45 = vsel %vm252_vm2, %v13429_v50, %v5699_v4  ;;  %v5841_v31 = vld [vmem:[#allocation2 + $0x199] sm:$0xff] }
 0x5ae   : > { %v13739_v56 = vpop.f32.mrb[76].mxu0  ;;  %v5946_v32 = vpop.permute.xlu0 %5945  ;;  %6833 = vmatmul.mubr.f32.gmra.mrb[58].mxu1 %v5769_v47 }
 0x5af   : > { %v13743_v5 = vpop.f32.mrb[77].mxu0  ;;  %v6027_v51 = vsel %vm252_vm2, %v13573_v6, %v5946_v32  ;;  %v5701_v30 = vpop.permute.xlu1 %5700  ;;  %v5842_v32 = vld [vmem:[#allocation2 + $0x1a1] sm:$0xff] }
 0x5b0   : > { %6837 = vmatprep.mubr.f32.mxu1 %v6027_v51  ;;  %v5776_v44 = vsel %vm252_vm2, %v13443_v38, %v5701_v30  ;;  %v5844_v30 = vld [vmem:[#allocation2 + $0x1b9] sm:$0xff] }
 0x5b2   : > { %v5948_v57 = vpop.permute.xlu0 %5947  ;;  %6838 = vmatmul.mubr.f32.gmra.mrb[60].mxu1 %v5770_v48 }
 0x5b3   : > { %v6028_v7 = vsel %vm252_vm2, %v13587_v39, %v5948_v57  ;;  %v5703_v55 = vpop.permute.xlu1 %5702 }
 0x5b4   : > { %6842 = vmatprep.mubr.f32.mxu1 %v6028_v7  ;;  %v5777_v50 = vsel %vm252_vm2, %v13457_v11, %v5703_v55  ;;  %v5843_v7 = vld [vmem:[#allocation2 + $0x1b1] sm:$0xff] }
 0x5b6   : > { %v5950_v6 = vpop.permute.xlu0 %5949  ;;  %6843 = vmatmul.mubr.f32.gmra.mrb[62].mxu1 %v5771_v37 }
 0x5b7   : > { %v13751_v3 = vpop.f32.mrb[78].mxu0  ;;  %v6029_v9 = vsel %vm252_vm2, %v13603_v20, %v5950_v6  ;;  %v5705_v40 = vpop.permute.xlu1 %5704 }
 0x5b8   : > { %v13755_v17 = vpop.f32.mrb[79].mxu0  ;;  %6847 = vmatprep.mubr.f32.mxu1 %v6029_v9  ;;  %v5778_v38 = vsel %vm252_vm2, %v13471_v14, %v5705_v40  ;;  %v5845_v14 = vld [vmem:[#allocation2 + $0x1c9] sm:$0xff] }
 0x5ba   : > { %v5952_v13 = vpop.permute.xlu0 %5951  ;;  %6848 = vmatmul.mubr.f32.gmra.mrb[64].mxu1 %v5772_v58  ;;  %v7253_v58 = vld [vmem:[#allocation2 + $0x34] sm:$0xff] }
 0x5bb   : > { %v6030_v39 = vsel %vm252_vm2, %v13617_v59, %v5952_v13  ;;  %v5707_v29 = vpop.permute.xlu1 %5706  ;;  %v7252_v13 = vld [vmem:[#allocation2 + $0x24] sm:$0xff]  ;;  %7321 = vrot.lane.b32.xlu0 %v7253_v58, %s10249_s19 }
 0x5bc   : > { %6852 = vmatprep.mubr.f32.mxu1 %v6030_v39  ;;  %7319 = vrot.lane.b32.xlu1 %v7252_v13, %s10249_s19 }
 0x5be   : > { %v13763_v60 = vpop.f32.mrb[80].mxu0  ;;  %v5954_v0 = vpop.permute.xlu0 %5953  ;;  %6853 = vmatmul.mubr.f32.gmra.mrb[66].mxu1 %v5773_v52  ;;  %v5779_v52 = vsel %vm252_vm2, %v13485_v19, %v5707_v29  ;;  %v7256_v29 = vld [vmem:[#allocation2 + $0x54] sm:$0xff] }
 0x5bf   : > { %v13767_v21 = vpop.f32.mrb[81].mxu0  ;;  %v6031_v20 = vsel %vm252_vm2, %v13631_v42, %v5954_v0  ;;  %v5709_v36 = vpop.permute.xlu1 %5708 }
 0x5c0   : > { %6857 = vmatprep.mubr.f32.mxu1 %v6031_v20  ;;  %v7255_v20 = vld [vmem:[#allocation2 + $0x4c] sm:$0xff] }
 0x5c1   : > { %7325 = vrot.lane.b32.xlu0 %v7255_v20, %s10249_s19 }
 0x5c2   : > { %v5956_v59 = vpop.permute.xlu0 %5955  ;;  %6858 = vmatmul.mubr.f32.gmra.mrb[68].mxu1 %v5774_v35  ;;  %v7254_v35 = vld [vmem:[#allocation2 + $0x3c] sm:$0xff] }
 0x5c3   : > { %v6032_v28 = vsel %vm252_vm2, %v13643_v46, %v5956_v59  ;;  %v5711_v57 = vpop.permute.xlu1 %5710  ;;  %7323 = vrot.lane.b32.xlu1 %v7254_v35, %s10249_s19 }
 0x5c4   : > { %6862 = vmatprep.mubr.f32.mxu1 %v6032_v28  ;;  %v5780_v28 = vsel %vm252_vm2, %v13499_v23, %v5709_v36  ;;  %v5781_v23 = vsel %vm252_vm2, %v13513_v62, %v5711_v57 }
 0x5c5   : > { %8130 = vrot.lane.b32.xlu0 %v13614_v41, %s10249_s19 }
 0x5c6   : > { %v5958_v42 = vpop.permute.xlu0 %5957  ;;  %6863 = vmatmul.mubr.f32.gmra.mrb[70].mxu1 %v5775_v45 }
 0x5c7   : > { %v13775_v33 = vpop.f32.mrb[82].mxu0  ;;  %v6033_v47 = vsel %vm252_vm2, %v5841_v31, %v5958_v42  ;;  %v5713_v11 = vpop.permute.xlu1 %5712  ;;  %v5846_v31 = vld [vmem:[#allocation2 + $0x1d1] sm:$0xff]  ;;  %7327 = vrot.lane.b32.xlu1 %v7256_v29, %s10249_s19  ;;  %v13842_v29 = vld [vmem:[#allocation2 + $0x8] sm:$0xff] }
 0x5c8   : > { %v13779_v16 = vpop.f32.mrb[83].mxu0  ;;  %6867 = vmatprep.mubr.f32.mxu1 %v6033_v47  ;;  %v5782_v41 = vsel %vm252_vm2, %v13527_v10, %v5713_v11 }
 0x5ca   : > { %v5960_v46 = vpop.permute.xlu0 %5959  ;;  %6868 = vmatmul.mubr.f32.gmra.mrb[72].mxu1 %v5776_v44 }
 0x5cb   : > { %v6034_v51 = vsel %vm252_vm2, %v5842_v32, %v5960_v46  ;;  %v5715_v45 = vpop.permute.xlu1 %5714  ;;  %v5847_v32 = vld [vmem:[#allocation2 + $0x1e1] sm:$0xff]  ;;  %8132 = vrot.lane.b32.xlu1 %v13626_v24, %s10249_s19 }
 0x5cc   : > { %6872 = vmatprep.mubr.f32.mxu1 %v6034_v51  ;;  %v5783_v62 = vsel %vm252_vm2, %v13541_v8, %v5715_v45 }
 0x5cd   : > { %v13785_v48 = vpop.f32.mrb[84].mxu0 }
 0x5ce   : > { %v13789_v4 = vpop.f32.mrb[85].mxu0  ;;  %v5962_v37 = vpop.permute.xlu0 %5961  ;;  %6873 = vmatmul.mubr.f32.gmra.mrb[74].mxu1 %v5777_v50  ;;  %v5848_v50 = vld [vmem:[#allocation2 + $0x1e9] sm:$0xff] }
 0x5cf   : > { %v6035_v6 = vsel %vm252_vm2, %v5843_v7, %v5962_v37  ;;  %v5717_v51 = vpop.permute.xlu1 %5716 }
 0x5d0   : > { %6877 = vmatprep.mubr.f32.mxu1 %v6035_v6  ;;  %v5849_v6 = vld [vmem:[#allocation2 + $0x1f9] sm:$0xff] }
 0x5d2   : > { %v5964_v9 = vpop.permute.xlu0 %5963  ;;  %6878 = vmatmul.mubr.f32.gmra.mrb[76].mxu1 %v5778_v38 }
 0x5d3   : > { %v6036_v39 = vsel %vm252_vm2, %v5844_v30, %v5964_v9  ;;  %v5719_v57 = vpop.permute.xlu1 %5718  ;;  %v5850_v30 = vld [vmem:[#allocation2 + $0x201] sm:$0xff]  ;;  %v5784_v9 = vsel %vm252_vm2, %v13555_v2, %v5717_v51 }
 0x5d4   : > { %6882 = vmatprep.mubr.f32.mxu1 %v6036_v39  ;;  %v5851_v39 = vld [vmem:[#allocation2 + $0x211] sm:$0xff]  ;;  %v5785_v8 = vsel %vm252_vm2, %v13569_v12, %v5719_v57 }
 0x5d6   : > { %v13797_v55 = vpop.f32.mrb[86].mxu0  ;;  %v5966_v40 = vpop.permute.xlu0 %5965  ;;  %6883 = vmatmul.mubr.f32.gmra.mrb[78].mxu1 %v5779_v52 }
 0x5d7   : > { %v13801_v0 = vpop.f32.mrb[87].mxu0  ;;  %v6037_v59 = vsel %vm252_vm2, %v5845_v14, %v5966_v40  ;;  %v5721_v13 = vpop.permute.xlu1 %5720  ;;  %v5852_v14 = vld [vmem:[#allocation2 + $0x219] sm:$0xff] }
 0x5d8   : > { %6887 = vmatprep.mubr.f32.mxu1 %v6037_v59  ;;  %v5786_v40 = vsel %vm252_vm2, %v13583_v25, %v5721_v13 }
 0x5da   : > { %v5968_v19 = vpop.permute.xlu0 %5967  ;;  %6888 = vmatmul.mubr.f32.gmra.mrb[80].mxu1 %v5780_v28 }
 0x5db   : > { %v6038_v42 = vsel %vm252_vm2, %v5846_v31, %v5968_v19  ;;  %v5723_v2 = vpop.permute.xlu1 %5722  ;;  %v7217_v31 = vld [vmem:[#allocation2] sm:$0xff]  ;;  %v7219_v19 = vld [vmem:[#allocation2 + $0x18] sm:$0xff] }
 0x5dc   : > { %6892 = vmatprep.mubr.f32.mxu1 %v6038_v42  ;;  %v5787_v59 = vsel %vm252_vm2, %v13599_v1, %v5723_v2 }
 0x5dd   : > { %v13809_v47 = vpop.f32.mrb[88].mxu0 }
 0x5de   : > { %v13814_v44 = vpop.f32.mrb[89].mxu0  ;;  %v5970_v36 = vpop.permute.xlu0 %5969  ;;  %6893 = vmatmul.mubr.f32.gmra.mrb[82].mxu1 %v5781_v23 }
 0x5df   : > { %v6039_v46 = vsel %vm252_vm2, %v5847_v32, %v5970_v36 }
 0x5e0   : > { %6897 = vmatprep.mubr.f32.mxu1 %v6039_v46 }
 0x5e2   : > { %v5972_v7 = vpop.permute.xlu0 %5971  ;;  %6898 = vmatmul.mubr.f32.gmra.mrb[84].mxu1 %v5782_v41  ;;  %v13860_v41 = vld [vmem:[#allocation2 + $0x20] sm:$0xff] }
 0x5e3   : > { %v6040_v37 = vsel %vm252_vm2, %v5848_v50, %v5972_v7 }
 0x5e4   : > { %6902 = vmatprep.mubr.f32.mxu1 %v6040_v37 }
 0x5e6   : > { %v5974_v38 = vpop.permute.xlu0 %5973  ;;  %6903 = vmatmul.mubr.f32.gmra.mrb[86].mxu1 %v5783_v62  ;;  %v7221_v62 = vld [vmem:[#allocation2 + $0x30] sm:$0xff] }
 0x5e7   : > { %v6041_v24 = vsel %vm252_vm2, %v5849_v6, %v5974_v38  ;;  %v7316_v25 = vpop.permute.xlu1 %7315  ;;  %v7223_v38 = vld [vmem:[#allocation2 + $0x48] sm:$0xff] }
 0x5e8   : > { %6907 = vmatprep.mubr.f32.mxu1 %v6041_v24  ;;  %v13851_v1 = vsel %vm252_vm2, %v13842_v29, %v7316_v25  ;;  %v13870_v24 = vld [vmem:[#allocation2 + $0x38] sm:$0xff] }
 0x5ea   : > { %v5976_v10 = vpop.permute.xlu0 %5975  ;;  %6908 = vmatmul.mubr.f32.gmra.mrb[88].mxu1 %v5784_v9 }
 0x5eb   : > { %v6042_v58 = vsel %vm252_vm2, %v5850_v30, %v5976_v10 }
 0x5ec   : > { %6912 = vmatprep.mubr.f32.mxu1 %v6042_v58 }
 0x5ee   : > { %v5978_v11 = vpop.permute.xlu0 %5977  ;;  %6913 = vmatmul.mubr.f32.gmra.mrb[90].mxu1 %v5785_v8  ;;  %v13887_v8 = vld [vmem:[%s14884_s4 + $0x2] ss:$0 sm:$0xff] }
 0x5ef   : > { %v6043_v52 = vsel %vm252_vm2, %v5851_v39, %v5978_v11 }
 0x5f0   : > { %6917 = vmatprep.mubr.f32.mxu1 %v6043_v52 }
 0x5f2   : > { %v5980_v20 = vpop.permute.xlu0 %5979  ;;  %6918 = vmatmul.mubr.f32.gmra.mrb[92].mxu1 %v5786_v40 }
 0x5f3   : > { %v6044_v35 = vsel %vm252_vm2, %v5852_v14, %v5980_v20  ;;  %v13891_v14 = vld [vmem:[#allocation2 + $0x50] sm:$0xff] }
 0x5f4   : > { %6922 = vmatprep.mubr.f32.mxu1 %v6044_v35 }
 0x5f6   : > { %6923 = vmatmul.mubr.f32.gmra.mrb[94].mxu1 %v5787_v59  ;;  %v7314_v45 = vpop.permute.xlu0 %7313 }
 0x5f7   : > { %v13845_v42 = vsel %vm252_vm2, %v7217_v31, %v7314_v45  ;;  %v8010_v45 = vld [vmem:[#allocation2 + $0x1e0] sm:$0xff] }
 0x5fa   : > { %v7318_v23 = vpop.permute.xlu0 %7317 }
 0x5fb   : > { %v13854_v36 = vsel %vm252_vm2, %v7219_v19, %v7318_v23  ;;  %v8011_v19 = vld [vmem:[#allocation2 + $0x1e8] sm:$0xff] }
 0x62c   : > { %v13838_v12 = vpop.f32.mrb[90].mxu0 }
 0x62d   : > { %v13840_v28 = vpop.f32.mrb[91].mxu0  ;;  %v7322_v50 = vpop.permute.xlu0 %7321 }
 0x62e   : > { %v7320_v7 = vpop.permute.xlu1 %7319  ;;  %v13873_v30 = vsel %vm252_vm2, %v7221_v62, %v7322_v50 }
 0x62f   : > { %v13864_v37 = vsel %vm252_vm2, %v13860_v41, %v7320_v7 }
 0x633   : > { %v7326_v9 = vpop.permute.xlu0 %7325 }
 0x634   : > { %v13876_v58 = vsel %vm252_vm2, %v7223_v38, %v7326_v9 }
 0x635   : > { %v7324_v10 = vpop.permute.xlu1 %7323 }
 0x636   : > { %v13880_v13 = vsel %vm252_vm2, %v13870_v24, %v7324_v10 }
 0x637   : > { %v8131_v31 = vpop.permute.xlu0 %8130 }
 0x638   : > { %v8202_v50 = vsel %vm252_vm2, %v8010_v45, %v8131_v31 }
 0x639   : > { %v7328_v20 = vpop.permute.xlu1 %7327  ;;  %8234 = vst [vmem:[#allocation3 + $0x3d8] sm:$0xff] %v8202_v50 }
 0x63a   : > { %v13896_v35 = vsel %vm252_vm2, %v13891_v14, %v7328_v20 }
 0x63c   : > { %v13847_v32 = vpop.f32.mrb[92].mxu0 }
 0x63d   : > { %v13856_v46 = vpop.f32.mrb[93].mxu0  ;;  %v8133_v9 = vpop.permute.xlu1 %8132 }
 0x63e   : > { %v8203_v10 = vsel %vm252_vm2, %v8011_v19, %v8133_v9 }
 0x63f   : > { %8235 = vst [vmem:[#allocation3 + $0x400] sm:$0xff] %v8203_v10 }
 0x644   : > { %v13868_v57 = vpop.f32.mrb[94].mxu0 }
 0x645   : > { %v13882_v39 = vpop.f32.mrb[95].mxu0 }
 0x64d   : > { %v6769_v52 = vpop.f32.mrb[32].mxu1 }
 0x64e   : > { %v9991_v40 = vadd.f32 %v13887_v8, %v6769_v52  ;;  %v6771_v2 = vpop.f32.mrb[33].mxu1 }
 0x650   : > { %v6995_v59 = vadd.f32 %v9991_v40, %v13670_v22 }
 0x651   : > { %v6774_v23 = vpop.f32.mrb[34].mxu1 }
 0x652   : > { %v7153_v7 = vmax.f32 %v6995_v59, 0.0  ;;  %v9992_v62 = vadd.f32 %v13887_v8, %v6774_v23  ;;  %v6776_v38 = vpop.f32.mrb[35].mxu1 }
 0x654   : > { %7185 = vst.msk [vmem:[#allocation2 + $0x64] sm:$0xff] %vm252_vm2, %v7153_v7  ;;  %v7000_v22 = vadd.f32 %v9992_v62, %v13665_v49 }
 0x655   : > { %v6779_v52 = vpop.f32.mrb[36].mxu1 }
 0x656   : > { %v7154_v40 = vmax.f32 %v7000_v22, 0.0  ;;  %v9993_v2 = vadd.f32 %v13887_v8, %v6779_v52  ;;  %v6781_v20 = vpop.f32.mrb[37].mxu1 }
 0x658   : > { %7186 = vst.msk [vmem:[#allocation2 + $0x6c] sm:$0xff] %vm252_vm2, %v7154_v40  ;;  %v7005_v59 = vadd.f32 %v9993_v2, %v13684_v63 }
 0x659   : > { %v6784_v45 = vpop.f32.mrb[38].mxu1 }
 0x65a   : > { %v7155_v31 = vmax.f32 %v7005_v59, 0.0  ;;  %v9994_v23 = vadd.f32 %v13887_v8, %v6784_v45  ;;  %v6786_v50 = vpop.f32.mrb[39].mxu1 }
 0x65b   : > { %v13910_v19 = vld [vmem:[#allocation2 + $0x60] sm:$0xff] }
 0x65c   : > { %7187 = vst.msk [vmem:[#allocation2 + $0x7c] sm:$0xff] %vm252_vm2, %v7155_v31  ;;  %v7010_v49 = vadd.f32 %v9994_v23, %v13679_v61  ;;  %7569 = vrot.lane.b32.xlu0 %v13910_v19, %s10249_s19  ;;  %v13917_v63 = vld [vmem:[#allocation2 + $0x64] sm:$0xff] }
 0x65d   : > { %v6789_v7 = vpop.f32.mrb[40].mxu1 }
 0x65e   : > { %v7156_v62 = vmax.f32 %v7010_v49, 0.0  ;;  %v9995_v38 = vadd.f32 %v13887_v8, %v6789_v7  ;;  %v6791_v9 = vpop.f32.mrb[41].mxu1 }
 0x65f   : > { %v13919_v10 = vld [vmem:[#allocation2 + $0x70] sm:$0xff]  ;;  %v13928_v20 = vld [vmem:[#allocation2 + $0x68] sm:$0xff] }
 0x660   : > { %7188 = vst.msk [vmem:[#allocation2 + $0x84] sm:$0xff] %vm252_vm2, %v7156_v62  ;;  %v7015_v22 = vadd.f32 %v9995_v38, %v13697_v15  ;;  %7329 = vrot.lane.b32.xlu0 %v13917_v63, %s10249_s19  ;;  %7827 = vrot.lane.b32.xlu1 %v13919_v10, %s10249_s19  ;;  %v13937_v50 = vld [vmem:[#allocation2 + $0x6c] sm:$0xff] }
 0x661   : > { %v6794_v61 = vpop.f32.mrb[42].mxu1 }
 0x662   : > { %v7157_v52 = vmax.f32 %v7015_v22, 0.0  ;;  %v9996_v40 = vadd.f32 %v13887_v8, %v6794_v61  ;;  %v6796_v2 = vpop.f32.mrb[43].mxu1 }
 0x663   : > { %v13939_v49 = vld [vmem:[#allocation2 + $0x78] sm:$0xff] }
 0x664   : > { %7189 = vst.msk [vmem:[#allocation2 + $0x94] sm:$0xff] %vm252_vm2, %v7157_v52  ;;  %v7020_v59 = vadd.f32 %v9996_v40, %v13693_v34  ;;  %7825 = vrot.lane.b32.xlu0 %v13928_v20, %s10249_s19  ;;  %7571 = vrot.lane.b32.xlu1 %v13928_v20, %s10249_s19  ;;  %v13948_v22 = vld [vmem:[#allocation2 + $0x7c] sm:$0xff] }
 0x665   : > { %v6799_v15 = vpop.f32.mrb[44].mxu1 }
 0x666   : > { %v7158_v45 = vmax.f32 %v7020_v59, 0.0  ;;  %v9997_v31 = vadd.f32 %v13887_v8, %v6799_v15  ;;  %v6801_v23 = vpop.f32.mrb[45].mxu1 }
 0x667   : > { %v7764_v61 = vld [vmem:[#allocation2 + $0x88] sm:$0xff]  ;;  %v13956_v15 = vld [vmem:[#allocation2 + $0x80] sm:$0xff] }
 0x668   : > { %7190 = vst.msk [vmem:[#allocation2 + $0x9c] sm:$0xff] %vm252_vm2, %v7158_v45  ;;  %v7025_v7 = vadd.f32 %v9997_v31, %v13709_v54  ;;  %7331 = vrot.lane.b32.xlu1 %v13937_v50, %s10249_s19  ;;  %7573 = vrot.lane.b32.xlu0 %v13939_v49, %s10249_s19 }
 0x669   : > { %v6804_v34 = vpop.f32.mrb[46].mxu1 }
 0x66a   : > { %v7159_v62 = vmax.f32 %v7025_v7, 0.0  ;;  %v9998_v38 = vadd.f32 %v13887_v8, %v6804_v34  ;;  %v6806_v9 = vpop.f32.mrb[47].mxu1  ;;  %v13965_v34 = vld [vmem:[#allocation2 + $0x84] sm:$0xff] }
 0x66c   : > { %7191 = vst.msk [vmem:[#allocation2 + $0xac] sm:$0xff] %vm252_vm2, %v7159_v62  ;;  %v7030_v52 = vadd.f32 %v9998_v38, %v13705_v18  ;;  %7333 = vrot.lane.b32.xlu0 %v13948_v22, %s10249_s19  ;;  %7831 = vrot.lane.b32.xlu1 %v7764_v61, %s10249_s19  ;;  %v7509_v62 = vld [vmem:[#allocation2 + $0x90] sm:$0xff] }
 0x66d   : > { %v6809_v54 = vpop.f32.mrb[48].mxu1 }
 0x66e   : > { %v7160_v40 = vmax.f32 %v7030_v52, 0.0  ;;  %v9999_v2 = vadd.f32 %v13887_v8, %v6809_v54  ;;  %v6811_v59 = vpop.f32.mrb[49].mxu1 }
 0x66f   : > { %v7766_v54 = vld [vmem:[#allocation2 + $0xa0] sm:$0xff] }
 0x670   : > { %7192 = vst.msk [vmem:[#allocation2 + $0xb4] sm:$0xff] %vm252_vm2, %v7160_v40  ;;  %v7035_v45 = vadd.f32 %v9999_v2, %v13719_v53  ;;  %7829 = vrot.lane.b32.xlu0 %v13956_v15, %s10249_s19  ;;  %7575 = vrot.lane.b32.xlu1 %v13956_v15, %s10249_s19  ;;  %v7765_v40 = vld [vmem:[#allocation2 + $0x98] sm:$0xff] }
 0x671   : > { %v6814_v18 = vpop.f32.mrb[50].mxu1 }
 0x672   : > { %v7161_v31 = vmax.f32 %v7035_v45, 0.0  ;;  %v10000_v23 = vadd.f32 %v13887_v8, %v6814_v18  ;;  %v6816_v7 = vpop.f32.mrb[51].mxu1 }
 0x674   : > { %7193 = vst.msk [vmem:[#allocation2 + $0xc4] sm:$0xff] %vm252_vm2, %v7161_v31  ;;  %v7040_v38 = vadd.f32 %v10000_v23, %v13716_v43  ;;  %7335 = vrot.lane.b32.xlu1 %v13965_v34, %s10249_s19  ;;  %7577 = vrot.lane.b32.xlu0 %v7509_v62, %s10249_s19  ;;  %v7511_v31 = vld [vmem:[#allocation2 + $0xa8] sm:$0xff] }
 0x675   : > { %v6819_v53 = vpop.f32.mrb[52].mxu1 }
 0x676   : > { %v7162_v9 = vmax.f32 %v7040_v38, 0.0  ;;  %v10001_v61 = vadd.f32 %v13887_v8, %v6819_v53  ;;  %v6821_v52 = vpop.f32.mrb[53].mxu1 }
 0x677   : > { %v7768_v53 = vld [vmem:[#allocation2 + $0xb8] sm:$0xff] }
 0x678   : > { %7194 = vst.msk [vmem:[#allocation2 + $0xcc] sm:$0xff] %vm252_vm2, %v7162_v9  ;;  %v7045_v2 = vadd.f32 %v10001_v61, %v13731_v26  ;;  %7835 = vrot.lane.b32.xlu1 %v7766_v54, %s10249_s19  ;;  %7833 = vrot.lane.b32.xlu0 %v7765_v40, %s10249_s19  ;;  %v7767_v9 = vld [vmem:[#allocation2 + $0xb0] sm:$0xff] }
 0x679   : > { %v6824_v43 = vpop.f32.mrb[54].mxu1 }
 0x67a   : > { %v7163_v59 = vmax.f32 %v7045_v2, 0.0  ;;  %v10002_v45 = vadd.f32 %v13887_v8, %v6824_v43  ;;  %v6826_v18 = vpop.f32.mrb[55].mxu1 }
 0x67c   : > { %7195 = vst.msk [vmem:[#allocation2 + $0xdc] sm:$0xff] %vm252_vm2, %v7163_v59  ;;  %v7050_v23 = vadd.f32 %v10002_v45, %v13727_v27  ;;  %7579 = vrot.lane.b32.xlu1 %v7765_v40, %s10249_s19  ;;  %7581 = vrot.lane.b32.xlu0 %v7511_v31, %s10249_s19 }
 0x67d   : > { %v6829_v7 = vpop.f32.mrb[56].mxu1 }
 0x67e   : > { %v7164_v26 = vmax.f32 %v7050_v23, 0.0  ;;  %v10003_v62 = vadd.f32 %v13887_v8, %v6829_v7  ;;  %v6831_v38 = vpop.f32.mrb[57].mxu1  ;;  %v14004_v7 = vld [vmem:[#allocation2 + $0xc0] sm:$0xff] }
 0x67f   : > { %v13987_v27 = vld [vmem:[#allocation2 + $0xc8] sm:$0xff]  ;;  %v13989_v52 = vld [vmem:[#allocation2 + $0xd0] sm:$0xff] }
 0x680   : > { %7196 = vst.msk [vmem:[#allocation2 + $0xe4] sm:$0xff] %vm252_vm2, %v7164_v26  ;;  %v7055_v61 = vadd.f32 %v10003_v62, %v13743_v5  ;;  %7839 = vrot.lane.b32.xlu1 %v7768_v53, %s10249_s19  ;;  %7837 = vrot.lane.b32.xlu0 %v7767_v9, %s10249_s19  ;;  %15121 = vst [vmem:[#allocation37_spill] sm:$0xff] %v13987_v27  ;;  %v13996_v5 = vld [vmem:[#allocation2 + $0xc4] sm:$0xff]  ;;  %v14006_v26 = vld [vmem:[#allocation2 + $0xcc] sm:$0xff] }
 0x681   : > { %15122 = vst [vmem:[#allocation17_spill] sm:$0xff] %v13989_v52  ;;  %v6834_v54 = vpop.f32.mrb[58].mxu1  ;;  %8274 = vst.msk [vmem:[#allocation3 + $0x20] sm:$0xff] %vm252_vm2, %v13987_v27 }
 0x682   : > { %8275 = vst.msk [vmem:[#allocation3 + $0x48] sm:$0xff] %vm252_vm2, %v13989_v52  ;;  %v7165_v40 = vmax.f32 %v7055_v61, 0.0  ;;  %v10004_v2 = vadd.f32 %v13887_v8, %v6834_v54  ;;  %v6836_v43 = vpop.f32.mrb[59].mxu1  ;;  %v7770_v54 = vld [vmem:[#allocation2 + $0xd0] sm:$0xff] }
 0x684   : > { %7197 = vst.msk [vmem:[#allocation2 + $0xf4] sm:$0xff] %vm252_vm2, %v7165_v40  ;;  %v7060_v59 = vadd.f32 %v10004_v2, %v13739_v56  ;;  %7583 = vrot.lane.b32.xlu1 %v7767_v9, %s10249_s19  ;;  %8082 = vrot.lane.b32.xlu0 %v13996_v5, %s10249_s19  ;;  %v14023_v40 = vld [vmem:[#allocation2 + $0xc8] sm:$0xff] }
 0x685   : > { %v6839_v45 = vpop.f32.mrb[60].mxu1 }
 0x686   : > { %v7166_v18 = vmax.f32 %v7060_v59, 0.0  ;;  %v10005_v31 = vadd.f32 %v13887_v8, %v6839_v45  ;;  %v6841_v23 = vpop.f32.mrb[61].mxu1 }
 0x687   : > { %v14014_v56 = vld [vmem:[#allocation2 + $0xe0] sm:$0xff]  ;;  %v14016_v38 = vld [vmem:[#allocation2 + $0xe8] sm:$0xff] }
 0x688   : > { %7198 = vst.msk [vmem:[#allocation2 + $0xfc] sm:$0xff] %vm252_vm2, %v7166_v18  ;;  %v7065_v62 = vadd.f32 %v10005_v31, %v13755_v17  ;;  %7585 = vrot.lane.b32.xlu0 %v14004_v7, %s10249_s19  ;;  %8084 = vrot.lane.b32.xlu1 %v14006_v26, %s10249_s19  ;;  %15123 = vst [vmem:[#allocation57_spill] sm:$0xff] %v14014_v56  ;;  %v14031_v31 = vld [vmem:[#allocation2 + $0xdc] sm:$0xff] }
 0x689   : > { %15124 = vst [vmem:[#allocation77_spill] sm:$0xff] %v14016_v38  ;;  %v6844_v53 = vpop.f32.mrb[62].mxu1  ;;  %8276 = vst.msk [vmem:[#allocation3 + $0x70] sm:$0xff] %vm252_vm2, %v14014_v56 }
 0x68a   : > { %8277 = vst.msk [vmem:[#allocation3 + $0x98] sm:$0xff] %vm252_vm2, %v14016_v38  ;;  %v7167_v9 = vmax.f32 %v7065_v62, 0.0  ;;  %v10006_v17 = vadd.f32 %v13887_v8, %v6844_v53  ;;  %v6846_v61 = vpop.f32.mrb[63].mxu1 }
 0x68b   : > { %v14048_v61 = vld [vmem:[#allocation2 + $0xd8] sm:$0xff] }
 0x68c   : > { %7199 = vst.msk [vmem:[#allocation2 + $0x10c] sm:$0xff] %vm252_vm2, %v7167_v9  ;;  %v7070_v2 = vadd.f32 %v10006_v17, %v13751_v3  ;;  %7843 = vrot.lane.b32.xlu1 %v7770_v54, %s10249_s19  ;;  %7841 = vrot.lane.b32.xlu0 %v14023_v40, %s10249_s19  ;;  %v14050_v54 = vld [vmem:[#allocation2 + $0xe4] sm:$0xff] }
 0x68d   : > { %v6849_v43 = vpop.f32.mrb[64].mxu1 }
 0x68e   : > { %v7168_v59 = vmax.f32 %v7070_v2, 0.0  ;;  %v10007_v45 = vadd.f32 %v13887_v8, %v6849_v43  ;;  %v6851_v18 = vpop.f32.mrb[65].mxu1 }
 0x68f   : > { %v14039_v3 = vld [vmem:[#allocation2 + $0xf8] sm:$0xff]  ;;  %v14041_v62 = vld [vmem:[#allocation2 + $0x100] sm:$0xff] }
 0x690   : > { %7200 = vst.msk [vmem:[#allocation2 + $0x114] sm:$0xff] %vm252_vm2, %v7168_v59  ;;  %v7075_v23 = vadd.f32 %v10007_v45, %v13767_v21  ;;  %7587 = vrot.lane.b32.xlu1 %v14023_v40, %s10249_s19  ;;  %8086 = vrot.lane.b32.xlu0 %v14031_v31, %s10249_s19  ;;  %15125 = vst [vmem:[#allocation36_spill] sm:$0xff] %v14039_v3  ;;  %v14084_v11 = vld [vmem:[#allocation2 + $0xfc] sm:$0xff] }
 0x691   : > { %15126 = vst [vmem:[#allocation16_spill] sm:$0xff] %v14041_v62  ;;  %v6854_v53 = vpop.f32.mrb[66].mxu1  ;;  %8278 = vst.msk [vmem:[#allocation3 + $0xc0] sm:$0xff] %vm252_vm2, %v14039_v3 }
 0x692   : > { %8279 = vst.msk [vmem:[#allocation3 + $0xe8] sm:$0xff] %vm252_vm2, %v14041_v62  ;;  %v7169_v9 = vmax.f32 %v7075_v23, 0.0  ;;  %v10008_v21 = vadd.f32 %v13887_v8, %v6854_v53  ;;  %v6856_v17 = vpop.f32.mrb[67].mxu1  ;;  %v7772_v23 = vld [vmem:[#allocation2 + $0xe8] sm:$0xff]  ;;  %v14059_v53 = vld [vmem:[#allocation2 + $0xe0] sm:$0xff] }
 0x694   : > { %7201 = vst.msk [vmem:[#allocation2 + $0x124] sm:$0xff] %vm252_vm2, %v7169_v9  ;;  %v7080_v2 = vadd.f32 %v10008_v21, %v13763_v60  ;;  %7589 = vrot.lane.b32.xlu0 %v14048_v61, %s10249_s19  ;;  %8088 = vrot.lane.b32.xlu1 %v14050_v54, %s10249_s19 }
 0x695   : > { %v6859_v43 = vpop.f32.mrb[68].mxu1 }
 0x696   : > { %v7170_v59 = vmax.f32 %v7080_v2, 0.0  ;;  %v10009_v45 = vadd.f32 %v13887_v8, %v6859_v43  ;;  %v6861_v18 = vpop.f32.mrb[69].mxu1 }
 0x697   : > { %v14066_v60 = vld [vmem:[#allocation2 + $0x110] sm:$0xff]  ;;  %v14068_v21 = vld [vmem:[#allocation2 + $0x118] sm:$0xff] }
 0x698   : > { %7202 = vst.msk [vmem:[#allocation2 + $0x12c] sm:$0xff] %vm252_vm2, %v7170_v59  ;;  %v7085_v9 = vadd.f32 %v10009_v45, %v13779_v16  ;;  %7847 = vrot.lane.b32.xlu1 %v7772_v23, %s10249_s19  ;;  %7845 = vrot.lane.b32.xlu0 %v14059_v53, %s10249_s19  ;;  %15127 = vst [vmem:[#allocation56_spill] sm:$0xff] %v14066_v60  ;;  %v14075_v59 = vld [vmem:[#allocation2 + $0xf4] sm:$0xff] }
 0x699   : > { %15128 = vst [vmem:[#allocation76_spill] sm:$0xff] %v14068_v21  ;;  %v6864_v17 = vpop.f32.mrb[70].mxu1  ;;  %8280 = vst.msk [vmem:[#allocation3 + $0x110] sm:$0xff] %vm252_vm2, %v14066_v60 }
 0x69a   : > { %8281 = vst.msk [vmem:[#allocation3 + $0x138] sm:$0xff] %vm252_vm2, %v14068_v21  ;;  %v7171_v2 = vmax.f32 %v7085_v9, 0.0  ;;  %v10010_v43 = vadd.f32 %v13887_v8, %v6864_v17  ;;  %v6866_v16 = vpop.f32.mrb[71].mxu1  ;;  %v14086_v17 = vld [vmem:[#allocation2 + $0xf8] sm:$0xff] }
 0x69c   : > { %7203 = vst.msk [vmem:[#allocation2 + $0x13c] sm:$0xff] %vm252_vm2, %v7171_v2  ;;  %v7090_v45 = vadd.f32 %v10010_v43, %v13775_v33  ;;  %7591 = vrot.lane.b32.xlu1 %v14059_v53, %s10249_s19  ;;  %8090 = vrot.lane.b32.xlu0 %v14075_v59, %s10249_s19 }
 0x69d   : > { %v6869_v18 = vpop.f32.mrb[72].mxu1 }
 0x69e   : > { %v7172_v23 = vmax.f32 %v7090_v45, 0.0  ;;  %v10011_v25 = vadd.f32 %v13887_v8, %v6869_v18  ;;  %v6871_v9 = vpop.f32.mrb[73].mxu1  ;;  %v7774_v18 = vld [vmem:[#allocation2 + $0x100] sm:$0xff] }
 0x69f   : > { %v14094_v33 = vld [vmem:[#allocation2 + $0x128] sm:$0xff]  ;;  %v14096_v43 = vld [vmem:[#allocation2 + $0x130] sm:$0xff] }
 0x6a0   : > { %7204 = vst.msk [vmem:[#allocation2 + $0x144] sm:$0xff] %vm252_vm2, %v7172_v23  ;;  %v7095_v2 = vadd.f32 %v10011_v25, %v13789_v4  ;;  %8092 = vrot.lane.b32.xlu1 %v14084_v11, %s10249_s19  ;;  %7849 = vrot.lane.b32.xlu0 %v14086_v17, %s10249_s19  ;;  %15129 = vst [vmem:[#allocation39_spill] sm:$0xff] %v14094_v33  ;;  %v14103_v23 = vld [vmem:[#allocation2 + $0x10c] sm:$0xff] }
 0x6a1   : > { %15130 = vst [vmem:[#allocation19_spill] sm:$0xff] %v14096_v43  ;;  %v6874_v16 = vpop.f32.mrb[74].mxu1  ;;  %8282 = vst.msk [vmem:[#allocation3 + $0x160] sm:$0xff] %vm252_vm2, %v14094_v33  ;;  %v14111_v33 = vld [vmem:[#allocation2 + $0x114] sm:$0xff]  ;;  %v14138_v21 = vld [vmem:[#allocation2 + $0x12c] sm:$0xff] }
 0x6a2   : > { %8283 = vst.msk [vmem:[#allocation3 + $0x188] sm:$0xff] %vm252_vm2, %v14096_v43  ;;  %v7173_v45 = vmax.f32 %v7095_v2, 0.0  ;;  %v10012_v4 = vadd.f32 %v13887_v8, %v6874_v16  ;;  %v6876_v25 = vpop.f32.mrb[75].mxu1  ;;  %v14113_v16 = vld [vmem:[#allocation2 + $0x110] sm:$0xff] }
 0x6a3   : > { %v7776_v25 = vld [vmem:[#allocation2 + $0x118] sm:$0xff] }
 0x6a4   : > { %7205 = vst.msk [vmem:[#allocation2 + $0x154] sm:$0xff] %vm252_vm2, %v7173_v45  ;;  %v7100_v9 = vadd.f32 %v10012_v4, %v13785_v48  ;;  %7851 = vrot.lane.b32.xlu1 %v7774_v18, %s10249_s19  ;;  %8094 = vrot.lane.b32.xlu0 %v14103_v23, %s10249_s19  ;;  %v14130_v18 = vld [vmem:[#allocation2 + $0x124] sm:$0xff] }
 0x6a5   : > { %v6879_v6 = vpop.f32.mrb[76].mxu1 }
 0x6a6   : > { %v7174_v51 = vmax.f32 %v7100_v9, 0.0  ;;  %v10013_v43 = vadd.f32 %v13887_v8, %v6879_v6  ;;  %v6881_v2 = vpop.f32.mrb[77].mxu1 }
 0x6a7   : > { %v14121_v48 = vld [vmem:[#allocation2 + $0x140] sm:$0xff]  ;;  %v14123_v4 = vld [vmem:[#allocation2 + $0x148] sm:$0xff] }
 0x6a8   : > { %7206 = vst.msk [vmem:[#allocation2 + $0x15c] sm:$0xff] %vm252_vm2, %v7174_v51  ;;  %v7105_v45 = vadd.f32 %v10013_v43, %v13801_v0  ;;  %8096 = vrot.lane.b32.xlu1 %v14111_v33, %s10249_s19  ;;  %7853 = vrot.lane.b32.xlu0 %v14113_v16, %s10249_s19  ;;  %15131 = vst [vmem:[#allocation59_spill] sm:$0xff] %v14121_v48  ;;  %v14165_v60 = vld [vmem:[#allocation2 + $0x144] sm:$0xff] }
 0x6a9   : > { %15132 = vst [vmem:[#allocation79_spill] sm:$0xff] %v14123_v4  ;;  %v6884_v6 = vpop.f32.mrb[78].mxu1  ;;  %8284 = vst.msk [vmem:[#allocation3 + $0x1b0] sm:$0xff] %vm252_vm2, %v14121_v48 }
 0x6aa   : > { %8285 = vst.msk [vmem:[#allocation3 + $0x1d8] sm:$0xff] %vm252_vm2, %v14123_v4  ;;  %v7175_v51 = vmax.f32 %v7105_v45, 0.0  ;;  %v10014_v0 = vadd.f32 %v13887_v8, %v6884_v6  ;;  %v6886_v43 = vpop.f32.mrb[79].mxu1  ;;  %v14140_v6 = vld [vmem:[#allocation2 + $0x128] sm:$0xff] }
 0x6ac   : > { %7207 = vst.msk [vmem:[#allocation2 + $0x16c] sm:$0xff] %vm252_vm2, %v7175_v51  ;;  %v7110_v9 = vadd.f32 %v10014_v0, %v13797_v55  ;;  %7855 = vrot.lane.b32.xlu1 %v7776_v25, %s10249_s19  ;;  %8098 = vrot.lane.b32.xlu0 %v14130_v18, %s10249_s19  ;;  %v7778_v25 = vld [vmem:[#allocation2 + $0x130] sm:$0xff] }
 0x6ad   : > { %v6889_v2 = vpop.f32.mrb[80].mxu1 }
 0x6ae   : > { %v7176_v48 = vmax.f32 %v7110_v9, 0.0  ;;  %v10015_v4 = vadd.f32 %v13887_v8, %v6889_v2  ;;  %v6891_v45 = vpop.f32.mrb[81].mxu1  ;;  %v14157_v9 = vld [vmem:[#allocation2 + $0x13c] sm:$0xff] }
 0x6af   : > { %v14148_v55 = vld [vmem:[#allocation2 + $0x158] sm:$0xff]  ;;  %v14150_v0 = vld [vmem:[#allocation2 + $0x160] sm:$0xff] }
 0x6b0   : > { %7208 = vst.msk [vmem:[#allocation2 + $0x174] sm:$0xff] %vm252_vm2, %v7176_v48  ;;  %v7115_v51 = vadd.f32 %v10015_v4, %v13814_v44  ;;  %8100 = vrot.lane.b32.xlu1 %v14138_v21, %s10249_s19  ;;  %7857 = vrot.lane.b32.xlu0 %v14140_v6, %s10249_s19  ;;  %15133 = vst [vmem:[#allocation38_spill] sm:$0xff] %v14148_v55  ;;  %v14192_v62 = vld [vmem:[#allocation2 + $0x15c] sm:$0xff] }
 0x6b1   : > { %15134 = vst [vmem:[#allocation18_spill] sm:$0xff] %v14150_v0  ;;  %v6894_v43 = vpop.f32.mrb[82].mxu1  ;;  %8286 = vst.msk [vmem:[#allocation3 + $0x200] sm:$0xff] %vm252_vm2, %v14148_v55 }
 0x6b2   : > { %8287 = vst.msk [vmem:[#allocation3 + $0x228] sm:$0xff] %vm252_vm2, %v14150_v0  ;;  %v7177_v48 = vmax.f32 %v7115_v51, 0.0  ;;  %v10016_v44 = vadd.f32 %v13887_v8, %v6894_v43  ;;  %v6896_v4 = vpop.f32.mrb[83].mxu1  ;;  %v14167_v43 = vld [vmem:[#allocation2 + $0x140] sm:$0xff] }
 0x6b4   : > { %7209 = vst.msk [vmem:[#allocation2 + $0x184] sm:$0xff] %vm252_vm2, %v7177_v48  ;;  %v7120_v2 = vadd.f32 %v10016_v44, %v13809_v47  ;;  %7859 = vrot.lane.b32.xlu1 %v7778_v25, %s10249_s19  ;;  %8102 = vrot.lane.b32.xlu0 %v14157_v9, %s10249_s19  ;;  %v7780_v25 = vld [vmem:[#allocation2 + $0x148] sm:$0xff] }
 0x6b5   : > { %v6899_v45 = vpop.f32.mrb[84].mxu1 }
 0x6b6   : > { %v7178_v55 = vmax.f32 %v7120_v2, 0.0  ;;  %v10017_v0 = vadd.f32 %v13887_v8, %v6899_v45  ;;  %v6901_v51 = vpop.f32.mrb[85].mxu1  ;;  %v14184_v2 = vld [vmem:[#allocation2 + $0x154] sm:$0xff] }
 0x6b7   : > { %v14175_v47 = vld [vmem:[#allocation2 + $0x170] sm:$0xff]  ;;  %v14177_v44 = vld [vmem:[#allocation2 + $0x178] sm:$0xff] }
 0x6b8   : > { %7210 = vst.msk [vmem:[#allocation2 + $0x18c] sm:$0xff] %vm252_vm2, %v7178_v55  ;;  %v7125_v48 = vadd.f32 %v10017_v0, %v13840_v28  ;;  %8104 = vrot.lane.b32.xlu1 %v14165_v60, %s10249_s19  ;;  %7861 = vrot.lane.b32.xlu0 %v14167_v43, %s10249_s19  ;;  %15135 = vst [vmem:[#allocation58_spill] sm:$0xff] %v14175_v47  ;;  %v14213_v3 = vld [vmem:[#allocation2 + $0x174] sm:$0xff] }
 0x6b9   : > { %15136 = vst [vmem:[#allocation78_spill] sm:$0xff] %v14177_v44  ;;  %v6904_v4 = vpop.f32.mrb[86].mxu1  ;;  %8288 = vst.msk [vmem:[#allocation3 + $0x250] sm:$0xff] %vm252_vm2, %v14175_v47 }
 0x6ba   : > { %8289 = vst.msk [vmem:[#allocation3 + $0x278] sm:$0xff] %vm252_vm2, %v14177_v44  ;;  %v7179_v55 = vmax.f32 %v7125_v48, 0.0  ;;  %v10018_v28 = vadd.f32 %v13887_v8, %v6904_v4  ;;  %v6906_v0 = vpop.f32.mrb[87].mxu1  ;;  %v14194_v4 = vld [vmem:[#allocation2 + $0x158] sm:$0xff] }
 0x6bc   : > { %7211 = vst.msk [vmem:[#allocation2 + $0x19c] sm:$0xff] %vm252_vm2, %v7179_v55  ;;  %v7130_v45 = vadd.f32 %v10018_v28, %v13838_v12  ;;  %7863 = vrot.lane.b32.xlu1 %v7780_v25, %s10249_s19  ;;  %8106 = vrot.lane.b32.xlu0 %v14184_v2, %s10249_s19 }
 0x6bd   : > { %v6909_v51 = vpop.f32.mrb[88].mxu1 }
 0x6be   : > { %v7180_v47 = vmax.f32 %v7130_v45, 0.0  ;;  %v10019_v44 = vadd.f32 %v13887_v8, %v6909_v51  ;;  %v6911_v48 = vpop.f32.mrb[89].mxu1 }
 0x6bf   : > { %v8258_v12 = vld [vmem:[#allocation2 + $0x188] sm:$0xff]  ;;  %v8259_v28 = vld [vmem:[#allocation2 + $0x190] sm:$0xff] }
 0x6c0   : > { %7212 = vst.msk [vmem:[#allocation2 + $0x1a4] sm:$0xff] %vm252_vm2, %v7180_v47  ;;  %v7135_v55 = vadd.f32 %v10019_v44, %v13856_v46  ;;  %8108 = vrot.lane.b32.xlu1 %v14192_v62, %s10249_s19  ;;  %7865 = vrot.lane.b32.xlu0 %v14194_v4, %s10249_s19  ;;  %8290 = vst.msk [vmem:[#allocation3 + $0x2a0] sm:$0xff] %vm252_vm2, %v8258_v12  ;;  %v7782_v47 = vld [vmem:[#allocation2 + $0x160] sm:$0xff]  ;;  %v14205_v48 = vld [vmem:[#allocation2 + $0x16c] sm:$0xff] }
 0x6c1   : > { %v6914_v0 = vpop.f32.mrb[90].mxu1  ;;  %8291 = vst.msk [vmem:[#allocation3 + $0x2c8] sm:$0xff] %vm252_vm2, %v8259_v28 }
 0x6c2   : > { %v7181_v25 = vmax.f32 %v7135_v55, 0.0  ;;  %v10020_v45 = vadd.f32 %v13887_v8, %v6914_v0  ;;  %v6916_v51 = vpop.f32.mrb[91].mxu1  ;;  %v14215_v0 = vld [vmem:[#allocation2 + $0x170] sm:$0xff] }
 0x6c4   : > { %7213 = vst.msk [vmem:[#allocation2 + $0x1b4] sm:$0xff] %vm252_vm2, %v7181_v25  ;;  %v7140_v46 = vadd.f32 %v10020_v45, %v13847_v32  ;;  %7867 = vrot.lane.b32.xlu1 %v7782_v47, %s10249_s19  ;;  %8110 = vrot.lane.b32.xlu0 %v14205_v48, %s10249_s19 }
 0x6c5   : > { %v6919_v44 = vpop.f32.mrb[92].mxu1 }
 0x6c6   : > { %v7182_v12 = vmax.f32 %v7140_v46, 0.0  ;;  %v10021_v28 = vadd.f32 %v13887_v8, %v6919_v44  ;;  %v6921_v55 = vpop.f32.mrb[93].mxu1 }
 0x6c7   : > { %v8260_v45 = vld [vmem:[#allocation2 + $0x1a0] sm:$0xff]  ;;  %v8261_v51 = vld [vmem:[#allocation2 + $0x1a8] sm:$0xff] }
 0x6c8   : > { %7214 = vst.msk [vmem:[#allocation2 + $0x1bc] sm:$0xff] %vm252_vm2, %v7182_v12  ;;  %v7145_v25 = vadd.f32 %v10021_v28, %v13882_v39  ;;  %8112 = vrot.lane.b32.xlu1 %v14213_v3, %s10249_s19  ;;  %7869 = vrot.lane.b32.xlu0 %v14215_v0, %s10249_s19  ;;  %8292 = vst.msk [vmem:[#allocation3 + $0x2f0] sm:$0xff] %vm252_vm2, %v8260_v45  ;;  %v7784_v12 = vld [vmem:[#allocation2 + $0x178] sm:$0xff]  ;;  %v14226_v55 = vld [vmem:[#allocation2 + $0x184] sm:$0xff] }
 0x6c9   : > { %v6924_v32 = vpop.f32.mrb[94].mxu1  ;;  %8293 = vst.msk [vmem:[#allocation3 + $0x318] sm:$0xff] %vm252_vm2, %v8261_v51  ;;  %v14237_v45 = vld [vmem:[#allocation2 + $0x188] sm:$0xff] }
 0x6ca   : > { %v7183_v47 = vmax.f32 %v7145_v25, 0.0  ;;  %v10022_v46 = vadd.f32 %v13887_v8, %v6924_v32  ;;  %v6926_v44 = vpop.f32.mrb[95].mxu1  ;;  %v14235_v32 = vld [vmem:[#allocation2 + $0x18c] sm:$0xff]  ;;  %v14264_v38 = vld [vmem:[#allocation2 + $0x1a4] sm:$0xff] }
 0x6cb   : > { %15137 = vst [vmem:[#allocation41_spill] sm:$0xff] %v14235_v32  ;;  %15139 = vst [vmem:[#allocation61_spill] sm:$0xff] %v14264_v38 }
 0x6cc   : > { %7215 = vst.msk [vmem:[#allocation2 + $0x1cc] sm:$0xff] %vm252_vm2, %v7183_v47  ;;  %v7150_v39 = vadd.f32 %v10022_v46, %v13868_v57  ;;  %7871 = vrot.lane.b32.xlu1 %v7784_v12, %s10249_s19  ;;  %8114 = vrot.lane.b32.xlu0 %v14226_v55, %s10249_s19  ;;  %v7786_v12 = vld [vmem:[#allocation2 + $0x190] sm:$0xff] }
 0x6ce   : > { %v7184_v28 = vmax.f32 %v7150_v39, 0.0  ;;  %v7570_v25 = vpop.permute.xlu0 %7569  ;;  %v14252_v39 = vld [vmem:[#allocation2 + $0x19c] sm:$0xff] }
 0x6cf   : > { %v7665_v8 = vsel %vm252_vm2, %v13842_v29, %v7570_v25  ;;  %v8262_v47 = vld [vmem:[#allocation2 + $0x1b8] sm:$0xff]  ;;  %v8263_v46 = vld [vmem:[#allocation2 + $0x1c0] sm:$0xff]  ;;  %15138 = vst [vmem:[#allocation21_spill] sm:$0xff] %v14252_v39 }
 0x6d0   : > { %7216 = vst.msk [vmem:[#allocation2 + $0x1d4] sm:$0xff] %vm252_vm2, %v7184_v28  ;;  %8116 = vrot.lane.b32.xlu1 %v14235_v32, %s10249_s19  ;;  %7873 = vrot.lane.b32.xlu0 %v14237_v45, %s10249_s19  ;;  %8294 = vst.msk [vmem:[#allocation3 + $0x340] sm:$0xff] %vm252_vm2, %v8262_v47  ;;  %v7474_v28 = vld [vmem:[#allocation2 + $0x10] sm:$0xff]  ;;  %v8044_v25 = vld [vmem:[#allocation2 + $0x1fc] sm:$0xff] }
 0x6d1   : > { %8295 = vst.msk [vmem:[#allocation3 + $0x368] sm:$0xff] %vm252_vm2, %v8263_v46 }
 0x6d2   : > { %v7330_v57 = vpop.permute.xlu0 %7329  ;;  %v7828_v51 = vpop.permute.xlu1 %7827 }
 0x6d3   : > { %v14246_v44 = vsel %vm252_vm2, %v13910_v19, %v7330_v57  ;;  %v14250_v29 = vsel %vm252_vm2, %v13937_v50, %v7828_v51 }
 0x6d4   : > { %7875 = vrot.lane.b32.xlu1 %v7786_v12, %s10249_s19  ;;  %8118 = vrot.lane.b32.xlu0 %v14252_v39, %s10249_s19  ;;  %v8045_v12 = vld [vmem:[#allocation2 + $0x204] sm:$0xff] }
 0x6d6   : > { %v7826_v19 = vpop.permute.xlu0 %7825  ;;  %v7572_v57 = vpop.permute.xlu1 %7571 }
 0x6d7   : > { %v14261_v50 = vsel %vm252_vm2, %v13917_v63, %v7826_v19  ;;  %v7666_v51 = vsel %vm252_vm2, %v7474_v28, %v7572_v57  ;;  %v8264_v46 = vld [vmem:[#allocation2 + $0x1d0] sm:$0xff]  ;;  %v8265_v56 = vld [vmem:[#allocation2 + $0x1d8] sm:$0xff] }
 0x6d8   : > { %8134 = vrot.lane.b32.xlu0 %v8044_v25, %s10249_s19  ;;  %8120 = vrot.lane.b32.xlu1 %v14264_v38, %s10249_s19  ;;  %v9783_v47 = vpack.c.bf16 %v7666_v51, %v7665_v8  ;;  %8296 = vst.msk [vmem:[#allocation3 + $0x390] sm:$0xff] %vm252_vm2, %v8264_v46  ;;  %8297 = vst.msk [vmem:[#allocation3 + $0x3b8] sm:$0xff] %vm252_vm2, %v8265_v56  ;;  %v8038_v25 = vld [vmem:[#allocation2 + $0x1b4] sm:$0xff]  ;;  %v15140_v8 = vpack.c.bf16 %v13851_v1, %v13845_v42  ;;  %v7476_v42 = vld [vmem:[#allocation2 + $0x28] sm:$0xff] }
 0x6d9   : > { %v7788_v46 = vld [vmem:[#allocation2 + $0x1a8] sm:$0xff] }
 0x6da   : > { %v7574_v52 = vpop.permute.xlu0 %7573  ;;  %v7332_v27 = vpop.permute.xlu1 %7331  ;;  %9784 = vmatprep.subr.bf16.mxu0 %v9783_v47 }
 0x6db   : > { %v7667_v63 = vsel %vm252_vm2, %v13860_v41, %v7574_v52  ;;  %v14275_v28 = vsel %vm252_vm2, %v13928_v20, %v7332_v27  ;;  %9786 = vmatpush1.bf16.xpose.msra.mxu0 %v15140_v8  ;;  %v14290_v27 = vld [vmem:[#allocation2 + $0x1a0] sm:$0xff] }
 0x6dc   : > { %8136 = vrot.lane.b32.xlu1 %v8045_v12, %s10249_s19  ;;  %8122 = vrot.lane.b32.xlu0 %v8038_v25, %s10249_s19  ;;  %v8039_v52 = vld [vmem:[#allocation2 + $0x1bc] sm:$0xff] }
 0x6de   : > { %v7334_v19 = vpop.permute.xlu0 %7333  ;;  %v7832_v57 = vpop.permute.xlu1 %7831 }
 0x6df   : > { %v14284_v56 = vsel %vm252_vm2, %v13939_v49, %v7334_v19  ;;  %v14288_v41 = vsel %vm252_vm2, %v13965_v34, %v7832_v57  ;;  %v8040_v34 = vld [vmem:[#allocation2 + $0x1cc] sm:$0xff] }
 0x6e0   : > { %7877 = vrot.lane.b32.xlu0 %v14290_v27, %s10249_s19  ;;  %8124 = vrot.lane.b32.xlu1 %v8039_v52, %s10249_s19  ;;  %v8041_v52 = vld [vmem:[#allocation2 + $0x1d4] sm:$0xff] }
 0x6e2   : > { %v7830_v1 = vpop.permute.xlu0 %7829  ;;  %v7576_v51 = vpop.permute.xlu1 %7575 }
 0x6e3   : > { %v14297_v47 = vsel %vm252_vm2, %v13948_v22, %v7830_v1  ;;  %v7668_v49 = vsel %vm252_vm2, %v7476_v42, %v7576_v51  ;;  %v14308_v22 = vld [vmem:[#allocation2 + $0xf0] sm:$0xff]  ;;  %v15141_v42 = vpack.c.bf16 %v13864_v37, %v13854_v36  ;;  %v7734_v51 = vld [vmem:[#allocation2 + $0x9c] sm:$0xff] }
 0x6e4   : > { %7879 = vrot.lane.b32.xlu1 %v7788_v46, %s10249_s19  ;;  %8126 = vrot.lane.b32.xlu0 %v8040_v34, %s10249_s19  ;;  %v9787_v12 = vpack.c.bf16 %v7668_v49, %v7667_v63  ;;  %v7733_v63 = vld [vmem:[#allocation2 + $0x94] sm:$0xff]  ;;  %v7478_v36 = vld [vmem:[#allocation2 + $0x40] sm:$0xff] }
 0x6e5   : > { %v8046_v37 = vld [vmem:[#allocation2 + $0x214] sm:$0xff] }
 0x6e6   : > { %v7578_v25 = vpop.permute.xlu0 %7577  ;;  %v7336_v8 = vpop.permute.xlu1 %7335  ;;  %9788 = vmatprep.subr.bf16.mxu0 %v9787_v12 }
 0x6e7   : > { %v7669_v19 = vsel %vm252_vm2, %v13870_v24, %v7578_v25  ;;  %v14306_v57 = vsel %vm252_vm2, %v13956_v15, %v7336_v8  ;;  %9790 = vmatpush1.bf16.xpose.msra.mxu0 %v15141_v42  ;;  %v8047_v42 = vld [vmem:[#allocation2 + $0x21c] sm:$0xff] }
 0x6e8   : > { %7593 = vrot.lane.b32.xlu0 %v14308_v22, %s10249_s19  ;;  %8128 = vrot.lane.b32.xlu1 %v8041_v52, %s10249_s19 }
 0x6ea   : > { %v7834_v1 = vpop.permute.xlu0 %7833  ;;  %v7836_v24 = vpop.permute.xlu1 %7835 }
 0x6eb   : > { %v14317_v49 = vsel %vm252_vm2, %v7733_v63, %v7834_v1  ;;  %v14320_v46 = vsel %vm252_vm2, %v7734_v51, %v7836_v24  ;;  %v7735_v1 = vld [vmem:[#allocation2 + $0xac] sm:$0xff]  ;;  %v7736_v24 = vld [vmem:[#allocation2 + $0xb4] sm:$0xff] }
 0x6ec   : > { %7337 = vrot.lane.b32.xlu0 %v7733_v63, %s10249_s19  ;;  %7595 = vrot.lane.b32.xlu1 %v14086_v17, %s10249_s19 }
 0x6ee   : > { %v7582_v34 = vpop.permute.xlu0 %7581  ;;  %v7580_v12 = vpop.permute.xlu1 %7579 }
 0x6ef   : > { %v7671_v25 = vsel %vm252_vm2, %v13891_v14, %v7582_v34  ;;  %v7670_v8 = vsel %vm252_vm2, %v7478_v36, %v7580_v12  ;;  %v14336_v14 = vld [vmem:[#allocation2 + $0x1b8] sm:$0xff]  ;;  %v15142_v36 = vpack.c.bf16 %v13880_v13, %v13873_v30  ;;  %v14347_v12 = vld [vmem:[#allocation2 + $0x108] sm:$0xff] }
 0x6f0   : > { %8138 = vrot.lane.b32.xlu0 %v8046_v37, %s10249_s19  ;;  %7339 = vrot.lane.b32.xlu1 %v7734_v51, %s10249_s19  ;;  %v9791_v52 = vpack.c.bf16 %v7670_v8, %v7669_v19  ;;  %v7480_v19 = vld [vmem:[#allocation2 + $0x58] sm:$0xff]  ;;  %v7790_v8 = vld [vmem:[#allocation2 + $0x1c0] sm:$0xff] }
 0x6f2   : > { %v7838_v63 = vpop.permute.xlu0 %7837  ;;  %v7840_v38 = vpop.permute.xlu1 %7839  ;;  %9792 = vmatprep.subr.bf16.mxu0 %v9791_v52 }
 0x6f3   : > { %v14331_v39 = vsel %vm252_vm2, %v7735_v1, %v7838_v63  ;;  %v14334_v32 = vsel %vm252_vm2, %v7736_v24, %v7840_v38  ;;  %9794 = vmatpush1.bf16.xpose.msra.mxu0 %v15142_v36  ;;  %v15143_v63 = vpack.c.bf16 %v13896_v35, %v13876_v58  ;;  %v8049_v35 = vld [vmem:[#allocation2 + $0x234] sm:$0xff] }
 0x6f4   : > { %7881 = vrot.lane.b32.xlu0 %v14336_v14, %s10249_s19  ;;  %8140 = vrot.lane.b32.xlu1 %v8047_v42, %s10249_s19 }
 0x6f6   : > { %v8083_v51 = vpop.permute.xlu0 %8082  ;;  %v7584_v37 = vpop.permute.xlu1 %7583 }
 0x6f7   : > { %v8178_v34 = vsel %vm252_vm2, %v14004_v7, %v8083_v51  ;;  %v7672_v38 = vsel %vm252_vm2, %v7480_v19, %v7584_v37  ;;  %v9849_v19 = vpack.c.bf16 %v14250_v29, %v14261_v50 }
 0x6f8   : > { %7597 = vrot.lane.b32.xlu0 %v14347_v12, %s10249_s19  ;;  %7883 = vrot.lane.b32.xlu1 %v7790_v8, %s10249_s19  ;;  %v9795_v30 = vpack.c.bf16 %v7672_v38, %v7671_v25  ;;  %v8048_v25 = vld [vmem:[#allocation2 + $0x22c] sm:$0xff] }
 0x6fa   : > { %v7586_v13 = vpop.permute.xlu0 %7585  ;;  %v8085_v52 = vpop.permute.xlu1 %8084  ;;  %9796 = vmatprep.subr.bf16.mxu0 %v9795_v30 }
 0x6fb   : > { %v7673_v42 = vsel %vm252_vm2, %v13928_v20, %v7586_v13  ;;  %v8179_v7 = vsel %vm252_vm2, %v14023_v40, %v8085_v52  ;;  %9798 = vmatpush1.bf16.xpose.msra.mxu0 %v15143_v63  ;;  %v7792_v13 = vld [vmem:[#allocation2 + $0x1d8] sm:$0xff]  ;;  %v7521_v52 = vld [vmem:[#allocation2 + $0x120] sm:$0xff] }
 0x6fc   : > { %7341 = vrot.lane.b32.xlu0 %v7735_v1, %s10249_s19  ;;  %7599 = vrot.lane.b32.xlu1 %v14113_v16, %s10249_s19  ;;  %v9847_v36 = vpack.c.bf16 %v8179_v7, %v8178_v34  ;;  %v14378_v34 = vld [vmem:[#allocation2 + $0x1d0] sm:$0xff] }
 0x6fe   : > { %v7842_v51 = vpop.permute.xlu0 %7841  ;;  %v7844_v37 = vpop.permute.xlu1 %7843  ;;  %9848 = vmatprep.subr.bf16.mxu1 %v9847_v36 }
 0x6ff   : > { %v14366_v20 = vsel %vm252_vm2, %v13996_v5, %v7842_v51  ;;  %v14370_v58 = vsel %vm252_vm2, %v14006_v26, %v7844_v37  ;;  %9850 = vmatpush1.bf16.xpose.msra.mxu1 %v9849_v19  ;;  %v7523_v51 = vld [vmem:[#allocation2 + $0x138] sm:$0xff] }
 0x700   : > { %8142 = vrot.lane.b32.xlu0 %v8048_v25, %s10249_s19  ;;  %7343 = vrot.lane.b32.xlu1 %v7736_v24, %s10249_s19  ;;  %v9801_v24 = vpack.c.bf16 %v14275_v28, %v14246_v44  ;;  %v8309_v44 = vld [vmem:[%s14883_s3 + $0x18] sm:$0xff]  ;;  %v9853_v28 = vpack.c.bf16 %v14288_v41, %v14297_v47  ;;  %v7484_v47 = vld [vmem:[#allocation2 + $0x88] sm:$0xff] }
 0x701   : > { %8851 = vmatprep.mubr.f32.mxu1 %v8309_v44 }
 0x702   : > { %v8087_v40 = vpop.permute.xlu0 %8086  ;;  %v7588_v1 = vpop.permute.xlu1 %7587 }
 0x703   : > { %v8180_v29 = vsel %vm252_vm2, %v14048_v61, %v8087_v40  ;;  %v7674_v50 = vsel %vm252_vm2, %v13919_v10, %v7588_v1 }
 0x704   : > { %8144 = vrot.lane.b32.xlu1 %v8049_v35, %s10249_s19  ;;  %7885 = vrot.lane.b32.xlu0 %v14378_v34, %s10249_s19  ;;  %v9799_v38 = vpack.c.bf16 %v7674_v50, %v7673_v42  ;;  %v9805_v35 = vpack.c.bf16 %v14306_v57, %v14284_v56  ;;  %v9857_v56 = vpack.c.bf16 %v14320_v46, %v14317_v49 }
 0x706   : > { %v7590_v8 = vpop.permute.xlu0 %7589  ;;  %v8089_v30 = vpop.permute.xlu1 %8088  ;;  %9800 = vmatprep.subr.bf16.mxu0 %v9799_v38  ;;  %v7525_v38 = vld [vmem:[#allocation2 + $0x150] sm:$0xff] }
 0x707   : > { %v7675_v61 = vsel %vm252_vm2, %v13956_v15, %v7590_v8  ;;  %v8181_v10 = vsel %vm252_vm2, %v14059_v53, %v8089_v30  ;;  %9802 = vmatpush1.bf16.xpose.msra.mxu0 %v9801_v24  ;;  %v9861_v8 = vpack.c.bf16 %v14334_v32, %v14331_v39 }
 0x708   : > { %7887 = vrot.lane.b32.xlu1 %v7792_v13, %s10249_s19  ;;  %7601 = vrot.lane.b32.xlu0 %v7521_v52, %s10249_s19  ;;  %v9851_v42 = vpack.c.bf16 %v8181_v10, %v8180_v29 }
 0x70a   : > { %v7846_v15 = vpop.permute.xlu0 %7845  ;;  %v7848_v7 = vpop.permute.xlu1 %7847  ;;  %9852 = vmatprep.subr.bf16.mxu1 %v9851_v42  ;;  %v9865_v42 = vpack.c.bf16 %v14370_v58, %v14366_v20 }
 0x70b   : > { %v14398_v53 = vsel %vm252_vm2, %v14031_v31, %v7846_v15  ;;  %v14402_v63 = vsel %vm252_vm2, %v14050_v54, %v7848_v7  ;;  %9854 = vmatpush1.bf16.xpose.msra.mxu1 %v9853_v28 }
 0x70c   : > { %7603 = vrot.lane.b32.xlu1 %v14140_v6, %s10249_s19  ;;  %7345 = vrot.lane.b32.xlu0 %v13996_v5, %s10249_s19 }
 0x70e   : > { %v8091_v41 = vpop.permute.xlu0 %8090  ;;  %v7592_v36 = vpop.permute.xlu1 %7591 }
 0x70f   : > { %v8182_v25 = vsel %vm252_vm2, %v14308_v22, %v8091_v41  ;;  %v7676_v19 = vsel %vm252_vm2, %v7484_v47, %v7592_v36  ;;  %v9869_v47 = vpack.c.bf16 %v14402_v63, %v14398_v53 }
 0x710   : > { %7605 = vrot.lane.b32.xlu0 %v7523_v51, %s10249_s19  ;;  %7347 = vrot.lane.b32.xlu1 %v14006_v26, %s10249_s19  ;;  %v9803_v37 = vpack.c.bf16 %v7676_v19, %v7675_v61 }
 0x712   : > { %v7850_v40 = vpop.permute.xlu0 %7849  ;;  %v8093_v5 = vpop.permute.xlu1 %8092  ;;  %9804 = vmatprep.subr.bf16.mxu0 %v9803_v37 }
 0x713   : > { %v14418_v1 = vsel %vm252_vm2, %v14075_v59, %v7850_v40  ;;  %v8183_v22 = vsel %vm252_vm2, %v14086_v17, %v8093_v5  ;;  %9806 = vmatpush1.bf16.xpose.msra.mxu0 %v9805_v35 }
 0x714   : > { %7349 = vrot.lane.b32.xlu0 %v14031_v31, %s10249_s19  ;;  %7607 = vrot.lane.b32.xlu1 %v14167_v43, %s10249_s19  ;;  %v9855_v26 = vpack.c.bf16 %v8183_v22, %v8182_v25 }
 0x716   : > { %v8095_v57 = vpop.permute.xlu0 %8094  ;;  %v7852_v29 = vpop.permute.xlu1 %7851  ;;  %9856 = vmatprep.subr.bf16.mxu1 %v9855_v26 }
 0x717   : > { %v8184_v50 = vsel %vm252_vm2, %v14347_v12, %v8095_v57  ;;  %v14432_v17 = vsel %vm252_vm2, %v14084_v11, %v7852_v29  ;;  %9858 = vmatpush1.bf16.xpose.msra.mxu1 %v9857_v56 }
 0x718   : > { %7609 = vrot.lane.b32.xlu0 %v7525_v38, %s10249_s19  ;;  %7351 = vrot.lane.b32.xlu1 %v14050_v54, %s10249_s19  ;;  %v9873_v35 = vpack.c.bf16 %v14432_v17, %v14418_v1 }
 0x71a   : > { %v7854_v31 = vpop.permute.xlu0 %7853  ;;  %v8097_v24 = vpop.permute.xlu1 %8096 }
 0x71b   : > { %v14439_v49 = vsel %vm252_vm2, %v14103_v23, %v7854_v31  ;;  %v8185_v46 = vsel %vm252_vm2, %v14113_v16, %v8097_v24  ;;  %v7527_v16 = vld [vmem:[#allocation2 + $0x168] sm:$0xff] }
 0x71c   : > { %7353 = vrot.lane.b32.xlu0 %v14075_v59, %s10249_s19  ;;  %7611 = vrot.lane.b32.xlu1 %v14194_v4, %s10249_s19  ;;  %v9859_v12 = vpack.c.bf16 %v8185_v46, %v8184_v50 }
 0x71e   : > { %v8099_v54 = vpop.permute.xlu0 %8098  ;;  %v7856_v30 = vpop.permute.xlu1 %7855  ;;  %9860 = vmatprep.subr.bf16.mxu1 %v9859_v12 }
 0x71f   : > { %v8186_v61 = vsel %vm252_vm2, %v7521_v52, %v8099_v54  ;;  %v14452_v10 = vsel %vm252_vm2, %v14111_v33, %v7856_v30  ;;  %9862 = vmatpush1.bf16.xpose.msra.mxu1 %v9861_v8  ;;  %v15144_v54 = vld [vmem:[#allocation41_spill] sm:$0xff] }
 0x720   : > { %7613 = vrot.lane.b32.xlu0 %v7527_v16, %s10249_s19  ;;  %7355 = vrot.lane.b32.xlu1 %v14084_v11, %s10249_s19  ;;  %v9877_v29 = vpack.c.bf16 %v14452_v10, %v14439_v49  ;;  %v8508_v10 = vld [vmem:[%s14885_s5 + $0x10] sm:$0xff] }
 0x722   : > { %v7858_v59 = vpop.permute.xlu0 %7857  ;;  %v8101_v13 = vpop.permute.xlu1 %8100 }
 0x723   : > { %v14459_v32 = vsel %vm252_vm2, %v14130_v18, %v7858_v59  ;;  %v8187_v39 = vsel %vm252_vm2, %v14140_v6, %v8101_v13  ;;  %v7529_v6 = vld [vmem:[#allocation2 + $0x180] sm:$0xff] }
 0x724   : > { %7357 = vrot.lane.b32.xlu0 %v14103_v23, %s10249_s19  ;;  %7615 = vrot.lane.b32.xlu1 %v14215_v0, %s10249_s19  ;;  %v9863_v52 = vpack.c.bf16 %v8187_v39, %v8186_v61  ;;  %v8012_v61 = vld [vmem:[#allocation2 + $0x1f8] sm:$0xff] }
 0x726   : > { %v8103_v11 = vpop.permute.xlu0 %8102  ;;  %v7860_v44 = vpop.permute.xlu1 %7859  ;;  %9864 = vmatprep.subr.bf16.mxu1 %v9863_v52 }
 0x727   : > { %v8188_v28 = vsel %vm252_vm2, %v7523_v51, %v8103_v11  ;;  %v14472_v15 = vsel %vm252_vm2, %v14138_v21, %v7860_v44  ;;  %9866 = vmatpush1.bf16.xpose.msra.mxu1 %v9865_v42  ;;  %v8510_v42 = vld [vmem:[%s14885_s5 + $0x20] sm:$0xff]  ;;  %v8509_v11 = vld [vmem:[%s14885_s5 + $0x18] sm:$0xff] }
 0x728   : > { %7617 = vrot.lane.b32.xlu0 %v7529_v6, %s10249_s19  ;;  %7359 = vrot.lane.b32.xlu1 %v14111_v33, %s10249_s19  ;;  %v9881_v12 = vpack.c.bf16 %v14472_v15, %v14459_v32 }
 0x72a   : > { %v7862_v23 = vpop.permute.xlu0 %7861  ;;  %v8105_v7 = vpop.permute.xlu1 %8104 }
 0x72b   : > { %v14479_v20 = vsel %vm252_vm2, %v14157_v9, %v7862_v23  ;;  %v8189_v58 = vsel %vm252_vm2, %v14167_v43, %v8105_v7  ;;  %v7531_v43 = vld [vmem:[#allocation2 + $0x198] sm:$0xff]  ;;  %v8512_v23 = vld [vmem:[%s14885_s5 + $0x30] sm:$0xff]  ;;  %v8511_v7 = vld [vmem:[%s14885_s5 + $0x28] sm:$0xff] }
 0x72c   : > { %7361 = vrot.lane.b32.xlu0 %v14130_v18, %s10249_s19  ;;  %7619 = vrot.lane.b32.xlu1 %v14237_v45, %s10249_s19  ;;  %v9867_v41 = vpack.c.bf16 %v8189_v58, %v8188_v28 }
 0x72e   : > { %v8107_v33 = vpop.permute.xlu0 %8106  ;;  %v7864_v36 = vpop.permute.xlu1 %7863  ;;  %9868 = vmatprep.subr.bf16.mxu1 %v9867_v41  ;;  %v15145_v41 = vld [vmem:[#allocation21_spill] sm:$0xff] }
 0x72f   : > { %v8190_v25 = vsel %vm252_vm2, %v7525_v38, %v8107_v33  ;;  %v14492_v19 = vsel %vm252_vm2, %v14165_v60, %v7864_v36  ;;  %9870 = vmatpush1.bf16.xpose.msra.mxu1 %v9869_v47 }
 0x730   : > { %7621 = vrot.lane.b32.xlu0 %v7531_v43, %s10249_s19  ;;  %7363 = vrot.lane.b32.xlu1 %v14138_v21, %s10249_s19  ;;  %v9885_v44 = vpack.c.bf16 %v14492_v19, %v14479_v20 }
 0x732   : > { %v7866_v18 = vpop.permute.xlu0 %7865  ;;  %v8109_v51 = vpop.permute.xlu1 %8108 }
 0x733   : > { %v14499_v53 = vsel %vm252_vm2, %v14184_v2, %v7866_v18  ;;  %v8191_v63 = vsel %vm252_vm2, %v14194_v4, %v8109_v51  ;;  %v7533_v4 = vld [vmem:[#allocation2 + $0x1b0] sm:$0xff] }
 0x734   : > { %7365 = vrot.lane.b32.xlu0 %v14157_v9, %s10249_s19  ;;  %7623 = vrot.lane.b32.xlu1 %v14290_v27, %s10249_s19  ;;  %v9871_v37 = vpack.c.bf16 %v8191_v63, %v8190_v25  ;;  %v8513_v25 = vld [vmem:[%s14885_s5 + $0x38] sm:$0xff]  ;;  %v15146_v63 = vld [vmem:[#allocation61_spill] sm:$0xff] }
 0x736   : > { %v8111_v21 = vpop.permute.xlu0 %8110  ;;  %v7868_v40 = vpop.permute.xlu1 %7867  ;;  %9872 = vmatprep.subr.bf16.mxu1 %v9871_v37 }
 0x737   : > { %v8192_v5 = vsel %vm252_vm2, %v7527_v16, %v8111_v21  ;;  %v14512_v22 = vsel %vm252_vm2, %v14192_v62, %v7868_v40  ;;  %9874 = vmatpush1.bf16.xpose.msra.mxu1 %v9873_v35  ;;  %v8507_v16 = vld [vmem:[%s14885_s5 + $0x8] sm:$0xff] }
 0x738   : > { %7625 = vrot.lane.b32.xlu0 %v7533_v4, %s10249_s19  ;;  %7367 = vrot.lane.b32.xlu1 %v14165_v60, %s10249_s19  ;;  %v9889_v19 = vpack.c.bf16 %v14512_v22, %v14499_v53  ;;  %v8474_v53 = vld [vmem:[#allocation3 + $0x400] sm:$0xff] }
 0x73a   : > { %v7870_v9 = vpop.permute.xlu0 %7869  ;;  %v8113_v26 = vpop.permute.xlu1 %8112 }
 0x73b   : > { %v14519_v1 = vsel %vm252_vm2, %v14205_v48, %v7870_v9  ;;  %v8193_v56 = vsel %vm252_vm2, %v14215_v0, %v8113_v26  ;;  %v7535_v0 = vld [vmem:[#allocation2 + $0x1c8] sm:$0xff]  ;;  %v7229_v26 = vld [vmem:[#allocation2 + $0x90] sm:$0xff] }
 0x73c   : > { %7369 = vrot.lane.b32.xlu0 %v14184_v2, %s10249_s19  ;;  %7627 = vrot.lane.b32.xlu1 %v14336_v14, %s10249_s19  ;;  %v9875_v57 = vpack.c.bf16 %v8193_v56, %v8192_v5 }
 0x73e   : > { %v8115_v60 = vpop.permute.xlu0 %8114  ;;  %v7872_v50 = vpop.permute.xlu1 %7871  ;;  %9876 = vmatprep.subr.bf16.mxu1 %v9875_v57  ;;  %v7486_v57 = vld [vmem:[#allocation2 + $0xa0] sm:$0xff] }
 0x73f   : > { %v8194_v17 = vsel %vm252_vm2, %v7529_v6, %v8115_v60  ;;  %v14532_v38 = vsel %vm252_vm2, %v14213_v3, %v7872_v50  ;;  %9878 = vmatpush1.bf16.xpose.msra.mxu1 %v9877_v29 }
 0x740   : > { %7629 = vrot.lane.b32.xlu0 %v7535_v0, %s10249_s19  ;;  %7371 = vrot.lane.b32.xlu1 %v14192_v62, %s10249_s19  ;;  %v8506_v62 = vld [vmem:[%s14885_s5] sm:$0xff]  ;;  %v9893_v9 = vpack.c.bf16 %v14532_v38, %v14519_v1  ;;  %v8015_v38 = vld [vmem:[#allocation2 + $0x218] sm:$0xff] }
 0x742   : > { %v7874_v2 = vpop.permute.xlu0 %7873  ;;  %v8117_v31 = vpop.permute.xlu1 %8116 }
 0x743   : > { %v14539_v24 = vsel %vm252_vm2, %v14226_v55, %v7874_v2  ;;  %v8195_v49 = vsel %vm252_vm2, %v14237_v45, %v8117_v31  ;;  %v8307_v45 = vld [vmem:[%s14883_s3 + $0x8] sm:$0xff] }
 0x744   : > { %7373 = vrot.lane.b32.xlu0 %v14205_v48, %s10249_s19  ;;  %7631 = vrot.lane.b32.xlu1 %v14378_v34, %s10249_s19  ;;  %v9879_v46 = vpack.c.bf16 %v8195_v49, %v8194_v17 }
 0x745   : > { %8738 = vmatprep.mubr.f32.mxu0 %v8307_v45 }
 0x746   : > { %v8119_v8 = vpop.permute.xlu0 %8118  ;;  %v7876_v55 = vpop.permute.xlu1 %7875  ;;  %9880 = vmatprep.subr.bf16.mxu1 %v9879_v46 }
 0x747   : > { %v8196_v48 = vsel %vm252_vm2, %v7531_v43, %v8119_v8  ;;  %v14558_v30 = vsel %vm252_vm2, %v15144_v54, %v7876_v55  ;;  %9882 = vmatpush1.bf16.xpose.msra.mxu1 %v9881_v12  ;;  %v7757_v12 = vld [vmem:[#allocation2 + $0x1b4] sm:$0xff] }
 0x748   : > { %8516 = vperm.xlu0 %10211, %v8506_v62   ;;  %7375 = vrot.lane.b32.xlu1 %v14213_v3, %s10249_s19  ;;  %v8013_v3 = vld [vmem:[#allocation2 + $0x200] sm:$0xff]  ;;  %v9897_v62 = vpack.c.bf16 %v14558_v30, %v14539_v24 }
 0x74a   : > { %v8135_v59 = vpop.permute.xlu0 %8134  ;;  %v8121_v13 = vpop.permute.xlu1 %8120 }
 0x74b   : > { %v14569_v32 = vsel %vm252_vm2, %v8012_v61, %v8135_v59  ;;  %v8197_v39 = vsel %vm252_vm2, %v14290_v27, %v8121_v13  ;;  %v7487_v61 = vld [vmem:[#allocation2 + $0xb0] sm:$0xff] }
 0x74c   : > { %8526 = vperm.xlu0 %10211, %v8508_v10   ;;  %8521 = vperm.xlu1 %10212, %v8507_v16   ;;  %v9883_v52 = vpack.c.bf16 %v8197_v39, %v8196_v48  ;;  %v7758_v16 = vld [vmem:[#allocation2 + $0x1bc] sm:$0xff]  ;;  %v7231_v39 = vld [vmem:[#allocation2 + $0xa8] sm:$0xff] }
 0x74e   : > { %v8123_v28 = vpop.permute.xlu0 %8122  ;;  %v8137_v15 = vpop.permute.xlu1 %8136  ;;  %9884 = vmatprep.subr.bf16.mxu1 %v9883_v52  ;;  %v7488_v52 = vld [vmem:[#allocation2 + $0xb8] sm:$0xff] }
 0x74f   : > { %v8198_v27 = vsel %vm252_vm2, %v7533_v4, %v8123_v28  ;;  %v8205_v6 = vsel %vm252_vm2, %v8013_v3, %v8137_v15  ;;  %9886 = vmatpush1.bf16.xpose.msra.mxu1 %v9885_v44  ;;  %v8469_v4 = vld [vmem:[#allocation3 + $0x3d8] sm:$0xff]  ;;  %v8016_v28 = vld [vmem:[#allocation2 + $0x228] sm:$0xff] }
 0x750   : > { %8536 = vperm.xlu0 %10211, %v8510_v42   ;;  %8531 = vperm.xlu1 %10212, %v8509_v11   ;;  %v9895_v60 = vpack.c.bf16 %v8474_v53, %v8469_v4  ;;  %v9899_v45 = vpack.c.bf16 %v8205_v6, %v14569_v32  ;;  %v7233_v53 = vld [vmem:[#allocation2 + $0xc0] sm:$0xff]  ;;  %v8311_v4 = vld [vmem:[%s14883_s3 + $0x28] sm:$0xff] }
 0x752   : > { %v7878_v58 = vpop.permute.xlu0 %7877  ;;  %v8125_v20 = vpop.permute.xlu1 %8124 }
 0x753   : > { %v14591_v47 = vsel %vm252_vm2, %v15145_v41, %v7878_v58  ;;  %v8199_v33 = vsel %vm252_vm2, %v14336_v14, %v8125_v20  ;;  %v7485_v14 = vld [vmem:[#allocation2 + $0x98] sm:$0xff]  ;;  %v8017_v58 = vld [vmem:[#allocation2 + $0x230] sm:$0xff] }
 0x754   : > { %8546 = vperm.xlu0 %10211, %v8512_v23   ;;  %8541 = vperm.xlu1 %10212, %v8511_v7   ;;  %v9887_v36 = vpack.c.bf16 %v8199_v33, %v8198_v27 }
 0x756   : > { %v8127_v43 = vpop.permute.xlu0 %8126  ;;  %v7880_v18 = vpop.permute.xlu1 %7879  ;;  %9888 = vmatprep.subr.bf16.mxu1 %v9887_v36 }
 0x757   : > { %v8200_v51 = vsel %vm252_vm2, %v7535_v0, %v8127_v43  ;;  %v7948_v37 = vsel %vm252_vm2, %v15146_v63, %v7880_v18  ;;  %9890 = vmatpush1.bf16.xpose.msra.mxu1 %v9889_v19  ;;  %v8014_v0 = vld [vmem:[#allocation2 + $0x210] sm:$0xff] }
 0x758   : > { %8551 = vperm.xlu1 %10212, %v8513_v25   ;;  %v9901_v30 = vpack.c.bf16 %v7948_v37, %v14591_v47  ;;  %v7759_v47 = vld [vmem:[#allocation2 + $0x1cc] sm:$0xff] }
 0x759   : > { %v15147_v37 = vld [vmem:[#allocation37_spill] sm:$0xff] }
 0x75a   : > { %v7594_v35 = vpop.permute.xlu0 %7593  ;;  %v8129_v21 = vpop.permute.xlu1 %8128 }
 0x75b   : > { %v7677_v40 = vsel %vm252_vm2, %v7485_v14, %v7594_v35  ;;  %v8201_v5 = vsel %vm252_vm2, %v14378_v34, %v8129_v21  ;;  %v8430_v21 = vld [vmem:[#allocation3 + $0x2a0] sm:$0xff] }
 0x75c   : > { %v9891_v22 = vpack.c.bf16 %v8201_v5, %v8200_v51  ;;  %v7760_v51 = vld [vmem:[#allocation2 + $0x1d4] sm:$0xff] }
 0x75e   : > { %v7338_v56 = vpop.permute.xlu0 %7337  ;;  %v7596_v29 = vpop.permute.xlu1 %7595  ;;  %9892 = vmatprep.subr.bf16.mxu1 %v9891_v22 }
 0x75f   : > { %v7421_v50 = vsel %vm252_vm2, %v7229_v26, %v7338_v56  ;;  %v7678_v17 = vsel %vm252_vm2, %v7486_v57, %v7596_v29  ;;  %9894 = vmatpush1.bf16.xpose.msra.mxu1 %v9893_v9  ;;  %v15150_v57 = vld [vmem:[#allocation17_spill] sm:$0xff] }
 0x760   : > { %9896 = vmatprep.subr.bf16.mxu1 %v9895_v60  ;;  %v9807_v34 = vpack.c.bf16 %v7678_v17, %v7677_v40  ;;  %v8435_v40 = vld [vmem:[#allocation3 + $0x2c8] sm:$0xff] }
 0x761   : > { %v9911_v26 = vpack.c.bf16 %v8435_v40, %v8430_v21  ;;  %v8460_v40 = vld [vmem:[#allocation3 + $0x390] sm:$0xff] }
 0x762   : > { %v8139_v2 = vpop.permute.xlu0 %8138  ;;  %v7340_v31 = vpop.permute.xlu1 %7339  ;;  %9808 = vmatprep.subr.bf16.mxu0 %v9807_v34  ;;  %v8355_v34 = vld [vmem:[#allocation3 + $0x48] sm:$0xff] }
 0x763   : > { %v8206_v49 = vsel %vm252_vm2, %v8014_v0, %v8139_v2  ;;  %v7422_v1 = vsel %vm252_vm2, %v7485_v14, %v7340_v31  ;;  %v8350_v0 = vld [vmem:[#allocation3 + $0x20] sm:$0xff]  ;;  %v15151_v2 = vld [vmem:[#allocation57_spill] sm:$0xff] }
 0x764   : > { %v9809_v46 = vpack.c.bf16 %v7422_v1, %v7421_v50  ;;  %v8308_v1 = vld [vmem:[%s14883_s3 + $0x10] sm:$0xff] }
 0x766   : > { %v7882_v8 = vpop.permute.xlu0 %7881  ;;  %v8141_v55 = vpop.permute.xlu1 %8140  ;;  %9810 = vmatpush1.bf16.xpose.msra.mxu0 %v9809_v46  ;;  %v8445_v46 = vld [vmem:[#allocation3 + $0x318] sm:$0xff] }
 0x767   : > { %v7949_v48 = vsel %vm252_vm2, %v7757_v12, %v7882_v8  ;;  %v8207_v54 = vsel %vm252_vm2, %v8015_v38, %v8141_v55  ;;  %9898 = vmatpush1.bf16.xpose.msra.mxu1 %v9897_v62  ;;  %v8440_v38 = vld [vmem:[#allocation3 + $0x2f0] sm:$0xff]  ;;  %v8314_v12 = vld [vmem:[%s14883_s3 + $0x40] sm:$0xff]  ;;  %v9914_v8 = vpack.c.bf16 %v8355_v34, %v8350_v0  ;;  %v7235_v55 = vld [vmem:[#allocation2 + $0xd8] sm:$0xff] }
 0x768   : > { %9900 = vmatprep.subr.bf16.mxu1 %v9899_v45  ;;  %v9903_v42 = vpack.c.bf16 %v8207_v54, %v8206_v49  ;;  %v9917_v54 = vpack.c.bf16 %v8445_v46, %v8440_v38  ;;  %v8333_v34 = vld [vmem:[%s14883_s3 + $0xd8] sm:$0xff] }
 0x76a   : > { %v7598_v10 = vpop.permute.xlu0 %7597  ;;  %v7884_v59 = vpop.permute.xlu1 %7883 }
 0x76b   : > { %v7679_v13 = vsel %vm252_vm2, %v7487_v61, %v7598_v10  ;;  %v7950_v24 = vsel %vm252_vm2, %v7758_v16, %v7884_v59  ;;  %v15152_v10 = vld [vmem:[#allocation77_spill] sm:$0xff]  ;;  %v8313_v59 = vld [vmem:[%s14883_s3 + $0x38] sm:$0xff] }
 0x76c   : > { %v9905_v41 = vpack.c.bf16 %v7950_v24, %v7949_v48  ;;  %v8319_v24 = vld [vmem:[%s14883_s3 + $0x68] sm:$0xff] }
 0x76e   : > { %v7342_v3 = vpop.permute.xlu0 %7341  ;;  %v7600_v32 = vpop.permute.xlu1 %7599 }
 0x76f   : > { %v7423_v11 = vsel %vm252_vm2, %v7231_v39, %v7342_v3  ;;  %v7680_v44 = vsel %vm252_vm2, %v7488_v52, %v7600_v32  ;;  %9902 = vmatpush1.bf16.xpose.msra.mxu1 %v9901_v30  ;;  %v8360_v3 = vld [vmem:[#allocation3 + $0x70] sm:$0xff]  ;;  %v8365_v52 = vld [vmem:[#allocation3 + $0x98] sm:$0xff]  ;;  %v15153_v32 = vld [vmem:[#allocation36_spill] sm:$0xff] }
 0x770   : > { %9904 = vmatprep.subr.bf16.mxu1 %v9903_v42  ;;  %v9811_v15 = vpack.c.bf16 %v7680_v44, %v7679_v13  ;;  %v8450_v44 = vld [vmem:[#allocation3 + $0x340] sm:$0xff] }
 0x772   : > { %v8143_v27 = vpop.permute.xlu0 %8142  ;;  %v7344_v6 = vpop.permute.xlu1 %7343  ;;  %9812 = vmatprep.subr.bf16.mxu0 %v9811_v15  ;;  %v8318_v15 = vld [vmem:[%s14883_s3 + $0x60] sm:$0xff] }
 0x773   : > { %v8208_v23 = vsel %vm252_vm2, %v8016_v28, %v8143_v27  ;;  %v7424_v7 = vsel %vm252_vm2, %v7487_v61, %v7344_v6  ;;  %v8455_v28 = vld [vmem:[#allocation3 + $0x368] sm:$0xff]  ;;  %v8324_v6 = vld [vmem:[%s14883_s3 + $0x90] sm:$0xff] }
 0x774   : > { %v9813_v20 = vpack.c.bf16 %v7424_v7, %v7423_v11  ;;  %v7237_v7 = vld [vmem:[#allocation2 + $0xf0] sm:$0xff] }
 0x776   : > { %v7886_v33 = vpop.permute.xlu0 %7885  ;;  %v8145_v36 = vpop.permute.xlu1 %8144  ;;  %9814 = vmatpush1.bf16.xpose.msra.mxu0 %v9813_v20 }
 0x777   : > { %v7951_v25 = vsel %vm252_vm2, %v7759_v47, %v7886_v33  ;;  %v8209_v19 = vsel %vm252_vm2, %v8017_v58, %v8145_v36  ;;  %9906 = vmatpush1.bf16.xpose.msra.mxu1 %v9905_v41  ;;  %v9923_v41 = vpack.c.bf16 %v8455_v28, %v8450_v44  ;;  %v15154_v33 = vld [vmem:[#allocation16_spill] sm:$0xff]  ;;  %v8485_v44 = vld [vmem:[#allocation3 + $0x458] sm:$0xff] }
 0x778   : > { %v9907_v43 = vpack.c.bf16 %v8209_v19, %v8208_v23  ;;  %v9920_v23 = vpack.c.bf16 %v8365_v52, %v8360_v3  ;;  %v8343_v52 = vld [vmem:[%s14883_s3 + $0x128] sm:$0xff] }
 0x77a   : > { %v7602_v18 = vpop.permute.xlu0 %7601  ;;  %v7888_v63 = vpop.permute.xlu1 %7887  ;;  %9908 = vmatprep.subr.bf16.mxu1 %v9907_v43  ;;  %v8329_v43 = vld [vmem:[%s14883_s3 + $0xb8] sm:$0xff] }
 0x77b   : > { %v7681_v14 = vsel %vm252_vm2, %v15147_v37, %v7602_v18  ;;  %v7952_v35 = vsel %vm252_vm2, %v7760_v51, %v7888_v63  ;;  %v8370_v63 = vld [vmem:[#allocation3 + $0xc0] sm:$0xff] }
 0x77c   : > { %v9909_v5 = vpack.c.bf16 %v7952_v35, %v7951_v25  ;;  %v8323_v25 = vld [vmem:[%s14883_s3 + $0x88] sm:$0xff] }
 0x77e   : > { %v7346_v22 = vpop.permute.xlu0 %7345  ;;  %v7604_v9 = vpop.permute.xlu1 %7603 }
 0x77f   : > { %v7425_v56 = vsel %vm252_vm2, %v7233_v53, %v7346_v22  ;;  %v7682_v29 = vsel %vm252_vm2, %v15150_v57, %v7604_v9  ;;  %9910 = vmatpush1.bf16.xpose.msra.mxu1 %v9909_v5  ;;  %v8465_v5 = vld [vmem:[#allocation3 + $0x3b8] sm:$0xff]  ;;  %v8328_v53 = vld [vmem:[%s14883_s3 + $0xb0] sm:$0xff]  ;;  %v8334_v9 = vld [vmem:[%s14883_s3 + $0xe0] sm:$0xff] }
 0x780   : > { %9913 = vmatprep.subr.msk.bf16.mxu1 %vm14631_vm4, %v9911_v26  ;;  %v9815_v60 = vpack.c.bf16 %v7682_v29, %v7681_v14  ;;  %v15155_v14 = vld [vmem:[#allocation56_spill] sm:$0xff] }
 0x782   : > { %v7606_v50 = vpop.permute.xlu0 %7605  ;;  %v7348_v17 = vpop.permute.xlu1 %7347  ;;  %9816 = vmatprep.subr.bf16.mxu0 %v9815_v60  ;;  %v9929_v60 = vpack.c.bf16 %v8465_v5, %v8460_v40  ;;  %v8405_v40 = vld [vmem:[#allocation3 + $0x1d8] sm:$0xff] }
 0x783   : > { %v7683_v31 = vsel %vm252_vm2, %v15151_v2, %v7606_v50  ;;  %v7426_v49 = vsel %vm252_vm2, %v15147_v37, %v7348_v17  ;;  %v8375_v37 = vld [vmem:[#allocation3 + $0xe8] sm:$0xff]  ;;  %v15161_v5 = vld [vmem:[#allocation38_spill] sm:$0xff] }
 0x784   : > { %v9817_v62 = vpack.c.bf16 %v7426_v49, %v7425_v56  ;;  %v9926_v26 = vpack.c.bf16 %v8375_v37, %v8370_v63  ;;  %v7239_v56 = vld [vmem:[#allocation2 + $0x108] sm:$0xff]  ;;  %v8470_v49 = vld [vmem:[#allocation3 + $0x3e0] sm:$0xff] }
 0x785   : > { %v15156_v17 = vld [vmem:[#allocation76_spill] sm:$0xff]  ;;  %v8490_v63 = vld [vmem:[#allocation3 + $0x480] sm:$0xff] }
 0x786   : > { %v7350_v45 = vpop.permute.xlu0 %7349  ;;  %v7608_v48 = vpop.permute.xlu1 %7607  ;;  %9818 = vmatpush1.bf16.xpose.msra.mxu0 %v9817_v62  ;;  %8852 = vmatmul.mubr.f32.vlgmr.msra.gmra.mrb[96].mxu1 %v8308_v1  ;;  %v8475_v1 = vld [vmem:[#allocation3 + $0x408] sm:$0xff]  ;;  %v8380_v62 = vld [vmem:[#allocation3 + $0x110] sm:$0xff] }
 0x787   : > { %v7427_v61 = vsel %vm252_vm2, %v7235_v55, %v7350_v45  ;;  %v7684_v16 = vsel %vm252_vm2, %v15152_v10, %v7608_v48  ;;  %9916 = vmatpush3.bf16.xpose.msk.msra.mxu1 %vm14631_vm4, %v9914_v8  ;;  %8857 = vmatprep.mubr.f32.mxu1 %v8314_v12  ;;  %v8385_v12 = vld [vmem:[#allocation3 + $0x138] sm:$0xff]  ;;  %v15157_v8 = vld [vmem:[#allocation39_spill] sm:$0xff]  ;;  %v8344_v10 = vld [vmem:[%s14883_s3 + $0x130] sm:$0xff] }
 0x788   : > { %9919 = vmatprep.subr.msk.bf16.mxu1 %vm14631_vm4, %v9917_v54  ;;  %v9819_v13 = vpack.c.bf16 %v7684_v16, %v7683_v31  ;;  %v8339_v31 = vld [vmem:[%s14883_s3 + $0x108] sm:$0xff]  ;;  %v8338_v48 = vld [vmem:[%s14883_s3 + $0x100] sm:$0xff]  ;;  %v9932_v16 = vpack.c.bf16 %v8385_v12, %v8380_v62  ;;  %v15163_v62 = vld [vmem:[#allocation58_spill] sm:$0xff] }
 0x789   : > { %v8495_v37 = vld [vmem:[#allocation3 + $0x4a8] sm:$0xff] }
 0x78a   : > { %v7610_v30 = vpop.permute.xlu0 %7609  ;;  %v7352_v39 = vpop.permute.xlu1 %7351  ;;  %9820 = vmatprep.subr.bf16.mxu0 %v9819_v13  ;;  %8858 = vmatmul.mubr.f32.gmra.mrb[98].mxu1 %v8313_v59  ;;  %v7241_v59 = vld [vmem:[#allocation2 + $0x120] sm:$0xff] }
 0x78b   : > { %v7685_v42 = vsel %vm252_vm2, %v15153_v32, %v7610_v30  ;;  %v7428_v11 = vsel %vm252_vm2, %v15151_v2, %v7352_v39  ;;  %8863 = vmatprep.mubr.f32.mxu1 %v8319_v24  ;;  %v15158_v39 = vld [vmem:[#allocation19_spill] sm:$0xff] }
 0x78c   : > { %v9821_v27 = vpack.c.bf16 %v7428_v11, %v7427_v61  ;;  %v9935_v61 = vpack.c.bf16 %v8475_v1, %v8470_v49  ;;  %v8480_v11 = vld [vmem:[#allocation3 + $0x430] sm:$0xff] }
 0x78e   : > { %v7354_v58 = vpop.permute.xlu0 %7353  ;;  %v7612_v20 = vpop.permute.xlu1 %7611  ;;  %9822 = vmatpush1.bf16.xpose.msra.mxu0 %v9821_v27  ;;  %8864 = vmatmul.mubr.f32.gmra.mrb[100].mxu1 %v8318_v15  ;;  %v8390_v27 = vld [vmem:[#allocation3 + $0x160] sm:$0xff] }
 0x78f   : > { %v7429_v47 = vsel %vm252_vm2, %v7237_v7, %v7354_v58  ;;  %v7686_v36 = vsel %vm252_vm2, %v15154_v33, %v7612_v20  ;;  %9922 = vmatpush3.bf16.xpose.msk.msra.mxu1 %vm14631_vm4, %v9920_v23  ;;  %8869 = vmatprep.mubr.f32.mxu1 %v8324_v6  ;;  %v8395_v6 = vld [vmem:[#allocation3 + $0x188] sm:$0xff]  ;;  %v15159_v23 = vld [vmem:[#allocation59_spill] sm:$0xff]  ;;  %v7243_v33 = vld [vmem:[#allocation2 + $0x138] sm:$0xff] }
 0x790   : > { %9925 = vmatprep.subr.msk.bf16.mxu1 %vm14631_vm4, %v9923_v41  ;;  %v9823_v19 = vpack.c.bf16 %v7686_v36, %v7685_v42  ;;  %v14732_v42 = vld [vmem:[%s14883_s3 + $0x20] sm:$0xff]  ;;  %v9941_v41 = vpack.c.bf16 %v8485_v44, %v8480_v11 }
 0x791   : > { %v8306_v44 = vld [vmem:[%s14883_s3] sm:$0xff] }
 0x792   : > { %v7614_v18 = vpop.permute.xlu0 %7613  ;;  %v7356_v51 = vpop.permute.xlu1 %7355  ;;  %9824 = vmatprep.subr.bf16.mxu0 %v9823_v19  ;;  %8870 = vmatmul.mubr.f32.gmra.mrb[102].mxu1 %v8323_v25 }
 0x793   : > { %v7687_v35 = vsel %vm252_vm2, %v15155_v14, %v7614_v18  ;;  %v7430_v21 = vsel %vm252_vm2, %v15153_v32, %v7356_v51  ;;  %8875 = vmatprep.mubr.f32.mxu1 %v8329_v43  ;;  %v15160_v43 = vld [vmem:[#allocation79_spill] sm:$0xff] }
 0x794   : > { %v9825_v22 = vpack.c.bf16 %v7430_v21, %v7429_v47  ;;  %v9938_v47 = vpack.c.bf16 %v8395_v6, %v8390_v27  ;;  %v8400_v21 = vld [vmem:[#allocation3 + $0x1b0] sm:$0xff]  ;;  %v8317_v27 = vld [vmem:[%s14883_s3 + $0x58] sm:$0xff] }
 0x795   : > { %v8320_v6 = vld [vmem:[%s14883_s3 + $0x70] sm:$0xff] }
 0x796   : > { %v7358_v57 = vpop.permute.xlu0 %7357  ;;  %v7616_v29 = vpop.permute.xlu1 %7615  ;;  %9826 = vmatpush1.bf16.xpose.msra.mxu0 %v9825_v22  ;;  %8876 = vmatmul.mubr.f32.gmra.mrb[104].mxu1 %v8328_v53 }
 0x797   : > { %v7431_v50 = vsel %vm252_vm2, %v7239_v56, %v7358_v57  ;;  %v7688_v0 = vsel %vm252_vm2, %v15156_v17, %v7616_v29  ;;  %9928 = vmatpush3.bf16.xpose.msk.msra.mxu1 %vm14631_vm4, %v9926_v26  ;;  %8881 = vmatprep.mubr.f32.mxu1 %v8334_v9  ;;  %v9947_v26 = vpack.c.bf16 %v8495_v37, %v8490_v63  ;;  %v7245_v57 = vld [vmem:[#allocation2 + $0x150] sm:$0xff]  ;;  %v15162_v17 = vld [vmem:[#allocation18_spill] sm:$0xff] }
 0x798   : > { %9931 = vmatprep.subr.msk.bf16.mxu1 %vm14631_vm4, %v9929_v60  ;;  %v9827_v2 = vpack.c.bf16 %v7688_v0, %v7687_v35  ;;  %v9944_v56 = vpack.c.bf16 %v8405_v40, %v8400_v21  ;;  %v8345_v63 = vld [vmem:[%s14883_s3 + $0x138] sm:$0xff] }
 0x799   : > { %v8341_v37 = vld [vmem:[%s14883_s3 + $0x118] sm:$0xff] }
 0x79a   : > { %v7618_v38 = vpop.permute.xlu0 %7617  ;;  %v7360_v46 = vpop.permute.xlu1 %7359  ;;  %9828 = vmatprep.subr.bf16.mxu0 %v9827_v2  ;;  %8882 = vmatmul.mubr.f32.gmra.mrb[106].mxu1 %v8333_v34  ;;  %v8500_v2 = vld [vmem:[#allocation3 + $0x4d0] sm:$0xff] }
 0x79b   : > { %v7689_v55 = vsel %vm252_vm2, %v15157_v8, %v7618_v38  ;;  %v7432_v45 = vsel %vm252_vm2, %v15155_v14, %v7360_v46  ;;  %8887 = vmatprep.mubr.f32.mxu1 %v8339_v31  ;;  %v8505_v31 = vld [vmem:[#allocation3 + $0x4f8] sm:$0xff]  ;;  %v8410_v38 = vld [vmem:[#allocation3 + $0x200] sm:$0xff]  ;;  %v8415_v46 = vld [vmem:[#allocation3 + $0x228] sm:$0xff] }
 0x79c   : > { %v9829_v54 = vpack.c.bf16 %v7432_v45, %v7431_v50  ;;  %v9953_v45 = vpack.c.bf16 %v8505_v31, %v8500_v2 }
 0x79e   : > { %v7362_v13 = vpop.permute.xlu0 %7361  ;;  %v7620_v24 = vpop.permute.xlu1 %7619  ;;  %9830 = vmatpush1.bf16.xpose.msra.mxu0 %v9829_v54  ;;  %8888 = vmatmul.mubr.f32.gmra.mrb[108].mxu1 %v8338_v48  ;;  %v9950_v48 = vpack.c.bf16 %v8415_v46, %v8410_v38  ;;  %v7247_v54 = vld [vmem:[#allocation2 + $0x168] sm:$0xff] }
 0x79f   : > { %v7433_v30 = vsel %vm252_vm2, %v7241_v59, %v7362_v13  ;;  %v7690_v3 = vsel %vm252_vm2, %v15158_v39, %v7620_v24  ;;  %9934 = vmatpush3.bf16.xpose.msk.msra.mxu1 %vm14631_vm4, %v9932_v16  ;;  %8893 = vmatprep.mubr.f32.mxu1 %v8344_v10  ;;  %v15164_v59 = vld [vmem:[#allocation78_spill] sm:$0xff]  ;;  %v8420_v39 = vld [vmem:[#allocation3 + $0x250] sm:$0xff] }
 0x7a0   : > { %v9831_v32 = vpack.c.bf16 %v7690_v3, %v7689_v55  ;;  %9937 = vmatprep.subr.msk.bf16.mxu1 %vm14631_vm4, %v9935_v61  ;;  %v8425_v3 = vld [vmem:[#allocation3 + $0x278] sm:$0xff] }
 0x7a1   : > { %v9956_v11 = vpack.c.bf16 %v8425_v3, %v8420_v39 }
 0x7a2   : > { %v7622_v28 = vpop.permute.xlu0 %7621  ;;  %v7364_v15 = vpop.permute.xlu1 %7363  ;;  %9832 = vmatprep.subr.bf16.mxu0 %v9831_v32  ;;  %8894 = vmatmul.mubr.f32.gmra.mrb[110].mxu1 %v8343_v52 }
 0x7a3   : > { %v7691_v7 = vsel %vm252_vm2, %v15159_v23, %v7622_v28  ;;  %v7434_v58 = vsel %vm252_vm2, %v15157_v8, %v7364_v15  ;;  %9415 = vmatprep.mubr.msk.f32.mxu1 %vm252_vm2, %v14732_v42  ;;  %v8312_v28 = vld [vmem:[%s14883_s3 + $0x30] sm:$0xff]  ;;  %v8315_v15 = vld [vmem:[%s14883_s3 + $0x48] sm:$0xff] }
 0x7a4   : > { %v9833_v20 = vpack.c.bf16 %v7434_v58, %v7433_v30  ;;  %v8321_v58 = vld [vmem:[%s14883_s3 + $0x78] sm:$0xff] }
 0x7a6   : > { %v7366_v36 = vpop.permute.xlu0 %7365  ;;  %v7624_v25 = vpop.permute.xlu1 %7623  ;;  %9834 = vmatpush1.bf16.xpose.msra.mxu0 %v9833_v20  ;;  %v8327_v20 = vld [vmem:[%s14883_s3 + $0xa8] sm:$0xff] }
 0x7a7   : > { %v7435_v19 = vsel %vm252_vm2, %v7243_v33, %v7366_v36  ;;  %v7692_v18 = vsel %vm252_vm2, %v15160_v43, %v7624_v25  ;;  %9940 = vmatpush3.bf16.xpose.msk.msra.mxu1 %vm14631_vm4, %v9938_v47  ;;  %v8326_v47 = vld [vmem:[%s14883_s3 + $0xa0] sm:$0xff]  ;;  %v8332_v33 = vld [vmem:[%s14883_s3 + $0xd0] sm:$0xff]  ;;  %v8335_v36 = vld [vmem:[%s14883_s3 + $0xe8] sm:$0xff] }
 0x7a8   : > { %v9835_v51 = vpack.c.bf16 %v7692_v18, %v7691_v7  ;;  %9943 = vmatprep.subr.msk.bf16.mxu1 %vm14631_vm4, %v9941_v41  ;;  %v8325_v7 = vld [vmem:[%s14883_s3 + $0x98] sm:$0xff]  ;;  %v8330_v41 = vld [vmem:[%s14883_s3 + $0xc0] sm:$0xff]  ;;  %v8331_v25 = vld [vmem:[%s14883_s3 + $0xc8] sm:$0xff] }
 0x7a9   : > { %v8340_v43 = vld [vmem:[%s14883_s3 + $0x110] sm:$0xff] }
 0x7aa   : > { %v7626_v14 = vpop.permute.xlu0 %7625  ;;  %v7368_v35 = vpop.permute.xlu1 %7367  ;;  %9836 = vmatprep.subr.bf16.mxu0 %v9835_v51  ;;  %v8336_v18 = vld [vmem:[%s14883_s3 + $0xf0] sm:$0xff]  ;;  %v8342_v51 = vld [vmem:[%s14883_s3 + $0x120] sm:$0xff] }
 0x7ab   : > { %v7693_v53 = vsel %vm252_vm2, %v15161_v5, %v7626_v14  ;;  %v7436_v22 = vsel %vm252_vm2, %v15159_v23, %v7368_v35  ;;  %v8322_v23 = vld [vmem:[%s14883_s3 + $0x80] sm:$0xff] }
 0x7ac   : > { %v9837_v9 = vpack.c.bf16 %v7436_v22, %v7435_v19  ;;  %v8337_v19 = vld [vmem:[%s14883_s3 + $0xf8] sm:$0xff] }
 0x7ae   : > { %v7370_v29 = vpop.permute.xlu0 %7369  ;;  %v7628_v60 = vpop.permute.xlu1 %7627  ;;  %9838 = vmatpush1.bf16.xpose.msra.mxu0 %v9837_v9 }
 0x7af   : > { %v7437_v50 = vsel %vm252_vm2, %v7245_v57, %v7370_v29  ;;  %v7694_v0 = vsel %vm252_vm2, %v15162_v17, %v7628_v60  ;;  %9946 = vmatpush3.bf16.xpose.msk.msra.mxu1 %vm14631_vm4, %v9944_v56 }
 0x7b0   : > { %v9839_v34 = vpack.c.bf16 %v7694_v0, %v7693_v53  ;;  %9949 = vmatprep.subr.msk.bf16.mxu1 %vm14631_vm4, %v9947_v26 }
 0x7b2   : > { %v7630_v49 = vpop.permute.xlu0 %7629  ;;  %v7372_v1 = vpop.permute.xlu1 %7371  ;;  %9840 = vmatprep.subr.bf16.mxu0 %v9839_v34 }
 0x7b3   : > { %v7695_v12 = vsel %vm252_vm2, %v15163_v62, %v7630_v49  ;;  %v7438_v8 = vsel %vm252_vm2, %v15161_v5, %v7372_v1 }
 0x7b4   : > { %v9841_v55 = vpack.c.bf16 %v7438_v8, %v7437_v50 }
 0x7b6   : > { %v7374_v61 = vpop.permute.xlu0 %7373  ;;  %v7632_v10 = vpop.permute.xlu1 %7631  ;;  %9842 = vmatpush1.bf16.xpose.msra.mxu0 %v9841_v55 }
 0x7b7   : > { %v7439_v16 = vsel %vm252_vm2, %v7247_v54, %v7374_v61  ;;  %v7696_v13 = vsel %vm252_vm2, %v15164_v59, %v7632_v10  ;;  %9952 = vmatpush3.bf16.xpose.msk.msra.mxu1 %vm14631_vm4, %v9950_v48 }
 0x7b8   : > { %v9843_v24 = vpack.c.bf16 %v7696_v13, %v7695_v12  ;;  %9955 = vmatprep.subr.msk.bf16.mxu1 %vm14631_vm4, %v9953_v45 }
 0x7ba   : > { %v7376_v30 = vpop.permute.xlu1 %7375  ;;  %9844 = vmatprep.subr.bf16.mxu0 %v9843_v24 }
 0x7bb   : > { %v7440_v52 = vsel %vm252_vm2, %v15163_v62, %v7376_v30 }
 0x7bc   : > { %v9845_v32 = vpack.c.bf16 %v7440_v52, %v7439_v16 }
 0x7be   : > { %9846 = vmatpush1.bf16.xpose.msra.mxu0 %v9845_v32 }
 0x7bf   : > { %9958 = vmatpush3.bf16.xpose.msk.msra.mxu1 %vm14631_vm4, %v9956_v11 }
 0x7c5   : > { %8739 = vmatmul.mubr.f32.vlgmr.msra.gmra.mrb[96].mxu0 %v8306_v44 }
 0x7c6   : > { %9416 = vmatmul.mubr.msk.f32.vlgmr.msra.gmra.mrb[96].mxu1 %vm252_vm2, %v14732_v42  ;;  %8744 = vmatprep.mubr.f32.mxu0 %v8312_v28  ;;  %v8316_v42 = vld [vmem:[%s14883_s3 + $0x50] sm:$0xff] }
 0x7c7   : > { %9417 = vmatprep.mubr.msk.f32.mxu1 %vm252_vm2, %v8315_v15  ;;  %v8517_v14 = vpop.permute.xlu0 %8516 }
 0x7c9   : > { %8745 = vmatmul.mubr.f32.gmra.mrb[98].mxu0 %v8311_v4 }
 0x7ca   : > { %9418 = vmatmul.mubr.msk.f32.gmra.mrb[98].mxu1 %vm252_vm2, %v8315_v15  ;;  %8750 = vmatprep.mubr.f32.mxu0 %v8317_v27 }
 0x7cb   : > { %9419 = vmatprep.mubr.msk.f32.mxu1 %vm252_vm2, %v8320_v6  ;;  %v8522_v26 = vpop.permute.xlu1 %8521  ;;  %v8527_v49 = vpop.permute.xlu0 %8526 }
 0x7cd   : > { %8751 = vmatmul.mubr.f32.gmra.mrb[100].mxu0 %v8316_v42 }
 0x7ce   : > { %9420 = vmatmul.mubr.msk.f32.gmra.mrb[100].mxu1 %vm252_vm2, %v8320_v6  ;;  %8756 = vmatprep.mubr.f32.mxu0 %v8322_v23 }
 0x7cf   : > { %9421 = vmatprep.mubr.msk.f32.mxu1 %vm252_vm2, %v8325_v7  ;;  %v8532_v61 = vpop.permute.xlu1 %8531  ;;  %v8537_v11 = vpop.permute.xlu0 %8536 }
 0x7d1   : > { %8757 = vmatmul.mubr.f32.gmra.mrb[102].mxu0 %v8321_v58 }
 0x7d2   : > { %9422 = vmatmul.mubr.msk.f32.gmra.mrb[102].mxu1 %vm252_vm2, %v8325_v7  ;;  %8762 = vmatprep.mubr.f32.mxu0 %v8327_v20 }
 0x7d3   : > { %9423 = vmatprep.mubr.msk.f32.mxu1 %vm252_vm2, %v8330_v41  ;;  %v8542_v20 = vpop.permute.xlu1 %8541 }
 0x7d5   : > { %8763 = vmatmul.mubr.f32.gmra.mrb[104].mxu0 %v8326_v47 }
 0x7d6   : > { %9424 = vmatmul.mubr.msk.f32.gmra.mrb[104].mxu1 %vm252_vm2, %v8330_v41  ;;  %8768 = vmatprep.mubr.f32.mxu0 %v8332_v33 }
 0x7d7   : > { %9425 = vmatprep.mubr.msk.f32.mxu1 %vm252_vm2, %v8335_v36 }
 0x7d9   : > { %8769 = vmatmul.mubr.f32.gmra.mrb[106].mxu0 %v8331_v25 }
 0x7da   : > { %9426 = vmatmul.mubr.msk.f32.gmra.mrb[106].mxu1 %vm252_vm2, %v8335_v36  ;;  %8774 = vmatprep.mubr.f32.mxu0 %v8337_v19 }
 0x7db   : > { %9427 = vmatprep.mubr.msk.f32.mxu1 %vm252_vm2, %v8340_v43 }
 0x7dd   : > { %8775 = vmatmul.mubr.f32.gmra.mrb[108].mxu0 %v8336_v18 }
 0x7de   : > { %9428 = vmatmul.mubr.msk.f32.gmra.mrb[108].mxu1 %vm252_vm2, %v8340_v43  ;;  %8780 = vmatprep.mubr.f32.mxu0 %v8342_v51 }
 0x7df   : > { %9429 = vmatprep.mubr.msk.f32.mxu1 %vm252_vm2, %v8345_v63 }
 0x7e1   : > { %8781 = vmatmul.mubr.f32.gmra.mrb[110].mxu0 %v8341_v37  ;;  %v8547_v37 = vpop.permute.xlu0 %8546 }
 0x7e2   : > { %9430 = vmatmul.mubr.msk.f32.gmra.mrb[110].mxu1 %vm252_vm2, %v8345_v63 }
 0x898   : > { %v8740_v35 = vpop.f32.mrb[96].mxu0 }
 0x899   : > { %v8741_v21 = vadd.f32 %v8740_v35, %v8517_v14  ;;  %v8742_v40 = vpop.f32.mrb[97].mxu0  ;;  %v8966_v5 = vpop.f32.mrb[96].mxu1 }
 0x89a   : > { %v8743_v53 = vadd.f32 %v8742_v40, %v8517_v14  ;;  %v8968_v22 = vpop.f32.mrb[97].mxu1 }
 0x89b   : > { %v10024_v9 = vadd.f32 %v8966_v5, %v8741_v21 }
 0x89c   : > { %v10026_v56 = vadd.f32 %v8968_v22, %v8743_v53  ;;  %v8746_v57 = vpop.f32.mrb[98].mxu0 }
 0x89d   : > { %v9013_v29 = vmax.f32 %v10024_v9, 0.0  ;;  %v8747_v60 = vadd.f32 %v8746_v57, %v8522_v26  ;;  %v8748_v50 = vpop.f32.mrb[99].mxu0  ;;  %v8972_v17 = vpop.f32.mrb[98].mxu1 }
 0x89e   : > { %v9014_v0 = vmax.f32 %v10026_v56, 0.0  ;;  %v8749_v34 = vadd.f32 %v8748_v50, %v8522_v26  ;;  %v8974_v2 = vpop.f32.mrb[99].mxu1  ;;  %v8552_v57 = vpop.permute.xlu1 %8551 }
 0x89f   : > { %9029 = vst [vmem:[%s14859_s8] sm:$0xff] %v9013_v29  ;;  %v10028_v31 = vadd.f32 %v8972_v17, %v8747_v60 }
 0x8a0   : > { %9030 = vst [vmem:[%s14859_s8 + $0x8] sm:$0xff] %v9014_v0  ;;  %v10030_v1 = vadd.f32 %v8974_v2, %v8749_v34  ;;  %v8752_v38 = vpop.f32.mrb[100].mxu0 }
 0x8a1   : > { %v9015_v46 = vmax.f32 %v10028_v31, 0.0  ;;  %v8753_v62 = vadd.f32 %v8752_v38, %v8527_v49  ;;  %v8754_v12 = vpop.f32.mrb[101].mxu0  ;;  %v8978_v8 = vpop.f32.mrb[100].mxu1 }
 0x8a2   : > { %v9016_v55 = vmax.f32 %v10030_v1, 0.0  ;;  %v8755_v45 = vadd.f32 %v8754_v12, %v8527_v49  ;;  %v8980_v48 = vpop.f32.mrb[101].mxu1 }
 0x8a3   : > { %9031 = vst [vmem:[%s14859_s8 + $0x10] sm:$0xff] %v9015_v46  ;;  %v10032_v54 = vadd.f32 %v8978_v8, %v8753_v62 }
 0x8a4   : > { %9032 = vst [vmem:[%s14859_s8 + $0x18] sm:$0xff] %v9016_v55  ;;  %v10034_v10 = vadd.f32 %v8980_v48, %v8755_v45  ;;  %v8758_v16 = vpop.f32.mrb[102].mxu0 }
 0x8a5   : > { %v9017_v59 = vmax.f32 %v10032_v54, 0.0  ;;  %v8759_v13 = vadd.f32 %v8758_v16, %v8532_v61  ;;  %v8760_v24 = vpop.f32.mrb[103].mxu0  ;;  %v8984_v30 = vpop.f32.mrb[102].mxu1 }
 0x8a6   : > { %v9018_v39 = vmax.f32 %v10034_v10, 0.0  ;;  %v8761_v3 = vadd.f32 %v8760_v24, %v8532_v61  ;;  %v8986_v52 = vpop.f32.mrb[103].mxu1 }
 0x8a7   : > { %9033 = vst [vmem:[%s14859_s8 + $0x20] sm:$0xff] %v9017_v59  ;;  %v10036_v32 = vadd.f32 %v8984_v30, %v8759_v13 }
 0x8a8   : > { %9034 = vst [vmem:[%s14859_s8 + $0x28] sm:$0xff] %v9018_v39  ;;  %v10038_v44 = vadd.f32 %v8986_v52, %v8761_v3  ;;  %v8764_v28 = vpop.f32.mrb[104].mxu0 }
 0x8a9   : > { %v9019_v15 = vmax.f32 %v10036_v32, 0.0  ;;  %v8765_v4 = vadd.f32 %v8764_v28, %v8537_v11  ;;  %v8766_v27 = vpop.f32.mrb[105].mxu0  ;;  %v8990_v6 = vpop.f32.mrb[104].mxu1 }
 0x8aa   : > { %v9020_v42 = vmax.f32 %v10038_v44, 0.0  ;;  %v8767_v23 = vadd.f32 %v8766_v27, %v8537_v11  ;;  %v8992_v7 = vpop.f32.mrb[105].mxu1 }
 0x8ab   : > { %9035 = vst [vmem:[%s14859_s8 + $0x30] sm:$0xff] %v9019_v15  ;;  %v10040_v58 = vadd.f32 %v8990_v6, %v8765_v4 }
 0x8ac   : > { %9036 = vst [vmem:[%s14859_s8 + $0x38] sm:$0xff] %v9020_v42  ;;  %v10042_v41 = vadd.f32 %v8992_v7, %v8767_v23  ;;  %v8770_v47 = vpop.f32.mrb[106].mxu0 }
 0x8ad   : > { %v9021_v33 = vmax.f32 %v10040_v58, 0.0  ;;  %v8771_v36 = vadd.f32 %v8770_v47, %v8542_v20  ;;  %v8772_v25 = vpop.f32.mrb[107].mxu0  ;;  %v8996_v19 = vpop.f32.mrb[106].mxu1 }
 0x8ae   : > { %v9022_v43 = vmax.f32 %v10042_v41, 0.0  ;;  %v8773_v18 = vadd.f32 %v8772_v25, %v8542_v20  ;;  %v8998_v51 = vpop.f32.mrb[107].mxu1 }
 0x8af   : > { %9037 = vst [vmem:[%s14859_s8 + $0x40] sm:$0xff] %v9021_v33  ;;  %v10044_v63 = vadd.f32 %v8996_v19, %v8771_v36 }
 0x8b0   : > { %9038 = vst [vmem:[%s14859_s8 + $0x48] sm:$0xff] %v9022_v43  ;;  %v10046_v14 = vadd.f32 %v8998_v51, %v8773_v18  ;;  %v8776_v35 = vpop.f32.mrb[108].mxu0 }
 0x8b1   : > { %v9023_v21 = vmax.f32 %v10044_v63, 0.0  ;;  %v8777_v40 = vadd.f32 %v8776_v35, %v8547_v37  ;;  %v8778_v5 = vpop.f32.mrb[109].mxu0  ;;  %v9002_v53 = vpop.f32.mrb[108].mxu1 }
 0x8b2   : > { %v9024_v22 = vmax.f32 %v10046_v14, 0.0  ;;  %v8779_v9 = vadd.f32 %v8778_v5, %v8547_v37  ;;  %v9004_v26 = vpop.f32.mrb[109].mxu1 }
 0x8b3   : > { %9039 = vst [vmem:[%s14859_s8 + $0x50] sm:$0xff] %v9023_v21  ;;  %v10048_v56 = vadd.f32 %v9002_v53, %v8777_v40 }
 0x8b4   : > { %9040 = vst [vmem:[%s14859_s8 + $0x58] sm:$0xff] %v9024_v22  ;;  %v10050_v29 = vadd.f32 %v9004_v26, %v8779_v9  ;;  %v8782_v60 = vpop.f32.mrb[110].mxu0 }
 0x8b5   : > { %v9025_v50 = vmax.f32 %v10048_v56, 0.0  ;;  %v8783_v17 = vadd.f32 %v8782_v60, %v8552_v57  ;;  %v8784_v0 = vpop.f32.mrb[111].mxu0  ;;  %v9008_v34 = vpop.f32.mrb[110].mxu1 }
 0x8b6   : > { %v9026_v2 = vmax.f32 %v10050_v29, 0.0  ;;  %v8785_v31 = vadd.f32 %v8784_v0, %v8552_v57  ;;  %v9010_v49 = vpop.f32.mrb[111].mxu1 }
 0x8b7   : > { %9041 = vst [vmem:[%s14859_s8 + $0x60] sm:$0xff] %v9025_v50  ;;  %v10052_v1 = vadd.f32 %v9008_v34, %v8783_v17 }
 0x8b8   : > { %9042 = vst [vmem:[%s14859_s8 + $0x68] sm:$0xff] %v9026_v2  ;;  %v10054_v38 = vadd.f32 %v9010_v49, %v8785_v31 }
 0x8b9   : > { %v9027_v46 = vmax.f32 %v10052_v1, 0.0 }
 0x8ba   : > { %v9028_v62 = vmax.f32 %v10054_v38, 0.0 }
 0x8bb   : > { %9043 = vst [vmem:[%s14859_s8 + $0x70] sm:$0xff] %v9027_v46 }
 0x8bc   : > { %9044 = vst [vmem:[%s14859_s8 + $0x78] sm:$0xff] %v9028_v62 }
 0x8bd PF: > { %s16_s21 = sadd.s32 1, %s10244_s21  }
 0x8be   : > { %p13_p4 = scmp.ge.s32.totalorder %s16_s21, 4  }
 0x8c0   :  { %15 = sbr.rel (!%p13_p4) target bundleno = 1 (0x1), region = 86 }

</bundles_post_ra>
